<compile_context>
chip_gen: v5e
topology: v5e:2x2
jax: 0.10.0
libtpu: 0.0.40
codegen_flags: <defaults>
</compile_context>

<pallas_src>
import jax
import jax.numpy as jnp
from jax.experimental import pallas as pl
from jax.experimental.pallas import tpu as pltpu

BN_EPS = 1e-5

# Fixed hidden sizes from the PyTorch module definition.
H1, H2, H3, H4 = 512, 1024, 1024, 512

# Packed (1, L) f32 vector layout: [g1|b1|g2|b2|g3|b3|g4|b4|s2|s3|s4|s5|b5]
# (s_i = per-output-column int8 dequant scale; s5/b5 have padded length F_pad).
_OFF_G1 = 0
_OFF_B1 = _OFF_G1 + H1
_OFF_G2 = _OFF_B1 + H1
_OFF_B2 = _OFF_G2 + H2
_OFF_G3 = _OFF_B2 + H2
_OFF_B3 = _OFF_G3 + H3
_OFF_G4 = _OFF_B3 + H3
_OFF_B4 = _OFF_G4 + H4
_OFF_S2 = _OFF_B4 + H4
_OFF_S3 = _OFF_S2 + H2
_OFF_S4 = _OFF_S3 + H3
_OFF_S5 = _OFF_S4 + H4          # = 8704


def _bn_relu(h_raw, gamma, beta, s=None):
    """BatchNorm1d (training mode, biased batch var) + ReLU, folded scale/shift.

    h_raw is the un-dequantized matmul output; if `s` (per-column dequant
    scale) is given, the true activation is h = h_raw * s and the scale is
    folded into the BN affine so only vector math changes:
        scale = gamma * s * rsqrt(var_raw * s^2 + eps)
        shift = beta  - mean_raw * scale
    Emits bf16 directly (next layer's MXU input dtype).
    """
    mean = jnp.mean(h_raw, axis=0, keepdims=True)                     # (1, H)
    var = jnp.mean(jnp.square(h_raw - mean), axis=0, keepdims=True)   # two-pass
    if s is None:
        scale = gamma * jax.lax.rsqrt(var + BN_EPS)
    else:
        scale = (gamma * s) * jax.lax.rsqrt(var * (s * s) + BN_EPS)
    shift = beta - mean * scale
    return jnp.maximum(h_raw * scale + shift, 0.0).astype(jnp.bfloat16)


def generator2_kernel(x_ref, w1_ref, gb_ref,
                      w2_hbm, w3_hbm, w4_hbm, w5_hbm,
                      o_ref,
                      w2_buf, w3_buf, w4_buf, w5_buf, sems):
    # Issue every weight DMA immediately, in consumption order (w2 first), so
    # layer-i compute overlaps the in-flight copies of layers i+1..5.
    # TODO(synk): add explicit DMA priorities when .start(priority=...) is
    # available in the deployed jax version.
    cp2 = pltpu.make_async_copy(w2_hbm, w2_buf, sems.at[0]); cp2.start()
    cp3 = pltpu.make_async_copy(w3_hbm, w3_buf, sems.at[1]); cp3.start()
    cp4 = pltpu.make_async_copy(w4_hbm, w4_buf, sems.at[2]); cp4.start()
    cp5 = pltpu.make_async_copy(w5_hbm, w5_buf, sems.at[3]); cp5.start()

    # Layer 1: Linear(noiseDim, 512, bias=False) [bf16 weight] + BN + ReLU.
    h = jnp.dot(x_ref[...].astype(jnp.bfloat16), w1_ref[...],
                preferred_element_type=jnp.float32)
    h = _bn_relu(h, gb_ref[:, _OFF_G1:_OFF_B1], gb_ref[:, _OFF_B1:_OFF_G2])

    # Layer 2: Linear(512, 1024, bias=False) [int8 weight] + BN + ReLU.
    cp2.wait()
    h = jnp.dot(h, w2_buf[...].astype(jnp.bfloat16),
                preferred_element_type=jnp.float32)
    h = _bn_relu(h, gb_ref[:, _OFF_G2:_OFF_B2], gb_ref[:, _OFF_B2:_OFF_G3],
                 gb_ref[:, _OFF_S2:_OFF_S3])

    # Layer 3: Linear(1024, 1024, bias=False) [int8 weight] + BN + ReLU.
    cp3.wait()
    h = jnp.dot(h, w3_buf[...].astype(jnp.bfloat16),
                preferred_element_type=jnp.float32)
    h = _bn_relu(h, gb_ref[:, _OFF_G3:_OFF_B3], gb_ref[:, _OFF_B3:_OFF_G4],
                 gb_ref[:, _OFF_S3:_OFF_S4])

    # Layer 4: Linear(1024, 512, bias=False) [int8 weight] + BN + ReLU.
    cp4.wait()
    h = jnp.dot(h, w4_buf[...].astype(jnp.bfloat16),
                preferred_element_type=jnp.float32)
    h = _bn_relu(h, gb_ref[:, _OFF_G4:_OFF_B4], gb_ref[:, _OFF_B4:_OFF_S2],
                 gb_ref[:, _OFF_S4:_OFF_S5])

    # Layer 5: Linear(512, numFeatures, bias=True) [int8 weight, padded cols].
    cp5.wait()
    f_pad = o_ref.shape[1]
    out = jnp.dot(h, w5_buf[...].astype(jnp.bfloat16),
                  preferred_element_type=jnp.float32)
    s5 = gb_ref[:, _OFF_S5:_OFF_S5 + f_pad]
    b5 = gb_ref[:, _OFF_S5 + f_pad:_OFF_S5 + 2 * f_pad]
    o_ref[...] = (out * s5 + b5).astype(o_ref.dtype)


def generator2_forward(x, kernel_params, num_features=None):
    """x: (B, noiseDim) f32.  kernel_params: (w1, w2q, w3q, w4q, w5q_pad, gb)."""
    w1, w2q, w3q, w4q, w5q, gb = kernel_params
    B = x.shape[0]
    f_pad = w5q.shape[1]
    if num_features is None:
        num_features = f_pad
    # Single grid point (exact full-batch BN).  Guard the VMEM batch ceiling
    # (v7x = 64 MiB physical VMEM is hit first as B grows).
    assert B <= 4096, (
        "single-grid-point design caps batch size; add a batch-group grid "
        "(per-group BN, needs caller sign-off) for larger batches")
    # ~2.6 MiB weights + packed vectors + a handful of live (B, 1024)
    # activations + DMA headroom.  Small enough to leave scoped-VMEM headroom
    # for surrounding fusions on v5e.
    vmem_limit = min(96 << 20, (10 << 20) + 8 * B * H2 * 4)

    vmem = pl.BlockSpec(memory_space=pltpu.MemorySpace.VMEM)
    hbm = pl.BlockSpec(memory_space=pl.ANY)
    out = pl.pallas_call(
        generator2_kernel,
        out_shape=jax.ShapeDtypeStruct((B, f_pad), jnp.float32),
        in_specs=[vmem, vmem, vmem, hbm, hbm, hbm, hbm],
        out_specs=vmem,
        scratch_shapes=[
            pltpu.VMEM((H1, H2), jnp.int8),      # w2 buffer
            pltpu.VMEM((H2, H3), jnp.int8),      # w3 buffer
            pltpu.VMEM((H3, H4), jnp.int8),      # w4 buffer
            pltpu.VMEM((H4, f_pad), jnp.int8),   # w5 buffer (padded cols)
            pltpu.SemaphoreType.DMA((4,)),
        ],
        compiler_params=pltpu.CompilerParams(vmem_limit_bytes=vmem_limit),
    )(x, w1, gb, w2q, w3q, w4q, w5q)
    return out[:, :num_features]


def _quantize_int8(w):
    """Per-output-column symmetric int8 quantization.  Returns (q, scale)."""
    amax = jnp.max(jnp.abs(w), axis=0, keepdims=True)          # (1, N)
    s = jnp.maximum(amax, 1e-8) / 127.0
    q = jnp.clip(jnp.round(w / s), -127.0, 127.0).astype(jnp.int8)
    return q, s.astype(jnp.float32)


def init_params(key, noise_dim, num_features):
    """Deterministic synthetic parameters.

    w1 stored bf16 (tiny); w2..w5 stored int8 + per-column f32 dequant scale;
    BN gamma/beta and the final bias stored as (1, H) f32."""
    dims = [noise_dim, H1, H2, H3, H4]
    keys = jax.random.split(key, 16)
    p = {"noise_dim": noise_dim, "num_features": num_features}
    for i in range(4):
        fan_in, fan_out = dims[i], dims[i + 1]
        w = jax.random.normal(keys[3 * i], (fan_in, fan_out), jnp.float32) * (fan_in ** -0.5)
        if i == 0:
            p["w1"] = w.astype(jnp.bfloat16)
        else:
            q, s = _quantize_int8(w)
            p[f"w{i + 1}q"] = q
            p[f"s{i + 1}"] = s
        p[f"g{i + 1}"] = 1.0 + 0.1 * jax.random.normal(keys[3 * i + 1], (1, fan_out), jnp.float32)
        p[f"b{i + 1}"] = 0.1 * jax.random.normal(keys[3 * i + 2], (1, fan_out), jnp.float32)
    w5 = jax.random.normal(keys[12], (H4, num_features), jnp.float32) * (H4 ** -0.5)
    p["w5q"], p["s5"] = _quantize_int8(w5)
    p["b5"] = 0.1 * jax.random.normal(keys[13], (1, num_features), jnp.float32)
    return p


def pack_params(p):
    """Pad numFeatures to a multiple of 128 and pack all tiny per-feature
    vectors (gamma/beta, dequant scales, final bias) into one array."""
    F = p["num_features"]
    f_pad = ((F + 127) // 128) * 128
    pad = f_pad - F
    w5q = jnp.pad(p["w5q"], ((0, 0), (0, pad)))
    s5 = jnp.pad(p["s5"], ((0, 0), (0, pad)), constant_values=1.0)
    b5 = jnp.pad(p["b5"], ((0, 0), (0, pad)))
    gb = jnp.concatenate(
        [p["g1"], p["b1"], p["g2"], p["b2"], p["g3"], p["b3"], p["g4"], p["b4"],
         p["s2"], p["s3"], p["s4"], s5, b5],
        axis=1).astype(jnp.float32)
    return (p["w1"], p["w2q"], p["w3q"], p["w4q"], w5q, gb)


def reference_forward(x, p):
    """Pure-JAX reference mirroring PyTorch training-mode BN semantics with the
    same quantized weights / bf16 matmul inputs and f32 accumulation."""

    def mm(a, w_bf16):
        return jnp.dot(a.astype(jnp.bfloat16), w_bf16, preferred_element_type=jnp.float32)

    def bn_relu(h, g, b):
        m = jnp.mean(h, axis=0, keepdims=True)
        v = jnp.mean((h - m) ** 2, axis=0, keepdims=True)
        y = (h - m) * jax.lax.rsqrt(v + BN_EPS) * g + b
        return jnp.maximum(y, 0.0).astype(jnp.bfloat16)

    h = bn_relu(mm(x, p["w1"]), p["g1"], p["b1"])
    h = bn_relu(mm(h, p["w2q"].astype(jnp.bfloat16)) * p["s2"], p["g2"], p["b2"])
    h = bn_relu(mm(h, p["w3q"].astype(jnp.bfloat16)) * p["s3"], p["g3"], p["b3"])
    h = bn_relu(mm(h, p["w4q"].astype(jnp.bfloat16)) * p["s4"], p["g4"], p["b4"])
    return mm(h, p["w5q"].astype(jnp.bfloat16)) * p["s5"] + p["b5"]


if __name__ == "__main__":
    noise_dim = 32
    num_features = 64
    batch = 8

    key = jax.random.PRNGKey(0)
    k_x, k_p = jax.random.split(key)
    x = jax.random.normal(k_x, (batch, noise_dim), jnp.float32)
    params = init_params(k_p, noise_dim, num_features)
    kernel_params = pack_params(params)

    out = generator2_forward(x, kernel_params, num_features)
    out = jax.block_until_ready(out)

    ref = reference_forward(x, params)
    assert out.shape == (batch, num_features)
    assert jnp.allclose(out, ref, atol=2e-3, rtol=2e-3), "mismatch vs reference"

    print("KERNEL_OK")
</pallas_src>

<mosaic_0001>
module attributes {stable_mosaic.version = 11 : i64} {
  func.func @generator2_kernel(%arg0: memref<8x32xf32, #tpu.memory_space<vmem>>, %arg1: memref<32x512xbf16, #tpu.memory_space<vmem>>, %arg2: memref<1x8960xf32, #tpu.memory_space<vmem>>, %arg3: memref<512x1024xi8, #tpu.memory_space<any>>, %arg4: memref<1024x1024xi8, #tpu.memory_space<any>>, %arg5: memref<1024x512xi8, #tpu.memory_space<any>>, %arg6: memref<512x128xi8, #tpu.memory_space<any>>, %arg7: memref<8x128xf32, #tpu.memory_space<vmem>>, %arg8: memref<512x1024xi8, #tpu.memory_space<vmem>>, %arg9: memref<1024x1024xi8, #tpu.memory_space<vmem>>, %arg10: memref<1024x512xi8, #tpu.memory_space<vmem>>, %arg11: memref<512x128xi8, #tpu.memory_space<vmem>>, %arg12: memref<4x!tpu.dma_semaphore, #tpu.memory_space<semaphore_mem>>) attributes {dimension_semantics = [], scalar_prefetch = 0 : i64, scratch_operands = 5 : i64, tpu.core_type = #tpu.core_type<tc>} {
    %c0_i32 = arith.constant 0 : i32
    %0 = tpu.memref_slice %arg12[%c0_i32] : memref<4x!tpu.dma_semaphore, #tpu.memory_space<semaphore_mem>> -> memref<1x!tpu.dma_semaphore, #tpu.memory_space<semaphore_mem>>
    %1 = tpu.memref_squeeze %0 : memref<1x!tpu.dma_semaphore, #tpu.memory_space<semaphore_mem>> -> memref<!tpu.dma_semaphore, #tpu.memory_space<semaphore_mem>>
    tpu.enqueue_dma source(%arg3 : memref<512x1024xi8, #tpu.memory_space<any>>) target(%arg8 : memref<512x1024xi8, #tpu.memory_space<vmem>>) target_semaphore(%1 : memref<!tpu.dma_semaphore, #tpu.memory_space<semaphore_mem>>)
    %c1_i32 = arith.constant 1 : i32
    %2 = tpu.memref_slice %arg12[%c1_i32] : memref<4x!tpu.dma_semaphore, #tpu.memory_space<semaphore_mem>> -> memref<1x!tpu.dma_semaphore, #tpu.memory_space<semaphore_mem>>
    %3 = tpu.memref_squeeze %2 : memref<1x!tpu.dma_semaphore, #tpu.memory_space<semaphore_mem>> -> memref<!tpu.dma_semaphore, #tpu.memory_space<semaphore_mem>>
    tpu.enqueue_dma source(%arg4 : memref<1024x1024xi8, #tpu.memory_space<any>>) target(%arg9 : memref<1024x1024xi8, #tpu.memory_space<vmem>>) target_semaphore(%3 : memref<!tpu.dma_semaphore, #tpu.memory_space<semaphore_mem>>)
    %c2_i32 = arith.constant 2 : i32
    %4 = tpu.memref_slice %arg12[%c2_i32] : memref<4x!tpu.dma_semaphore, #tpu.memory_space<semaphore_mem>> -> memref<1x!tpu.dma_semaphore, #tpu.memory_space<semaphore_mem>>
    %5 = tpu.memref_squeeze %4 : memref<1x!tpu.dma_semaphore, #tpu.memory_space<semaphore_mem>> -> memref<!tpu.dma_semaphore, #tpu.memory_space<semaphore_mem>>
    tpu.enqueue_dma source(%arg5 : memref<1024x512xi8, #tpu.memory_space<any>>) target(%arg10 : memref<1024x512xi8, #tpu.memory_space<vmem>>) target_semaphore(%5 : memref<!tpu.dma_semaphore, #tpu.memory_space<semaphore_mem>>)
    %c3_i32 = arith.constant 3 : i32
    %6 = tpu.memref_slice %arg12[%c3_i32] : memref<4x!tpu.dma_semaphore, #tpu.memory_space<semaphore_mem>> -> memref<1x!tpu.dma_semaphore, #tpu.memory_space<semaphore_mem>>
    %7 = tpu.memref_squeeze %6 : memref<1x!tpu.dma_semaphore, #tpu.memory_space<semaphore_mem>> -> memref<!tpu.dma_semaphore, #tpu.memory_space<semaphore_mem>>
    tpu.enqueue_dma source(%arg6 : memref<512x128xi8, #tpu.memory_space<any>>) target(%arg11 : memref<512x128xi8, #tpu.memory_space<vmem>>) target_semaphore(%7 : memref<!tpu.dma_semaphore, #tpu.memory_space<semaphore_mem>>)
    %c0 = arith.constant 0 : index
    %c0_0 = arith.constant 0 : index
    %8 = vector.load %arg0[%c0, %c0_0] : memref<8x32xf32, #tpu.memory_space<vmem>>, vector<8x32xf32>
    %9 = arith.truncf %8 : vector<8x32xf32> to vector<8x32xbf16>
    %c0_1 = arith.constant 0 : index
    %c0_2 = arith.constant 0 : index
    %10 = vector.load %arg1[%c0_1, %c0_2] : memref<32x512xbf16, #tpu.memory_space<vmem>>, vector<32x512xbf16>
    %cst = arith.constant dense<0.000000e+00> : vector<8x512xf32>
    %11 = tpu.matmul %9, %10, %cst {dimension_numbers = #tpu.dot_dimension_numbers<[1], [0], [0], [1], [0, 0, 1, 1], [], []>} : vector<8x32xbf16>, vector<32x512xbf16>, vector<8x512xf32> -> vector<8x512xf32>
    %c0_3 = arith.constant 0 : index
    %c0_4 = arith.constant 0 : index
    %12 = vector.load %arg2[%c0_3, %c0_4] : memref<1x8960xf32, #tpu.memory_space<vmem>>, vector<1x512xf32>
    %c0_5 = arith.constant 0 : index
    %c512 = arith.constant 512 : index
    %13 = vector.load %arg2[%c0_5, %c512] : memref<1x8960xf32, #tpu.memory_space<vmem>>, vector<1x512xf32>
    %cst_6 = arith.constant dense<0.000000e+00> : vector<512xf32>
    %14 = vector.multi_reduction <add>, %11, %cst_6 [0] : vector<8x512xf32> to vector<512xf32>
    %15 = vector.shape_cast %14 : vector<512xf32> to vector<1x512xf32>
    %cst_7 = arith.constant 8.000000e+00 : f32
    %16 = vector.broadcast %cst_7 : f32 to vector<1x512xf32>
    %17 = arith.divf %15, %16 : vector<1x512xf32>
    %18 = vector.broadcast %17 : vector<1x512xf32> to vector<8x512xf32>
    %19 = arith.subf %11, %18 : vector<8x512xf32>
    %20 = arith.mulf %19, %19 : vector<8x512xf32>
    %cst_8 = arith.constant dense<0.000000e+00> : vector<512xf32>
    %21 = vector.multi_reduction <add>, %20, %cst_8 [0] : vector<8x512xf32> to vector<512xf32>
    %22 = vector.shape_cast %21 : vector<512xf32> to vector<1x512xf32>
    %cst_9 = arith.constant 8.000000e+00 : f32
    %23 = vector.broadcast %cst_9 : f32 to vector<1x512xf32>
    %24 = arith.divf %22, %23 : vector<1x512xf32>
    %cst_10 = arith.constant 9.99999974E-6 : f32
    %25 = vector.broadcast %cst_10 : f32 to vector<1x512xf32>
    %26 = arith.addf %24, %25 : vector<1x512xf32>
    %27 = math.rsqrt %26 : vector<1x512xf32>
    %28 = arith.mulf %12, %27 : vector<1x512xf32>
    %29 = arith.mulf %17, %28 : vector<1x512xf32>
    %30 = arith.subf %13, %29 : vector<1x512xf32>
    %31 = vector.broadcast %28 : vector<1x512xf32> to vector<8x512xf32>
    %32 = arith.mulf %11, %31 : vector<8x512xf32>
    %33 = vector.broadcast %30 : vector<1x512xf32> to vector<8x512xf32>
    %34 = arith.addf %32, %33 : vector<8x512xf32>
    %cst_11 = arith.constant 0.000000e+00 : f32
    %35 = vector.broadcast %cst_11 : f32 to vector<8x512xf32>
    %36 = arith.maximumf %34, %35 : vector<8x512xf32>
    %37 = arith.truncf %36 : vector<8x512xf32> to vector<8x512xbf16>
    %c0_i32_12 = arith.constant 0 : i32
    %38 = tpu.memref_slice %arg12[%c0_i32_12] : memref<4x!tpu.dma_semaphore, #tpu.memory_space<semaphore_mem>> -> memref<1x!tpu.dma_semaphore, #tpu.memory_space<semaphore_mem>>
    %39 = tpu.memref_squeeze %38 : memref<1x!tpu.dma_semaphore, #tpu.memory_space<semaphore_mem>> -> memref<!tpu.dma_semaphore, #tpu.memory_space<semaphore_mem>>
    tpu.wait_dma2 semaphore(%39 : memref<!tpu.dma_semaphore, #tpu.memory_space<semaphore_mem>>) src(%arg3 : memref<512x1024xi8, #tpu.memory_space<any>>) dst(%arg8 : memref<512x1024xi8, #tpu.memory_space<vmem>>)
    %c0_13 = arith.constant 0 : index
    %c0_14 = arith.constant 0 : index
    %40 = vector.load %arg8[%c0_13, %c0_14] : memref<512x1024xi8, #tpu.memory_space<vmem>>, vector<512x1024xi8>
    %41 = arith.sitofp %40 : vector<512x1024xi8> to vector<512x1024xbf16>
    %cst_15 = arith.constant dense<0.000000e+00> : vector<8x1024xf32>
    %42 = tpu.matmul %37, %41, %cst_15 {dimension_numbers = #tpu.dot_dimension_numbers<[1], [0], [0], [1], [0, 0, 1, 1], [], []>} : vector<8x512xbf16>, vector<512x1024xbf16>, vector<8x1024xf32> -> vector<8x1024xf32>
    %c0_16 = arith.constant 0 : index
    %c1024 = arith.constant 1024 : index
    %43 = vector.load %arg2[%c0_16, %c1024] : memref<1x8960xf32, #tpu.memory_space<vmem>>, vector<1x1024xf32>
    %c0_17 = arith.constant 0 : index
    %c2048 = arith.constant 2048 : index
    %44 = vector.load %arg2[%c0_17, %c2048] : memref<1x8960xf32, #tpu.memory_space<vmem>>, vector<1x1024xf32>
    %c0_18 = arith.constant 0 : index
    %c6144 = arith.constant 6144 : index
    %45 = vector.load %arg2[%c0_18, %c6144] : memref<1x8960xf32, #tpu.memory_space<vmem>>, vector<1x1024xf32>
    %cst_19 = arith.constant dense<0.000000e+00> : vector<1024xf32>
    %46 = vector.multi_reduction <add>, %42, %cst_19 [0] : vector<8x1024xf32> to vector<1024xf32>
    %47 = vector.shape_cast %46 : vector<1024xf32> to vector<1x1024xf32>
    %cst_20 = arith.constant 8.000000e+00 : f32
    %48 = vector.broadcast %cst_20 : f32 to vector<1x1024xf32>
    %49 = arith.divf %47, %48 : vector<1x1024xf32>
    %50 = vector.broadcast %49 : vector<1x1024xf32> to vector<8x1024xf32>
    %51 = arith.subf %42, %50 : vector<8x1024xf32>
    %52 = arith.mulf %51, %51 : vector<8x1024xf32>
    %cst_21 = arith.constant dense<0.000000e+00> : vector<1024xf32>
    %53 = vector.multi_reduction <add>, %52, %cst_21 [0] : vector<8x1024xf32> to vector<1024xf32>
    %54 = vector.shape_cast %53 : vector<1024xf32> to vector<1x1024xf32>
    %cst_22 = arith.constant 8.000000e+00 : f32
    %55 = vector.broadcast %cst_22 : f32 to vector<1x1024xf32>
    %56 = arith.divf %54, %55 : vector<1x1024xf32>
    %57 = arith.mulf %43, %45 : vector<1x1024xf32>
    %58 = arith.mulf %45, %45 : vector<1x1024xf32>
    %59 = arith.mulf %56, %58 : vector<1x1024xf32>
    %cst_23 = arith.constant 9.99999974E-6 : f32
    %60 = vector.broadcast %cst_23 : f32 to vector<1x1024xf32>
    %61 = arith.addf %59, %60 : vector<1x1024xf32>
    %62 = math.rsqrt %61 : vector<1x1024xf32>
    %63 = arith.mulf %57, %62 : vector<1x1024xf32>
    %64 = arith.mulf %49, %63 : vector<1x1024xf32>
    %65 = arith.subf %44, %64 : vector<1x1024xf32>
    %66 = vector.broadcast %63 : vector<1x1024xf32> to vector<8x1024xf32>
    %67 = arith.mulf %42, %66 : vector<8x1024xf32>
    %68 = vector.broadcast %65 : vector<1x1024xf32> to vector<8x1024xf32>
    %69 = arith.addf %67, %68 : vector<8x1024xf32>
    %cst_24 = arith.constant 0.000000e+00 : f32
    %70 = vector.broadcast %cst_24 : f32 to vector<8x1024xf32>
    %71 = arith.maximumf %69, %70 : vector<8x1024xf32>
    %72 = arith.truncf %71 : vector<8x1024xf32> to vector<8x1024xbf16>
    %c1_i32_25 = arith.constant 1 : i32
    %73 = tpu.memref_slice %arg12[%c1_i32_25] : memref<4x!tpu.dma_semaphore, #tpu.memory_space<semaphore_mem>> -> memref<1x!tpu.dma_semaphore, #tpu.memory_space<semaphore_mem>>
    %74 = tpu.memref_squeeze %73 : memref<1x!tpu.dma_semaphore, #tpu.memory_space<semaphore_mem>> -> memref<!tpu.dma_semaphore, #tpu.memory_space<semaphore_mem>>
    tpu.wait_dma2 semaphore(%74 : memref<!tpu.dma_semaphore, #tpu.memory_space<semaphore_mem>>) src(%arg4 : memref<1024x1024xi8, #tpu.memory_space<any>>) dst(%arg9 : memref<1024x1024xi8, #tpu.memory_space<vmem>>)
    %c0_26 = arith.constant 0 : index
    %c0_27 = arith.constant 0 : index
    %75 = vector.load %arg9[%c0_26, %c0_27] : memref<1024x1024xi8, #tpu.memory_space<vmem>>, vector<1024x1024xi8>
    %76 = arith.sitofp %75 : vector<1024x1024xi8> to vector<1024x1024xbf16>
    %cst_28 = arith.constant dense<0.000000e+00> : vector<8x1024xf32>
    %77 = tpu.matmul %72, %76, %cst_28 {dimension_numbers = #tpu.dot_dimension_numbers<[1], [0], [0], [1], [0, 0, 1, 1], [], []>} : vector<8x1024xbf16>, vector<1024x1024xbf16>, vector<8x1024xf32> -> vector<8x1024xf32>
    %c0_29 = arith.constant 0 : index
    %c3072 = arith.constant 3072 : index
    %78 = vector.load %arg2[%c0_29, %c3072] : memref<1x8960xf32, #tpu.memory_space<vmem>>, vector<1x1024xf32>
    %c0_30 = arith.constant 0 : index
    %c4096 = arith.constant 4096 : index
    %79 = vector.load %arg2[%c0_30, %c4096] : memref<1x8960xf32, #tpu.memory_space<vmem>>, vector<1x1024xf32>
    %c0_31 = arith.constant 0 : index
    %c7168 = arith.constant 7168 : index
    %80 = vector.load %arg2[%c0_31, %c7168] : memref<1x8960xf32, #tpu.memory_space<vmem>>, vector<1x1024xf32>
    %cst_32 = arith.constant dense<0.000000e+00> : vector<1024xf32>
    %81 = vector.multi_reduction <add>, %77, %cst_32 [0] : vector<8x1024xf32> to vector<1024xf32>
    %82 = vector.shape_cast %81 : vector<1024xf32> to vector<1x1024xf32>
    %cst_33 = arith.constant 8.000000e+00 : f32
    %83 = vector.broadcast %cst_33 : f32 to vector<1x1024xf32>
    %84 = arith.divf %82, %83 : vector<1x1024xf32>
    %85 = vector.broadcast %84 : vector<1x1024xf32> to vector<8x1024xf32>
    %86 = arith.subf %77, %85 : vector<8x1024xf32>
    %87 = arith.mulf %86, %86 : vector<8x1024xf32>
    %cst_34 = arith.constant dense<0.000000e+00> : vector<1024xf32>
    %88 = vector.multi_reduction <add>, %87, %cst_34 [0] : vector<8x1024xf32> to vector<1024xf32>
    %89 = vector.shape_cast %88 : vector<1024xf32> to vector<1x1024xf32>
    %cst_35 = arith.constant 8.000000e+00 : f32
    %90 = vector.broadcast %cst_35 : f32 to vector<1x1024xf32>
    %91 = arith.divf %89, %90 : vector<1x1024xf32>
    %92 = arith.mulf %78, %80 : vector<1x1024xf32>
    %93 = arith.mulf %80, %80 : vector<1x1024xf32>
    %94 = arith.mulf %91, %93 : vector<1x1024xf32>
    %cst_36 = arith.constant 9.99999974E-6 : f32
    %95 = vector.broadcast %cst_36 : f32 to vector<1x1024xf32>
    %96 = arith.addf %94, %95 : vector<1x1024xf32>
    %97 = math.rsqrt %96 : vector<1x1024xf32>
    %98 = arith.mulf %92, %97 : vector<1x1024xf32>
    %99 = arith.mulf %84, %98 : vector<1x1024xf32>
    %100 = arith.subf %79, %99 : vector<1x1024xf32>
    %101 = vector.broadcast %98 : vector<1x1024xf32> to vector<8x1024xf32>
    %102 = arith.mulf %77, %101 : vector<8x1024xf32>
    %103 = vector.broadcast %100 : vector<1x1024xf32> to vector<8x1024xf32>
    %104 = arith.addf %102, %103 : vector<8x1024xf32>
    %cst_37 = arith.constant 0.000000e+00 : f32
    %105 = vector.broadcast %cst_37 : f32 to vector<8x1024xf32>
    %106 = arith.maximumf %104, %105 : vector<8x1024xf32>
    %107 = arith.truncf %106 : vector<8x1024xf32> to vector<8x1024xbf16>
    %c2_i32_38 = arith.constant 2 : i32
    %108 = tpu.memref_slice %arg12[%c2_i32_38] : memref<4x!tpu.dma_semaphore, #tpu.memory_space<semaphore_mem>> -> memref<1x!tpu.dma_semaphore, #tpu.memory_space<semaphore_mem>>
    %109 = tpu.memref_squeeze %108 : memref<1x!tpu.dma_semaphore, #tpu.memory_space<semaphore_mem>> -> memref<!tpu.dma_semaphore, #tpu.memory_space<semaphore_mem>>
    tpu.wait_dma2 semaphore(%109 : memref<!tpu.dma_semaphore, #tpu.memory_space<semaphore_mem>>) src(%arg5 : memref<1024x512xi8, #tpu.memory_space<any>>) dst(%arg10 : memref<1024x512xi8, #tpu.memory_space<vmem>>)
    %c0_39 = arith.constant 0 : index
    %c0_40 = arith.constant 0 : index
    %110 = vector.load %arg10[%c0_39, %c0_40] : memref<1024x512xi8, #tpu.memory_space<vmem>>, vector<1024x512xi8>
    %111 = arith.sitofp %110 : vector<1024x512xi8> to vector<1024x512xbf16>
    %cst_41 = arith.constant dense<0.000000e+00> : vector<8x512xf32>
    %112 = tpu.matmul %107, %111, %cst_41 {dimension_numbers = #tpu.dot_dimension_numbers<[1], [0], [0], [1], [0, 0, 1, 1], [], []>} : vector<8x1024xbf16>, vector<1024x512xbf16>, vector<8x512xf32> -> vector<8x512xf32>
    %c0_42 = arith.constant 0 : index
    %c5120 = arith.constant 5120 : index
    %113 = vector.load %arg2[%c0_42, %c5120] : memref<1x8960xf32, #tpu.memory_space<vmem>>, vector<1x512xf32>
    %c0_43 = arith.constant 0 : index
    %c5632 = arith.constant 5632 : index
    %114 = vector.load %arg2[%c0_43, %c5632] : memref<1x8960xf32, #tpu.memory_space<vmem>>, vector<1x512xf32>
    %c0_44 = arith.constant 0 : index
    %c8192 = arith.constant 8192 : index
    %115 = vector.load %arg2[%c0_44, %c8192] : memref<1x8960xf32, #tpu.memory_space<vmem>>, vector<1x512xf32>
    %cst_45 = arith.constant dense<0.000000e+00> : vector<512xf32>
    %116 = vector.multi_reduction <add>, %112, %cst_45 [0] : vector<8x512xf32> to vector<512xf32>
    %117 = vector.shape_cast %116 : vector<512xf32> to vector<1x512xf32>
    %cst_46 = arith.constant 8.000000e+00 : f32
    %118 = vector.broadcast %cst_46 : f32 to vector<1x512xf32>
    %119 = arith.divf %117, %118 : vector<1x512xf32>
    %120 = vector.broadcast %119 : vector<1x512xf32> to vector<8x512xf32>
    %121 = arith.subf %112, %120 : vector<8x512xf32>
    %122 = arith.mulf %121, %121 : vector<8x512xf32>
    %cst_47 = arith.constant dense<0.000000e+00> : vector<512xf32>
    %123 = vector.multi_reduction <add>, %122, %cst_47 [0] : vector<8x512xf32> to vector<512xf32>
    %124 = vector.shape_cast %123 : vector<512xf32> to vector<1x512xf32>
    %cst_48 = arith.constant 8.000000e+00 : f32
    %125 = vector.broadcast %cst_48 : f32 to vector<1x512xf32>
    %126 = arith.divf %124, %125 : vector<1x512xf32>
    %127 = arith.mulf %113, %115 : vector<1x512xf32>
    %128 = arith.mulf %115, %115 : vector<1x512xf32>
    %129 = arith.mulf %126, %128 : vector<1x512xf32>
    %cst_49 = arith.constant 9.99999974E-6 : f32
    %130 = vector.broadcast %cst_49 : f32 to vector<1x512xf32>
    %131 = arith.addf %129, %130 : vector<1x512xf32>
    %132 = math.rsqrt %131 : vector<1x512xf32>
    %133 = arith.mulf %127, %132 : vector<1x512xf32>
    %134 = arith.mulf %119, %133 : vector<1x512xf32>
    %135 = arith.subf %114, %134 : vector<1x512xf32>
    %136 = vector.broadcast %133 : vector<1x512xf32> to vector<8x512xf32>
    %137 = arith.mulf %112, %136 : vector<8x512xf32>
    %138 = vector.broadcast %135 : vector<1x512xf32> to vector<8x512xf32>
    %139 = arith.addf %137, %138 : vector<8x512xf32>
    %cst_50 = arith.constant 0.000000e+00 : f32
    %140 = vector.broadcast %cst_50 : f32 to vector<8x512xf32>
    %141 = arith.maximumf %139, %140 : vector<8x512xf32>
    %142 = arith.truncf %141 : vector<8x512xf32> to vector<8x512xbf16>
    %c3_i32_51 = arith.constant 3 : i32
    %143 = tpu.memref_slice %arg12[%c3_i32_51] : memref<4x!tpu.dma_semaphore, #tpu.memory_space<semaphore_mem>> -> memref<1x!tpu.dma_semaphore, #tpu.memory_space<semaphore_mem>>
    %144 = tpu.memref_squeeze %143 : memref<1x!tpu.dma_semaphore, #tpu.memory_space<semaphore_mem>> -> memref<!tpu.dma_semaphore, #tpu.memory_space<semaphore_mem>>
    tpu.wait_dma2 semaphore(%144 : memref<!tpu.dma_semaphore, #tpu.memory_space<semaphore_mem>>) src(%arg6 : memref<512x128xi8, #tpu.memory_space<any>>) dst(%arg11 : memref<512x128xi8, #tpu.memory_space<vmem>>)
    %c0_52 = arith.constant 0 : index
    %c0_53 = arith.constant 0 : index
    %145 = vector.load %arg11[%c0_52, %c0_53] : memref<512x128xi8, #tpu.memory_space<vmem>>, vector<512x128xi8>
    %146 = arith.sitofp %145 : vector<512x128xi8> to vector<512x128xbf16>
    %cst_54 = arith.constant dense<0.000000e+00> : vector<8x128xf32>
    %147 = tpu.matmul %142, %146, %cst_54 {dimension_numbers = #tpu.dot_dimension_numbers<[1], [0], [0], [1], [0, 0, 1, 1], [], []>} : vector<8x512xbf16>, vector<512x128xbf16>, vector<8x128xf32> -> vector<8x128xf32>
    %c0_55 = arith.constant 0 : index
    %c8704 = arith.constant 8704 : index
    %148 = vector.load %arg2[%c0_55, %c8704] : memref<1x8960xf32, #tpu.memory_space<vmem>>, vector<1x128xf32>
    %c0_56 = arith.constant 0 : index
    %c8832 = arith.constant 8832 : index
    %149 = vector.load %arg2[%c0_56, %c8832] : memref<1x8960xf32, #tpu.memory_space<vmem>>, vector<1x128xf32>
    %150 = vector.broadcast %148 : vector<1x128xf32> to vector<8x128xf32>
    %151 = arith.mulf %147, %150 : vector<8x128xf32>
    %152 = vector.broadcast %149 : vector<1x128xf32> to vector<8x128xf32>
    %153 = arith.addf %151, %152 : vector<8x128xf32>
    %c0_57 = arith.constant 0 : index
    %c0_58 = arith.constant 0 : index
    %154 = vector.load %arg7[%c0_57, %c0_58] : memref<8x128xf32, #tpu.memory_space<vmem>>, vector<8x128xf32>
    tpu.vector_store %arg7[%c0_57, %c0_58], %153 {strides = array<i32>} : memref<8x128xf32, #tpu.memory_space<vmem>>, vector<8x128xf32>,
    return
  }
}

</mosaic_0001>

<bundles_post_ra>
// kernel: tpu_custom_call.1
= control target key start
LH: loop header
LB: loop body
LE: loop exit
PB: predicated region body
PF: predicated region fallthrough
CT: control target
= control target key end

     0   :  { %12 = vsyncpa [#allocation8], 0  ;;  %s10464_s0 = inlined_call_operand.hbm [shape: f32[8,32], index: 0, kind: input, shape index: {}]   ;;  %s10465_s1 = inlined_call_operand.hbm [shape: bf16[32,512], index: 1, kind: input, shape index: {}]   ;;  %s10466_s2 = inlined_call_operand.hbm [shape: f32[1,8960], index: 2, kind: input, shape index: {}]   ;;  %s10467_s3 = inlined_call_operand.hbm [shape: s8[512,1024], index: 3, kind: input, shape index: {}]   ;;  %s10468_s4 = inlined_call_operand.hbm [shape: s8[1024,1024], index: 4, kind: input, shape index: {}]   ;;  %s10469_s5 = inlined_call_operand.hbm [shape: s8[1024,512], index: 5, kind: input, shape index: {}]   ;;  %s10470_s6 = inlined_call_operand.hbm [shape: s8[512,128], index: 6, kind: input, shape index: {}]   ;;  %s10471_s7 = inlined_call_operand.hbm [shape: f32[8,128], index: 7, kind: output, shape index: {}]  }
   0x1   :  { %13 = vsyncpa [#allocation11], 0  ;;  %s30_s26 = sshll.u32 %s10465_s1, 4  ;;  %s31_s26 = int_to_ptr.hbm [resolvable:$true] %s30_s26 }
   0x2   :  { %14 = vsyncpa [#allocation9], 0  ;;  %s9245_s27 = smov [#allocation10]   ;;  %s20_s8 = sshll.u32 %s10464_s0, 4  ;;  %s21_s8 = int_to_ptr.hbm [resolvable:$true] %s20_s8 }
   0x3   :  { %s32_s28 = sshll.u32 %s9245_s27, 4  ;;  %s9246_s9 = smov 256   ;;  %s33_s28 = int_to_ptr.vmem [resolvable:$true] %s32_s28 }
   0x4   :  { %s9247_s10 = smov 16   ;;  %s9248_s11 = smov [#allocation7]  }
   0x5   :  { %38 = dma.hbm_to_vmem [thread:$0]  %s31_s26, 1024, %s33_s28, [#allocation11], %s9246_s9, %s9246_s9, %s9247_s10  }
   0x6   :  { %s22_s12 = sshll.u32 %s9248_s11, 4  ;;  %s44_s15 = sshll.u32 %s10466_s2, 4  ;;  %s23_s12 = int_to_ptr.vmem [resolvable:$true] %s22_s12  ;;  %s45_s15 = int_to_ptr.hbm [resolvable:$true] %s44_s15 }
   0x7   :  { %25 = dma.hbm_to_vmem [thread:$0]  %s21_s8, 128, %s23_s12, [#allocation8]  }
   0x8   :  { %s9249_s1 = smov [#allocation12]  }
   0x9   :  { %s46_s16 = sshll.u32 %s9249_s1, 4  ;;  %s47_s16 = int_to_ptr.vmem [resolvable:$true] %s46_s16 }
   0xa   :  { %49 = dma.hbm_to_vmem [thread:$0]  %s45_s15, 1120, %s47_s16, [#allocation11]  }
   0xb   :  { %9231 = dma.done.wait [#allocation8], 128  }
   0xc   :  { %9232 = vsyncadd [#allocation8], 4294967168 }
   0xd   :  { %9233 = dma.done.wait [#allocation11], 2144  }
   0xe   :  { %9234 = vsyncadd [#allocation11], 4294965152  ;;  %v8946_v0 = vld [vmem:[#allocation10 + $0x20] sm:$0xf]  ;;  %v8974_v1 = vld [vmem:[#allocation10 + $0x2c] sm:$0xf0] }
   0xf   :  { %v8972_v2 = vld [vmem:[#allocation10 + $0x24] sm:$0xf]  ;;  %v8947_v3 = vor.u32 %v8974_v1, %v8946_v0  ;;  %v8948_v4 = vld [vmem:[#allocation10 + $0x30] sm:$0xf0]  ;;  %v8954_v5 = vld [vmem:[#allocation10 + $0x28] sm:$0xf] }
  0x10   :  { %v8975_v6 = vld [vmem:[#allocation10 + $0x34] sm:$0xf0]  ;;  %v8951_v7 = vor.u32 %v8972_v2, %v8948_v4  ;;  %v8973_v9 = vld [vmem:[#allocation10 + $0x2c] sm:$0xf]  ;;  %v8956_v10 = vld [vmem:[#allocation10 + $0x38] sm:$0xf0] }
  0x11   :  { %v8955_v8 = vor.u32 %v8975_v6, %v8954_v5  ;;  %v8930_v11 = vld [vmem:[#allocation10] sm:$0xf]  ;;  %178 = vmatpush.bf16.msra.mxu0 %v8947_v3  ;;  %v8959_v12 = vor.u32 %v8973_v9, %v8956_v10  ;;  %v8970_v13 = vld [vmem:[#allocation10 + $0xc] sm:$0xf0]  ;;  %v8968_v14 = vld [vmem:[#allocation10 + $0x4] sm:$0xf] }
  0x12   :  { %v8932_v15 = vld [vmem:[#allocation10 + $0x10] sm:$0xf0]  ;;  %191 = vmatpush.bf16.msra.mxu1 %v8951_v7  ;;  %v8931_v16 = vor.u32 %v8970_v13, %v8930_v11  ;;  %v8938_v18 = vld [vmem:[#allocation10 + $0x8] sm:$0xf]  ;;  %v8971_v19 = vld [vmem:[#allocation10 + $0x14] sm:$0xf0] }
  0x13   :  { %204 = vmatpush.bf16.msra.mxu2 %v8955_v8  ;;  %v8935_v17 = vor.u32 %v8968_v14, %v8932_v15  ;;  %v8969_v20 = vld [vmem:[#allocation10 + $0xc] sm:$0xf]  ;;  %217 = vmatpush.bf16.msra.mxu3 %v8959_v12  ;;  %v8939_v21 = vor.u32 %v8971_v19, %v8938_v18  ;;  %v8940_v22 = vld [vmem:[#allocation10 + $0x18] sm:$0xf0]  ;;  %vm168_vm0 = vcmask 261120   ;;  %s70_s17 = sshll.u32 %s10467_s3, 4  ;;  %s71_s17 = int_to_ptr.hbm [resolvable:$true] %s70_s17 }
  0x14   :  { %v118_v23 = vld [vmem:[#allocation7] sm:$0xff]  ;;  %v8943_v24 = vor.u32 %v8969_v20, %v8940_v22  ;;  %s9250_s18 = smov [#allocation2]   ;;  %s84_s22 = sshll.u32 %s10468_s4, 4  ;;  %v9254_v26 = vmov 8.0   ;;  %vm348_vm12 = vcmask 1040384   ;;  %vm350_vm14 = vcmask 1042434   ;;  %s85_s22 = int_to_ptr.hbm [resolvable:$true] %s84_s22 }
  0x15   :  { %v119_v25 = vpack.c.bf16 %v118_v23, %v118_v23  ;;  %179 = vmatpush.bf16.msra.mxu0 %v8931_v16  ;;  %s72_s19 = sshll.u32 %s9250_s18, 4  ;;  %s9251_s23 = smov [#allocation3]   ;;  %8987 = vrcp.f32 %v9254_v26  ;;  %s73_s19 = int_to_ptr.vmem [resolvable:$true] %s72_s19 }
  0x16   :  { %192 = vmatpush.bf16.msra.mxu1 %v8935_v17  ;;  %75 = dma.hbm_to_vmem [thread:$0]  %s71_s17, 16384, %s73_s19, [#allocation6] }
  0x17   :  { %205 = vmatpush.bf16.msra.mxu2 %v8939_v21  ;;  %218 = vmatpush.bf16.msra.mxu3 %v8943_v24  ;;  %s86_s24 = sshll.u32 %s9251_s23, 4  ;;  %s98_s27 = sshll.u32 %s10469_s5, 4  ;;  %s87_s24 = int_to_ptr.vmem [resolvable:$true] %s86_s24  ;;  %s99_s27 = int_to_ptr.hbm [resolvable:$true] %s98_s27 }
  0x18   :  { %8960 = vmatmul.msk.bf16.vlgmr.msra.gmra.mxu0 %vm168_vm0, %v119_v25  ;;  %89 = dma.hbm_to_vmem [thread:$0]  %s85_s22, 32768, %s87_s24, [#allocation6 + $0x1] }
  0x19   :  { %8961 = vmatmul.msk.bf16.vlgmr.msra.gmra.mxu1 %vm168_vm0, %v119_v25  ;;  %s9252_s3 = smov [#allocation4]   ;;  %s112_s8 = sshll.u32 %s10470_s6, 4  ;;  %s113_s8 = int_to_ptr.hbm [resolvable:$true] %s112_s8 }
  0x1a   :  { %8962 = vmatmul.msk.bf16.vlgmr.msra.gmra.mxu2 %vm168_vm0, %v119_v25  ;;  %8963 = vmatmul.msk.bf16.vlgmr.msra.gmra.mxu3 %vm168_vm0, %v119_v25  ;;  %s100_s28 = sshll.u32 %s9252_s3, 4  ;;  %s9253_s4 = smov [#allocation5]   ;;  %vm352_vm0 = vcmask 1041408   ;;  %s101_s28 = int_to_ptr.vmem [resolvable:$true] %s100_s28 }
  0x1b   :  { %103 = dma.hbm_to_vmem [thread:$0]  %s99_s27, 16384, %s101_s28, [#allocation6 + $0x2]  ;;  %v8988_v27 = vpop.eup %8987 }
  0x1c   :  { %s114_s9 = sshll.u32 %s9253_s4, 4  ;;  %v251_v28 = vmul.f32 8.0, %v8988_v27  ;;  %vm255_vm1 = vweird.f32 %v8988_v27  ;;  %s115_s9 = int_to_ptr.vmem [resolvable:$true] %s114_s9 }
  0x1d   :  { %117 = dma.hbm_to_vmem [thread:$0]  %s113_s8, 2048, %s115_s9, [#allocation6 + $0x3] }
  0x1e   :  { %v252_v29 = vsub.f32 1.0, %v251_v28 }
  0x20   :  { %v253_v33 = vmul.f32 %v8988_v27, %v252_v29 }
  0x22   :  { %v254_v38 = vadd.f32 %v8988_v27, %v253_v33 }
  0x24   :  { %v9331_v49 = vsel %vm255_vm1, %v8988_v27, %v254_v38 }
  0x95   :  { %v9317_v30 = vpop.f32.mrf.mxu0 }
  0x96   :  { %v226_v31 = vrot.slane %v9317_v30, 4  ;;  %v9320_v32 = vpop.f32.mrf.mxu1 }
  0x97   :  { %v232_v34 = vrot.slane %v9320_v32, 4 }
  0x98   :  { %v227_v35 = vadd.f32 %v226_v31, %v9317_v30 }
  0x99   :  { %v233_v36 = vadd.f32 %v232_v34, %v9320_v32 }
  0x9a   :  { %v228_v37 = vrot.slane %v227_v35, 2 }
  0x9b   :  { %v234_v39 = vrot.slane %v233_v36, 2 }
  0x9c   :  { %v229_v40 = vadd.f32 %v228_v37, %v227_v35 }
  0x9d   :  { %v9325_v41 = vpop.f32.mrf.mxu2  ;;  %v235_v42 = vadd.f32 %v234_v39, %v233_v36  ;;  %v9328_v44 = vpop.f32.mrf.mxu3 }
  0x9e   :  { %v238_v43 = vrot.slane %v9325_v41, 4  ;;  %v183_v45 = vpop.f32.mrf.mxu0  ;;  %v230_v46 = vrot.slane %v229_v40, 1  ;;  %v244_v47 = vrot.slane %v9328_v44, 4  ;;  %v196_v48 = vpop.f32.mrf.mxu1 }
  0x9f   :  { %v236_v50 = vrot.slane %v235_v42, 1 }
  0xa0   :  { %v239_v51 = vadd.f32 %v238_v43, %v9325_v41  ;;  %v231_v52 = vadd.f32 %v230_v46, %v229_v40  ;;  %v245_v53 = vadd.f32 %v244_v47, %v9328_v44 }
  0xa1   :  { %v237_v54 = vadd.f32 %v236_v50, %v235_v42 }
  0xa2   :  { %v240_v55 = vrot.slane %v239_v51, 2  ;;  %v9336_v56 = vmul.f32 %v9331_v49, %v231_v52  ;;  %v246_v57 = vrot.slane %v245_v53, 2 }
  0xa3   :  { %v9339_v58 = vmul.f32 %v9331_v49, %v237_v54 }
  0xa4   :  { %v241_v59 = vadd.f32 %v240_v55, %v239_v51  ;;  %v261_v60 = vsub.f32 %v9317_v30, %v9336_v56  ;;  %v247_v61 = vadd.f32 %v246_v57, %v245_v53 }
  0xa5   :  { %v209_v62 = vpop.f32.mrf.mxu2  ;;  %v262_v63 = vsub.f32 %v9320_v32, %v9339_v58  ;;  %v222_v1 = vpop.f32.mrf.mxu3 }
  0xa6   :  { %v242_v0 = vrot.slane %v241_v59, 1  ;;  %v265_v2 = vmul.f32 %v261_v60, %v261_v60  ;;  %v248_v3 = vrot.slane %v247_v61, 1 }
  0xa7   :  { %v266_v4 = vmul.f32 %v262_v63, %v262_v63 }
  0xa8   :  { %v243_v5 = vadd.f32 %v242_v0, %v241_v59  ;;  %v269_v6 = vrot.slane %v265_v2, 4  ;;  %v249_v7 = vadd.f32 %v248_v3, %v247_v61 }
  0xa9   :  { %v275_v8 = vrot.slane %v266_v4, 4 }
  0xaa   :  { %v9346_v9 = vmul.f32 %v9331_v49, %v243_v5  ;;  %v270_v10 = vadd.f32 %v269_v6, %v265_v2  ;;  %v9349_v11 = vmul.f32 %v9331_v49, %v249_v7 }
  0xab   :  { %v276_v12 = vadd.f32 %v275_v8, %v266_v4 }
  0xac   :  { %v263_v13 = vsub.f32 %v9325_v41, %v9346_v9  ;;  %v271_v14 = vrot.slane %v270_v10, 2  ;;  %v264_v15 = vsub.f32 %v9328_v44, %v9349_v11 }
  0xad   :  { %v277_v16 = vrot.slane %v276_v12, 2 }
  0xae   :  { %v267_v17 = vmul.f32 %v263_v13, %v263_v13  ;;  %v272_v18 = vadd.f32 %v271_v14, %v270_v10  ;;  %v268_v19 = vmul.f32 %v264_v15, %v264_v15 }
  0xaf   :  { %v278_v20 = vadd.f32 %v277_v16, %v276_v12 }
  0xb0   :  { %v281_v21 = vrot.slane %v267_v17, 4  ;;  %v273_v22 = vrot.slane %v272_v18, 1  ;;  %v287_v23 = vrot.slane %v268_v19, 4 }
  0xb1   :  { %v279_v24 = vrot.slane %v278_v20, 1 }
  0xb2   :  { %v282_v25 = vadd.f32 %v281_v21, %v267_v17  ;;  %v274_v26 = vadd.f32 %v273_v22, %v272_v18  ;;  %v288_v27 = vadd.f32 %v287_v23, %v268_v19 }
  0xb3   :  { %v280_v28 = vadd.f32 %v279_v24, %v278_v20  ;;  %v224_v20 = vld [vmem:[#allocation12] sm:$0xf] }
  0xb4   :  { %v283_v29 = vrot.slane %v282_v25, 2  ;;  %v293_v31 = vmul.f32 %v274_v26, %v9331_v49  ;;  %v289_v33 = vrot.slane %v288_v27, 2 }
  0xb5   :  { %v294_v34 = vmul.f32 %v280_v28, %v9331_v49 }
  0xb6   :  { %v284_v35 = vadd.f32 %v283_v29, %v282_v25  ;;  %v297_v36 = vadd.f32 1e-05, %v293_v31  ;;  %v290_v37 = vadd.f32 %v289_v33, %v288_v27 }
  0xb7   :  { %v298_v38 = vadd.f32 1e-05, %v294_v34 }
  0xb8   :  { %v285_v39 = vrot.slane %v284_v35, 1  ;;  %8989 = vrsqrt.f32 %v297_v36  ;;  %v291_v40 = vrot.slane %v290_v37, 1  ;;  %vm307_vm13 = vweird.f32 %v297_v36 }
  0xb9   :  { %8991 = vrsqrt.f32 %v298_v38  ;;  %vm317_vm3 = vweird.f32 %v298_v38 }
  0xba   :  { %v286_v42 = vadd.f32 %v285_v39, %v284_v35  ;;  %v292_v43 = vadd.f32 %v291_v40, %v290_v37  ;;  %v225_v39 = vld [vmem:[#allocation12 + $0x4] sm:$0xf] }
  0xbc   :  { %v295_v45 = vmul.f32 %v286_v42, %v9331_v49  ;;  %v296_v46 = vmul.f32 %v292_v43, %v9331_v49 }
  0xbe   :  { %v299_v47 = vadd.f32 1e-05, %v295_v45  ;;  %v8990_v48 = vpop.eup %8989  ;;  %v300_v50 = vadd.f32 1e-05, %v296_v46 }
  0xbf   :  { %v8992_v51 = vpop.eup %8991  ;;  %v302_v52 = vmul.f32 %v8990_v48, %v297_v36  ;;  %vm308_vm8 = vweird.f32 %v8990_v48 }
  0xc0   :  { %8993 = vrsqrt.f32 %v299_v47  ;;  %v312_v53 = vmul.f32 %v8992_v51, %v298_v38  ;;  %vm318_vm2 = vweird.f32 %v8992_v51  ;;  %vm327_vm7 = vweird.f32 %v299_v47  ;;  %vm309_vm15 = vmor %vm307_vm13, %vm308_vm8 }
  0xc1   :  { %8995 = vrsqrt.f32 %v300_v50  ;;  %v303_v55 = vmul.f32 %v8990_v48, %v302_v52  ;;  %vm319_vm4 = vmor %vm317_vm3, %vm318_vm2  ;;  %vm337_vm10 = vweird.f32 %v300_v50 }
  0xc2   :  { %v313_v54 = vmul.f32 %v8992_v51, %v312_v53 }
  0xc3   :  { %v304_v63 = vmul.f32 0.5, %v303_v55 }
  0xc4   :  { %v314_v57 = vmul.f32 0.5, %v313_v54 }
  0xc5   :  { %v305_v5 = vsub.f32 1.5, %v304_v63 }
  0xc6   :  { %v8994_v59 = vpop.eup %8993  ;;  %v315_v61 = vsub.f32 1.5, %v314_v57 }
  0xc7   :  { %v8996_v60 = vpop.eup %8995  ;;  %v322_v62 = vmul.f32 %v8994_v59, %v299_v47  ;;  %vm328_vm5 = vweird.f32 %v8994_v59  ;;  %v306_v13 = vmul.f32 %v8990_v48, %v305_v5 }
  0xc8   :  { %v332_v0 = vmul.f32 %v8996_v60, %v300_v50  ;;  %v316_v2 = vmul.f32 %v8992_v51, %v315_v61  ;;  %vm338_vm6 = vweird.f32 %v8996_v60  ;;  %vm329_vm9 = vmor %vm327_vm7, %vm328_vm5 }
  0xc9   :  { %v323_v1 = vmul.f32 %v8994_v59, %v322_v62  ;;  %vm339_vm11 = vmor %vm337_vm10, %vm338_vm6  ;;  %v310_v21 = vsel %vm309_vm15, %v8990_v48, %v306_v13 }
  0xca   :  { %v333_v3 = vmul.f32 %v8996_v60, %v332_v0  ;;  %v320_v8 = vsel %vm319_vm4, %v8992_v51, %v316_v2 }
  0xcb   :  { %v324_v4 = vmul.f32 0.5, %v323_v1  ;;  %v345_v15 = vrot.slane %v320_v8, 7 }
  0xcc   :  { %v334_v6 = vmul.f32 0.5, %v333_v3 }
  0xcd   :  { %v325_v7 = vsub.f32 1.5, %v324_v4  ;;  %v349_v22 = vsel %vm348_vm12, %v310_v21, %v345_v15 }
  0xce   :  { %v335_v10 = vsub.f32 1.5, %v334_v6 }
  0xcf   :  { %v326_v12 = vmul.f32 %v8994_v59, %v325_v7 }
  0xd0   :  { %v336_v14 = vmul.f32 %v8996_v60, %v335_v10 }
  0xd1   :  { %v330_v16 = vsel %vm329_vm9, %v8994_v59, %v326_v12 }
  0xd2   :  { %v346_v17 = vrot.slane %v330_v16, 6  ;;  %v340_v18 = vsel %vm339_vm11, %v8996_v60, %v336_v14 }
  0xd3   :  { %v347_v19 = vrot.slane %v340_v18, 5 }
  0xd5   :  { %v351_v23 = vsel %vm350_vm14, %v346_v17, %v347_v19 }
  0xd6   :  { %v353_v24 = vsel %vm352_vm0, %v349_v22, %v351_v23 }
  0xd7   :  { %v355_v25 = vmul.f32 %v353_v24, %v224_v20 }
  0xd9   :  { %v357_v26 = vperm.slane %v355_v25, 0  ;;  %v358_v27 = vperm.slane %v355_v25, 1  ;;  %v359_v28 = vperm.slane %v355_v25, 2  ;;  %v360_v29 = vperm.slane %v355_v25, 3 }
  0xdb   :  { %v366_v31 = vmul.f32 %v358_v27, %v9339_v58  ;;  %v367_v33 = vmul.f32 %v359_v28, %v9346_v9  ;;  %v368_v34 = vmul.f32 %v360_v29, %v9349_v11  ;;  %v365_v35 = vmul.f32 %v357_v26, %v9336_v56 }
  0xdc   :  { %v381_v46 = vmul.f32 %v357_v26, %v9317_v30  ;;  %v382_v58 = vmul.f32 %v358_v27, %v9320_v32  ;;  %v383_v9 = vmul.f32 %v359_v28, %v9325_v41  ;;  %v384_v11 = vmul.f32 %v360_v29, %v9328_v44 }
  0xdd   :  { %v373_v36 = vrot.slane %v366_v31, 7  ;;  %v374_v37 = vrot.slane %v367_v33, 6  ;;  %v375_v38 = vrot.slane %v368_v34, 5 }
  0xdf   :  { %v376_v40 = vsel %vm348_vm12, %v365_v35, %v373_v36  ;;  %v377_v42 = vsel %vm350_vm14, %v374_v37, %v375_v38 }
  0xe0   :  { %v378_v43 = vsel %vm352_vm0, %v376_v40, %v377_v42 }
  0xe1   :  { %v380_v45 = vsub.f32 %v225_v39, %v378_v43 }
  0xe3   :  { %v386_v56 = vperm.slane %v380_v45, 0  ;;  %v387_v47 = vperm.slane %v380_v45, 1  ;;  %v388_v48 = vperm.slane %v380_v45, 2  ;;  %v389_v50 = vperm.slane %v380_v45, 3 }
  0xe5   :  { %v394_v51 = vadd.f32 %v386_v56, %v381_v46  ;;  %v395_v52 = vadd.f32 %v387_v47, %v382_v58  ;;  %v396_v53 = vadd.f32 %v388_v48, %v383_v9  ;;  %v397_v54 = vadd.f32 %v389_v50, %v384_v11 }
  0xe7   :  { %v398_v55 = vmax.f32 %v394_v51, 0.0  ;;  %v399_v57 = vmax.f32 %v395_v52, 0.0  ;;  %v400_v59 = vmax.f32 %v396_v53, 0.0  ;;  %v401_v60 = vmax.f32 %v397_v54, 0.0 }
  0xe9   :  { %v9373_v61 = vpack.c.bf16 %v398_v55, %v398_v55  ;;  %v9375_v30 = vpack.c.bf16 %v399_v57, %v399_v57  ;;  %v9377_v32 = vpack.c.bf16 %v400_v59, %v400_v59  ;;  %v9379_v41 = vpack.c.bf16 %v401_v60, %v401_v60 }
  0xea   :  { %9235 = dma.done.wait [#allocation6], 16384 }
  0xeb   :  { %9236 = vsyncadd [#allocation6], 4294950912  ;;  %v434_v44 = vld [vmem:[#allocation2 + $0xc0] sm:$0xff] }
  0xec   :  { %v466_v62 = vld [vmem:[#allocation2 + $0x1c0] sm:$0xff]  ;;  %v650_v0 = vunpack.c.2.s8 %v434_v44  ;;  %v658_v1 = vunpack.c.3.s8 %v434_v44  ;;  %v634_v21 = vunpack.c.0.s8 %v434_v44  ;;  %v642_v22 = vunpack.c.1.s8 %v434_v44 }
  0xed   :  { %v498_v63 = vld [vmem:[#allocation2 + $0x2c0] sm:$0xff]  ;;  %v778_v2 = vunpack.c.2.s8 %v466_v62  ;;  %v786_v3 = vunpack.c.3.s8 %v466_v62  ;;  %v762_v25 = vunpack.c.0.s8 %v466_v62  ;;  %v770_v26 = vunpack.c.1.s8 %v466_v62 }
  0xee   :  { %v530_v4 = vld [vmem:[#allocation2 + $0x3c0] sm:$0xff]  ;;  %v906_v5 = vunpack.c.2.s8 %v498_v63  ;;  %v914_v6 = vunpack.c.3.s8 %v498_v63  ;;  %v1162_v10 = vcvt.s32.f32 %v650_v0  ;;  %v1170_v12 = vcvt.s32.f32 %v658_v1 }
  0xef   :  { %v1034_v7 = vunpack.c.2.s8 %v530_v4  ;;  %v1042_v8 = vunpack.c.3.s8 %v530_v4  ;;  %v1290_v13 = vcvt.s32.f32 %v778_v2  ;;  %v1298_v14 = vcvt.s32.f32 %v786_v3  ;;  %v426_v27 = vld [vmem:[#allocation2 + $0x80] sm:$0xff] }
  0xf0   :  { %v1418_v15 = vcvt.s32.f32 %v906_v5  ;;  %v1426_v16 = vcvt.s32.f32 %v914_v6  ;;  %v1618_v19 = vpack.c.bf16 %v1170_v12, %v1162_v10  ;;  %v1146_v28 = vcvt.s32.f32 %v634_v21  ;;  %v458_v38 = vld [vmem:[#allocation2 + $0x180] sm:$0xff] }
  0xf1   :  { %v1546_v17 = vcvt.s32.f32 %v1034_v7  ;;  %v1554_v18 = vcvt.s32.f32 %v1042_v8  ;;  %v1682_v20 = vpack.c.bf16 %v1298_v14, %v1290_v13  ;;  %v1154_v29 = vcvt.s32.f32 %v642_v22  ;;  %v490_v45 = vld [vmem:[#allocation2 + $0x280] sm:$0xff] }
  0xf2   :  { %v1746_v23 = vpack.c.bf16 %v1426_v16, %v1418_v15  ;;  %1818 = vmatpush.bf16.msrb.mxu0 %v1618_v19  ;;  %v890_v31 = vunpack.c.0.s8 %v498_v63  ;;  %v898_v33 = vunpack.c.1.s8 %v498_v63  ;;  %v1274_v34 = vcvt.s32.f32 %v762_v25  ;;  %v522_v56 = vld [vmem:[#allocation2 + $0x380] sm:$0xff] }
  0xf3   :  { %v1810_v24 = vpack.c.bf16 %v1554_v18, %v1546_v17  ;;  %1831 = vmatpush.bf16.msrb.mxu1 %v1682_v20  ;;  %v1282_v35 = vcvt.s32.f32 %v770_v26  ;;  %v1018_v36 = vunpack.c.0.s8 %v530_v4  ;;  %v1026_v37 = vunpack.c.1.s8 %v530_v4  ;;  %v418_v12 = vld [vmem:[#allocation2 + $0x40] sm:$0xff] }
  0xf4   :  { %1844 = vmatpush.bf16.msrb.mxu2 %v1746_v23  ;;  %v1610_v39 = vpack.c.bf16 %v1154_v29, %v1146_v28  ;;  %v1402_v40 = vcvt.s32.f32 %v890_v31  ;;  %v1410_v42 = vcvt.s32.f32 %v898_v33  ;;  %v618_v43 = vunpack.c.2.s8 %v426_v27  ;;  %v450_v21 = vld [vmem:[#allocation2 + $0x140] sm:$0xff] }
  0xf5   :  { %1857 = vmatpush.bf16.msrb.mxu3 %v1810_v24  ;;  %v1674_v46 = vpack.c.bf16 %v1282_v35, %v1274_v34  ;;  %v1530_v58 = vcvt.s32.f32 %v1018_v36  ;;  %v1538_v9 = vcvt.s32.f32 %v1026_v37  ;;  %v626_v11 = vunpack.c.3.s8 %v426_v27  ;;  %v482_v26 = vld [vmem:[#allocation2 + $0x240] sm:$0xff] }
  0xf6   :  { %1819 = vmatpush.bf16.msrb.mxu0 %v1610_v39  ;;  %v1738_v47 = vpack.c.bf16 %v1410_v42, %v1402_v40  ;;  %v1130_v48 = vcvt.s32.f32 %v618_v43  ;;  %v746_v50 = vunpack.c.2.s8 %v458_v38  ;;  %v754_v51 = vunpack.c.3.s8 %v458_v38  ;;  %v514_v33 = vld [vmem:[#allocation2 + $0x340] sm:$0xff] }
  0xf7   :  { %1832 = vmatpush.bf16.msrb.mxu1 %v1674_v46  ;;  %v1802_v52 = vpack.c.bf16 %v1538_v9, %v1530_v58  ;;  %v1138_v53 = vcvt.s32.f32 %v626_v11  ;;  %v874_v54 = vunpack.c.2.s8 %v490_v45  ;;  %v882_v55 = vunpack.c.3.s8 %v490_v45 }
  0xf8   :  { %1845 = vmatpush.bf16.msrb.mxu2 %v1738_v47  ;;  %v1258_v57 = vcvt.s32.f32 %v746_v50  ;;  %v1266_v59 = vcvt.s32.f32 %v754_v51  ;;  %v1002_v60 = vunpack.c.2.s8 %v522_v56  ;;  %v1010_v44 = vunpack.c.3.s8 %v522_v56 }
  0xf9   :  { %1858 = vmatpush.bf16.msrb.mxu3 %v1802_v52  ;;  %v1602_v62 = vpack.c.bf16 %v1138_v53, %v1130_v48  ;;  %v1386_v63 = vcvt.s32.f32 %v874_v54  ;;  %v1394_v0 = vcvt.s32.f32 %v882_v55  ;;  %v602_v1 = vunpack.c.0.s8 %v426_v27 }
  0xfa   :  { %v1666_v2 = vpack.c.bf16 %v1266_v59, %v1258_v57  ;;  %v1514_v3 = vcvt.s32.f32 %v1002_v60  ;;  %v1522_v4 = vcvt.s32.f32 %v1010_v44  ;;  %v610_v5 = vunpack.c.1.s8 %v426_v27  ;;  %v410_v59 = vld [vmem:[#allocation2] sm:$0xff] }
  0xfb   :  { %1820 = vmatpush.bf16.msrb.mxu0 %v1602_v62  ;;  %v1730_v6 = vpack.c.bf16 %v1394_v0, %v1386_v63  ;;  %v1114_v7 = vcvt.s32.f32 %v602_v1  ;;  %v730_v8 = vunpack.c.0.s8 %v458_v38  ;;  %v738_v10 = vunpack.c.1.s8 %v458_v38 }
  0xfc   :  { %1833 = vmatpush.bf16.msrb.mxu1 %v1666_v2  ;;  %v1794_v13 = vpack.c.bf16 %v1522_v4, %v1514_v3  ;;  %v1122_v14 = vcvt.s32.f32 %v610_v5  ;;  %v858_v15 = vunpack.c.0.s8 %v490_v45  ;;  %v866_v16 = vunpack.c.1.s8 %v490_v45  ;;  %v442_v4 = vld [vmem:[#allocation2 + $0x100] sm:$0xff] }
  0xfd   :  { %1846 = vmatpush.bf16.msrb.mxu2 %v1730_v6  ;;  %v1242_v17 = vcvt.s32.f32 %v730_v8  ;;  %v1250_v18 = vcvt.s32.f32 %v738_v10  ;;  %v986_v19 = vunpack.c.0.s8 %v522_v56  ;;  %v994_v20 = vunpack.c.1.s8 %v522_v56  ;;  %v474_v10 = vld [vmem:[#allocation2 + $0x200] sm:$0xff] }
  0xfe   :  { %1859 = vmatpush.bf16.msrb.mxu3 %v1794_v13  ;;  %v1594_v22 = vpack.c.bf16 %v1122_v14, %v1114_v7  ;;  %v1370_v23 = vcvt.s32.f32 %v858_v15  ;;  %v1378_v24 = vcvt.s32.f32 %v866_v16  ;;  %v586_v25 = vunpack.c.2.s8 %v418_v12  ;;  %v506_v16 = vld [vmem:[#allocation2 + $0x300] sm:$0xff] }
  0xff   :  { %v1658_v27 = vpack.c.bf16 %v1250_v18, %v1242_v17  ;;  %v1498_v28 = vcvt.s32.f32 %v986_v19  ;;  %v1506_v29 = vcvt.s32.f32 %v994_v20  ;;  %v594_v31 = vunpack.c.3.s8 %v418_v12 }
 0x100   :  { %1821 = vmatpush.bf16.msrb.mxu0 %v1594_v22  ;;  %v1722_v34 = vpack.c.bf16 %v1378_v24, %v1370_v23  ;;  %v1098_v35 = vcvt.s32.f32 %v586_v25  ;;  %v714_v36 = vunpack.c.2.s8 %v450_v21  ;;  %v722_v37 = vunpack.c.3.s8 %v450_v21 }
 0x101   :  { %1834 = vmatpush.bf16.msrb.mxu1 %v1658_v27  ;;  %v1786_v38 = vpack.c.bf16 %v1506_v29, %v1498_v28  ;;  %v1106_v39 = vcvt.s32.f32 %v594_v31  ;;  %v842_v40 = vunpack.c.2.s8 %v482_v26  ;;  %v850_v42 = vunpack.c.3.s8 %v482_v26 }
 0x102   :  { %1847 = vmatpush.bf16.msrb.mxu2 %v1722_v34  ;;  %v1226_v43 = vcvt.s32.f32 %v714_v36  ;;  %v1234_v45 = vcvt.s32.f32 %v722_v37  ;;  %v970_v46 = vunpack.c.2.s8 %v514_v33  ;;  %v978_v58 = vunpack.c.3.s8 %v514_v33 }
 0x103   :  { %1860 = vmatpush.bf16.msrb.mxu3 %v1786_v38  ;;  %v1586_v9 = vpack.c.bf16 %v1106_v39, %v1098_v35  ;;  %v1354_v11 = vcvt.s32.f32 %v842_v40  ;;  %v1362_v56 = vcvt.s32.f32 %v850_v42  ;;  %v570_v47 = vunpack.c.0.s8 %v418_v12 }
 0x104   :  { %v1650_v48 = vpack.c.bf16 %v1234_v45, %v1226_v43  ;;  %v1482_v50 = vcvt.s32.f32 %v970_v46  ;;  %v1490_v51 = vcvt.s32.f32 %v978_v58  ;;  %v578_v52 = vunpack.c.1.s8 %v418_v12  ;;  %v435_v45 = vld [vmem:[#allocation2 + $0xc8] sm:$0xff] }
 0x105   :  { %1822 = vmatpush.bf16.msrb.mxu0 %v1586_v9  ;;  %v1714_v53 = vpack.c.bf16 %v1362_v56, %v1354_v11  ;;  %v1082_v54 = vcvt.s32.f32 %v570_v47  ;;  %v698_v55 = vunpack.c.0.s8 %v450_v21  ;;  %v706_v57 = vunpack.c.1.s8 %v450_v21 }
 0x106   :  { %1835 = vmatpush.bf16.msrb.mxu1 %v1650_v48  ;;  %v1778_v60 = vpack.c.bf16 %v1490_v51, %v1482_v50  ;;  %v1090_v44 = vcvt.s32.f32 %v578_v52  ;;  %v826_v62 = vunpack.c.0.s8 %v482_v26  ;;  %v834_v63 = vunpack.c.1.s8 %v482_v26  ;;  %v467_v51 = vld [vmem:[#allocation2 + $0x1c8] sm:$0xff] }
 0x107   :  { %1848 = vmatpush.bf16.msrb.mxu2 %v1714_v53  ;;  %v1210_v0 = vcvt.s32.f32 %v698_v55  ;;  %v1218_v1 = vcvt.s32.f32 %v706_v57  ;;  %v954_v2 = vunpack.c.0.s8 %v514_v33  ;;  %v962_v3 = vunpack.c.1.s8 %v514_v33  ;;  %v499_v57 = vld [vmem:[#allocation2 + $0x2c8] sm:$0xff] }
 0x108   :  { %1861 = vmatpush.bf16.msrb.mxu3 %v1778_v60  ;;  %v1578_v5 = vpack.c.bf16 %v1090_v44, %v1082_v54  ;;  %v1338_v6 = vcvt.s32.f32 %v826_v62  ;;  %v1346_v7 = vcvt.s32.f32 %v834_v63  ;;  %v554_v8 = vunpack.c.2.s8 %v410_v59  ;;  %v531_v63 = vld [vmem:[#allocation2 + $0x3c8] sm:$0xff] }
 0x109   :  { %v1642_v12 = vpack.c.bf16 %v1218_v1, %v1210_v0  ;;  %v1466_v13 = vcvt.s32.f32 %v954_v2  ;;  %v1474_v14 = vcvt.s32.f32 %v962_v3  ;;  %v562_v15 = vunpack.c.3.s8 %v410_v59 }
 0x10a   :  { %1823 = vmatpush.bf16.msrb.mxu0 %v1578_v5  ;;  %v1706_v17 = vpack.c.bf16 %v1346_v7, %v1338_v6  ;;  %v1066_v18 = vcvt.s32.f32 %v554_v8  ;;  %v682_v19 = vunpack.c.2.s8 %v442_v4  ;;  %v690_v20 = vunpack.c.3.s8 %v442_v4 }
 0x10b   :  { %1836 = vmatpush.bf16.msrb.mxu1 %v1642_v12  ;;  %v1770_v21 = vpack.c.bf16 %v1474_v14, %v1466_v13  ;;  %v1074_v22 = vcvt.s32.f32 %v562_v15  ;;  %v810_v23 = vunpack.c.2.s8 %v474_v10  ;;  %v818_v24 = vunpack.c.3.s8 %v474_v10 }
 0x10c   :  { %1849 = vmatpush.bf16.msrb.mxu2 %v1706_v17  ;;  %v1194_v25 = vcvt.s32.f32 %v682_v19  ;;  %v1202_v26 = vcvt.s32.f32 %v690_v20  ;;  %v938_v27 = vunpack.c.2.s8 %v506_v16  ;;  %v946_v28 = vunpack.c.3.s8 %v506_v16 }
 0x10d   :  { %1862 = vmatpush.bf16.msrb.mxu3 %v1770_v21  ;;  %v1570_v29 = vpack.c.bf16 %v1074_v22, %v1066_v18  ;;  %v1322_v31 = vcvt.s32.f32 %v810_v23  ;;  %v1330_v33 = vcvt.s32.f32 %v818_v24  ;;  %v538_v34 = vunpack.c.0.s8 %v410_v59 }
 0x10e   :  { %v1634_v35 = vpack.c.bf16 %v1202_v26, %v1194_v25  ;;  %v1450_v36 = vcvt.s32.f32 %v938_v27  ;;  %v1458_v37 = vcvt.s32.f32 %v946_v28  ;;  %v546_v38 = vunpack.c.1.s8 %v410_v59  ;;  %v427_v26 = vld [vmem:[#allocation2 + $0x88] sm:$0xff] }
 0x10f   :  { %1824 = vmatpush.bf16.msrb.mxu0 %v1570_v29  ;;  %v1698_v39 = vpack.c.bf16 %v1330_v33, %v1322_v31  ;;  %v1050_v40 = vcvt.s32.f32 %v538_v34  ;;  %v666_v42 = vunpack.c.0.s8 %v442_v4  ;;  %v674_v43 = vunpack.c.1.s8 %v442_v4 }
 0x110   :  { %1837 = vmatpush.bf16.msrb.mxu1 %v1634_v35  ;;  %v1762_v46 = vpack.c.bf16 %v1458_v37, %v1450_v36  ;;  %v1058_v58 = vcvt.s32.f32 %v546_v38  ;;  %v794_v9 = vunpack.c.0.s8 %v474_v10  ;;  %v802_v11 = vunpack.c.1.s8 %v474_v10  ;;  %v459_v37 = vld [vmem:[#allocation2 + $0x188] sm:$0xff] }
 0x111   :  { %1850 = vmatpush.bf16.msrb.mxu2 %v1698_v39  ;;  %v1178_v56 = vcvt.s32.f32 %v666_v42  ;;  %v1186_v47 = vcvt.s32.f32 %v674_v43  ;;  %v922_v48 = vunpack.c.0.s8 %v506_v16  ;;  %v930_v50 = vunpack.c.1.s8 %v506_v16  ;;  %v491_v43 = vld [vmem:[#allocation2 + $0x288] sm:$0xff] }
 0x112   :  { %1863 = vmatpush.bf16.msrb.mxu3 %v1762_v46  ;;  %v1562_v52 = vpack.c.bf16 %v1058_v58, %v1050_v40  ;;  %v1306_v53 = vcvt.s32.f32 %v794_v9  ;;  %v1314_v54 = vcvt.s32.f32 %v802_v11  ;;  %v651_v55 = vunpack.c.2.s8 %v435_v45  ;;  %v523_v11 = vld [vmem:[#allocation2 + $0x388] sm:$0xff] }
 0x113   :  { %v1626_v59 = vpack.c.bf16 %v1186_v47, %v1178_v56  ;;  %v1434_v60 = vcvt.s32.f32 %v922_v48  ;;  %v1442_v44 = vcvt.s32.f32 %v930_v50  ;;  %v659_v62 = vunpack.c.3.s8 %v435_v45 }
 0x114   :  { %1825 = vmatpush.bf16.msrb.mxu0 %v1562_v52  ;;  %v1690_v0 = vpack.c.bf16 %v1314_v54, %v1306_v53  ;;  %v1163_v1 = vcvt.s32.f32 %v651_v55  ;;  %v779_v2 = vunpack.c.2.s8 %v467_v51  ;;  %v787_v3 = vunpack.c.3.s8 %v467_v51 }
 0x115   :  { %1838 = vmatpush.bf16.msrb.mxu1 %v1626_v59  ;;  %v1754_v4 = vpack.c.bf16 %v1442_v44, %v1434_v60  ;;  %v1171_v5 = vcvt.s32.f32 %v659_v62  ;;  %v907_v6 = vunpack.c.2.s8 %v499_v57  ;;  %v915_v7 = vunpack.c.3.s8 %v499_v57 }
 0x116   :  { %1851 = vmatpush.bf16.msrb.mxu2 %v1690_v0  ;;  %v1291_v8 = vcvt.s32.f32 %v779_v2  ;;  %v1299_v10 = vcvt.s32.f32 %v787_v3  ;;  %v1035_v12 = vunpack.c.2.s8 %v531_v63  ;;  %v1043_v13 = vunpack.c.3.s8 %v531_v63 }
 0x117   :  { %1864 = vmatpush.bf16.msrb.mxu3 %v1754_v4  ;;  %v1619_v14 = vpack.c.bf16 %v1171_v5, %v1163_v1  ;;  %v1419_v15 = vcvt.s32.f32 %v907_v6  ;;  %v1427_v16 = vcvt.s32.f32 %v915_v7  ;;  %v635_v17 = vunpack.c.0.s8 %v435_v45  ;;  %1826 = vmatmul.bf16.vlgmr.msrb.gmra.mxu0 %v9373_v61 }
 0x118   :  { %v1683_v18 = vpack.c.bf16 %v1299_v10, %v1291_v8  ;;  %v1547_v19 = vcvt.s32.f32 %v1035_v12  ;;  %v1555_v20 = vcvt.s32.f32 %v1043_v13  ;;  %v643_v21 = vunpack.c.1.s8 %v435_v45  ;;  %1839 = vmatmul.bf16.vlgmr.msrb.gmra.mxu1 %v9375_v30  ;;  %v419_v10 = vld [vmem:[#allocation2 + $0x48] sm:$0xff] }
 0x119   :  { %1870 = vmatpush.bf16.msra.mxu0 %v1619_v14  ;;  %v1747_v22 = vpack.c.bf16 %v1427_v16, %v1419_v15  ;;  %1852 = vmatmul.bf16.vlgmr.msrb.gmra.mxu2 %v9377_v32  ;;  %v1147_v23 = vcvt.s32.f32 %v635_v17  ;;  %v763_v24 = vunpack.c.0.s8 %v467_v51  ;;  %v771_v25 = vunpack.c.1.s8 %v467_v51 }
 0x11a   :  { %1883 = vmatpush.bf16.msra.mxu1 %v1683_v18  ;;  %v1811_v27 = vpack.c.bf16 %v1555_v20, %v1547_v19  ;;  %1865 = vmatmul.bf16.vlgmr.msrb.gmra.mxu3 %v9379_v41  ;;  %v1155_v28 = vcvt.s32.f32 %v643_v21  ;;  %v891_v29 = vunpack.c.0.s8 %v499_v57  ;;  %v899_v31 = vunpack.c.1.s8 %v499_v57  ;;  %v451_v20 = vld [vmem:[#allocation2 + $0x148] sm:$0xff] }
 0x11b   :  { %1896 = vmatpush.bf16.msra.mxu2 %v1747_v22  ;;  %v1275_v33 = vcvt.s32.f32 %v763_v24  ;;  %v1283_v34 = vcvt.s32.f32 %v771_v25  ;;  %v1019_v35 = vunpack.c.0.s8 %v531_v63  ;;  %v1027_v36 = vunpack.c.1.s8 %v531_v63  ;;  %v483_v25 = vld [vmem:[#allocation2 + $0x248] sm:$0xff] }
 0x11c   :  { %1909 = vmatpush.bf16.msra.mxu3 %v1811_v27  ;;  %v1611_v38 = vpack.c.bf16 %v1155_v28, %v1147_v23  ;;  %v1403_v39 = vcvt.s32.f32 %v891_v29  ;;  %v1411_v40 = vcvt.s32.f32 %v899_v31  ;;  %v619_v42 = vunpack.c.2.s8 %v427_v26  ;;  %v515_v31 = vld [vmem:[#allocation2 + $0x348] sm:$0xff] }
 0x11d   :  { %v1675_v45 = vpack.c.bf16 %v1283_v34, %v1275_v33  ;;  %v1531_v46 = vcvt.s32.f32 %v1019_v35  ;;  %v1539_v58 = vcvt.s32.f32 %v1027_v36  ;;  %v627_v9 = vunpack.c.3.s8 %v427_v26 }
 0x11e   :  { %1871 = vmatpush.bf16.msra.mxu0 %v1611_v38  ;;  %v1739_v56 = vpack.c.bf16 %v1411_v40, %v1403_v39  ;;  %v1131_v47 = vcvt.s32.f32 %v619_v42  ;;  %v747_v48 = vunpack.c.2.s8 %v459_v37  ;;  %v755_v50 = vunpack.c.3.s8 %v459_v37 }
 0x11f   :  { %1884 = vmatpush.bf16.msra.mxu1 %v1675_v45  ;;  %v1803_v51 = vpack.c.bf16 %v1539_v58, %v1531_v46  ;;  %v1139_v52 = vcvt.s32.f32 %v627_v9  ;;  %v875_v53 = vunpack.c.2.s8 %v491_v43  ;;  %v883_v54 = vunpack.c.3.s8 %v491_v43 }
 0x120   :  { %1897 = vmatpush.bf16.msra.mxu2 %v1739_v56  ;;  %v1259_v55 = vcvt.s32.f32 %v747_v48  ;;  %v1267_v57 = vcvt.s32.f32 %v755_v50  ;;  %v1003_v59 = vunpack.c.2.s8 %v523_v11  ;;  %v1011_v60 = vunpack.c.3.s8 %v523_v11 }
 0x121   :  { %1910 = vmatpush.bf16.msra.mxu3 %v1803_v51  ;;  %v1603_v44 = vpack.c.bf16 %v1139_v52, %v1131_v47  ;;  %v1387_v62 = vcvt.s32.f32 %v875_v53  ;;  %v1395_v63 = vcvt.s32.f32 %v883_v54  ;;  %v603_v0 = vunpack.c.0.s8 %v427_v26 }
 0x122   :  { %v1667_v1 = vpack.c.bf16 %v1267_v57, %v1259_v55  ;;  %v1515_v2 = vcvt.s32.f32 %v1003_v59  ;;  %v1523_v3 = vcvt.s32.f32 %v1011_v60  ;;  %v611_v4 = vunpack.c.1.s8 %v427_v26  ;;  %v411_v57 = vld [vmem:[#allocation2 + $0x8] sm:$0xff] }
 0x123   :  { %1872 = vmatpush.bf16.msra.mxu0 %v1603_v44  ;;  %v1731_v5 = vpack.c.bf16 %v1395_v63, %v1387_v62  ;;  %v1115_v6 = vcvt.s32.f32 %v603_v0  ;;  %v731_v7 = vunpack.c.0.s8 %v459_v37  ;;  %v739_v8 = vunpack.c.1.s8 %v459_v37 }
 0x124   :  { %1885 = vmatpush.bf16.msra.mxu1 %v1667_v1  ;;  %v1795_v12 = vpack.c.bf16 %v1523_v3, %v1515_v2  ;;  %v1123_v13 = vcvt.s32.f32 %v611_v4  ;;  %v859_v14 = vunpack.c.0.s8 %v491_v43  ;;  %v867_v15 = vunpack.c.1.s8 %v491_v43  ;;  %v443_v3 = vld [vmem:[#allocation2 + $0x108] sm:$0xff] }
 0x125   :  { %1898 = vmatpush.bf16.msra.mxu2 %v1731_v5  ;;  %v1243_v16 = vcvt.s32.f32 %v731_v7  ;;  %v1251_v17 = vcvt.s32.f32 %v739_v8  ;;  %v987_v18 = vunpack.c.0.s8 %v523_v11  ;;  %v995_v19 = vunpack.c.1.s8 %v523_v11  ;;  %v475_v8 = vld [vmem:[#allocation2 + $0x208] sm:$0xff] }
 0x126   :  { %1911 = vmatpush.bf16.msra.mxu3 %v1795_v12  ;;  %v1595_v21 = vpack.c.bf16 %v1123_v13, %v1115_v6  ;;  %v1371_v22 = vcvt.s32.f32 %v859_v14  ;;  %v1379_v23 = vcvt.s32.f32 %v867_v15  ;;  %v587_v24 = vunpack.c.2.s8 %v419_v10  ;;  %v507_v15 = vld [vmem:[#allocation2 + $0x308] sm:$0xff] }
 0x127   :  { %v1659_v26 = vpack.c.bf16 %v1251_v17, %v1243_v16  ;;  %v1499_v27 = vcvt.s32.f32 %v987_v18  ;;  %v1507_v28 = vcvt.s32.f32 %v995_v19  ;;  %v595_v29 = vunpack.c.3.s8 %v419_v10 }
 0x128   :  { %1873 = vmatpush.bf16.msra.mxu0 %v1595_v21  ;;  %v1723_v33 = vpack.c.bf16 %v1379_v23, %v1371_v22  ;;  %v1099_v34 = vcvt.s32.f32 %v587_v24  ;;  %v715_v35 = vunpack.c.2.s8 %v451_v20  ;;  %v723_v36 = vunpack.c.3.s8 %v451_v20 }
 0x129   :  { %1886 = vmatpush.bf16.msra.mxu1 %v1659_v26  ;;  %v1787_v37 = vpack.c.bf16 %v1507_v28, %v1499_v27  ;;  %v1107_v38 = vcvt.s32.f32 %v595_v29  ;;  %v843_v39 = vunpack.c.2.s8 %v483_v25  ;;  %v851_v40 = vunpack.c.3.s8 %v483_v25 }
 0x12a   :  { %1899 = vmatpush.bf16.msra.mxu2 %v1723_v33  ;;  %v1227_v42 = vcvt.s32.f32 %v715_v35  ;;  %v1235_v43 = vcvt.s32.f32 %v723_v36  ;;  %v971_v45 = vunpack.c.2.s8 %v515_v31  ;;  %v979_v46 = vunpack.c.3.s8 %v515_v31 }
 0x12b   :  { %1912 = vmatpush.bf16.msra.mxu3 %v1787_v37  ;;  %v1587_v58 = vpack.c.bf16 %v1107_v38, %v1099_v34  ;;  %v1355_v9 = vcvt.s32.f32 %v843_v39  ;;  %v1363_v11 = vcvt.s32.f32 %v851_v40  ;;  %v571_v56 = vunpack.c.0.s8 %v419_v10 }
 0x12c   :  { %v1651_v47 = vpack.c.bf16 %v1235_v43, %v1227_v42  ;;  %v1483_v48 = vcvt.s32.f32 %v971_v45  ;;  %v1491_v50 = vcvt.s32.f32 %v979_v46  ;;  %v579_v51 = vunpack.c.1.s8 %v419_v10  ;;  %v436_v43 = vld [vmem:[#allocation2 + $0xd0] sm:$0xff] }
 0x12d   :  { %1874 = vmatpush.bf16.msra.mxu0 %v1587_v58  ;;  %v1715_v52 = vpack.c.bf16 %v1363_v11, %v1355_v9  ;;  %v1083_v53 = vcvt.s32.f32 %v571_v56  ;;  %v699_v54 = vunpack.c.0.s8 %v451_v20  ;;  %v707_v55 = vunpack.c.1.s8 %v451_v20 }
 0x12e   :  { %1887 = vmatpush.bf16.msra.mxu1 %v1651_v47  ;;  %v1779_v59 = vpack.c.bf16 %v1491_v50, %v1483_v48  ;;  %v1091_v60 = vcvt.s32.f32 %v579_v51  ;;  %v827_v44 = vunpack.c.0.s8 %v483_v25  ;;  %v835_v62 = vunpack.c.1.s8 %v483_v25  ;;  %v468_v50 = vld [vmem:[#allocation2 + $0x1d0] sm:$0xff] }
 0x12f   :  { %1900 = vmatpush.bf16.msra.mxu2 %v1715_v52  ;;  %v1211_v63 = vcvt.s32.f32 %v699_v54  ;;  %v1219_v0 = vcvt.s32.f32 %v707_v55  ;;  %v955_v1 = vunpack.c.0.s8 %v515_v31  ;;  %v963_v2 = vunpack.c.1.s8 %v515_v31  ;;  %v500_v55 = vld [vmem:[#allocation2 + $0x2d0] sm:$0xff] }
 0x130   :  { %1913 = vmatpush.bf16.msra.mxu3 %v1779_v59  ;;  %v1579_v4 = vpack.c.bf16 %v1091_v60, %v1083_v53  ;;  %v1339_v5 = vcvt.s32.f32 %v827_v44  ;;  %v1347_v6 = vcvt.s32.f32 %v835_v62  ;;  %v555_v7 = vunpack.c.2.s8 %v411_v57  ;;  %v532_v62 = vld [vmem:[#allocation2 + $0x3d0] sm:$0xff] }
 0x131   :  { %v1643_v10 = vpack.c.bf16 %v1219_v0, %v1211_v63  ;;  %v1467_v12 = vcvt.s32.f32 %v955_v1  ;;  %v1475_v13 = vcvt.s32.f32 %v963_v2  ;;  %v563_v14 = vunpack.c.3.s8 %v411_v57 }
 0x132   :  { %1875 = vmatpush.bf16.msra.mxu0 %v1579_v4  ;;  %v1707_v16 = vpack.c.bf16 %v1347_v6, %v1339_v5  ;;  %v1067_v17 = vcvt.s32.f32 %v555_v7  ;;  %v683_v18 = vunpack.c.2.s8 %v443_v3  ;;  %v691_v19 = vunpack.c.3.s8 %v443_v3 }
 0x133   :  { %1888 = vmatpush.bf16.msra.mxu1 %v1643_v10  ;;  %v1771_v20 = vpack.c.bf16 %v1475_v13, %v1467_v12  ;;  %v1075_v21 = vcvt.s32.f32 %v563_v14  ;;  %v811_v22 = vunpack.c.2.s8 %v475_v8  ;;  %v819_v23 = vunpack.c.3.s8 %v475_v8 }
 0x134   :  { %1901 = vmatpush.bf16.msra.mxu2 %v1707_v16  ;;  %v1195_v24 = vcvt.s32.f32 %v683_v18  ;;  %v1203_v25 = vcvt.s32.f32 %v691_v19  ;;  %v939_v26 = vunpack.c.2.s8 %v507_v15  ;;  %v947_v27 = vunpack.c.3.s8 %v507_v15 }
 0x135   :  { %1914 = vmatpush.bf16.msra.mxu3 %v1771_v20  ;;  %v1571_v28 = vpack.c.bf16 %v1075_v21, %v1067_v17  ;;  %v1323_v29 = vcvt.s32.f32 %v811_v22  ;;  %v1331_v31 = vcvt.s32.f32 %v819_v23  ;;  %v539_v33 = vunpack.c.0.s8 %v411_v57 }
 0x136   :  { %v1635_v34 = vpack.c.bf16 %v1203_v25, %v1195_v24  ;;  %v1451_v35 = vcvt.s32.f32 %v939_v26  ;;  %v1459_v36 = vcvt.s32.f32 %v947_v27  ;;  %v547_v37 = vunpack.c.1.s8 %v411_v57  ;;  %v428_v25 = vld [vmem:[#allocation2 + $0x90] sm:$0xff] }
 0x137   :  { %1876 = vmatpush.bf16.msra.mxu0 %v1571_v28  ;;  %v1699_v38 = vpack.c.bf16 %v1331_v31, %v1323_v29  ;;  %v1051_v39 = vcvt.s32.f32 %v539_v33  ;;  %v667_v40 = vunpack.c.0.s8 %v443_v3  ;;  %v675_v42 = vunpack.c.1.s8 %v443_v3 }
 0x138   :  { %1889 = vmatpush.bf16.msra.mxu1 %v1635_v34  ;;  %v1763_v45 = vpack.c.bf16 %v1459_v36, %v1451_v35  ;;  %v1059_v46 = vcvt.s32.f32 %v547_v37  ;;  %v795_v58 = vunpack.c.0.s8 %v475_v8  ;;  %v803_v9 = vunpack.c.1.s8 %v475_v8  ;;  %v460_v36 = vld [vmem:[#allocation2 + $0x190] sm:$0xff] }
 0x139   :  { %1902 = vmatpush.bf16.msra.mxu2 %v1699_v38  ;;  %v1179_v11 = vcvt.s32.f32 %v667_v40  ;;  %v1187_v56 = vcvt.s32.f32 %v675_v42  ;;  %v923_v47 = vunpack.c.0.s8 %v507_v15  ;;  %v931_v48 = vunpack.c.1.s8 %v507_v15  ;;  %v492_v42 = vld [vmem:[#allocation2 + $0x290] sm:$0xff] }
 0x13a   :  { %1915 = vmatpush.bf16.msra.mxu3 %v1763_v45  ;;  %v1563_v51 = vpack.c.bf16 %v1059_v46, %v1051_v39  ;;  %v1307_v52 = vcvt.s32.f32 %v795_v58  ;;  %v1315_v53 = vcvt.s32.f32 %v803_v9  ;;  %v652_v54 = vunpack.c.2.s8 %v436_v43  ;;  %v524_v9 = vld [vmem:[#allocation2 + $0x390] sm:$0xff] }
 0x13b   :  { %v1627_v57 = vpack.c.bf16 %v1187_v56, %v1179_v11  ;;  %v1435_v59 = vcvt.s32.f32 %v923_v47  ;;  %v1443_v60 = vcvt.s32.f32 %v931_v48  ;;  %v660_v44 = vunpack.c.3.s8 %v436_v43 }
 0x13c   :  { %1877 = vmatpush.bf16.msra.mxu0 %v1563_v51  ;;  %v1691_v63 = vpack.c.bf16 %v1315_v53, %v1307_v52  ;;  %v1164_v0 = vcvt.s32.f32 %v652_v54  ;;  %v780_v1 = vunpack.c.2.s8 %v468_v50  ;;  %v788_v2 = vunpack.c.3.s8 %v468_v50 }
 0x13d   :  { %1890 = vmatpush.bf16.msra.mxu1 %v1627_v57  ;;  %v1755_v3 = vpack.c.bf16 %v1443_v60, %v1435_v59  ;;  %v1172_v4 = vcvt.s32.f32 %v660_v44  ;;  %v908_v5 = vunpack.c.2.s8 %v500_v55  ;;  %v916_v6 = vunpack.c.3.s8 %v500_v55 }
 0x13e   :  { %1903 = vmatpush.bf16.msra.mxu2 %v1691_v63  ;;  %v1292_v7 = vcvt.s32.f32 %v780_v1  ;;  %v1300_v8 = vcvt.s32.f32 %v788_v2  ;;  %v1036_v10 = vunpack.c.2.s8 %v532_v62  ;;  %v1044_v12 = vunpack.c.3.s8 %v532_v62 }
 0x13f   :  { %1916 = vmatpush.bf16.msra.mxu3 %v1755_v3  ;;  %v1620_v13 = vpack.c.bf16 %v1172_v4, %v1164_v0  ;;  %v1420_v14 = vcvt.s32.f32 %v908_v5  ;;  %v1428_v15 = vcvt.s32.f32 %v916_v6  ;;  %v636_v16 = vunpack.c.0.s8 %v436_v43  ;;  %1878 = vmatmul.bf16.vlgmr.msra.gmra.mxu0 %v9373_v61 }
 0x140   :  { %v1684_v17 = vpack.c.bf16 %v1300_v8, %v1292_v7  ;;  %v1548_v18 = vcvt.s32.f32 %v1036_v10  ;;  %v1556_v19 = vcvt.s32.f32 %v1044_v12  ;;  %v644_v20 = vunpack.c.1.s8 %v436_v43  ;;  %1891 = vmatmul.bf16.vlgmr.msra.gmra.mxu1 %v9375_v30  ;;  %v420_v8 = vld [vmem:[#allocation2 + $0x50] sm:$0xff] }
 0x141   :  { %1922 = vmatpush.bf16.msrb.mxu0 %v1620_v13  ;;  %v1748_v21 = vpack.c.bf16 %v1428_v15, %v1420_v14  ;;  %1904 = vmatmul.bf16.vlgmr.msra.gmra.mxu2 %v9377_v32  ;;  %v1148_v22 = vcvt.s32.f32 %v636_v16  ;;  %v764_v23 = vunpack.c.0.s8 %v468_v50  ;;  %v772_v24 = vunpack.c.1.s8 %v468_v50 }
 0x142   :  { %1935 = vmatpush.bf16.msrb.mxu1 %v1684_v17  ;;  %v1812_v26 = vpack.c.bf16 %v1556_v19, %v1548_v18  ;;  %1917 = vmatmul.bf16.vlgmr.msra.gmra.mxu3 %v9379_v41  ;;  %v1156_v27 = vcvt.s32.f32 %v644_v20  ;;  %v892_v28 = vunpack.c.0.s8 %v500_v55  ;;  %v900_v29 = vunpack.c.1.s8 %v500_v55  ;;  %v452_v19 = vld [vmem:[#allocation2 + $0x150] sm:$0xff] }
 0x143   :  { %1948 = vmatpush.bf16.msrb.mxu2 %v1748_v21  ;;  %v1276_v31 = vcvt.s32.f32 %v764_v23  ;;  %v1284_v33 = vcvt.s32.f32 %v772_v24  ;;  %v1020_v34 = vunpack.c.0.s8 %v532_v62  ;;  %v1028_v35 = vunpack.c.1.s8 %v532_v62  ;;  %v484_v24 = vld [vmem:[#allocation2 + $0x250] sm:$0xff] }
 0x144   :  { %1961 = vmatpush.bf16.msrb.mxu3 %v1812_v26  ;;  %v1612_v37 = vpack.c.bf16 %v1156_v27, %v1148_v22  ;;  %v1404_v38 = vcvt.s32.f32 %v892_v28  ;;  %v1412_v39 = vcvt.s32.f32 %v900_v29  ;;  %v620_v40 = vunpack.c.2.s8 %v428_v25  ;;  %v516_v29 = vld [vmem:[#allocation2 + $0x350] sm:$0xff] }
 0x145   :  { %v1676_v43 = vpack.c.bf16 %v1284_v33, %v1276_v31  ;;  %v1532_v45 = vcvt.s32.f32 %v1020_v34  ;;  %v1540_v46 = vcvt.s32.f32 %v1028_v35  ;;  %v628_v58 = vunpack.c.3.s8 %v428_v25 }
 0x146   :  { %1923 = vmatpush.bf16.msrb.mxu0 %v1612_v37  ;;  %v1740_v11 = vpack.c.bf16 %v1412_v39, %v1404_v38  ;;  %v1132_v56 = vcvt.s32.f32 %v620_v40  ;;  %v748_v47 = vunpack.c.2.s8 %v460_v36  ;;  %v756_v48 = vunpack.c.3.s8 %v460_v36 }
 0x147   :  { %1936 = vmatpush.bf16.msrb.mxu1 %v1676_v43  ;;  %v1804_v50 = vpack.c.bf16 %v1540_v46, %v1532_v45  ;;  %v1140_v51 = vcvt.s32.f32 %v628_v58  ;;  %v876_v52 = vunpack.c.2.s8 %v492_v42  ;;  %v884_v53 = vunpack.c.3.s8 %v492_v42 }
 0x148   :  { %1949 = vmatpush.bf16.msrb.mxu2 %v1740_v11  ;;  %v1260_v54 = vcvt.s32.f32 %v748_v47  ;;  %v1268_v55 = vcvt.s32.f32 %v756_v48  ;;  %v1004_v57 = vunpack.c.2.s8 %v524_v9  ;;  %v1012_v59 = vunpack.c.3.s8 %v524_v9 }
 0x149   :  { %1962 = vmatpush.bf16.msrb.mxu3 %v1804_v50  ;;  %v1604_v60 = vpack.c.bf16 %v1140_v51, %v1132_v56  ;;  %v1388_v44 = vcvt.s32.f32 %v876_v52  ;;  %v1396_v62 = vcvt.s32.f32 %v884_v53  ;;  %v604_v63 = vunpack.c.0.s8 %v428_v25 }
 0x14a   :  { %v1668_v0 = vpack.c.bf16 %v1268_v55, %v1260_v54  ;;  %v1516_v1 = vcvt.s32.f32 %v1004_v57  ;;  %v1524_v2 = vcvt.s32.f32 %v1012_v59  ;;  %v612_v3 = vunpack.c.1.s8 %v428_v25  ;;  %v412_v55 = vld [vmem:[#allocation2 + $0x10] sm:$0xff] }
 0x14b   :  { %1924 = vmatpush.bf16.msrb.mxu0 %v1604_v60  ;;  %v1732_v4 = vpack.c.bf16 %v1396_v62, %v1388_v44  ;;  %v1116_v5 = vcvt.s32.f32 %v604_v63  ;;  %v732_v6 = vunpack.c.0.s8 %v460_v36  ;;  %v740_v7 = vunpack.c.1.s8 %v460_v36 }
 0x14c   :  { %1937 = vmatpush.bf16.msrb.mxu1 %v1668_v0  ;;  %v1796_v10 = vpack.c.bf16 %v1524_v2, %v1516_v1  ;;  %v1124_v12 = vcvt.s32.f32 %v612_v3  ;;  %v860_v13 = vunpack.c.0.s8 %v492_v42  ;;  %v868_v14 = vunpack.c.1.s8 %v492_v42  ;;  %v444_v2 = vld [vmem:[#allocation2 + $0x110] sm:$0xff] }
 0x14d   :  { %1950 = vmatpush.bf16.msrb.mxu2 %v1732_v4  ;;  %v1244_v15 = vcvt.s32.f32 %v732_v6  ;;  %v1252_v16 = vcvt.s32.f32 %v740_v7  ;;  %v988_v17 = vunpack.c.0.s8 %v524_v9  ;;  %v996_v18 = vunpack.c.1.s8 %v524_v9  ;;  %v476_v7 = vld [vmem:[#allocation2 + $0x210] sm:$0xff] }
 0x14e   :  { %1963 = vmatpush.bf16.msrb.mxu3 %v1796_v10  ;;  %v1596_v20 = vpack.c.bf16 %v1124_v12, %v1116_v5  ;;  %v1372_v21 = vcvt.s32.f32 %v860_v13  ;;  %v1380_v22 = vcvt.s32.f32 %v868_v14  ;;  %v588_v23 = vunpack.c.2.s8 %v420_v8  ;;  %v508_v14 = vld [vmem:[#allocation2 + $0x310] sm:$0xff] }
 0x14f   :  { %v1660_v25 = vpack.c.bf16 %v1252_v16, %v1244_v15  ;;  %v1500_v26 = vcvt.s32.f32 %v988_v17  ;;  %v1508_v27 = vcvt.s32.f32 %v996_v18  ;;  %v596_v28 = vunpack.c.3.s8 %v420_v8 }
 0x150   :  { %1925 = vmatpush.bf16.msrb.mxu0 %v1596_v20  ;;  %v1724_v31 = vpack.c.bf16 %v1380_v22, %v1372_v21  ;;  %v1100_v33 = vcvt.s32.f32 %v588_v23  ;;  %v716_v34 = vunpack.c.2.s8 %v452_v19  ;;  %v724_v35 = vunpack.c.3.s8 %v452_v19 }
 0x151   :  { %1938 = vmatpush.bf16.msrb.mxu1 %v1660_v25  ;;  %v1788_v36 = vpack.c.bf16 %v1508_v27, %v1500_v26  ;;  %v1108_v37 = vcvt.s32.f32 %v596_v28  ;;  %v844_v38 = vunpack.c.2.s8 %v484_v24  ;;  %v852_v39 = vunpack.c.3.s8 %v484_v24 }
 0x152   :  { %1951 = vmatpush.bf16.msrb.mxu2 %v1724_v31  ;;  %v1228_v40 = vcvt.s32.f32 %v716_v34  ;;  %v1236_v42 = vcvt.s32.f32 %v724_v35  ;;  %v972_v43 = vunpack.c.2.s8 %v516_v29  ;;  %v980_v45 = vunpack.c.3.s8 %v516_v29 }
 0x153   :  { %1964 = vmatpush.bf16.msrb.mxu3 %v1788_v36  ;;  %v1588_v46 = vpack.c.bf16 %v1108_v37, %v1100_v33  ;;  %v1356_v58 = vcvt.s32.f32 %v844_v38  ;;  %v1364_v9 = vcvt.s32.f32 %v852_v39  ;;  %v572_v11 = vunpack.c.0.s8 %v420_v8 }
 0x154   :  { %v1652_v56 = vpack.c.bf16 %v1236_v42, %v1228_v40  ;;  %v1484_v47 = vcvt.s32.f32 %v972_v43  ;;  %v1492_v48 = vcvt.s32.f32 %v980_v45  ;;  %v580_v50 = vunpack.c.1.s8 %v420_v8  ;;  %v437_v42 = vld [vmem:[#allocation2 + $0xd8] sm:$0xff] }
 0x155   :  { %1926 = vmatpush.bf16.msrb.mxu0 %v1588_v46  ;;  %v1716_v51 = vpack.c.bf16 %v1364_v9, %v1356_v58  ;;  %v1084_v52 = vcvt.s32.f32 %v572_v11  ;;  %v700_v53 = vunpack.c.0.s8 %v452_v19  ;;  %v708_v54 = vunpack.c.1.s8 %v452_v19 }
 0x156   :  { %1939 = vmatpush.bf16.msrb.mxu1 %v1652_v56  ;;  %v1780_v57 = vpack.c.bf16 %v1492_v48, %v1484_v47  ;;  %v1092_v59 = vcvt.s32.f32 %v580_v50  ;;  %v828_v60 = vunpack.c.0.s8 %v484_v24  ;;  %v836_v44 = vunpack.c.1.s8 %v484_v24  ;;  %v469_v48 = vld [vmem:[#allocation2 + $0x1d8] sm:$0xff] }
 0x157   :  { %1952 = vmatpush.bf16.msrb.mxu2 %v1716_v51  ;;  %v1212_v62 = vcvt.s32.f32 %v700_v53  ;;  %v1220_v63 = vcvt.s32.f32 %v708_v54  ;;  %v956_v0 = vunpack.c.0.s8 %v516_v29  ;;  %v964_v1 = vunpack.c.1.s8 %v516_v29  ;;  %v501_v54 = vld [vmem:[#allocation2 + $0x2d8] sm:$0xff] }
 0x158   :  { %1965 = vmatpush.bf16.msrb.mxu3 %v1780_v57  ;;  %v1580_v3 = vpack.c.bf16 %v1092_v59, %v1084_v52  ;;  %v1340_v4 = vcvt.s32.f32 %v828_v60  ;;  %v1348_v5 = vcvt.s32.f32 %v836_v44  ;;  %v556_v6 = vunpack.c.2.s8 %v412_v55  ;;  %v533_v44 = vld [vmem:[#allocation2 + $0x3d8] sm:$0xff] }
 0x159   :  { %v1644_v8 = vpack.c.bf16 %v1220_v63, %v1212_v62  ;;  %v1468_v10 = vcvt.s32.f32 %v956_v0  ;;  %v1476_v12 = vcvt.s32.f32 %v964_v1  ;;  %v564_v13 = vunpack.c.3.s8 %v412_v55 }
 0x15a   :  { %1927 = vmatpush.bf16.msrb.mxu0 %v1580_v3  ;;  %v1708_v15 = vpack.c.bf16 %v1348_v5, %v1340_v4  ;;  %v1068_v16 = vcvt.s32.f32 %v556_v6  ;;  %v684_v17 = vunpack.c.2.s8 %v444_v2  ;;  %v692_v18 = vunpack.c.3.s8 %v444_v2 }
 0x15b   :  { %1940 = vmatpush.bf16.msrb.mxu1 %v1644_v8  ;;  %v1772_v19 = vpack.c.bf16 %v1476_v12, %v1468_v10  ;;  %v1076_v20 = vcvt.s32.f32 %v564_v13  ;;  %v812_v21 = vunpack.c.2.s8 %v476_v7  ;;  %v820_v22 = vunpack.c.3.s8 %v476_v7 }
 0x15c   :  { %1953 = vmatpush.bf16.msrb.mxu2 %v1708_v15  ;;  %v1196_v23 = vcvt.s32.f32 %v684_v17  ;;  %v1204_v24 = vcvt.s32.f32 %v692_v18  ;;  %v940_v25 = vunpack.c.2.s8 %v508_v14  ;;  %v948_v26 = vunpack.c.3.s8 %v508_v14 }
 0x15d   :  { %1966 = vmatpush.bf16.msrb.mxu3 %v1772_v19  ;;  %v1572_v27 = vpack.c.bf16 %v1076_v20, %v1068_v16  ;;  %v1324_v28 = vcvt.s32.f32 %v812_v21  ;;  %v1332_v29 = vcvt.s32.f32 %v820_v22  ;;  %v540_v31 = vunpack.c.0.s8 %v412_v55 }
 0x15e   :  { %v1636_v33 = vpack.c.bf16 %v1204_v24, %v1196_v23  ;;  %v1452_v34 = vcvt.s32.f32 %v940_v25  ;;  %v1460_v35 = vcvt.s32.f32 %v948_v26  ;;  %v548_v36 = vunpack.c.1.s8 %v412_v55  ;;  %v429_v24 = vld [vmem:[#allocation2 + $0x98] sm:$0xff] }
 0x15f   :  { %1928 = vmatpush.bf16.msrb.mxu0 %v1572_v27  ;;  %v1700_v37 = vpack.c.bf16 %v1332_v29, %v1324_v28  ;;  %v1052_v38 = vcvt.s32.f32 %v540_v31  ;;  %v668_v39 = vunpack.c.0.s8 %v444_v2  ;;  %v676_v40 = vunpack.c.1.s8 %v444_v2 }
 0x160   :  { %1941 = vmatpush.bf16.msrb.mxu1 %v1636_v33  ;;  %v1764_v43 = vpack.c.bf16 %v1460_v35, %v1452_v34  ;;  %v1060_v45 = vcvt.s32.f32 %v548_v36  ;;  %v796_v46 = vunpack.c.0.s8 %v476_v7  ;;  %v804_v58 = vunpack.c.1.s8 %v476_v7  ;;  %v461_v35 = vld [vmem:[#allocation2 + $0x198] sm:$0xff] }
 0x161   :  { %1954 = vmatpush.bf16.msrb.mxu2 %v1700_v37  ;;  %v1180_v9 = vcvt.s32.f32 %v668_v39  ;;  %v1188_v11 = vcvt.s32.f32 %v676_v40  ;;  %v924_v56 = vunpack.c.0.s8 %v508_v14  ;;  %v932_v47 = vunpack.c.1.s8 %v508_v14  ;;  %v493_v40 = vld [vmem:[#allocation2 + $0x298] sm:$0xff] }
 0x162   :  { %1967 = vmatpush.bf16.msrb.mxu3 %v1764_v43  ;;  %v1564_v50 = vpack.c.bf16 %v1060_v45, %v1052_v38  ;;  %v1308_v51 = vcvt.s32.f32 %v796_v46  ;;  %v1316_v52 = vcvt.s32.f32 %v804_v58  ;;  %v653_v53 = vunpack.c.2.s8 %v437_v42  ;;  %v525_v58 = vld [vmem:[#allocation2 + $0x398] sm:$0xff] }
 0x163   :  { %v1628_v55 = vpack.c.bf16 %v1188_v11, %v1180_v9  ;;  %v1436_v57 = vcvt.s32.f32 %v924_v56  ;;  %v1444_v59 = vcvt.s32.f32 %v932_v47  ;;  %v661_v60 = vunpack.c.3.s8 %v437_v42 }
 0x164   :  { %1929 = vmatpush.bf16.msrb.mxu0 %v1564_v50  ;;  %v1692_v62 = vpack.c.bf16 %v1316_v52, %v1308_v51  ;;  %v1165_v63 = vcvt.s32.f32 %v653_v53  ;;  %v781_v0 = vunpack.c.2.s8 %v469_v48  ;;  %v789_v1 = vunpack.c.3.s8 %v469_v48 }
 0x165   :  { %1942 = vmatpush.bf16.msrb.mxu1 %v1628_v55  ;;  %v1756_v2 = vpack.c.bf16 %v1444_v59, %v1436_v57  ;;  %v1173_v3 = vcvt.s32.f32 %v661_v60  ;;  %v909_v4 = vunpack.c.2.s8 %v501_v54  ;;  %v917_v5 = vunpack.c.3.s8 %v501_v54 }
 0x166   :  { %1955 = vmatpush.bf16.msrb.mxu2 %v1692_v62  ;;  %v1293_v6 = vcvt.s32.f32 %v781_v0  ;;  %v1301_v7 = vcvt.s32.f32 %v789_v1  ;;  %v1037_v8 = vunpack.c.2.s8 %v533_v44  ;;  %v1045_v10 = vunpack.c.3.s8 %v533_v44 }
 0x167   :  { %1968 = vmatpush.bf16.msrb.mxu3 %v1756_v2  ;;  %v1621_v12 = vpack.c.bf16 %v1173_v3, %v1165_v63  ;;  %v1421_v13 = vcvt.s32.f32 %v909_v4  ;;  %v1429_v14 = vcvt.s32.f32 %v917_v5  ;;  %v637_v15 = vunpack.c.0.s8 %v437_v42  ;;  %1930 = vmatmul.bf16.vlgmr.msrb.gmra.mxu0 %v9373_v61 }
 0x168   :  { %v1685_v16 = vpack.c.bf16 %v1301_v7, %v1293_v6  ;;  %v1549_v17 = vcvt.s32.f32 %v1037_v8  ;;  %v1557_v18 = vcvt.s32.f32 %v1045_v10  ;;  %v645_v19 = vunpack.c.1.s8 %v437_v42  ;;  %1943 = vmatmul.bf16.vlgmr.msrb.gmra.mxu1 %v9375_v30  ;;  %v421_v7 = vld [vmem:[#allocation2 + $0x58] sm:$0xff] }
 0x169   :  { %1974 = vmatpush.bf16.msra.mxu0 %v1621_v12  ;;  %v1749_v20 = vpack.c.bf16 %v1429_v14, %v1421_v13  ;;  %1956 = vmatmul.bf16.vlgmr.msrb.gmra.mxu2 %v9377_v32  ;;  %v1149_v21 = vcvt.s32.f32 %v637_v15  ;;  %v765_v22 = vunpack.c.0.s8 %v469_v48  ;;  %v773_v23 = vunpack.c.1.s8 %v469_v48 }
 0x16a   :  { %1987 = vmatpush.bf16.msra.mxu1 %v1685_v16  ;;  %v1813_v25 = vpack.c.bf16 %v1557_v18, %v1549_v17  ;;  %1969 = vmatmul.bf16.vlgmr.msrb.gmra.mxu3 %v9379_v41  ;;  %v1157_v26 = vcvt.s32.f32 %v645_v19  ;;  %v893_v27 = vunpack.c.0.s8 %v501_v54  ;;  %v901_v28 = vunpack.c.1.s8 %v501_v54  ;;  %v453_v18 = vld [vmem:[#allocation2 + $0x158] sm:$0xff] }
 0x16b   :  { %2000 = vmatpush.bf16.msra.mxu2 %v1749_v20  ;;  %v1277_v29 = vcvt.s32.f32 %v765_v22  ;;  %v1285_v31 = vcvt.s32.f32 %v773_v23  ;;  %v1021_v33 = vunpack.c.0.s8 %v533_v44  ;;  %v1029_v34 = vunpack.c.1.s8 %v533_v44  ;;  %v485_v23 = vld [vmem:[#allocation2 + $0x258] sm:$0xff] }
 0x16c   :  { %2013 = vmatpush.bf16.msra.mxu3 %v1813_v25  ;;  %v1613_v36 = vpack.c.bf16 %v1157_v26, %v1149_v21  ;;  %v1405_v37 = vcvt.s32.f32 %v893_v27  ;;  %v1413_v38 = vcvt.s32.f32 %v901_v28  ;;  %v621_v39 = vunpack.c.2.s8 %v429_v24  ;;  %v517_v28 = vld [vmem:[#allocation2 + $0x358] sm:$0xff] }
 0x16d   :  { %v1677_v42 = vpack.c.bf16 %v1285_v31, %v1277_v29  ;;  %v1533_v43 = vcvt.s32.f32 %v1021_v33  ;;  %v1541_v45 = vcvt.s32.f32 %v1029_v34  ;;  %v629_v46 = vunpack.c.3.s8 %v429_v24 }
 0x16e   :  { %1975 = vmatpush.bf16.msra.mxu0 %v1613_v36  ;;  %v1741_v9 = vpack.c.bf16 %v1413_v38, %v1405_v37  ;;  %v1133_v11 = vcvt.s32.f32 %v621_v39  ;;  %v749_v56 = vunpack.c.2.s8 %v461_v35  ;;  %v757_v47 = vunpack.c.3.s8 %v461_v35 }
 0x16f   :  { %1988 = vmatpush.bf16.msra.mxu1 %v1677_v42  ;;  %v1805_v48 = vpack.c.bf16 %v1541_v45, %v1533_v43  ;;  %v1141_v50 = vcvt.s32.f32 %v629_v46  ;;  %v877_v51 = vunpack.c.2.s8 %v493_v40  ;;  %v885_v52 = vunpack.c.3.s8 %v493_v40 }
 0x170   :  { %2001 = vmatpush.bf16.msra.mxu2 %v1741_v9  ;;  %v1261_v53 = vcvt.s32.f32 %v749_v56  ;;  %v1269_v54 = vcvt.s32.f32 %v757_v47  ;;  %v1005_v55 = vunpack.c.2.s8 %v525_v58  ;;  %v1013_v57 = vunpack.c.3.s8 %v525_v58 }
 0x171   :  { %2014 = vmatpush.bf16.msra.mxu3 %v1805_v48  ;;  %v1605_v59 = vpack.c.bf16 %v1141_v50, %v1133_v11  ;;  %v1389_v60 = vcvt.s32.f32 %v877_v51  ;;  %v1397_v44 = vcvt.s32.f32 %v885_v52  ;;  %v605_v62 = vunpack.c.0.s8 %v429_v24 }
 0x172   :  { %v1669_v63 = vpack.c.bf16 %v1269_v54, %v1261_v53  ;;  %v1517_v0 = vcvt.s32.f32 %v1005_v55  ;;  %v1525_v1 = vcvt.s32.f32 %v1013_v57  ;;  %v613_v2 = vunpack.c.1.s8 %v429_v24  ;;  %v413_v54 = vld [vmem:[#allocation2 + $0x18] sm:$0xff] }
 0x173   :  { %1976 = vmatpush.bf16.msra.mxu0 %v1605_v59  ;;  %v1733_v3 = vpack.c.bf16 %v1397_v44, %v1389_v60  ;;  %v1117_v4 = vcvt.s32.f32 %v605_v62  ;;  %v733_v5 = vunpack.c.0.s8 %v461_v35  ;;  %v741_v6 = vunpack.c.1.s8 %v461_v35 }
 0x174   :  { %1989 = vmatpush.bf16.msra.mxu1 %v1669_v63  ;;  %v1797_v8 = vpack.c.bf16 %v1525_v1, %v1517_v0  ;;  %v1125_v10 = vcvt.s32.f32 %v613_v2  ;;  %v861_v12 = vunpack.c.0.s8 %v493_v40  ;;  %v869_v13 = vunpack.c.1.s8 %v493_v40  ;;  %v445_v1 = vld [vmem:[#allocation2 + $0x118] sm:$0xff] }
 0x175   :  { %2002 = vmatpush.bf16.msra.mxu2 %v1733_v3  ;;  %v1245_v14 = vcvt.s32.f32 %v733_v5  ;;  %v1253_v15 = vcvt.s32.f32 %v741_v6  ;;  %v989_v16 = vunpack.c.0.s8 %v525_v58  ;;  %v997_v17 = vunpack.c.1.s8 %v525_v58  ;;  %v477_v6 = vld [vmem:[#allocation2 + $0x218] sm:$0xff] }
 0x176   :  { %2015 = vmatpush.bf16.msra.mxu3 %v1797_v8  ;;  %v1597_v19 = vpack.c.bf16 %v1125_v10, %v1117_v4  ;;  %v1373_v20 = vcvt.s32.f32 %v861_v12  ;;  %v1381_v21 = vcvt.s32.f32 %v869_v13  ;;  %v589_v22 = vunpack.c.2.s8 %v421_v7  ;;  %v509_v13 = vld [vmem:[#allocation2 + $0x318] sm:$0xff] }
 0x177   :  { %v1661_v24 = vpack.c.bf16 %v1253_v15, %v1245_v14  ;;  %v1501_v25 = vcvt.s32.f32 %v989_v16  ;;  %v1509_v26 = vcvt.s32.f32 %v997_v17  ;;  %v597_v27 = vunpack.c.3.s8 %v421_v7 }
 0x178   :  { %1977 = vmatpush.bf16.msra.mxu0 %v1597_v19  ;;  %v1725_v29 = vpack.c.bf16 %v1381_v21, %v1373_v20  ;;  %v1101_v31 = vcvt.s32.f32 %v589_v22  ;;  %v717_v33 = vunpack.c.2.s8 %v453_v18  ;;  %v725_v34 = vunpack.c.3.s8 %v453_v18 }
 0x179   :  { %1990 = vmatpush.bf16.msra.mxu1 %v1661_v24  ;;  %v1789_v35 = vpack.c.bf16 %v1509_v26, %v1501_v25  ;;  %v1109_v36 = vcvt.s32.f32 %v597_v27  ;;  %v845_v37 = vunpack.c.2.s8 %v485_v23  ;;  %v853_v38 = vunpack.c.3.s8 %v485_v23 }
 0x17a   :  { %2003 = vmatpush.bf16.msra.mxu2 %v1725_v29  ;;  %v1229_v39 = vcvt.s32.f32 %v717_v33  ;;  %v1237_v40 = vcvt.s32.f32 %v725_v34  ;;  %v973_v42 = vunpack.c.2.s8 %v517_v28  ;;  %v981_v43 = vunpack.c.3.s8 %v517_v28 }
 0x17b   :  { %2016 = vmatpush.bf16.msra.mxu3 %v1789_v35  ;;  %v1589_v45 = vpack.c.bf16 %v1109_v36, %v1101_v31  ;;  %v1357_v46 = vcvt.s32.f32 %v845_v37  ;;  %v1365_v58 = vcvt.s32.f32 %v853_v38  ;;  %v573_v9 = vunpack.c.0.s8 %v421_v7 }
 0x17c   :  { %v1653_v11 = vpack.c.bf16 %v1237_v40, %v1229_v39  ;;  %v1485_v56 = vcvt.s32.f32 %v973_v42  ;;  %v1493_v47 = vcvt.s32.f32 %v981_v43  ;;  %v581_v48 = vunpack.c.1.s8 %v421_v7  ;;  %v438_v40 = vld [vmem:[#allocation2 + $0xe0] sm:$0xff] }
 0x17d   :  { %1978 = vmatpush.bf16.msra.mxu0 %v1589_v45  ;;  %v1717_v50 = vpack.c.bf16 %v1365_v58, %v1357_v46  ;;  %v1085_v51 = vcvt.s32.f32 %v573_v9  ;;  %v701_v52 = vunpack.c.0.s8 %v453_v18  ;;  %v709_v53 = vunpack.c.1.s8 %v453_v18 }
 0x17e   :  { %1991 = vmatpush.bf16.msra.mxu1 %v1653_v11  ;;  %v1781_v55 = vpack.c.bf16 %v1493_v47, %v1485_v56  ;;  %v1093_v57 = vcvt.s32.f32 %v581_v48  ;;  %v829_v59 = vunpack.c.0.s8 %v485_v23  ;;  %v837_v60 = vunpack.c.1.s8 %v485_v23  ;;  %v470_v47 = vld [vmem:[#allocation2 + $0x1e0] sm:$0xff] }
 0x17f   :  { %2004 = vmatpush.bf16.msra.mxu2 %v1717_v50  ;;  %v1213_v44 = vcvt.s32.f32 %v701_v52  ;;  %v1221_v62 = vcvt.s32.f32 %v709_v53  ;;  %v957_v63 = vunpack.c.0.s8 %v517_v28  ;;  %v965_v0 = vunpack.c.1.s8 %v517_v28  ;;  %v502_v53 = vld [vmem:[#allocation2 + $0x2e0] sm:$0xff] }
 0x180   :  { %2017 = vmatpush.bf16.msra.mxu3 %v1781_v55  ;;  %v1581_v2 = vpack.c.bf16 %v1093_v57, %v1085_v51  ;;  %v1341_v3 = vcvt.s32.f32 %v829_v59  ;;  %v1349_v4 = vcvt.s32.f32 %v837_v60  ;;  %v557_v5 = vunpack.c.2.s8 %v413_v54  ;;  %v534_v60 = vld [vmem:[#allocation2 + $0x3e0] sm:$0xff] }
 0x181   :  { %v1645_v7 = vpack.c.bf16 %v1221_v62, %v1213_v44  ;;  %v1469_v8 = vcvt.s32.f32 %v957_v63  ;;  %v1477_v10 = vcvt.s32.f32 %v965_v0  ;;  %v565_v12 = vunpack.c.3.s8 %v413_v54 }
 0x182   :  { %1979 = vmatpush.bf16.msra.mxu0 %v1581_v2  ;;  %v1709_v14 = vpack.c.bf16 %v1349_v4, %v1341_v3  ;;  %v1069_v15 = vcvt.s32.f32 %v557_v5  ;;  %v685_v16 = vunpack.c.2.s8 %v445_v1  ;;  %v693_v17 = vunpack.c.3.s8 %v445_v1 }
 0x183   :  { %1992 = vmatpush.bf16.msra.mxu1 %v1645_v7  ;;  %v1773_v18 = vpack.c.bf16 %v1477_v10, %v1469_v8  ;;  %v1077_v19 = vcvt.s32.f32 %v565_v12  ;;  %v813_v20 = vunpack.c.2.s8 %v477_v6  ;;  %v821_v21 = vunpack.c.3.s8 %v477_v6 }
 0x184   :  { %2005 = vmatpush.bf16.msra.mxu2 %v1709_v14  ;;  %v1197_v22 = vcvt.s32.f32 %v685_v16  ;;  %v1205_v23 = vcvt.s32.f32 %v693_v17  ;;  %v941_v24 = vunpack.c.2.s8 %v509_v13  ;;  %v949_v25 = vunpack.c.3.s8 %v509_v13 }
 0x185   :  { %2018 = vmatpush.bf16.msra.mxu3 %v1773_v18  ;;  %v1573_v26 = vpack.c.bf16 %v1077_v19, %v1069_v15  ;;  %v1325_v27 = vcvt.s32.f32 %v813_v20  ;;  %v1333_v28 = vcvt.s32.f32 %v821_v21  ;;  %v541_v29 = vunpack.c.0.s8 %v413_v54 }
 0x186   :  { %v1637_v31 = vpack.c.bf16 %v1205_v23, %v1197_v22  ;;  %v1453_v33 = vcvt.s32.f32 %v941_v24  ;;  %v1461_v34 = vcvt.s32.f32 %v949_v25  ;;  %v549_v35 = vunpack.c.1.s8 %v413_v54  ;;  %v430_v23 = vld [vmem:[#allocation2 + $0xa0] sm:$0xff] }
 0x187   :  { %1980 = vmatpush.bf16.msra.mxu0 %v1573_v26  ;;  %v1701_v36 = vpack.c.bf16 %v1333_v28, %v1325_v27  ;;  %v1053_v37 = vcvt.s32.f32 %v541_v29  ;;  %v669_v38 = vunpack.c.0.s8 %v445_v1  ;;  %v677_v39 = vunpack.c.1.s8 %v445_v1 }
 0x188   :  { %1993 = vmatpush.bf16.msra.mxu1 %v1637_v31  ;;  %v1765_v42 = vpack.c.bf16 %v1461_v34, %v1453_v33  ;;  %v1061_v43 = vcvt.s32.f32 %v549_v35  ;;  %v797_v45 = vunpack.c.0.s8 %v477_v6  ;;  %v805_v46 = vunpack.c.1.s8 %v477_v6  ;;  %v462_v34 = vld [vmem:[#allocation2 + $0x1a0] sm:$0xff] }
 0x189   :  { %2006 = vmatpush.bf16.msra.mxu2 %v1701_v36  ;;  %v1181_v58 = vcvt.s32.f32 %v669_v38  ;;  %v1189_v9 = vcvt.s32.f32 %v677_v39  ;;  %v925_v11 = vunpack.c.0.s8 %v509_v13  ;;  %v933_v56 = vunpack.c.1.s8 %v509_v13  ;;  %v494_v39 = vld [vmem:[#allocation2 + $0x2a0] sm:$0xff] }
 0x18a   :  { %2019 = vmatpush.bf16.msra.mxu3 %v1765_v42  ;;  %v1565_v48 = vpack.c.bf16 %v1061_v43, %v1053_v37  ;;  %v1309_v50 = vcvt.s32.f32 %v797_v45  ;;  %v1317_v51 = vcvt.s32.f32 %v805_v46  ;;  %v654_v52 = vunpack.c.2.s8 %v438_v40  ;;  %v526_v46 = vld [vmem:[#allocation2 + $0x3a0] sm:$0xff] }
 0x18b   :  { %v1629_v54 = vpack.c.bf16 %v1189_v9, %v1181_v58  ;;  %v1437_v55 = vcvt.s32.f32 %v925_v11  ;;  %v1445_v57 = vcvt.s32.f32 %v933_v56  ;;  %v662_v59 = vunpack.c.3.s8 %v438_v40 }
 0x18c   :  { %1981 = vmatpush.bf16.msra.mxu0 %v1565_v48  ;;  %v1693_v44 = vpack.c.bf16 %v1317_v51, %v1309_v50  ;;  %v1166_v62 = vcvt.s32.f32 %v654_v52  ;;  %v782_v63 = vunpack.c.2.s8 %v470_v47  ;;  %v790_v0 = vunpack.c.3.s8 %v470_v47 }
 0x18d   :  { %1994 = vmatpush.bf16.msra.mxu1 %v1629_v54  ;;  %v1757_v1 = vpack.c.bf16 %v1445_v57, %v1437_v55  ;;  %v1174_v2 = vcvt.s32.f32 %v662_v59  ;;  %v910_v3 = vunpack.c.2.s8 %v502_v53  ;;  %v918_v4 = vunpack.c.3.s8 %v502_v53 }
 0x18e   :  { %2007 = vmatpush.bf16.msra.mxu2 %v1693_v44  ;;  %v1294_v5 = vcvt.s32.f32 %v782_v63  ;;  %v1302_v6 = vcvt.s32.f32 %v790_v0  ;;  %v1038_v7 = vunpack.c.2.s8 %v534_v60  ;;  %v1046_v8 = vunpack.c.3.s8 %v534_v60 }
 0x18f   :  { %2020 = vmatpush.bf16.msra.mxu3 %v1757_v1  ;;  %v1622_v10 = vpack.c.bf16 %v1174_v2, %v1166_v62  ;;  %v1422_v12 = vcvt.s32.f32 %v910_v3  ;;  %v1430_v13 = vcvt.s32.f32 %v918_v4  ;;  %v638_v14 = vunpack.c.0.s8 %v438_v40  ;;  %1982 = vmatmul.bf16.vlgmr.msra.gmra.mxu0 %v9373_v61 }
 0x190   :  { %v1686_v15 = vpack.c.bf16 %v1302_v6, %v1294_v5  ;;  %v1550_v16 = vcvt.s32.f32 %v1038_v7  ;;  %v1558_v17 = vcvt.s32.f32 %v1046_v8  ;;  %v646_v18 = vunpack.c.1.s8 %v438_v40  ;;  %1995 = vmatmul.bf16.vlgmr.msra.gmra.mxu1 %v9375_v30  ;;  %v422_v6 = vld [vmem:[#allocation2 + $0x60] sm:$0xff] }
 0x191   :  { %2026 = vmatpush.bf16.msrb.mxu0 %v1622_v10  ;;  %v1750_v19 = vpack.c.bf16 %v1430_v13, %v1422_v12  ;;  %2008 = vmatmul.bf16.vlgmr.msra.gmra.mxu2 %v9377_v32  ;;  %v1150_v20 = vcvt.s32.f32 %v638_v14  ;;  %v766_v21 = vunpack.c.0.s8 %v470_v47  ;;  %v774_v22 = vunpack.c.1.s8 %v470_v47 }
 0x192   :  { %2039 = vmatpush.bf16.msrb.mxu1 %v1686_v15  ;;  %v1814_v24 = vpack.c.bf16 %v1558_v17, %v1550_v16  ;;  %2021 = vmatmul.bf16.vlgmr.msra.gmra.mxu3 %v9379_v41  ;;  %v1158_v25 = vcvt.s32.f32 %v646_v18  ;;  %v894_v26 = vunpack.c.0.s8 %v502_v53  ;;  %v902_v27 = vunpack.c.1.s8 %v502_v53  ;;  %v454_v17 = vld [vmem:[#allocation2 + $0x160] sm:$0xff] }
 0x193   :  { %2052 = vmatpush.bf16.msrb.mxu2 %v1750_v19  ;;  %v1278_v28 = vcvt.s32.f32 %v766_v21  ;;  %v1286_v29 = vcvt.s32.f32 %v774_v22  ;;  %v1022_v31 = vunpack.c.0.s8 %v534_v60  ;;  %v1030_v33 = vunpack.c.1.s8 %v534_v60  ;;  %v486_v22 = vld [vmem:[#allocation2 + $0x260] sm:$0xff] }
 0x194   :  { %2065 = vmatpush.bf16.msrb.mxu3 %v1814_v24  ;;  %v1614_v35 = vpack.c.bf16 %v1158_v25, %v1150_v20  ;;  %v1406_v36 = vcvt.s32.f32 %v894_v26  ;;  %v1414_v37 = vcvt.s32.f32 %v902_v27  ;;  %v622_v38 = vunpack.c.2.s8 %v430_v23  ;;  %v518_v27 = vld [vmem:[#allocation2 + $0x360] sm:$0xff] }
 0x195   :  { %v1678_v40 = vpack.c.bf16 %v1286_v29, %v1278_v28  ;;  %v1534_v42 = vcvt.s32.f32 %v1022_v31  ;;  %v1542_v43 = vcvt.s32.f32 %v1030_v33  ;;  %v630_v45 = vunpack.c.3.s8 %v430_v23 }
 0x196   :  { %2027 = vmatpush.bf16.msrb.mxu0 %v1614_v35  ;;  %v1742_v58 = vpack.c.bf16 %v1414_v37, %v1406_v36  ;;  %v1134_v9 = vcvt.s32.f32 %v622_v38  ;;  %v750_v11 = vunpack.c.2.s8 %v462_v34  ;;  %v758_v56 = vunpack.c.3.s8 %v462_v34 }
 0x197   :  { %2040 = vmatpush.bf16.msrb.mxu1 %v1678_v40  ;;  %v1806_v47 = vpack.c.bf16 %v1542_v43, %v1534_v42  ;;  %v1142_v48 = vcvt.s32.f32 %v630_v45  ;;  %v878_v50 = vunpack.c.2.s8 %v494_v39  ;;  %v886_v51 = vunpack.c.3.s8 %v494_v39 }
 0x198   :  { %2053 = vmatpush.bf16.msrb.mxu2 %v1742_v58  ;;  %v1262_v52 = vcvt.s32.f32 %v750_v11  ;;  %v1270_v53 = vcvt.s32.f32 %v758_v56  ;;  %v1006_v54 = vunpack.c.2.s8 %v526_v46  ;;  %v1014_v55 = vunpack.c.3.s8 %v526_v46 }
 0x199   :  { %2066 = vmatpush.bf16.msrb.mxu3 %v1806_v47  ;;  %v1606_v57 = vpack.c.bf16 %v1142_v48, %v1134_v9  ;;  %v1390_v59 = vcvt.s32.f32 %v878_v50  ;;  %v1398_v60 = vcvt.s32.f32 %v886_v51  ;;  %v606_v44 = vunpack.c.0.s8 %v430_v23 }
 0x19a   :  { %v1670_v62 = vpack.c.bf16 %v1270_v53, %v1262_v52  ;;  %v1518_v63 = vcvt.s32.f32 %v1006_v54  ;;  %v1526_v0 = vcvt.s32.f32 %v1014_v55  ;;  %v614_v1 = vunpack.c.1.s8 %v430_v23  ;;  %v414_v53 = vld [vmem:[#allocation2 + $0x20] sm:$0xff] }
 0x19b   :  { %2028 = vmatpush.bf16.msrb.mxu0 %v1606_v57  ;;  %v1734_v2 = vpack.c.bf16 %v1398_v60, %v1390_v59  ;;  %v1118_v3 = vcvt.s32.f32 %v606_v44  ;;  %v734_v4 = vunpack.c.0.s8 %v462_v34  ;;  %v742_v5 = vunpack.c.1.s8 %v462_v34 }
 0x19c   :  { %2041 = vmatpush.bf16.msrb.mxu1 %v1670_v62  ;;  %v1798_v7 = vpack.c.bf16 %v1526_v0, %v1518_v63  ;;  %v1126_v8 = vcvt.s32.f32 %v614_v1  ;;  %v862_v10 = vunpack.c.0.s8 %v494_v39  ;;  %v870_v12 = vunpack.c.1.s8 %v494_v39  ;;  %v446_v0 = vld [vmem:[#allocation2 + $0x120] sm:$0xff] }
 0x19d   :  { %2054 = vmatpush.bf16.msrb.mxu2 %v1734_v2  ;;  %v1246_v13 = vcvt.s32.f32 %v734_v4  ;;  %v1254_v14 = vcvt.s32.f32 %v742_v5  ;;  %v990_v15 = vunpack.c.0.s8 %v526_v46  ;;  %v998_v16 = vunpack.c.1.s8 %v526_v46  ;;  %v478_v5 = vld [vmem:[#allocation2 + $0x220] sm:$0xff] }
 0x19e   :  { %2067 = vmatpush.bf16.msrb.mxu3 %v1798_v7  ;;  %v1598_v18 = vpack.c.bf16 %v1126_v8, %v1118_v3  ;;  %v1374_v19 = vcvt.s32.f32 %v862_v10  ;;  %v1382_v20 = vcvt.s32.f32 %v870_v12  ;;  %v590_v21 = vunpack.c.2.s8 %v422_v6  ;;  %v510_v12 = vld [vmem:[#allocation2 + $0x320] sm:$0xff] }
 0x19f   :  { %v1662_v23 = vpack.c.bf16 %v1254_v14, %v1246_v13  ;;  %v1502_v24 = vcvt.s32.f32 %v990_v15  ;;  %v1510_v25 = vcvt.s32.f32 %v998_v16  ;;  %v598_v26 = vunpack.c.3.s8 %v422_v6 }
 0x1a0   :  { %2029 = vmatpush.bf16.msrb.mxu0 %v1598_v18  ;;  %v1726_v28 = vpack.c.bf16 %v1382_v20, %v1374_v19  ;;  %v1102_v29 = vcvt.s32.f32 %v590_v21  ;;  %v718_v31 = vunpack.c.2.s8 %v454_v17  ;;  %v726_v33 = vunpack.c.3.s8 %v454_v17  ;;  %v9397_v21 = vpop.f32.mrf.mxu0 }
 0x1a1   :  { %2042 = vmatpush.bf16.msrb.mxu1 %v1662_v23  ;;  %v1790_v34 = vpack.c.bf16 %v1510_v25, %v1502_v24  ;;  %v1110_v35 = vcvt.s32.f32 %v598_v26  ;;  %v846_v36 = vunpack.c.2.s8 %v486_v22  ;;  %v854_v37 = vunpack.c.3.s8 %v486_v22 }
 0x1a2   :  { %2055 = vmatpush.bf16.msrb.mxu2 %v1726_v28  ;;  %v1230_v38 = vcvt.s32.f32 %v718_v31  ;;  %v1238_v39 = vcvt.s32.f32 %v726_v33  ;;  %v974_v40 = vunpack.c.2.s8 %v518_v27  ;;  %v982_v42 = vunpack.c.3.s8 %v518_v27 }
 0x1a3   :  { %2068 = vmatpush.bf16.msrb.mxu3 %v1790_v34  ;;  %v1590_v43 = vpack.c.bf16 %v1110_v35, %v1102_v29  ;;  %v1358_v45 = vcvt.s32.f32 %v846_v36  ;;  %v1366_v46 = vcvt.s32.f32 %v854_v37  ;;  %v574_v58 = vunpack.c.0.s8 %v422_v6 }
 0x1a4   :  { %v1654_v9 = vpack.c.bf16 %v1238_v39, %v1230_v38  ;;  %v1486_v11 = vcvt.s32.f32 %v974_v40  ;;  %v1494_v56 = vcvt.s32.f32 %v982_v42  ;;  %v582_v47 = vunpack.c.1.s8 %v422_v6  ;;  %v9401_v42 = vld [vmem:[#allocation2 + $0xe8] sm:$0xff] }
 0x1a5   :  { %2030 = vmatpush.bf16.msrb.mxu0 %v1590_v43  ;;  %v1718_v48 = vpack.c.bf16 %v1366_v46, %v1358_v45  ;;  %v1086_v50 = vcvt.s32.f32 %v574_v58  ;;  %v702_v51 = vunpack.c.0.s8 %v454_v17  ;;  %v710_v52 = vunpack.c.1.s8 %v454_v17 }
 0x1a6   :  { %2043 = vmatpush.bf16.msrb.mxu1 %v1654_v9  ;;  %v1782_v54 = vpack.c.bf16 %v1494_v56, %v1486_v11  ;;  %v1094_v55 = vcvt.s32.f32 %v582_v47  ;;  %v830_v57 = vunpack.c.0.s8 %v486_v22  ;;  %v838_v59 = vunpack.c.1.s8 %v486_v22  ;;  %v9399_v22 = vpop.f32.mrf.mxu1 }
 0x1a7   :  { %2056 = vmatpush.bf16.msrb.mxu2 %v1718_v48  ;;  %v1214_v60 = vcvt.s32.f32 %v702_v51  ;;  %v1222_v44 = vcvt.s32.f32 %v710_v52  ;;  %v958_v62 = vunpack.c.0.s8 %v518_v27  ;;  %v966_v63 = vunpack.c.1.s8 %v518_v27  ;;  %v471_v48 = vld [vmem:[#allocation2 + $0x1e8] sm:$0xff]  ;;  %v9405_v51 = vpop.f32.mrf.mxu3 }
 0x1a8   :  { %2069 = vmatpush.bf16.msrb.mxu3 %v1782_v54  ;;  %v1582_v1 = vpack.c.bf16 %v1094_v55, %v1086_v50  ;;  %v1342_v2 = vcvt.s32.f32 %v830_v57  ;;  %v1350_v3 = vcvt.s32.f32 %v838_v59  ;;  %v558_v4 = vunpack.c.2.s8 %v414_v53  ;;  %v9403_v50 = vpop.f32.mrf.mxu2  ;;  %v503_v57 = vld [vmem:[#allocation2 + $0x2e8] sm:$0xff] }
 0x1a9   :  { %v1646_v6 = vpack.c.bf16 %v1222_v44, %v1214_v60  ;;  %v1470_v7 = vcvt.s32.f32 %v958_v62  ;;  %v1478_v8 = vcvt.s32.f32 %v966_v63  ;;  %v566_v10 = vunpack.c.3.s8 %v414_v53  ;;  %v535_v63 = vld [vmem:[#allocation2 + $0x3e8] sm:$0xff] }
 0x1aa   :  { %2031 = vmatpush.bf16.msrb.mxu0 %v1582_v1  ;;  %v1710_v13 = vpack.c.bf16 %v1350_v3, %v1342_v2  ;;  %v1070_v14 = vcvt.s32.f32 %v558_v4  ;;  %v686_v15 = vunpack.c.2.s8 %v446_v0  ;;  %v694_v16 = vunpack.c.3.s8 %v446_v0 }
 0x1ab   :  { %2044 = vmatpush.bf16.msrb.mxu1 %v1646_v6  ;;  %v1774_v17 = vpack.c.bf16 %v1478_v8, %v1470_v7  ;;  %v1078_v18 = vcvt.s32.f32 %v566_v10  ;;  %v814_v19 = vunpack.c.2.s8 %v478_v5  ;;  %v822_v20 = vunpack.c.3.s8 %v478_v5 }
 0x1ac   :  { %2057 = vmatpush.bf16.msrb.mxu2 %v1710_v13  ;;  %v1198_v23 = vcvt.s32.f32 %v686_v15  ;;  %v1206_v24 = vcvt.s32.f32 %v694_v16  ;;  %v942_v25 = vunpack.c.2.s8 %v510_v12  ;;  %v950_v26 = vunpack.c.3.s8 %v510_v12 }
 0x1ad   :  { %2070 = vmatpush.bf16.msrb.mxu3 %v1774_v17  ;;  %v1574_v27 = vpack.c.bf16 %v1078_v18, %v1070_v14  ;;  %v1326_v28 = vcvt.s32.f32 %v814_v19  ;;  %v1334_v29 = vcvt.s32.f32 %v822_v20  ;;  %v542_v31 = vunpack.c.0.s8 %v414_v53 }
 0x1ae   :  { %v1638_v33 = vpack.c.bf16 %v1206_v24, %v1198_v23  ;;  %v1454_v34 = vcvt.s32.f32 %v942_v25  ;;  %v1462_v35 = vcvt.s32.f32 %v950_v26  ;;  %v550_v36 = vunpack.c.1.s8 %v414_v53  ;;  %v1842_v1 = vpop.f32.mrf.mxu1 }
 0x1af   :  { %2032 = vmatpush.bf16.msrb.mxu0 %v1574_v27  ;;  %v1702_v37 = vpack.c.bf16 %v1334_v29, %v1326_v28  ;;  %v1054_v38 = vcvt.s32.f32 %v542_v31  ;;  %v670_v39 = vunpack.c.0.s8 %v446_v0  ;;  %v678_v40 = vunpack.c.1.s8 %v446_v0  ;;  %v1829_v0 = vpop.f32.mrf.mxu0  ;;  %v431_v31 = vld [vmem:[#allocation2 + $0xa8] sm:$0xff] }
 0x1b0   :  { %2045 = vmatpush.bf16.msrb.mxu1 %v1638_v33  ;;  %v1766_v43 = vpack.c.bf16 %v1462_v35, %v1454_v34  ;;  %v1062_v45 = vcvt.s32.f32 %v550_v36  ;;  %v798_v46 = vunpack.c.0.s8 %v478_v5  ;;  %v806_v58 = vunpack.c.1.s8 %v478_v5  ;;  %v1855_v33 = vpop.f32.mrf.mxu2  ;;  %v1868_v34 = vpop.f32.mrf.mxu3 }
 0x1b1   :  { %2058 = vmatpush.bf16.msrb.mxu2 %v1702_v37  ;;  %v1182_v9 = vcvt.s32.f32 %v670_v39  ;;  %v1190_v11 = vcvt.s32.f32 %v678_v40  ;;  %v926_v56 = vunpack.c.0.s8 %v510_v12  ;;  %v934_v47 = vunpack.c.1.s8 %v510_v12  ;;  %v455_v33 = vld [vmem:[#allocation2 + $0x168] sm:$0xff] }
 0x1b2   :  { %2071 = vmatpush.bf16.msrb.mxu3 %v1766_v43  ;;  %v1566_v52 = vpack.c.bf16 %v1062_v45, %v1054_v38  ;;  %v1310_v53 = vcvt.s32.f32 %v798_v46  ;;  %v1318_v54 = vcvt.s32.f32 %v806_v58  ;;  %v655_v55 = vunpack.c.2.s8 %v9401_v42  ;;  %v463_v45 = vld [vmem:[#allocation2 + $0x1a8] sm:$0xff] }
 0x1b3   :  { %v1630_v59 = vpack.c.bf16 %v1190_v11, %v1182_v9  ;;  %v1438_v60 = vcvt.s32.f32 %v926_v56  ;;  %v1446_v44 = vcvt.s32.f32 %v934_v47  ;;  %v663_v62 = vunpack.c.3.s8 %v9401_v42  ;;  %v495_v56 = vld [vmem:[#allocation2 + $0x2a8] sm:$0xff] }
 0x1b4   :  { %2033 = vmatpush.bf16.msrb.mxu0 %v1566_v52  ;;  %v1694_v2 = vpack.c.bf16 %v1318_v54, %v1310_v53  ;;  %v1167_v3 = vcvt.s32.f32 %v655_v55  ;;  %v783_v4 = vunpack.c.2.s8 %v471_v48  ;;  %v791_v5 = vunpack.c.3.s8 %v471_v48  ;;  %v527_v54 = vld [vmem:[#allocation2 + $0x3a8] sm:$0xff] }
 0x1b5   :  { %2046 = vmatpush.bf16.msrb.mxu1 %v1630_v59  ;;  %v1758_v6 = vpack.c.bf16 %v1446_v44, %v1438_v60  ;;  %v1175_v7 = vcvt.s32.f32 %v663_v62  ;;  %v911_v8 = vunpack.c.2.s8 %v503_v57  ;;  %v919_v10 = vunpack.c.3.s8 %v503_v57 }
 0x1b6   :  { %2059 = vmatpush.bf16.msrb.mxu2 %v1694_v2  ;;  %v1295_v12 = vcvt.s32.f32 %v783_v4  ;;  %v1303_v13 = vcvt.s32.f32 %v791_v5  ;;  %v1039_v14 = vunpack.c.2.s8 %v535_v63  ;;  %v1047_v15 = vunpack.c.3.s8 %v535_v63 }
 0x1b7   :  { %2072 = vmatpush.bf16.msrb.mxu3 %v1758_v6  ;;  %v1623_v16 = vpack.c.bf16 %v1175_v7, %v1167_v3  ;;  %v1423_v17 = vcvt.s32.f32 %v911_v8  ;;  %v1431_v18 = vcvt.s32.f32 %v919_v10  ;;  %v639_v19 = vunpack.c.0.s8 %v9401_v42  ;;  %2034 = vmatmul.bf16.vlgmr.msrb.gmra.mxu0 %v9373_v61 }
 0x1b8   :  { %v1687_v20 = vpack.c.bf16 %v1303_v13, %v1295_v12  ;;  %v1551_v23 = vcvt.s32.f32 %v1039_v14  ;;  %v1559_v24 = vcvt.s32.f32 %v1047_v15  ;;  %v647_v25 = vunpack.c.1.s8 %v9401_v42  ;;  %2047 = vmatmul.bf16.vlgmr.msrb.gmra.mxu1 %v9375_v30 }
 0x1b9   :  { %2078 = vmatpush.bf16.msra.mxu0 %v1623_v16  ;;  %v1751_v26 = vpack.c.bf16 %v1431_v18, %v1423_v17  ;;  %2060 = vmatmul.bf16.vlgmr.msrb.gmra.mxu2 %v9377_v32  ;;  %v1151_v27 = vcvt.s32.f32 %v639_v19  ;;  %v767_v28 = vunpack.c.0.s8 %v471_v48  ;;  %v775_v29 = vunpack.c.1.s8 %v471_v48 }
 0x1ba   :  { %2091 = vmatpush.bf16.msra.mxu1 %v1687_v20  ;;  %v1815_v35 = vpack.c.bf16 %v1559_v24, %v1551_v23  ;;  %2073 = vmatmul.bf16.vlgmr.msrb.gmra.mxu3 %v9379_v41  ;;  %v1159_v36 = vcvt.s32.f32 %v647_v25  ;;  %v895_v37 = vunpack.c.0.s8 %v503_v57  ;;  %v903_v38 = vunpack.c.1.s8 %v503_v57  ;;  %v423_v25 = vld [vmem:[#allocation2 + $0x68] sm:$0xff] }
 0x1bb   :  { %2104 = vmatpush.bf16.msra.mxu2 %v1751_v26  ;;  %v1279_v39 = vcvt.s32.f32 %v767_v28  ;;  %v1287_v40 = vcvt.s32.f32 %v775_v29  ;;  %v1023_v42 = vunpack.c.0.s8 %v535_v63  ;;  %v1031_v43 = vunpack.c.1.s8 %v535_v63 }
 0x1bc   :  { %2117 = vmatpush.bf16.msra.mxu3 %v1815_v35  ;;  %v1615_v46 = vpack.c.bf16 %v1159_v36, %v1151_v27  ;;  %v1407_v58 = vcvt.s32.f32 %v895_v37  ;;  %v1415_v9 = vcvt.s32.f32 %v903_v38  ;;  %v623_v11 = vunpack.c.2.s8 %v431_v31  ;;  %v487_v37 = vld [vmem:[#allocation2 + $0x268] sm:$0xff] }
 0x1bd   :  { %v1679_v47 = vpack.c.bf16 %v1287_v40, %v1279_v39  ;;  %v1535_v48 = vcvt.s32.f32 %v1023_v42  ;;  %v1543_v52 = vcvt.s32.f32 %v1031_v43  ;;  %v631_v53 = vunpack.c.3.s8 %v431_v31  ;;  %v519_v43 = vld [vmem:[#allocation2 + $0x368] sm:$0xff] }
 0x1be   :  { %2079 = vmatpush.bf16.msra.mxu0 %v1615_v46  ;;  %v1743_v55 = vpack.c.bf16 %v1415_v9, %v1407_v58  ;;  %v1135_v57 = vcvt.s32.f32 %v623_v11  ;;  %v751_v59 = vunpack.c.2.s8 %v463_v45  ;;  %v759_v60 = vunpack.c.3.s8 %v463_v45 }
 0x1bf   :  { %2092 = vmatpush.bf16.msra.mxu1 %v1679_v47  ;;  %v1807_v44 = vpack.c.bf16 %v1543_v52, %v1535_v48  ;;  %v1143_v62 = vcvt.s32.f32 %v631_v53  ;;  %v879_v63 = vunpack.c.2.s8 %v495_v56  ;;  %v887_v0 = vunpack.c.3.s8 %v495_v56 }
 0x1c0   :  { %2105 = vmatpush.bf16.msra.mxu2 %v1743_v55  ;;  %v1263_v1 = vcvt.s32.f32 %v751_v59  ;;  %v1271_v2 = vcvt.s32.f32 %v759_v60  ;;  %v1007_v3 = vunpack.c.2.s8 %v527_v54  ;;  %v1015_v4 = vunpack.c.3.s8 %v527_v54 }
 0x1c1   :  { %2118 = vmatpush.bf16.msra.mxu3 %v1807_v44  ;;  %v1607_v5 = vpack.c.bf16 %v1143_v62, %v1135_v57  ;;  %v1391_v6 = vcvt.s32.f32 %v879_v63  ;;  %v1399_v7 = vcvt.s32.f32 %v887_v0  ;;  %v607_v8 = vunpack.c.0.s8 %v431_v31 }
 0x1c2   :  { %v1671_v10 = vpack.c.bf16 %v1271_v2, %v1263_v1  ;;  %v1519_v12 = vcvt.s32.f32 %v1007_v3  ;;  %v1527_v13 = vcvt.s32.f32 %v1015_v4  ;;  %v615_v14 = vunpack.c.1.s8 %v431_v31 }
 0x1c3   :  { %2080 = vmatpush.bf16.msra.mxu0 %v1607_v5  ;;  %v1735_v15 = vpack.c.bf16 %v1399_v7, %v1391_v6  ;;  %v1119_v16 = vcvt.s32.f32 %v607_v8  ;;  %v735_v17 = vunpack.c.0.s8 %v463_v45  ;;  %v743_v18 = vunpack.c.1.s8 %v463_v45 }
 0x1c4   :  { %2093 = vmatpush.bf16.msra.mxu1 %v1671_v10  ;;  %v1799_v19 = vpack.c.bf16 %v1527_v13, %v1519_v12  ;;  %v1127_v20 = vcvt.s32.f32 %v615_v14  ;;  %v863_v23 = vunpack.c.0.s8 %v495_v56  ;;  %v871_v24 = vunpack.c.1.s8 %v495_v56  ;;  %v415_v10 = vld [vmem:[#allocation2 + $0x28] sm:$0xff] }
 0x1c5   :  { %2106 = vmatpush.bf16.msra.mxu2 %v1735_v15  ;;  %v1247_v26 = vcvt.s32.f32 %v735_v17  ;;  %v1255_v27 = vcvt.s32.f32 %v743_v18  ;;  %v991_v28 = vunpack.c.0.s8 %v527_v54  ;;  %v999_v29 = vunpack.c.1.s8 %v527_v54 }
 0x1c6   :  { %2119 = vmatpush.bf16.msra.mxu3 %v1799_v19  ;;  %v1599_v34 = vpack.c.bf16 %v1127_v20, %v1119_v16  ;;  %v1375_v31 = vcvt.s32.f32 %v863_v23  ;;  %v1383_v35 = vcvt.s32.f32 %v871_v24  ;;  %v1841_v36 = vadd.f32 %v9399_v22, %v9397_v21  ;;  %v479_v24 = vld [vmem:[#allocation2 + $0x228] sm:$0xff] }
 0x1c7   :  { %v1663_v38 = vpack.c.bf16 %v1255_v27, %v1247_v26  ;;  %v1503_v39 = vcvt.s32.f32 %v991_v28  ;;  %v1511_v40 = vcvt.s32.f32 %v999_v29  ;;  %v591_v42 = vunpack.c.2.s8 %v423_v25  ;;  %v511_v28 = vld [vmem:[#allocation2 + $0x328] sm:$0xff] }
 0x1c8   :  { %2081 = vmatpush.bf16.msra.mxu0 %v1599_v34  ;;  %v1727_v45 = vpack.c.bf16 %v1383_v35, %v1375_v31  ;;  %v599_v46 = vunpack.c.3.s8 %v423_v25  ;;  %v719_v58 = vunpack.c.2.s8 %v455_v33  ;;  %v727_v9 = vunpack.c.3.s8 %v455_v33 }
 0x1c9   :  { %2094 = vmatpush.bf16.msra.mxu1 %v1663_v38  ;;  %v1791_v11 = vpack.c.bf16 %v1511_v40, %v1503_v39  ;;  %v1103_v56 = vcvt.s32.f32 %v591_v42  ;;  %v847_v47 = vunpack.c.2.s8 %v487_v37  ;;  %v855_v48 = vunpack.c.3.s8 %v487_v37 }
 0x1ca   :  { %2107 = vmatpush.bf16.msra.mxu2 %v1727_v45  ;;  %v1111_v52 = vcvt.s32.f32 %v599_v46  ;;  %v1231_v53 = vcvt.s32.f32 %v719_v58  ;;  %v1239_v21 = vcvt.s32.f32 %v727_v9  ;;  %v975_v22 = vunpack.c.2.s8 %v519_v43 }
 0x1cb   :  { %2120 = vmatpush.bf16.msra.mxu3 %v1791_v11  ;;  %v1359_v54 = vcvt.s32.f32 %v847_v47  ;;  %v1367_v55 = vcvt.s32.f32 %v855_v48  ;;  %v983_v57 = vunpack.c.3.s8 %v519_v43  ;;  %v1854_v59 = vadd.f32 %v9403_v50, %v1841_v36 }
 0x1cc   :  { %v1591_v60 = vpack.c.bf16 %v1111_v52, %v1103_v56  ;;  %v1655_v44 = vpack.c.bf16 %v1239_v21, %v1231_v53  ;;  %v1487_v62 = vcvt.s32.f32 %v975_v22  ;;  %v575_v63 = vunpack.c.0.s8 %v423_v25 }
 0x1cd   :  { %v1719_v0 = vpack.c.bf16 %v1367_v55, %v1359_v54  ;;  %v1495_v1 = vcvt.s32.f32 %v983_v57  ;;  %v9419_v2 = vadd.f32 %v9405_v51, %v1854_v59  ;;  %v583_v3 = vunpack.c.1.s8 %v423_v25  ;;  %v447_v51 = vld [vmem:[#allocation2 + $0x128] sm:$0xff]  ;;  %v440_v55 = vld [vmem:[#allocation2 + $0xf0] sm:$0xff] }
 0x1ce   :  { %2082 = vmatpush.bf16.msra.mxu0 %v1591_v60  ;;  %2095 = vmatpush.bf16.msra.mxu1 %v1655_v44  ;;  %v1087_v4 = vcvt.s32.f32 %v575_v63  ;;  %v703_v5 = vunpack.c.0.s8 %v455_v33  ;;  %v711_v6 = vunpack.c.1.s8 %v455_v33  ;;  %v831_v8 = vunpack.c.0.s8 %v487_v37 }
 0x1cf   :  { %2108 = vmatpush.bf16.msra.mxu2 %v1719_v0  ;;  %v1783_v7 = vpack.c.bf16 %v1495_v1, %v1487_v62  ;;  %v1095_v50 = vcvt.s32.f32 %v583_v3  ;;  %v839_v14 = vunpack.c.1.s8 %v487_v37  ;;  %v959_v16 = vunpack.c.0.s8 %v519_v43  ;;  %v472_v1 = vld [vmem:[#allocation2 + $0x1f0] sm:$0xff] }
 0x1d0   :  { %v1215_v12 = vcvt.s32.f32 %v703_v5  ;;  %v1223_v13 = vcvt.s32.f32 %v711_v6  ;;  %v1343_v15 = vcvt.s32.f32 %v831_v8  ;;  %v967_v17 = vunpack.c.1.s8 %v519_v43  ;;  %v504_v6 = vld [vmem:[#allocation2 + $0x2f0] sm:$0xff]  ;;  %v9423_v8 = vpop.f32.mrf.mxu1 }
 0x1d1   :  { %2121 = vmatpush.bf16.msra.mxu3 %v1783_v7  ;;  %v1583_v18 = vpack.c.bf16 %v1095_v50, %v1087_v4  ;;  %v1351_v20 = vcvt.s32.f32 %v839_v14  ;;  %v559_v23 = vunpack.c.2.s8 %v415_v10  ;;  %v1471_v25 = vcvt.s32.f32 %v959_v16  ;;  %v9421_v7 = vpop.f32.mrf.mxu0 }
 0x1d2   :  { %v1647_v19 = vpack.c.bf16 %v1223_v13, %v1215_v12  ;;  %v1479_v26 = vcvt.s32.f32 %v967_v17  ;;  %v567_v27 = vunpack.c.3.s8 %v415_v10  ;;  %v687_v34 = vunpack.c.2.s8 %v447_v51  ;;  %v536_v17 = vld [vmem:[#allocation2 + $0x3f0] sm:$0xff] }
 0x1d3   :  { %2083 = vmatpush.bf16.msra.mxu0 %v1583_v18  ;;  %v1711_v29 = vpack.c.bf16 %v1351_v20, %v1343_v15  ;;  %v1071_v33 = vcvt.s32.f32 %v559_v23  ;;  %v695_v31 = vunpack.c.3.s8 %v447_v51  ;;  %v815_v37 = vunpack.c.2.s8 %v479_v24  ;;  %v9425_v23 = vpop.f32.mrf.mxu2 }
 0x1d4   :  { %2096 = vmatpush.bf16.msra.mxu1 %v1647_v19  ;;  %v1775_v35 = vpack.c.bf16 %v1479_v26, %v1471_v25  ;;  %v1079_v36 = vcvt.s32.f32 %v567_v27  ;;  %v1199_v38 = vcvt.s32.f32 %v687_v34  ;;  %v823_v40 = vunpack.c.3.s8 %v479_v24  ;;  %v9428_v34 = vpop.f32.mrf.mxu3 }
 0x1d5   :  { %2109 = vmatpush.bf16.msra.mxu2 %v1711_v29  ;;  %v1207_v39 = vcvt.s32.f32 %v695_v31  ;;  %v943_v42 = vunpack.c.2.s8 %v511_v28  ;;  %v1327_v45 = vcvt.s32.f32 %v815_v37  ;;  %v951_v46 = vunpack.c.3.s8 %v511_v28 }
 0x1d6   :  { %2122 = vmatpush.bf16.msra.mxu3 %v1775_v35  ;;  %v1575_v43 = vpack.c.bf16 %v1079_v36, %v1071_v33  ;;  %v1335_v9 = vcvt.s32.f32 %v823_v40  ;;  %v543_v56 = vunpack.c.0.s8 %v415_v10  ;;  %v551_v48 = vunpack.c.1.s8 %v415_v10 }
 0x1d7   :  { %v1639_v58 = vpack.c.bf16 %v1207_v39, %v1199_v38  ;;  %v1455_v11 = vcvt.s32.f32 %v943_v42  ;;  %v1463_v47 = vcvt.s32.f32 %v951_v46  ;;  %v671_v52 = vunpack.c.0.s8 %v447_v51 }
 0x1d8   :  { %2084 = vmatpush.bf16.msra.mxu0 %v1575_v43  ;;  %v1703_v53 = vpack.c.bf16 %v1335_v9, %v1327_v45  ;;  %v1055_v21 = vcvt.s32.f32 %v543_v56  ;;  %v679_v22 = vunpack.c.1.s8 %v447_v51  ;;  %v799_v54 = vunpack.c.0.s8 %v479_v24 }
 0x1d9   :  { %2097 = vmatpush.bf16.msra.mxu1 %v1639_v58  ;;  %v1767_v57 = vpack.c.bf16 %v1463_v47, %v1455_v11  ;;  %v1063_v59 = vcvt.s32.f32 %v551_v48  ;;  %v1183_v60 = vcvt.s32.f32 %v671_v52  ;;  %v807_v62 = vunpack.c.1.s8 %v479_v24  ;;  %v1881_v46 = vpop.f32.mrf.mxu0  ;;  %v1894_v58 = vpop.f32.mrf.mxu1  ;;  %v432_v48 = vld [vmem:[#allocation2 + $0xb0] sm:$0xff] }
 0x1da   :  { %2110 = vmatpush.bf16.msra.mxu2 %v1703_v53  ;;  %v1191_v44 = vcvt.s32.f32 %v679_v22  ;;  %v1311_v63 = vcvt.s32.f32 %v799_v54  ;;  %v927_v0 = vunpack.c.0.s8 %v511_v28  ;;  %v935_v4 = vunpack.c.1.s8 %v511_v28  ;;  %v464_v22 = vld [vmem:[#allocation2 + $0x1b0] sm:$0xff] }
 0x1db   :  { %2123 = vmatpush.bf16.msra.mxu3 %v1767_v57  ;;  %v1567_v3 = vpack.c.bf16 %v1063_v59, %v1055_v21  ;;  %v656_v5 = vunpack.c.2.s8 %v440_v55  ;;  %v1319_v50 = vcvt.s32.f32 %v807_v62  ;;  %v664_v13 = vunpack.c.3.s8 %v440_v55  ;;  %v424_v46 = vld [vmem:[#allocation2 + $0x70] sm:$0xff] }
 0x1dc   :  { %v1631_v10 = vpack.c.bf16 %v1191_v44, %v1183_v60  ;;  %v1439_v12 = vcvt.s32.f32 %v927_v0  ;;  %v1447_v14 = vcvt.s32.f32 %v935_v4  ;;  %v784_v16 = vunpack.c.2.s8 %v472_v1  ;;  %v1907_v60 = vpop.f32.mrf.mxu2  ;;  %v496_v0 = vld [vmem:[#allocation2 + $0x2b0] sm:$0xff] }
 0x1dd   :  { %2085 = vmatpush.bf16.msra.mxu0 %v1567_v3  ;;  %v1168_v15 = vcvt.s32.f32 %v656_v5  ;;  %v1695_v51 = vpack.c.bf16 %v1319_v50, %v1311_v63  ;;  %v1176_v18 = vcvt.s32.f32 %v664_v13  ;;  %v792_v19 = vunpack.c.3.s8 %v472_v1  ;;  %v1920_v50 = vpop.f32.mrf.mxu3 }
 0x1de   :  { %2098 = vmatpush.bf16.msra.mxu1 %v1631_v10  ;;  %v912_v20 = vunpack.c.2.s8 %v504_v6  ;;  %v1759_v24 = vpack.c.bf16 %v1447_v14, %v1439_v12  ;;  %v1296_v25 = vcvt.s32.f32 %v784_v16  ;;  %v920_v26 = vunpack.c.3.s8 %v504_v6  ;;  %v528_v10 = vld [vmem:[#allocation2 + $0x3b0] sm:$0xff] }
 0x1df   :  { %2111 = vmatpush.bf16.msra.mxu2 %v1695_v51  ;;  %v1624_v27 = vpack.c.bf16 %v1176_v18, %v1168_v15  ;;  %v1304_v28 = vcvt.s32.f32 %v792_v19  ;;  %v1040_v33 = vunpack.c.2.s8 %v536_v17  ;;  %v1048_v35 = vunpack.c.3.s8 %v536_v17 }
 0x1e0   :  { %v1424_v29 = vcvt.s32.f32 %v912_v20  ;;  %2086 = vmatmul.bf16.vlgmr.msra.gmra.mxu0 %v9373_v61  ;;  %2124 = vmatpush.bf16.msra.mxu3 %v1759_v24  ;;  %v1432_v31 = vcvt.s32.f32 %v920_v26  ;;  %v640_v36 = vunpack.c.0.s8 %v440_v55  ;;  %v648_v39 = vunpack.c.1.s8 %v440_v55 }
 0x1e1   :  { %2099 = vmatmul.bf16.vlgmr.msra.gmra.mxu1 %v9375_v30  ;;  %2130 = vmatpush.bf16.msrb.mxu0 %v1624_v27  ;;  %v1688_v37 = vpack.c.bf16 %v1304_v28, %v1296_v25  ;;  %v1552_v38 = vcvt.s32.f32 %v1040_v33  ;;  %v768_v40 = vunpack.c.0.s8 %v472_v1  ;;  %v1560_v43 = vcvt.s32.f32 %v1048_v35 }
 0x1e2   :  { %v1752_v42 = vpack.c.bf16 %v1432_v31, %v1424_v29  ;;  %2112 = vmatmul.bf16.vlgmr.msra.gmra.mxu2 %v9377_v32  ;;  %v1152_v45 = vcvt.s32.f32 %v640_v36  ;;  %v1160_v9 = vcvt.s32.f32 %v648_v39  ;;  %v776_v11 = vunpack.c.1.s8 %v472_v1 }
 0x1e3   :  { %2143 = vmatpush.bf16.msrb.mxu1 %v1688_v37  ;;  %2125 = vmatmul.bf16.vlgmr.msra.gmra.mxu3 %v9379_v41  ;;  %v1280_v56 = vcvt.s32.f32 %v768_v40  ;;  %v896_v47 = vunpack.c.0.s8 %v504_v6  ;;  %v1816_v52 = vpack.c.bf16 %v1560_v43, %v1552_v38  ;;  %v904_v53 = vunpack.c.1.s8 %v504_v6 }
 0x1e4   :  { %2156 = vmatpush.bf16.msrb.mxu2 %v1752_v42  ;;  %v1024_v21 = vunpack.c.0.s8 %v536_v17  ;;  %v1616_v54 = vpack.c.bf16 %v1160_v9, %v1152_v45  ;;  %v1288_v55 = vcvt.s32.f32 %v776_v11  ;;  %v1032_v59 = vunpack.c.1.s8 %v536_v17  ;;  %v456_v11 = vld [vmem:[#allocation2 + $0x170] sm:$0xff] }
 0x1e5   :  { %v1408_v57 = vcvt.s32.f32 %v896_v47  ;;  %2169 = vmatpush.bf16.msrb.mxu3 %v1816_v52  ;;  %v1416_v44 = vcvt.s32.f32 %v904_v53  ;;  %v624_v63 = vunpack.c.2.s8 %v432_v48  ;;  %v632_v4 = vunpack.c.3.s8 %v432_v48  ;;  %v488_v53 = vld [vmem:[#allocation2 + $0x270] sm:$0xff] }
 0x1e6   :  { %v1536_v62 = vcvt.s32.f32 %v1024_v21  ;;  %2131 = vmatpush.bf16.msrb.mxu0 %v1616_v54  ;;  %v1680_v1 = vpack.c.bf16 %v1288_v55, %v1280_v56  ;;  %v1544_v3 = vcvt.s32.f32 %v1032_v59  ;;  %v752_v5 = vunpack.c.2.s8 %v464_v22 }
 0x1e7   :  { %v1744_v6 = vpack.c.bf16 %v1416_v44, %v1408_v57  ;;  %v1136_v12 = vcvt.s32.f32 %v624_v63  ;;  %v760_v13 = vunpack.c.3.s8 %v464_v22  ;;  %v1144_v15 = vcvt.s32.f32 %v632_v4  ;;  %v520_v57 = vld [vmem:[#allocation2 + $0x370] sm:$0xff] }
 0x1e8   :  { %2144 = vmatpush.bf16.msrb.mxu1 %v1680_v1  ;;  %v1808_v14 = vpack.c.bf16 %v1544_v3, %v1536_v62  ;;  %v1264_v16 = vcvt.s32.f32 %v752_v5  ;;  %v880_v17 = vunpack.c.2.s8 %v496_v0  ;;  %v888_v18 = vunpack.c.3.s8 %v496_v0 }
 0x1e9   :  { %2157 = vmatpush.bf16.msrb.mxu2 %v1744_v6  ;;  %v1272_v51 = vcvt.s32.f32 %v760_v13  ;;  %v1008_v19 = vunpack.c.2.s8 %v528_v10  ;;  %v1608_v20 = vpack.c.bf16 %v1144_v15, %v1136_v12  ;;  %v1016_v25 = vunpack.c.3.s8 %v528_v10 }
 0x1ea   :  { %2170 = vmatpush.bf16.msrb.mxu3 %v1808_v14  ;;  %v1392_v24 = vcvt.s32.f32 %v880_v17  ;;  %v608_v26 = vunpack.c.0.s8 %v432_v48  ;;  %v1400_v28 = vcvt.s32.f32 %v888_v18  ;;  %v616_v31 = vunpack.c.1.s8 %v432_v48 }
 0x1eb   :  { %v1672_v27 = vpack.c.bf16 %v1272_v51, %v1264_v16  ;;  %v1520_v29 = vcvt.s32.f32 %v1008_v19  ;;  %2132 = vmatpush.bf16.msrb.mxu0 %v1608_v20  ;;  %v1528_v33 = vcvt.s32.f32 %v1016_v25  ;;  %v736_v36 = vunpack.c.0.s8 %v464_v22 }
 0x1ec   :  { %v1120_v35 = vcvt.s32.f32 %v608_v26  ;;  %v1736_v37 = vpack.c.bf16 %v1400_v28, %v1392_v24  ;;  %v744_v38 = vunpack.c.1.s8 %v464_v22  ;;  %v864_v39 = vunpack.c.0.s8 %v496_v0 }
 0x1ed   :  { %2145 = vmatpush.bf16.msrb.mxu1 %v1672_v27  ;;  %v1800_v40 = vpack.c.bf16 %v1528_v33, %v1520_v29  ;;  %v1128_v42 = vcvt.s32.f32 %v616_v31  ;;  %v1248_v43 = vcvt.s32.f32 %v736_v36  ;;  %v872_v45 = vunpack.c.1.s8 %v496_v0  ;;  %v416_v36 = vld [vmem:[#allocation2 + $0x30] sm:$0xff] }
 0x1ee   :  { %2158 = vmatpush.bf16.msrb.mxu2 %v1736_v37  ;;  %v1256_v58 = vcvt.s32.f32 %v744_v38  ;;  %v1376_v9 = vcvt.s32.f32 %v864_v39  ;;  %v992_v52 = vunpack.c.0.s8 %v528_v10  ;;  %v1000_v48 = vunpack.c.1.s8 %v528_v10  ;;  %v448_v39 = vld [vmem:[#allocation2 + $0x130] sm:$0xff] }
 0x1ef   :  { %2171 = vmatpush.bf16.msrb.mxu3 %v1800_v40  ;;  %v1600_v56 = vpack.c.bf16 %v1128_v42, %v1120_v35  ;;  %v1384_v47 = vcvt.s32.f32 %v872_v45  ;;  %v1893_v22 = vadd.f32 %v9423_v8, %v9421_v7  ;;  %v592_v54 = vunpack.c.2.s8 %v424_v46 }
 0x1f0   :  { %v1664_v21 = vpack.c.bf16 %v1256_v58, %v1248_v43  ;;  %v600_v55 = vunpack.c.3.s8 %v424_v46  ;;  %v1504_v60 = vcvt.s32.f32 %v992_v52  ;;  %v1512_v44 = vcvt.s32.f32 %v1000_v48  ;;  %v480_v58 = vld [vmem:[#allocation2 + $0x230] sm:$0xff] }
 0x1f1   :  { %2133 = vmatpush.bf16.msrb.mxu0 %v1600_v56  ;;  %v1728_v59 = vpack.c.bf16 %v1384_v47, %v1376_v9  ;;  %v720_v62 = vunpack.c.2.s8 %v456_v11  ;;  %v1104_v63 = vcvt.s32.f32 %v592_v54  ;;  %v728_v1 = vunpack.c.3.s8 %v456_v11  ;;  %v512_v47 = vld [vmem:[#allocation2 + $0x330] sm:$0xff] }
 0x1f2   :  { %2146 = vmatpush.bf16.msrb.mxu1 %v1664_v21  ;;  %v1112_v0 = vcvt.s32.f32 %v600_v55  ;;  %v848_v3 = vunpack.c.2.s8 %v488_v53  ;;  %v1792_v4 = vpack.c.bf16 %v1512_v44, %v1504_v60  ;;  %v856_v10 = vunpack.c.3.s8 %v488_v53 }
 0x1f3   :  { %2159 = vmatpush.bf16.msrb.mxu2 %v1728_v59  ;;  %v1232_v5 = vcvt.s32.f32 %v720_v62  ;;  %v976_v50 = vunpack.c.2.s8 %v520_v57  ;;  %v1240_v7 = vcvt.s32.f32 %v728_v1  ;;  %v984_v12 = vunpack.c.3.s8 %v520_v57 }
 0x1f4   :  { %v1592_v6 = vpack.c.bf16 %v1112_v0, %v1104_v63  ;;  %v1360_v8 = vcvt.s32.f32 %v848_v3  ;;  %2172 = vmatpush.bf16.msrb.mxu3 %v1792_v4  ;;  %v1368_v13 = vcvt.s32.f32 %v856_v10  ;;  %v1906_v17 = vadd.f32 %v9425_v23, %v1893_v22 }
 0x1f5   :  { %v1488_v14 = vcvt.s32.f32 %v976_v50  ;;  %v1656_v15 = vpack.c.bf16 %v1240_v7, %v1232_v5  ;;  %v1496_v16 = vcvt.s32.f32 %v984_v12  ;;  %v576_v51 = vunpack.c.0.s8 %v424_v46 }
 0x1f6   :  { %2134 = vmatpush.bf16.msrb.mxu0 %v1592_v6  ;;  %v1720_v18 = vpack.c.bf16 %v1368_v13, %v1360_v8  ;;  %v584_v19 = vunpack.c.1.s8 %v424_v46  ;;  %v704_v20 = vunpack.c.0.s8 %v456_v11  ;;  %v9437_v25 = vadd.f32 %v9428_v34, %v1906_v17  ;;  %v441_v13 = vld [vmem:[#allocation2 + $0xf8] sm:$0xff] }
 0x1f7   :  { %2147 = vmatpush.bf16.msrb.mxu1 %v1656_v15  ;;  %v1784_v24 = vpack.c.bf16 %v1496_v16, %v1488_v14  ;;  %v1088_v26 = vcvt.s32.f32 %v576_v51  ;;  %v712_v28 = vunpack.c.1.s8 %v456_v11  ;;  %v832_v33 = vunpack.c.0.s8 %v488_v53 }
 0x1f8   :  { %2160 = vmatpush.bf16.msrb.mxu2 %v1720_v18  ;;  %v1096_v27 = vcvt.s32.f32 %v584_v19  ;;  %v1216_v29 = vcvt.s32.f32 %v704_v20  ;;  %v840_v31 = vunpack.c.1.s8 %v488_v53  ;;  %v960_v35 = vunpack.c.0.s8 %v520_v57  ;;  %v473_v20 = vld [vmem:[#allocation2 + $0x1f8] sm:$0xff] }
 0x1f9   :  { %2173 = vmatpush.bf16.msrb.mxu3 %v1784_v24  ;;  %v1224_v37 = vcvt.s32.f32 %v712_v28  ;;  %v968_v38 = vunpack.c.1.s8 %v520_v57  ;;  %v1344_v40 = vcvt.s32.f32 %v832_v33  ;;  %v560_v46 = vunpack.c.2.s8 %v416_v36  ;;  %v9439_v28 = vld [vmem:[#allocation2 + $0x2f8] sm:$0xff]  ;;  %v9443_v33 = vpop.f32.mrf.mxu1 }
 0x1fa   :  { %v1584_v23 = vpack.c.bf16 %v1096_v27, %v1088_v26  ;;  %v1352_v42 = vcvt.s32.f32 %v840_v31  ;;  %v1472_v43 = vcvt.s32.f32 %v960_v35  ;;  %v568_v11 = vunpack.c.3.s8 %v416_v36 }
 0x1fb   :  { %v1648_v34 = vpack.c.bf16 %v1224_v37, %v1216_v29  ;;  %v1480_v45 = vcvt.s32.f32 %v968_v38  ;;  %v688_v56 = vunpack.c.2.s8 %v448_v39  ;;  %v1072_v48 = vcvt.s32.f32 %v560_v46  ;;  %v9441_v29 = vpop.f32.mrf.mxu0  ;;  %v537_v37 = vld [vmem:[#allocation2 + $0x3f8] sm:$0xff]  ;;  %v9446_v46 = vpop.f32.mrf.mxu2 }
 0x1fc   :  { %2135 = vmatpush.bf16.msrb.mxu0 %v1584_v23  ;;  %v1712_v9 = vpack.c.bf16 %v1352_v42, %v1344_v40  ;;  %v696_v53 = vunpack.c.3.s8 %v448_v39  ;;  %v1080_v21 = vcvt.s32.f32 %v568_v11  ;;  %v816_v54 = vunpack.c.2.s8 %v480_v58 }
 0x1fd   :  { %2148 = vmatpush.bf16.msrb.mxu1 %v1648_v34  ;;  %v1776_v52 = vpack.c.bf16 %v1480_v45, %v1472_v43  ;;  %v1200_v22 = vcvt.s32.f32 %v688_v56  ;;  %v824_v57 = vunpack.c.3.s8 %v480_v58  ;;  %v944_v59 = vunpack.c.2.s8 %v512_v47 }
 0x1fe   :  { %2161 = vmatpush.bf16.msrb.mxu2 %v1712_v9  ;;  %v1208_v55 = vcvt.s32.f32 %v696_v53  ;;  %v952_v60 = vunpack.c.3.s8 %v512_v47  ;;  %v1576_v44 = vpack.c.bf16 %v1080_v21, %v1072_v48  ;;  %v1328_v62 = vcvt.s32.f32 %v816_v54  ;;  %v9450_v53 = vpop.f32.mrf.mxu3 }
 0x1ff   :  { %2174 = vmatpush.bf16.msrb.mxu3 %v1776_v52  ;;  %v544_v63 = vunpack.c.0.s8 %v416_v36  ;;  %v1336_v1 = vcvt.s32.f32 %v824_v57  ;;  %v1456_v3 = vcvt.s32.f32 %v944_v59  ;;  %v552_v5 = vunpack.c.1.s8 %v416_v36 }
 0x200   :  { %v1640_v0 = vpack.c.bf16 %v1208_v55, %v1200_v22  ;;  %v1464_v4 = vcvt.s32.f32 %v952_v60  ;;  %2136 = vmatpush.bf16.msrb.mxu0 %v1576_v44  ;;  %v672_v50 = vunpack.c.0.s8 %v448_v39  ;;  %v680_v8 = vunpack.c.1.s8 %v448_v39 }
 0x201   :  { %v1056_v10 = vcvt.s32.f32 %v544_v63  ;;  %v1704_v6 = vpack.c.bf16 %v1336_v1, %v1328_v62  ;;  %v800_v12 = vunpack.c.0.s8 %v480_v58  ;;  %v1064_v14 = vcvt.s32.f32 %v552_v5 }
 0x202   :  { %2149 = vmatpush.bf16.msrb.mxu1 %v1640_v0  ;;  %v1768_v7 = vpack.c.bf16 %v1464_v4, %v1456_v3  ;;  %v1184_v15 = vcvt.s32.f32 %v672_v50  ;;  %v808_v16 = vunpack.c.1.s8 %v480_v58  ;;  %v1192_v17 = vcvt.s32.f32 %v680_v8  ;;  %v433_v0 = vld [vmem:[#allocation2 + $0xb8] sm:$0xff]  ;;  %v1946_v3 = vpop.f32.mrf.mxu1 }
 0x203   :  { %2162 = vmatpush.bf16.msrb.mxu2 %v1704_v6  ;;  %v1312_v51 = vcvt.s32.f32 %v800_v12  ;;  %v928_v18 = vunpack.c.0.s8 %v512_v47  ;;  %v936_v19 = vunpack.c.1.s8 %v512_v47  ;;  %v1568_v24 = vpack.c.bf16 %v1064_v14, %v1056_v10  ;;  %v1933_v1 = vpop.f32.mrf.mxu0  ;;  %v465_v12 = vld [vmem:[#allocation2 + $0x1b8] sm:$0xff] }
 0x204   :  { %2175 = vmatpush.bf16.msrb.mxu3 %v1768_v7  ;;  %v1320_v26 = vcvt.s32.f32 %v808_v16  ;;  %v657_v27 = vunpack.c.2.s8 %v441_v13  ;;  %v1632_v31 = vpack.c.bf16 %v1192_v17, %v1184_v15  ;;  %v665_v23 = vunpack.c.3.s8 %v441_v13  ;;  %v497_v17 = vld [vmem:[#allocation2 + $0x2b8] sm:$0xff] }
 0x205   :  { %v1440_v35 = vcvt.s32.f32 %v928_v18  ;;  %v1448_v36 = vcvt.s32.f32 %v936_v19  ;;  %2137 = vmatpush.bf16.msrb.mxu0 %v1568_v24  ;;  %v785_v40 = vunpack.c.2.s8 %v473_v20  ;;  %v793_v34 = vunpack.c.3.s8 %v473_v20  ;;  %v425_v3 = vld [vmem:[#allocation2 + $0x78] sm:$0xff] }
 0x206   :  { %v1696_v38 = vpack.c.bf16 %v1320_v26, %v1312_v51  ;;  %v1169_v39 = vcvt.s32.f32 %v657_v27  ;;  %2150 = vmatpush.bf16.msrb.mxu1 %v1632_v31  ;;  %v1177_v43 = vcvt.s32.f32 %v665_v23  ;;  %v913_v45 = vunpack.c.2.s8 %v9439_v28  ;;  %v1959_v51 = vpop.f32.mrf.mxu2 }
 0x207   :  { %v1760_v42 = vpack.c.bf16 %v1448_v36, %v1440_v35  ;;  %v1297_v58 = vcvt.s32.f32 %v785_v40  ;;  %v921_v9 = vunpack.c.3.s8 %v9439_v28  ;;  %v1041_v11 = vunpack.c.2.s8 %v537_v37  ;;  %v529_v35 = vld [vmem:[#allocation2 + $0x3b8] sm:$0xff]  ;;  %v1972_v36 = vpop.f32.mrf.mxu3 }
 0x208   :  { %2163 = vmatpush.bf16.msrb.mxu2 %v1696_v38  ;;  %v1625_v56 = vpack.c.bf16 %v1177_v43, %v1169_v39  ;;  %v1305_v47 = vcvt.s32.f32 %v793_v34  ;;  %v1425_v52 = vcvt.s32.f32 %v913_v45  ;;  %v1049_v48 = vunpack.c.3.s8 %v537_v37  ;;  %2138 = vmatmul.bf16.vlgmr.msrb.gmra.mxu0 %v9373_v61 }
 0x209   :  { %2176 = vmatpush.bf16.msrb.mxu3 %v1760_v42  ;;  %v1433_v21 = vcvt.s32.f32 %v921_v9  ;;  %v1553_v22 = vcvt.s32.f32 %v1041_v11  ;;  %v641_v54 = vunpack.c.0.s8 %v441_v13  ;;  %2151 = vmatmul.bf16.vlgmr.msrb.gmra.mxu1 %v9375_v30  ;;  %v649_v59 = vunpack.c.1.s8 %v441_v13 }
 0x20a   :  { %2182 = vmatpush.bf16.msra.mxu0 %v1625_v56  ;;  %v1689_v55 = vpack.c.bf16 %v1305_v47, %v1297_v58  ;;  %v1561_v57 = vcvt.s32.f32 %v1049_v48  ;;  %v769_v60 = vunpack.c.0.s8 %v473_v20  ;;  %v777_v63 = vunpack.c.1.s8 %v473_v20 }
 0x20b   :  { %2164 = vmatmul.bf16.vlgmr.msrb.gmra.mxu2 %v9377_v32  ;;  %v1753_v44 = vpack.c.bf16 %v1433_v21, %v1425_v52  ;;  %v1153_v62 = vcvt.s32.f32 %v641_v54  ;;  %v1161_v5 = vcvt.s32.f32 %v649_v59  ;;  %v897_v50 = vunpack.c.0.s8 %v9439_v28 }
 0x20c   :  { %2177 = vmatmul.bf16.vlgmr.msrb.gmra.mxu3 %v9379_v41  ;;  %2195 = vmatpush.bf16.msra.mxu1 %v1689_v55  ;;  %v1817_v4 = vpack.c.bf16 %v1561_v57, %v1553_v22  ;;  %v1281_v10 = vcvt.s32.f32 %v769_v60  ;;  %v1289_v6 = vcvt.s32.f32 %v777_v63  ;;  %v905_v7 = vunpack.c.1.s8 %v9439_v28 }
 0x20d   :  { %2208 = vmatpush.bf16.msra.mxu2 %v1753_v44  ;;  %v1025_v8 = vunpack.c.0.s8 %v537_v37  ;;  %v1617_v13 = vpack.c.bf16 %v1161_v5, %v1153_v62  ;;  %v1409_v14 = vcvt.s32.f32 %v897_v50  ;;  %v1033_v15 = vunpack.c.1.s8 %v537_v37 }
 0x20e   :  { %2221 = vmatpush.bf16.msra.mxu3 %v1817_v4  ;;  %v625_v16 = vunpack.c.2.s8 %v433_v0  ;;  %v1681_v18 = vpack.c.bf16 %v1289_v6, %v1281_v10  ;;  %v1417_v19 = vcvt.s32.f32 %v905_v7  ;;  %v633_v26 = vunpack.c.3.s8 %v433_v0  ;;  %v457_v10 = vld [vmem:[#allocation2 + $0x178] sm:$0xff] }
 0x20f   :  { %v1537_v20 = vcvt.s32.f32 %v1025_v8  ;;  %2183 = vmatpush.bf16.msra.mxu0 %v1617_v13  ;;  %v1545_v24 = vcvt.s32.f32 %v1033_v15  ;;  %v753_v31 = vunpack.c.2.s8 %v465_v12  ;;  %v761_v23 = vunpack.c.3.s8 %v465_v12  ;;  %v489_v8 = vld [vmem:[#allocation2 + $0x278] sm:$0xff] }
 0x210   :  { %v1137_v27 = vcvt.s32.f32 %v625_v16  ;;  %2196 = vmatpush.bf16.msra.mxu1 %v1681_v18  ;;  %v1745_v28 = vpack.c.bf16 %v1417_v19, %v1409_v14  ;;  %v881_v38 = vunpack.c.2.s8 %v497_v17  ;;  %v1145_v40 = vcvt.s32.f32 %v633_v26  ;;  %v521_v16 = vld [vmem:[#allocation2 + $0x378] sm:$0xff] }
 0x211   :  { %v1809_v39 = vpack.c.bf16 %v1545_v24, %v1537_v20  ;;  %v1265_v37 = vcvt.s32.f32 %v753_v31  ;;  %v889_v42 = vunpack.c.3.s8 %v497_v17  ;;  %v1273_v43 = vcvt.s32.f32 %v761_v23 }
 0x212   :  { %2209 = vmatpush.bf16.msra.mxu2 %v1745_v28  ;;  %v1393_v34 = vcvt.s32.f32 %v881_v38  ;;  %v1009_v45 = vunpack.c.2.s8 %v529_v35  ;;  %v1609_v58 = vpack.c.bf16 %v1145_v40, %v1137_v27  ;;  %v1017_v11 = vunpack.c.3.s8 %v529_v35 }
 0x213   :  { %2222 = vmatpush.bf16.msra.mxu3 %v1809_v39  ;;  %v1401_v9 = vcvt.s32.f32 %v889_v42  ;;  %v609_v56 = vunpack.c.0.s8 %v433_v0  ;;  %v1673_v47 = vpack.c.bf16 %v1273_v43, %v1265_v37  ;;  %v617_v48 = vunpack.c.1.s8 %v433_v0 }
 0x214   :  { %v1521_v52 = vcvt.s32.f32 %v1009_v45  ;;  %2184 = vmatpush.bf16.msra.mxu0 %v1609_v58  ;;  %v1529_v22 = vcvt.s32.f32 %v1017_v11  ;;  %v737_v55 = vunpack.c.0.s8 %v465_v12  ;;  %v745_v59 = vunpack.c.1.s8 %v465_v12 }
 0x215   :  { %v1737_v21 = vpack.c.bf16 %v1401_v9, %v1393_v34  ;;  %v1121_v54 = vcvt.s32.f32 %v609_v56  ;;  %2197 = vmatpush.bf16.msra.mxu1 %v1673_v47  ;;  %v1129_v57 = vcvt.s32.f32 %v617_v48  ;;  %v865_v60 = vunpack.c.0.s8 %v497_v17 }
 0x216   :  { %v1801_v44 = vpack.c.bf16 %v1529_v22, %v1521_v52  ;;  %v1249_v62 = vcvt.s32.f32 %v737_v55  ;;  %v873_v63 = vunpack.c.1.s8 %v497_v17  ;;  %v993_v1 = vunpack.c.0.s8 %v529_v35 }
 0x217   :  { %2210 = vmatpush.bf16.msra.mxu2 %v1737_v21  ;;  %v1601_v4 = vpack.c.bf16 %v1129_v57, %v1121_v54  ;;  %v1257_v5 = vcvt.s32.f32 %v745_v59  ;;  %v1377_v0 = vcvt.s32.f32 %v865_v60  ;;  %v1001_v6 = vunpack.c.1.s8 %v529_v35  ;;  %v417_v57 = vld [vmem:[#allocation2 + $0x38] sm:$0xff] }
 0x218   :  { %2223 = vmatpush.bf16.msra.mxu3 %v1801_v44  ;;  %v1385_v50 = vcvt.s32.f32 %v873_v63  ;;  %v1505_v7 = vcvt.s32.f32 %v993_v1  ;;  %v1945_v12 = vadd.f32 %v9443_v33, %v9441_v29  ;;  %v593_v14 = vunpack.c.2.s8 %v425_v3  ;;  %v449_v44 = vld [vmem:[#allocation2 + $0x138] sm:$0xff] }
 0x219   :  { %2185 = vmatpush.bf16.msra.mxu0 %v1601_v4  ;;  %v1665_v13 = vpack.c.bf16 %v1257_v5, %v1249_v62  ;;  %v601_v15 = vunpack.c.3.s8 %v425_v3  ;;  %v1513_v51 = vcvt.s32.f32 %v1001_v6  ;;  %v721_v18 = vunpack.c.2.s8 %v457_v10  ;;  %v513_v6 = vld [vmem:[#allocation2 + $0x338] sm:$0xff] }
 0x21a   :  { %v1729_v17 = vpack.c.bf16 %v1385_v50, %v1377_v0  ;;  %v729_v19 = vunpack.c.3.s8 %v457_v10  ;;  %v1105_v20 = vcvt.s32.f32 %v593_v14  ;;  %v849_v26 = vunpack.c.2.s8 %v489_v8  ;;  %v481_v50 = vld [vmem:[#allocation2 + $0x238] sm:$0xff] }
 0x21b   :  { %2198 = vmatpush.bf16.msra.mxu1 %v1665_v13  ;;  %v1113_v24 = vcvt.s32.f32 %v601_v15  ;;  %v857_v27 = vunpack.c.3.s8 %v489_v8  ;;  %v1793_v31 = vpack.c.bf16 %v1513_v51, %v1505_v7  ;;  %v1233_v35 = vcvt.s32.f32 %v721_v18  ;;  %v1983_v7 = vpop.f32.mrf.mxu0 }
 0x21c   :  { %2211 = vmatpush.bf16.msra.mxu2 %v1729_v17  ;;  %v1241_v36 = vcvt.s32.f32 %v729_v19  ;;  %v977_v28 = vunpack.c.2.s8 %v521_v16  ;;  %v1361_v38 = vcvt.s32.f32 %v849_v26  ;;  %v985_v33 = vunpack.c.3.s8 %v521_v16  ;;  %v2009_v17 = vpop.f32.mrf.mxu2 }
 0x21d   :  { %v1593_v23 = vpack.c.bf16 %v1113_v24, %v1105_v20  ;;  %v1369_v29 = vcvt.s32.f32 %v857_v27  ;;  %2224 = vmatpush.bf16.msra.mxu3 %v1793_v31  ;;  %v1958_v43 = vadd.f32 %v9446_v46, %v1945_v12  ;;  %v577_v34 = vunpack.c.0.s8 %v425_v3  ;;  %v2022_v27 = vpop.f32.mrf.mxu3 }
 0x21e   :  { %v1657_v39 = vpack.c.bf16 %v1241_v36, %v1233_v35  ;;  %v1489_v40 = vcvt.s32.f32 %v977_v28  ;;  %v1497_v42 = vcvt.s32.f32 %v985_v33  ;;  %v585_v45 = vunpack.c.1.s8 %v425_v3 }
 0x21f   :  { %2186 = vmatpush.bf16.msra.mxu0 %v1593_v23  ;;  %v1721_v37 = vpack.c.bf16 %v1369_v29, %v1361_v38  ;;  %v705_v58 = vunpack.c.0.s8 %v457_v10  ;;  %v713_v9 = vunpack.c.1.s8 %v457_v10  ;;  %v9461_v56 = vadd.f32 %v9450_v53, %v1958_v43 }
 0x220   :  { %2199 = vmatpush.bf16.msra.mxu1 %v1657_v39  ;;  %v1785_v11 = vpack.c.bf16 %v1497_v42, %v1489_v40  ;;  %v1089_v47 = vcvt.s32.f32 %v577_v34  ;;  %v1097_v52 = vcvt.s32.f32 %v585_v45  ;;  %v833_v22 = vunpack.c.0.s8 %v489_v8 }
 0x221   :  { %2212 = vmatpush.bf16.msra.mxu2 %v1721_v37  ;;  %v1217_v48 = vcvt.s32.f32 %v705_v58  ;;  %v1225_v21 = vcvt.s32.f32 %v713_v9  ;;  %v841_v54 = vunpack.c.1.s8 %v489_v8  ;;  %v961_v55 = vunpack.c.0.s8 %v521_v16  ;;  %v1996_v8 = vpop.f32.mrf.mxu1 }
 0x222   :  { %2225 = vmatpush.bf16.msra.mxu3 %v1785_v11  ;;  %v1585_v46 = vpack.c.bf16 %v1097_v52, %v1089_v47  ;;  %v969_v60 = vunpack.c.1.s8 %v521_v16  ;;  %v1345_v62 = vcvt.s32.f32 %v833_v22  ;;  %v561_v3 = vunpack.c.2.s8 %v417_v57 }
 0x223   :  { %v1649_v59 = vpack.c.bf16 %v1225_v21, %v1217_v48  ;;  %v1353_v63 = vcvt.s32.f32 %v841_v54  ;;  %v1473_v1 = vcvt.s32.f32 %v961_v55  ;;  %v569_v4 = vunpack.c.3.s8 %v417_v57  ;;  %v1985_v45 = vpop.f32.mrf.mxu0 }
 0x224   :  { %2187 = vmatpush.bf16.msra.mxu0 %v1585_v46  ;;  %v1481_v53 = vcvt.s32.f32 %v969_v60  ;;  %v689_v10 = vunpack.c.2.s8 %v449_v44  ;;  %v697_v0 = vunpack.c.3.s8 %v449_v44  ;;  %v1073_v12 = vcvt.s32.f32 %v561_v3  ;;  %v2011_v54 = vpop.f32.mrf.mxu2 }
 0x225   :  { %2200 = vmatpush.bf16.msra.mxu1 %v1649_v59  ;;  %v1713_v5 = vpack.c.bf16 %v1353_v63, %v1345_v62  ;;  %v1081_v14 = vcvt.s32.f32 %v569_v4  ;;  %v817_v18 = vunpack.c.2.s8 %v481_v50  ;;  %v825_v19 = vunpack.c.3.s8 %v481_v50 }
 0x226   :  { %v1777_v13 = vpack.c.bf16 %v1481_v53, %v1473_v1  ;;  %v1201_v15 = vcvt.s32.f32 %v689_v10  ;;  %v1209_v16 = vcvt.s32.f32 %v697_v0  ;;  %v945_v20 = vunpack.c.2.s8 %v513_v6 }
 0x227   :  { %2213 = vmatpush.bf16.msra.mxu2 %v1713_v5  ;;  %v1577_v51 = vpack.c.bf16 %v1081_v14, %v1073_v12  ;;  %v953_v26 = vunpack.c.3.s8 %v513_v6  ;;  %v1329_v31 = vcvt.s32.f32 %v817_v18  ;;  %v1337_v35 = vcvt.s32.f32 %v825_v19 }
 0x228   :  { %2226 = vmatpush.bf16.msra.mxu3 %v1777_v13  ;;  %v1641_v24 = vpack.c.bf16 %v1209_v16, %v1201_v15  ;;  %v1457_v36 = vcvt.s32.f32 %v945_v20  ;;  %v545_v28 = vunpack.c.0.s8 %v417_v57  ;;  %v553_v38 = vunpack.c.1.s8 %v417_v57 }
 0x229   :  { %2188 = vmatpush.bf16.msra.mxu0 %v1577_v51  ;;  %v1465_v23 = vcvt.s32.f32 %v953_v26  ;;  %v673_v29 = vunpack.c.0.s8 %v449_v44  ;;  %v1705_v33 = vpack.c.bf16 %v1337_v35, %v1329_v31  ;;  %v681_v40 = vunpack.c.1.s8 %v449_v44  ;;  %v1998_v58 = vpop.f32.mrf.mxu1  ;;  %v2024_v44 = vpop.f32.mrf.mxu3 }
 0x22a   :  { %2201 = vmatpush.bf16.msra.mxu1 %v1641_v24  ;;  %v1057_v39 = vcvt.s32.f32 %v545_v28  ;;  %v801_v37 = vunpack.c.0.s8 %v481_v50  ;;  %v1065_v43 = vcvt.s32.f32 %v553_v38  ;;  %v809_v11 = vunpack.c.1.s8 %v481_v50 }
 0x22b   :  { %v1769_v42 = vpack.c.bf16 %v1465_v23, %v1457_v36  ;;  %v1185_v34 = vcvt.s32.f32 %v673_v29  ;;  %2214 = vmatpush.bf16.msra.mxu2 %v1705_v33  ;;  %v1193_v9 = vcvt.s32.f32 %v681_v40  ;;  %v929_v52 = vunpack.c.0.s8 %v513_v6 }
 0x22c   :  { %v1313_v47 = vcvt.s32.f32 %v801_v37  ;;  %v1569_v48 = vpack.c.bf16 %v1065_v43, %v1057_v39  ;;  %v937_v21 = vunpack.c.1.s8 %v513_v6  ;;  %v1997_v22 = vadd.f32 %v1996_v8, %v1983_v7 }
 0x22d   :  { %2227 = vmatpush.bf16.msra.mxu3 %v1769_v42  ;;  %v1633_v55 = vpack.c.bf16 %v1193_v9, %v1185_v34  ;;  %v1321_v57 = vcvt.s32.f32 %v809_v11  ;;  %v1441_v46 = vcvt.s32.f32 %v929_v52  ;;  %v2243_v36 = vrot.slane %v9437_v25, 4 }
 0x22e   :  { %2189 = vmatpush.bf16.msra.mxu0 %v1569_v48  ;;  %v1449_v59 = vcvt.s32.f32 %v937_v21  ;;  %v2010_v60 = vadd.f32 %v2009_v17, %v1997_v22  ;;  %v2237_v58 = vrot.slane %v9419_v2, 4 }
 0x22f   :  { %2202 = vmatpush.bf16.msra.mxu1 %v1633_v55  ;;  %v1697_v62 = vpack.c.bf16 %v1321_v57, %v1313_v47  ;;  %v2244_v42 = vadd.f32 %v2243_v36, %v9437_v25 }
 0x230   :  { %v1761_v63 = vpack.c.bf16 %v1449_v59, %v1441_v46  ;;  %v9463_v1 = vadd.f32 %v2022_v27, %v2010_v60  ;;  %v2249_v27 = vrot.slane %v9461_v56, 4  ;;  %v2238_v55 = vadd.f32 %v2237_v58, %v9419_v2 }
 0x231   :  { %2215 = vmatpush.bf16.msra.mxu2 %v1697_v62  ;;  %2190 = vmatmul.bf16.vlgmr.msra.gmra.mxu0 %v9373_v61  ;;  %v2245_v48 = vrot.slane %v2244_v42, 2 }
 0x232   :  { %2228 = vmatpush.bf16.msra.mxu3 %v1761_v63  ;;  %2203 = vmatmul.bf16.vlgmr.msra.gmra.mxu1 %v9375_v30  ;;  %v2255_v24 = vrot.slane %v9463_v1, 4  ;;  %v2250_v39 = vadd.f32 %v2249_v27, %v9461_v56  ;;  %v2239_v63 = vrot.slane %v2238_v55, 2 }
 0x233   :  { %v2246_v60 = vadd.f32 %v2245_v48, %v2244_v42 }
 0x234   :  { %2216 = vmatmul.bf16.vlgmr.msra.gmra.mxu2 %v9377_v32  ;;  %v2035_v53 = vpop.f32.mrf.mxu0  ;;  %v2256_v28 = vadd.f32 %v2255_v24, %v9463_v1  ;;  %v2251_v9 = vrot.slane %v2250_v39, 2 }
 0x235   :  { %2229 = vmatmul.bf16.vlgmr.msra.gmra.mxu3 %v9379_v41  ;;  %v2048_v3 = vpop.f32.mrf.mxu1 }
 0x236   :  { %v2049_v4 = vadd.f32 %v2048_v3, %v2035_v53  ;;  %v2257_v43 = vrot.slane %v2256_v28, 2  ;;  %v2252_v57 = vadd.f32 %v2251_v9, %v2250_v39 }
 0x238   :  { %v2258_v21 = vadd.f32 %v2257_v43, %v2256_v28  ;;  %v2253_v53 = vrot.slane %v2252_v57, 1 }
 0x23a   :  { %v2259_v44 = vrot.slane %v2258_v21, 1 }
 0x23c   :  { %v2061_v5 = vpop.f32.mrf.mxu2  ;;  %v2037_v6 = vpop.f32.mrf.mxu0 }
 0x23d   :  { %v2062_v10 = vadd.f32 %v2061_v5, %v2049_v4  ;;  %v2074_v0 = vpop.f32.mrf.mxu3  ;;  %v2050_v7 = vpop.f32.mrf.mxu1  ;;  %v2247_v5 = vrot.slane %v2246_v60, 1  ;;  %v2240_v6 = vadd.f32 %v2239_v63, %v2238_v55 }
 0x23e   :  { %v2254_v7 = vadd.f32 %v2253_v53, %v2252_v57 }
 0x23f   :  { %v9469_v50 = vadd.f32 %v2074_v0, %v2062_v10  ;;  %v2260_v10 = vadd.f32 %v2259_v44, %v2258_v21 }
 0x241   :  { %v2261_v40 = vrot.slane %v9469_v50, 4 }
 0x243   :  { %v2262_v11 = vadd.f32 %v2261_v40, %v9469_v50 }
 0x244   :  { %v2063_v8 = vpop.f32.mrf.mxu2 }
 0x245   :  { %v2076_v13 = vpop.f32.mrf.mxu3  ;;  %v2263_v46 = vrot.slane %v2262_v11, 2 }
 0x247   :  { %v2264_v3 = vadd.f32 %v2263_v46, %v2262_v11 }
 0x249   :  { %v2265_v8 = vrot.slane %v2264_v3, 1 }
 0x25d   :  { %v2087_v61 = vpop.f32.mrf.mxu0 }
 0x25e   :  { %v2100_v12 = vpop.f32.mrf.mxu1 }
 0x25f   :  { %v2101_v14 = vadd.f32 %v2100_v12, %v2087_v61  ;;  %v2248_v61 = vadd.f32 %v2247_v5, %v2246_v60  ;;  %v9490_v12 = vmul.f32 %v2260_v10, %v9331_v49 }
 0x265   :  { %v2113_v30 = vpop.f32.mrf.mxu2  ;;  %v2089_v41 = vpop.f32.mrf.mxu0 }
 0x266   :  { %v2126_v15 = vpop.f32.mrf.mxu3  ;;  %v2114_v32 = vadd.f32 %v2113_v30, %v2101_v14  ;;  %v2102_v17 = vpop.f32.mrf.mxu1  ;;  %v2241_v30 = vrot.slane %v2240_v6, 1 }
 0x267   :  { %v9496_v17 = vmul.f32 %v2248_v61, %v9331_v49 }
 0x268   :  { %v9471_v16 = vadd.f32 %v2126_v15, %v2114_v32  ;;  %v9493_v15 = vmul.f32 %v2254_v7, %v9331_v49  ;;  %v2266_v32 = vadd.f32 %v2265_v8, %v2264_v3 }
 0x269   :  { %v2294_v27 = vsub.f32 %v9437_v25, %v9496_v17 }
 0x26a   :  { %v2267_v33 = vrot.slane %v9471_v16, 4  ;;  %v9506_v24 = vmul.f32 %v2266_v32, %v9331_v49 }
 0x26c   :  { %v2268_v45 = vadd.f32 %v2267_v33, %v9471_v16 }
 0x26d   :  { %v2115_v51 = vpop.f32.mrf.mxu2 }
 0x26e   :  { %v2128_v18 = vpop.f32.mrf.mxu3  ;;  %v2269_v54 = vrot.slane %v2268_v45, 2  ;;  %v2296_v51 = vsub.f32 %v9463_v1, %v9490_v12 }
 0x270   :  { %v2270_v62 = vadd.f32 %v2269_v54, %v2268_v45 }
 0x272   :  { %v2271_v0 = vrot.slane %v2270_v62, 1 }
 0x274   :  { %v2272_v14 = vadd.f32 %v2271_v0, %v2270_v62 }
 0x276   :  { %v9501_v18 = vmul.f32 %v2272_v14, %v9331_v49 }
 0x285   :  { %v2139_v19 = vpop.f32.mrf.mxu0 }
 0x286   :  { %v2152_v20 = vpop.f32.mrf.mxu1 }
 0x287   :  { %v2153_v26 = vadd.f32 %v2152_v20, %v2139_v19  ;;  %v2242_v19 = vadd.f32 %v2241_v30, %v2240_v6  ;;  %v2295_v20 = vsub.f32 %v9461_v56, %v9493_v15 }
 0x289   :  { %v9516_v36 = vmul.f32 %v2242_v19, %v9331_v49  ;;  %v2303_v28 = vmul.f32 %v2295_v20, %v2295_v20  ;;  %v9524_v20 = vld [vmem:[#allocation12 + $0x30] sm:$0xff] }
 0x28b   :  { %v2293_v40 = vsub.f32 %v9419_v2, %v9516_v36  ;;  %v2321_v42 = vrot.slane %v2303_v28, 4 }
 0x28d   :  { %v2141_v35 = vpop.f32.mrf.mxu0  ;;  %v2301_v11 = vmul.f32 %v2293_v40, %v2293_v40 }
 0x28e   :  { %v2165_v31 = vpop.f32.mrf.mxu2  ;;  %v2154_v29 = vpop.f32.mrf.mxu1  ;;  %v2298_v35 = vsub.f32 %v9471_v16, %v9501_v18 }
 0x28f   :  { %v2166_v23 = vadd.f32 %v2165_v31, %v2153_v26  ;;  %v2178_v38 = vpop.f32.mrf.mxu3  ;;  %v2304_v31 = vmul.f32 %v2296_v51, %v2296_v51  ;;  %v2302_v29 = vmul.f32 %v2294_v27, %v2294_v27  ;;  %v2309_v46 = vrot.slane %v2301_v11, 4 }
 0x290   :  { %v2306_v39 = vmul.f32 %v2298_v35, %v2298_v35 }
 0x291   :  { %v9480_v37 = vadd.f32 %v2178_v38, %v2166_v23  ;;  %v2297_v23 = vsub.f32 %v9469_v50, %v9506_v24  ;;  %v2327_v33 = vrot.slane %v2304_v31, 4  ;;  %v2315_v45 = vrot.slane %v2302_v29, 4 }
 0x292   :  { %v2339_v9 = vrot.slane %v2306_v39, 4 }
 0x293   :  { %v2273_v34 = vrot.slane %v9480_v37, 4  ;;  %v2305_v43 = vmul.f32 %v2297_v23, %v2297_v23  ;;  %v2328_v58 = vadd.f32 %v2327_v33, %v2304_v31  ;;  %v9531_v33 = vmul.f32 %v9524_v20, %v9524_v20 }
 0x294   :  { %v2340_v57 = vadd.f32 %v2339_v9, %v2306_v39 }
 0x295   :  { %v2274_v47 = vadd.f32 %v2273_v34, %v9480_v37  ;;  %v2329_v54 = vrot.slane %v2328_v58, 2 }
 0x296   :  { %v2167_v52 = vpop.f32.mrf.mxu2  ;;  %v2341_v53 = vrot.slane %v2340_v57, 2 }
 0x297   :  { %v2180_v22 = vpop.f32.mrf.mxu3  ;;  %v2275_v59 = vrot.slane %v2274_v47, 2  ;;  %v2333_v52 = vrot.slane %v2305_v43, 4  ;;  %v2330_v63 = vadd.f32 %v2329_v54, %v2328_v58  ;;  %v2371_v58 = vperm.slane %v9531_v33, 3 }
 0x298   :  { %v2316_v22 = vadd.f32 %v2315_v45, %v2302_v29  ;;  %v2342_v14 = vadd.f32 %v2341_v53, %v2340_v57 }
 0x299   :  { %v2276_v4 = vadd.f32 %v2275_v59, %v2274_v47  ;;  %v2322_v47 = vadd.f32 %v2321_v42, %v2303_v28  ;;  %v2334_v60 = vadd.f32 %v2333_v52, %v2305_v43  ;;  %v2331_v8 = vrot.slane %v2330_v63, 1 }
 0x29a   :  { %v2317_v62 = vrot.slane %v2316_v22, 2  ;;  %v2343_v23 = vrot.slane %v2342_v14, 1 }
 0x29b   :  { %v2277_v13 = vrot.slane %v2276_v4, 1  ;;  %v2323_v59 = vrot.slane %v2322_v47, 2  ;;  %v2335_v10 = vrot.slane %v2334_v60, 2  ;;  %v2332_v28 = vadd.f32 %v2331_v8, %v2330_v63 }
 0x29c   :  { %v2318_v7 = vadd.f32 %v2317_v62, %v2316_v22  ;;  %v2370_v22 = vperm.slane %v9531_v33, 2  ;;  %v2373_v62 = vperm.slane %v9531_v33, 5 }
 0x29d   :  { %v2278_v41 = vadd.f32 %v2277_v13, %v2276_v4  ;;  %v2310_v4 = vadd.f32 %v2309_v46, %v2301_v11  ;;  %v2324_v5 = vadd.f32 %v2323_v59, %v2322_v47  ;;  %v2336_v19 = vadd.f32 %v2335_v10, %v2334_v60 }
 0x29e   :  { %v2319_v35 = vrot.slane %v2318_v7, 1  ;;  %v2360_v45 = vmul.f32 %v2332_v28, %v9331_v49  ;;  %v2344_v11 = vadd.f32 %v2343_v23, %v2342_v14  ;;  %v2369_v59 = vperm.slane %v9531_v33, 1 }
 0x29f   :  { %v9509_v26 = vmul.f32 %v2278_v41, %v9331_v49  ;;  %v2311_v41 = vrot.slane %v2310_v4, 2  ;;  %v2325_v51 = vrot.slane %v2324_v5, 1  ;;  %v2337_v40 = vrot.slane %v2336_v19, 1 }
 0x2a0   :  { %v2387_v60 = vmul.f32 %v2371_v58, %v2360_v45 }
 0x2a1   :  { %v2299_v38 = vsub.f32 %v9480_v37, %v9509_v26  ;;  %v2312_v29 = vadd.f32 %v2311_v41, %v2310_v4  ;;  %v2326_v39 = vadd.f32 %v2325_v51, %v2324_v5  ;;  %v2338_v54 = vadd.f32 %v2337_v40, %v2336_v19 }
 0x2a2   :  { %v2372_v5 = vperm.slane %v9531_v33, 4  ;;  %v9546_v8 = vadd.f32 1e-05, %v2387_v60 }
 0x2a3   :  { %v2307_v34 = vmul.f32 %v2299_v38, %v2299_v38  ;;  %v2361_v4 = vmul.f32 %v2338_v54, %v9331_v49 }
 0x2a4   :  { %8997 = vrsqrt.f32 %v9546_v8  ;;  %vm2436_vm1 = vweird.f32 %v9546_v8 }
 0x2a5   :  { %v2345_v48 = vrot.slane %v2307_v34, 4  ;;  %v2388_v41 = vmul.f32 %v2372_v5, %v2361_v4 }
 0x2a7   :  { %v2346_v44 = vadd.f32 %v2345_v48, %v2307_v34  ;;  %v2320_v34 = vadd.f32 %v2319_v35, %v2318_v7  ;;  %v2313_v48 = vrot.slane %v2312_v29, 1 }
 0x2a9   :  { %v2347_v0 = vrot.slane %v2346_v44, 2  ;;  %v2358_v46 = vmul.f32 %v2320_v34, %v9331_v49  ;;  %v2314_v53 = vadd.f32 %v2313_v48, %v2312_v29 }
 0x2ab   :  { %v2348_v27 = vadd.f32 %v2347_v0, %v2346_v44  ;;  %v2362_v44 = vmul.f32 %v2344_v11, %v9331_v49  ;;  %v2374_v0 = vperm.slane %v9531_v33, 6  ;;  %v2385_v7 = vmul.f32 %v2369_v59, %v2358_v46 }
 0x2ac   :  { %v2357_v14 = vmul.f32 %v2314_v53, %v9331_v49  ;;  %v2375_v46 = vperm.slane %v9531_v33, 7 }
 0x2ad   :  { %v2349_v42 = vrot.slane %v2348_v27, 1 }
 0x2ae   :  { %v2191_v21 = vpop.f32.mrf.mxu0 }
 0x2af   :  { %v2204_v55 = vpop.f32.mrf.mxu1 }
 0x2b0   :  { %v2205_v3 = vadd.f32 %v2204_v55, %v2191_v21  ;;  %v2359_v21 = vmul.f32 %v2326_v39, %v9331_v49  ;;  %v2350_v55 = vadd.f32 %v2349_v42, %v2348_v27  ;;  %v9557_v27 = vadd.f32 1e-05, %v2385_v7  ;;  %v9569_v42 = vpop.eup %8997 }
 0x2b1   :  { %v2431_v58 = vmul.f32 %v9569_v42, %v9546_v8  ;;  %vm2437_vm2 = vweird.f32 %v9569_v42 }
 0x2b2   :  { %v2363_v10 = vmul.f32 %v2350_v55, %v9331_v49  ;;  %vm9620_vm5 = vmor %vm2436_vm1, %vm2437_vm2  ;;  %vm2416_vm6 = vweird.f32 %v9557_v27 }
 0x2b3   :  { %v2432_v55 = vmul.f32 %v9569_v42, %v2431_v58 }
 0x2b4   :  { %v2390_v51 = vmul.f32 %v2374_v0, %v2363_v10 }
 0x2b5   :  { %v2433_v4 = vmul.f32 0.5, %v2432_v55 }
 0x2b6   :  { %v2193_v6 = vpop.f32.mrf.mxu0  ;;  %v9565_v29 = vadd.f32 1e-05, %v2390_v51 }
 0x2b7   :  { %v2217_v13 = vpop.f32.mrf.mxu2  ;;  %v2206_v61 = vpop.f32.mrf.mxu1 }
 0x2b8   :  { %v2218_v30 = vadd.f32 %v2217_v13, %v2205_v3  ;;  %v2230_v32 = vpop.f32.mrf.mxu3  ;;  %v2386_v3 = vmul.f32 %v2370_v22, %v2359_v21  ;;  %v2389_v13 = vmul.f32 %v2373_v62, %v2362_v44 }
 0x2ba   :  { %v9526_v31 = vadd.f32 %v2230_v32, %v2218_v30  ;;  %v2368_v30 = vperm.slane %v9531_v33, 0  ;;  %v9553_v32 = vadd.f32 1e-05, %v2386_v3  ;;  %v9560_v35 = vadd.f32 1e-05, %v2389_v13 }
 0x2bc   :  { %v2279_v38 = vrot.slane %v9526_v31, 4  ;;  %v2384_v23 = vmul.f32 %v2368_v30, %v2357_v14  ;;  %8999 = vrsqrt.f32 %v9553_v32  ;;  %v2434_v30 = vsub.f32 1.5, %v2433_v4 }
 0x2bd   :  { %9001 = vrsqrt.f32 %v9557_v27  ;;  %vm2426_vm3 = vweird.f32 %v9553_v32  ;;  %vm2456_vm9 = vweird.f32 %v9560_v35 }
 0x2be   :  { %v2280_v43 = vadd.f32 %v2279_v38, %v9526_v31  ;;  %v9563_v38 = vadd.f32 1e-05, %v2388_v41  ;;  %9003 = vrsqrt.f32 %v9560_v35 }
 0x2bf   :  { %v2219_v9 = vpop.f32.mrf.mxu2 }
 0x2c0   :  { %v2281_v47 = vrot.slane %v2280_v43, 2  ;;  %v2232_v52 = vpop.f32.mrf.mxu3  ;;  %9005 = vrsqrt.f32 %v9563_v38  ;;  %vm2446_vm11 = vweird.f32 %v9563_v38 }
 0x2c1   :  { %9007 = vrsqrt.f32 %v9565_v29 }
 0x2c2   :  { %v2282_v57 = vadd.f32 %v2281_v47, %v2280_v43  ;;  %v9571_v43 = vadd.f32 1e-05, %v2384_v23  ;;  %v9575_v45 = vpop.eup %8999 }
 0x2c3   :  { %v9579_v11 = vpop.eup %9001  ;;  %v2421_v52 = vmul.f32 %v9575_v45, %v9553_v32  ;;  %vm2427_vm4 = vweird.f32 %v9575_v45 }
 0x2c4   :  { %v2283_v63 = vrot.slane %v2282_v57, 1  ;;  %9009 = vrsqrt.f32 %v9571_v43  ;;  %v9582_v47 = vpop.eup %9003  ;;  %v2411_v54 = vmul.f32 %v9579_v11, %v9557_v27  ;;  %vm2417_vm7 = vweird.f32 %v9579_v11  ;;  %vm9631_vm8 = vmor %vm2426_vm3, %vm2427_vm4 }
 0x2c5   :  { %v2451_v59 = vmul.f32 %v9582_v47, %v9560_v35  ;;  %v2422_v60 = vmul.f32 %v9575_v45, %v2421_v52  ;;  %vm2457_vm10 = vweird.f32 %v9582_v47  ;;  %vm9643_vm15 = vmor %vm2416_vm6, %vm2417_vm7  ;;  %vm2466_vm4 = vweird.f32 %v9565_v29 }
 0x2c6   :  { %v2284_v6 = vadd.f32 %v2283_v63, %v2282_v57  ;;  %v9586_v21 = vpop.eup %9005  ;;  %v2412_v3 = vmul.f32 %v9579_v11, %v2411_v54  ;;  %vm9653_vm2 = vmor %vm2456_vm9, %vm2457_vm10  ;;  %vm2406_vm6 = vweird.f32 %v9571_v43 }
 0x2c7   :  { %v9588_v22 = vpop.eup %9007  ;;  %v2441_v63 = vmul.f32 %v9586_v21, %v9563_v38  ;;  %v2452_v33 = vmul.f32 %v9582_v47, %v2451_v59  ;;  %v2423_v0 = vmul.f32 0.5, %v2422_v60  ;;  %vm2447_vm13 = vweird.f32 %v9586_v21 }
 0x2c8   :  { %v9549_v61 = vmul.f32 %v2284_v6, %v9331_v49  ;;  %v2461_v53 = vmul.f32 %v9588_v22, %v9565_v29  ;;  %v2413_v14 = vmul.f32 0.5, %v2412_v3  ;;  %vm2467_vm1 = vweird.f32 %v9588_v22  ;;  %vm9657_vm3 = vmor %vm2446_vm11, %vm2447_vm13 }
 0x2c9   :  { %v2442_v7 = vmul.f32 %v9586_v21, %v2441_v63  ;;  %v2453_v41 = vmul.f32 0.5, %v2452_v33  ;;  %vm2498_vm11 = vcmask 1044484   ;;  %vm2500_vm13 = vcmask 1046534  }
 0x2ca   :  { %v2300_v19 = vsub.f32 %v9526_v31, %v9549_v61  ;;  %v9598_v62 = vpop.eup %9009  ;;  %v2462_v13 = vmul.f32 %v9588_v22, %v2461_v53 }
 0x2cb   :  { %v2401_v10 = vmul.f32 %v9598_v62, %v9571_v43  ;;  %vm2407_vm7 = vweird.f32 %v9598_v62 }
 0x2cc   :  { %v2308_v28 = vmul.f32 %v2300_v19, %v2300_v19  ;;  %v2424_v19 = vsub.f32 1.5, %v2423_v0  ;;  %v2463_v23 = vmul.f32 0.5, %v2462_v13 }
 0x2cd   :  { %v2402_v51 = vmul.f32 %v9598_v62, %v2401_v10 }
 0x2ce   :  { %v2351_v39 = vrot.slane %v2308_v28, 4  ;;  %v2425_v52 = vmul.f32 %v9575_v45, %v2424_v19  ;;  %v2464_v55 = vsub.f32 1.5, %v2463_v23 }
 0x2d0   :  { %v2352_v40 = vadd.f32 %v2351_v39, %v2308_v28  ;;  %v2443_v28 = vmul.f32 0.5, %v2442_v7  ;;  %v2414_v39 = vsub.f32 1.5, %v2413_v14  ;;  %v2429_v27 = vsel %vm9631_vm8, %v9575_v45, %v2425_v52  ;;  %vm2468_vm8 = vmor %vm2466_vm4, %vm2467_vm1  ;;  %v2234_v14 = vld [vmem:[#allocation12 + $0x8] sm:$0xff] }
 0x2d1   :  { %v2465_v35 = vmul.f32 %v9588_v22, %v2464_v55  ;;  %vm2502_vm1 = vcmask 1045508   ;;  %v2365_v19 = vmul.f32 %v9524_v20, %v2234_v14 }
 0x2d2   :  { %v2353_v34 = vrot.slane %v2352_v40, 2  ;;  %v2444_v54 = vsub.f32 1.5, %v2443_v28  ;;  %v2415_v8 = vmul.f32 %v9579_v11, %v2414_v39 }
 0x2d3   :  { %v2469_v7 = vsel %vm2468_vm8, %v9588_v22, %v2465_v35 }
 0x2d4   :  { %v2354_v9 = vadd.f32 %v2353_v34, %v2352_v40  ;;  %v2435_v40 = vmul.f32 %v9569_v42, %v2434_v30  ;;  %v2454_v34 = vsub.f32 1.5, %v2453_v41  ;;  %v2445_v63 = vmul.f32 %v9586_v21, %v2444_v54 }
 0x2d5   :  { %v2419_v3 = vsel %vm9643_vm15, %v9579_v11, %v2415_v8  ;;  %v2489_v11 = vrot.slane %v2429_v27, 6  ;;  %vm2408_vm15 = vmor %vm2406_vm6, %vm2407_vm7 }
 0x2d6   :  { %v2355_v48 = vrot.slane %v2354_v9, 1  ;;  %v2439_v32 = vsel %vm9620_vm5, %v9569_v42, %v2435_v40  ;;  %v2455_v59 = vmul.f32 %v9582_v47, %v2454_v34  ;;  %v2449_v0 = vsel %vm9657_vm3, %v9586_v21, %v2445_v63 }
 0x2d7   :  { %v2490_v45 = vrot.slane %v2439_v32, 5  ;;  %v2488_v29 = vrot.slane %v2419_v3, 7  ;;  %v2491_v21 = vrot.slane %v2449_v0, 4 }
 0x2d8   :  { %v2356_v57 = vadd.f32 %v2355_v48, %v2354_v9  ;;  %v2403_v9 = vmul.f32 0.5, %v2402_v51  ;;  %v2493_v51 = vrot.slane %v2469_v7, 2 }
 0x2d9   :  { %v2496_v30 = vsel %vm350_vm14, %v2489_v11, %v2490_v45 }
 0x2da   :  { %v2364_v44 = vmul.f32 %v2356_v57, %v9331_v49 }
 0x2dc   :  { %v2391_v5 = vmul.f32 %v2375_v46, %v2364_v44  ;;  %v2404_v44 = vsub.f32 1.5, %v2403_v9 }
 0x2de   :  { %v9608_v6 = vadd.f32 1e-05, %v2391_v5  ;;  %v2459_v5 = vsel %vm9653_vm2, %v9582_v47, %v2455_v59  ;;  %v2405_v10 = vmul.f32 %v9598_v62, %v2404_v44  ;;  %vm10472_vm2 = vcmask 1043456  }
 0x2df   :  { %v2492_v47 = vrot.slane %v2459_v5, 3 }
 0x2e0   :  { %9011 = vrsqrt.f32 %v9608_v6  ;;  %vm2476_vm9 = vweird.f32 %v9608_v6 }
 0x2e1   :  { %v2499_v23 = vsel %vm2498_vm11, %v2491_v21, %v2492_v47 }
 0x2e6   :  { %v9012_v58 = vpop.eup %9011 }
 0x2e7   :  { %v2471_v57 = vmul.f32 %v9012_v58, %v9608_v6  ;;  %vm2477_vm5 = vweird.f32 %v9012_v58  ;;  %v2409_v6 = vsel %vm2408_vm15, %v9598_v62, %v2405_v10 }
 0x2e8   :  { %vm2478_vm10 = vmor %vm2476_vm9, %vm2477_vm5  ;;  %v2495_v28 = vsel %vm348_vm12, %v2409_v6, %v2488_v29 }
 0x2e9   :  { %v2472_v60 = vmul.f32 %v9012_v58, %v2471_v57  ;;  %v2497_v40 = vsel %vm352_vm0, %v2495_v28, %v2496_v30 }
 0x2eb   :  { %v2473_v53 = vmul.f32 0.5, %v2472_v60 }
 0x2ed   :  { %v2474_v33 = vsub.f32 1.5, %v2473_v53 }
 0x2ef   :  { %v2475_v13 = vmul.f32 %v9012_v58, %v2474_v33 }
 0x2f1   :  { %v2479_v41 = vsel %vm2478_vm10, %v9012_v58, %v2475_v13 }
 0x2f2   :  { %v2494_v22 = vrot.slane %v2479_v41, 1 }
 0x2f4   :  { %v2501_v39 = vsel %vm2500_vm13, %v2493_v51, %v2494_v22 }
 0x2f5   :  { %v2503_v43 = vsel %vm2502_vm1, %v2499_v23, %v2501_v39 }
 0x2f6   :  { %v2505_v34 = vsel %vm10472_vm2, %v2497_v40, %v2503_v43 }
 0x2f7   :  { %v2507_v58 = vmul.f32 %v2505_v34, %v2365_v19 }
 0x2f9   :  { %v2509_v9 = vperm.slane %v2507_v58, 0  ;;  %v2510_v52 = vperm.slane %v2507_v58, 1  ;;  %v2511_v48 = vperm.slane %v2507_v58, 2  ;;  %v2512_v62 = vperm.slane %v2507_v58, 3 }
 0x2fa   :  { %v2513_v54 = vperm.slane %v2507_v58, 4  ;;  %v2514_v20 = vperm.slane %v2507_v58, 5  ;;  %v2515_v55 = vperm.slane %v2507_v58, 6  ;;  %v2516_v57 = vperm.slane %v2507_v58, 7 }
 0x2fb   :  { %v2526_v8 = vmul.f32 %v2510_v52, %v9496_v17  ;;  %v2527_v32 = vmul.f32 %v2511_v48, %v9493_v15  ;;  %v2528_v46 = vmul.f32 %v2512_v62, %v9490_v12  ;;  %v2525_v42 = vmul.f32 %v2509_v9, %v9516_v36 }
 0x2fc   :  { %v2529_v59 = vmul.f32 %v2513_v54, %v9506_v24  ;;  %v2530_v60 = vmul.f32 %v2514_v20, %v9501_v18  ;;  %v2531_v44 = vmul.f32 %v2515_v55, %v9509_v26  ;;  %v2532_v27 = vmul.f32 %v2516_v57, %v9549_v61  ;;  %v2235_v24 = vld [vmem:[#allocation12 + $0x10] sm:$0xff] }
 0x2fd   :  { %v2541_v63 = vrot.slane %v2526_v8, 7  ;;  %v2542_v35 = vrot.slane %v2527_v32, 6  ;;  %v2543_v53 = vrot.slane %v2528_v46, 5  ;;  %v2557_v5 = vmul.f32 %v2509_v9, %v9419_v2 }
 0x2fe   :  { %v2544_v3 = vrot.slane %v2529_v59, 4  ;;  %v2545_v45 = vrot.slane %v2530_v60, 3  ;;  %v2546_v17 = vrot.slane %v2531_v44, 2  ;;  %v2547_v38 = vrot.slane %v2532_v27, 1 }
 0x2ff   :  { %v2548_v15 = vsel %vm348_vm12, %v2525_v42, %v2541_v63  ;;  %v2549_v12 = vsel %vm350_vm14, %v2542_v35, %v2543_v53  ;;  %v2558_v10 = vmul.f32 %v2510_v52, %v9437_v25  ;;  %v2559_v11 = vmul.f32 %v2511_v48, %v9461_v56 }
 0x300   :  { %v2550_v18 = vsel %vm352_vm0, %v2548_v15, %v2549_v12  ;;  %v2551_v26 = vsel %vm2498_vm11, %v2544_v3, %v2545_v45  ;;  %v2552_v61 = vsel %vm2500_vm13, %v2546_v17, %v2547_v38  ;;  %v2560_v0 = vmul.f32 %v2512_v62, %v9463_v1 }
 0x301   :  { %v2553_v36 = vsel %vm2502_vm1, %v2551_v26, %v2552_v61  ;;  %v2561_v7 = vmul.f32 %v2513_v54, %v9469_v50  ;;  %v2562_v13 = vmul.f32 %v2514_v20, %v9471_v16  ;;  %v2563_v29 = vmul.f32 %v2515_v55, %v9480_v37 }
 0x302   :  { %v2554_v4 = vsel %vm10472_vm2, %v2550_v18, %v2553_v36  ;;  %v2564_v47 = vmul.f32 %v2516_v57, %v9526_v31 }
 0x303   :  { %v2556_v33 = vsub.f32 %v2235_v24, %v2554_v4 }
 0x305   :  { %v2566_v14 = vperm.slane %v2556_v33, 0  ;;  %v2567_v30 = vperm.slane %v2556_v33, 1  ;;  %v2568_v41 = vperm.slane %v2556_v33, 2  ;;  %v2569_v21 = vperm.slane %v2556_v33, 3 }
 0x306   :  { %v2570_v2 = vperm.slane %v2556_v33, 4  ;;  %v2571_v51 = vperm.slane %v2556_v33, 5  ;;  %v2572_v22 = vperm.slane %v2556_v33, 6  ;;  %v2573_v25 = vperm.slane %v2556_v33, 7 }
 0x307   :  { %v2582_v6 = vadd.f32 %v2566_v14, %v2557_v5  ;;  %v2583_v56 = vadd.f32 %v2567_v30, %v2558_v10  ;;  %v2584_v19 = vadd.f32 %v2568_v41, %v2559_v11  ;;  %v2585_v1 = vadd.f32 %v2569_v21, %v2560_v0 }
 0x308   :  { %v2586_v28 = vadd.f32 %v2570_v2, %v2561_v7  ;;  %v2587_v50 = vadd.f32 %v2571_v51, %v2562_v13  ;;  %v2588_v23 = vadd.f32 %v2572_v22, %v2563_v29  ;;  %v2589_v16 = vadd.f32 %v2573_v25, %v2564_v47 }
 0x309   :  { %v2590_v39 = vmax.f32 %v2582_v6, 0.0  ;;  %v2591_v37 = vmax.f32 %v2583_v56, 0.0  ;;  %v2592_v40 = vmax.f32 %v2584_v19, 0.0  ;;  %v2593_v31 = vmax.f32 %v2585_v1, 0.0 }
 0x30a   :  { %v2594_v43 = vmax.f32 %v2586_v28, 0.0  ;;  %v2595_v34 = vmax.f32 %v2587_v50, 0.0  ;;  %v2596_v58 = vmax.f32 %v2588_v23, 0.0  ;;  %v2597_v9 = vmax.f32 %v2589_v16, 0.0 }
 0x30b   :  { %v9709_v52 = vpack.c.bf16 %v2590_v39, %v2590_v39  ;;  %v9711_v48 = vpack.c.bf16 %v2591_v37, %v2591_v37  ;;  %v9713_v62 = vpack.c.bf16 %v2592_v40, %v2592_v40  ;;  %v9715_v54 = vpack.c.bf16 %v2593_v31, %v2593_v31 }
 0x30c   :  { %v9717_v20 = vpack.c.bf16 %v2594_v43, %v2594_v43  ;;  %v9719_v55 = vpack.c.bf16 %v2595_v34, %v2595_v34  ;;  %v9721_v57 = vpack.c.bf16 %v2596_v58, %v2596_v58  ;;  %v9723_v8 = vpack.c.bf16 %v2597_v9, %v2597_v9 }
 0x30d   :  { %9237 = dma.done.wait [#allocation6 + $0x1], 32768 }
 0x30e   :  { %9238 = vsyncadd [#allocation6 + $0x1], 4294934528  ;;  %v2634_v32 = vld [vmem:[#allocation3 + $0xc0] sm:$0xff] }
 0x30f   :  { %v2666_v46 = vld [vmem:[#allocation3 + $0x1c0] sm:$0xff]  ;;  %v2978_v60 = vunpack.c.2.s8 %v2634_v32  ;;  %v2986_v44 = vunpack.c.3.s8 %v2634_v32  ;;  %v2962_v5 = vunpack.c.0.s8 %v2634_v32  ;;  %v2970_v33 = vunpack.c.1.s8 %v2634_v32 }
 0x310   :  { %v2698_v59 = vld [vmem:[#allocation3 + $0x2c0] sm:$0xff]  ;;  %v3106_v27 = vunpack.c.2.s8 %v2666_v46  ;;  %v3114_v42 = vunpack.c.3.s8 %v2666_v46  ;;  %v3090_v0 = vunpack.c.0.s8 %v2666_v46  ;;  %v3098_v7 = vunpack.c.1.s8 %v2666_v46 }
 0x311   :  { %v2730_v63 = vld [vmem:[#allocation3 + $0x3c0] sm:$0xff]  ;;  %v3234_v35 = vunpack.c.2.s8 %v2698_v59  ;;  %v3242_v53 = vunpack.c.3.s8 %v2698_v59  ;;  %v4002_v17 = vcvt.s32.f32 %v2978_v60  ;;  %v4010_v38 = vcvt.s32.f32 %v2986_v44 }
 0x312   :  { %v3362_v3 = vunpack.c.2.s8 %v2730_v63  ;;  %v3370_v45 = vunpack.c.3.s8 %v2730_v63  ;;  %v4130_v15 = vcvt.s32.f32 %v3106_v27  ;;  %v4138_v12 = vcvt.s32.f32 %v3114_v42  ;;  %v2626_v13 = vld [vmem:[#allocation3 + $0x80] sm:$0xff] }
 0x313   :  { %v4258_v24 = vcvt.s32.f32 %v3234_v35  ;;  %v4266_v18 = vcvt.s32.f32 %v3242_v53  ;;  %v4970_v36 = vpack.c.bf16 %v4010_v38, %v4002_v17  ;;  %v3986_v29 = vcvt.s32.f32 %v2962_v5  ;;  %v2658_v22 = vld [vmem:[#allocation3 + $0x180] sm:$0xff] }
 0x314   :  { %v4386_v26 = vcvt.s32.f32 %v3362_v3  ;;  %v4394_v61 = vcvt.s32.f32 %v3370_v45  ;;  %v5034_v4 = vpack.c.bf16 %v4138_v12, %v4130_v15  ;;  %v3994_v47 = vcvt.s32.f32 %v2970_v33  ;;  %v2690_v1 = vld [vmem:[#allocation3 + $0x280] sm:$0xff] }
 0x315   :  { %v5098_v10 = vpack.c.bf16 %v4266_v18, %v4258_v24  ;;  %5426 = vmatpush.bf16.msrb.mxu0 %v4970_v36  ;;  %v3218_v14 = vunpack.c.0.s8 %v2698_v59  ;;  %v3226_v30 = vunpack.c.1.s8 %v2698_v59  ;;  %v4114_v41 = vcvt.s32.f32 %v3090_v0  ;;  %v2722_v39 = vld [vmem:[#allocation3 + $0x380] sm:$0xff] }
 0x316   :  { %v5162_v11 = vpack.c.bf16 %v4394_v61, %v4386_v26  ;;  %5439 = vmatpush.bf16.msrb.mxu1 %v5034_v4  ;;  %v4122_v21 = vcvt.s32.f32 %v3098_v7  ;;  %v3346_v2 = vunpack.c.0.s8 %v2730_v63  ;;  %v3354_v51 = vunpack.c.1.s8 %v2730_v63  ;;  %v2618_v18 = vld [vmem:[#allocation3 + $0x40] sm:$0xff] }
 0x317   :  { %5452 = vmatpush.bf16.msrb.mxu2 %v5098_v10  ;;  %v4962_v25 = vpack.c.bf16 %v3994_v47, %v3986_v29  ;;  %v4242_v6 = vcvt.s32.f32 %v3218_v14  ;;  %v4250_v56 = vcvt.s32.f32 %v3226_v30  ;;  %v2946_v19 = vunpack.c.2.s8 %v2626_v13  ;;  %v2650_v0 = vld [vmem:[#allocation3 + $0x140] sm:$0xff] }
 0x318   :  { %5465 = vmatpush.bf16.msrb.mxu3 %v5162_v11  ;;  %v5026_v28 = vpack.c.bf16 %v4122_v21, %v4114_v41  ;;  %v4370_v50 = vcvt.s32.f32 %v3346_v2  ;;  %v4378_v23 = vcvt.s32.f32 %v3354_v51  ;;  %v2954_v16 = vunpack.c.3.s8 %v2626_v13  ;;  %v2682_v14 = vld [vmem:[#allocation3 + $0x240] sm:$0xff] }
 0x319   :  { %5427 = vmatpush.bf16.msrb.mxu0 %v4962_v25  ;;  %v5090_v37 = vpack.c.bf16 %v4250_v56, %v4242_v6  ;;  %v3970_v40 = vcvt.s32.f32 %v2946_v19  ;;  %v3074_v31 = vunpack.c.2.s8 %v2658_v22  ;;  %v3082_v43 = vunpack.c.3.s8 %v2658_v22  ;;  %v2714_v51 = vld [vmem:[#allocation3 + $0x340] sm:$0xff] }
 0x31a   :  { %5440 = vmatpush.bf16.msrb.mxu1 %v5026_v28  ;;  %v5154_v34 = vpack.c.bf16 %v4378_v23, %v4370_v50  ;;  %v3978_v58 = vcvt.s32.f32 %v2954_v16  ;;  %v3202_v9 = vunpack.c.2.s8 %v2690_v1  ;;  %v3210_v32 = vunpack.c.3.s8 %v2690_v1 }
 0x31b   :  { %5453 = vmatpush.bf16.msrb.mxu2 %v5090_v37  ;;  %v4098_v46 = vcvt.s32.f32 %v3074_v31  ;;  %v4106_v59 = vcvt.s32.f32 %v3082_v43  ;;  %v3330_v60 = vunpack.c.2.s8 %v2722_v39  ;;  %v3338_v44 = vunpack.c.3.s8 %v2722_v39 }
 0x31c   :  { %5466 = vmatpush.bf16.msrb.mxu3 %v5154_v34  ;;  %v4954_v27 = vpack.c.bf16 %v3978_v58, %v3970_v40  ;;  %v4226_v42 = vcvt.s32.f32 %v3202_v9  ;;  %v4234_v63 = vcvt.s32.f32 %v3210_v32  ;;  %v2930_v35 = vunpack.c.0.s8 %v2626_v13 }
 0x31d   :  { %v5018_v53 = vpack.c.bf16 %v4106_v59, %v4098_v46  ;;  %v4354_v3 = vcvt.s32.f32 %v3330_v60  ;;  %v4362_v45 = vcvt.s32.f32 %v3338_v44  ;;  %v2938_v17 = vunpack.c.1.s8 %v2626_v13 }
 0x31e   :  { %5428 = vmatpush.bf16.msrb.mxu0 %v4954_v27  ;;  %v5082_v38 = vpack.c.bf16 %v4234_v63, %v4226_v42  ;;  %v3954_v15 = vcvt.s32.f32 %v2930_v35  ;;  %v3058_v12 = vunpack.c.0.s8 %v2658_v22  ;;  %v3066_v24 = vunpack.c.1.s8 %v2658_v22  ;;  %v2610_v42 = vld [vmem:[#allocation3] sm:$0xff] }
 0x31f   :  { %5441 = vmatpush.bf16.msrb.mxu1 %v5018_v53  ;;  %v5146_v26 = vpack.c.bf16 %v4362_v45, %v4354_v3  ;;  %v3962_v61 = vcvt.s32.f32 %v2938_v17  ;;  %v3186_v36 = vunpack.c.0.s8 %v2690_v1  ;;  %v3194_v4 = vunpack.c.1.s8 %v2690_v1 }
 0x320   :  { %5454 = vmatpush.bf16.msrb.mxu2 %v5082_v38  ;;  %v4082_v5 = vcvt.s32.f32 %v3058_v12  ;;  %v4090_v33 = vcvt.s32.f32 %v3066_v24  ;;  %v3314_v10 = vunpack.c.0.s8 %v2722_v39  ;;  %v3322_v11 = vunpack.c.1.s8 %v2722_v39  ;;  %v2642_v12 = vld [vmem:[#allocation3 + $0x100] sm:$0xff] }
 0x321   :  { %5467 = vmatpush.bf16.msrb.mxu3 %v5146_v26  ;;  %v4946_v7 = vpack.c.bf16 %v3962_v61, %v3954_v15  ;;  %v4210_v13 = vcvt.s32.f32 %v3186_v36  ;;  %v4218_v29 = vcvt.s32.f32 %v3194_v4  ;;  %v2914_v47 = vunpack.c.2.s8 %v2618_v18  ;;  %v2674_v36 = vld [vmem:[#allocation3 + $0x200] sm:$0xff] }
 0x322   :  { %v5010_v30 = vpack.c.bf16 %v4090_v33, %v4082_v5  ;;  %v4338_v41 = vcvt.s32.f32 %v3314_v10  ;;  %v4346_v21 = vcvt.s32.f32 %v3322_v11  ;;  %v2922_v2 = vunpack.c.3.s8 %v2618_v18  ;;  %v2706_v11 = vld [vmem:[#allocation3 + $0x300] sm:$0xff] }
 0x323   :  { %5429 = vmatpush.bf16.msrb.mxu0 %v4946_v7  ;;  %v5074_v22 = vpack.c.bf16 %v4218_v29, %v4210_v13  ;;  %v3938_v25 = vcvt.s32.f32 %v2914_v47  ;;  %v3042_v6 = vunpack.c.2.s8 %v2650_v0  ;;  %v3050_v56 = vunpack.c.3.s8 %v2650_v0 }
 0x324   :  { %5442 = vmatpush.bf16.msrb.mxu1 %v5010_v30  ;;  %v5138_v19 = vpack.c.bf16 %v4346_v21, %v4338_v41  ;;  %v3946_v1 = vcvt.s32.f32 %v2922_v2  ;;  %v3170_v28 = vunpack.c.2.s8 %v2682_v14  ;;  %v3178_v50 = vunpack.c.3.s8 %v2682_v14 }
 0x325   :  { %5455 = vmatpush.bf16.msrb.mxu2 %v5074_v22  ;;  %v4066_v23 = vcvt.s32.f32 %v3042_v6  ;;  %v4074_v16 = vcvt.s32.f32 %v3050_v56  ;;  %v3298_v39 = vunpack.c.2.s8 %v2714_v51  ;;  %v3306_v37 = vunpack.c.3.s8 %v2714_v51 }
 0x326   :  { %5468 = vmatpush.bf16.msrb.mxu3 %v5138_v19  ;;  %v4938_v40 = vpack.c.bf16 %v3946_v1, %v3938_v25  ;;  %v4194_v31 = vcvt.s32.f32 %v3170_v28  ;;  %v4202_v43 = vcvt.s32.f32 %v3178_v50  ;;  %v2898_v34 = vunpack.c.0.s8 %v2618_v18 }
 0x327   :  { %v5002_v58 = vpack.c.bf16 %v4074_v16, %v4066_v23  ;;  %v4322_v9 = vcvt.s32.f32 %v3298_v39  ;;  %v4330_v32 = vcvt.s32.f32 %v3306_v37  ;;  %v2906_v46 = vunpack.c.1.s8 %v2618_v18 }
 0x328   :  { %5430 = vmatpush.bf16.msrb.mxu0 %v4938_v40  ;;  %v5066_v59 = vpack.c.bf16 %v4202_v43, %v4194_v31  ;;  %v3922_v60 = vcvt.s32.f32 %v2898_v34  ;;  %v3026_v44 = vunpack.c.0.s8 %v2650_v0  ;;  %v3034_v27 = vunpack.c.1.s8 %v2650_v0  ;;  %v2762_v31 = vld [vmem:[#allocation3 + $0x4c0] sm:$0xff] }
 0x329   :  { %5443 = vmatpush.bf16.msrb.mxu1 %v5002_v58  ;;  %v5130_v63 = vpack.c.bf16 %v4330_v32, %v4322_v9  ;;  %v3930_v35 = vcvt.s32.f32 %v2906_v46  ;;  %v3154_v53 = vunpack.c.0.s8 %v2682_v14  ;;  %v3162_v3 = vunpack.c.1.s8 %v2682_v14 }
 0x32a   :  { %5456 = vmatpush.bf16.msrb.mxu2 %v5066_v59  ;;  %v4050_v45 = vcvt.s32.f32 %v3026_v44  ;;  %v4058_v17 = vcvt.s32.f32 %v3034_v27  ;;  %v3282_v38 = vunpack.c.0.s8 %v2714_v51  ;;  %v3290_v15 = vunpack.c.1.s8 %v2714_v51  ;;  %v2794_v44 = vld [vmem:[#allocation3 + $0x5c0] sm:$0xff] }
 0x32b   :  { %5469 = vmatpush.bf16.msrb.mxu3 %v5130_v63  ;;  %v4930_v24 = vpack.c.bf16 %v3930_v35, %v3922_v60  ;;  %v4178_v18 = vcvt.s32.f32 %v3154_v53  ;;  %v4186_v26 = vcvt.s32.f32 %v3162_v3  ;;  %v2882_v61 = vunpack.c.2.s8 %v2610_v42  ;;  %v2826_v53 = vld [vmem:[#allocation3 + $0x6c0] sm:$0xff] }
 0x32c   :  { %v4994_v4 = vpack.c.bf16 %v4058_v17, %v4050_v45  ;;  %v4306_v5 = vcvt.s32.f32 %v3282_v38  ;;  %v4314_v33 = vcvt.s32.f32 %v3290_v15  ;;  %v2890_v10 = vunpack.c.3.s8 %v2610_v42  ;;  %v2858_v15 = vld [vmem:[#allocation3 + $0x7c0] sm:$0xff] }
 0x32d   :  { %5431 = vmatpush.bf16.msrb.mxu0 %v4930_v24  ;;  %v5058_v0 = vpack.c.bf16 %v4186_v26, %v4178_v18  ;;  %v3906_v7 = vcvt.s32.f32 %v2882_v61  ;;  %v3010_v13 = vunpack.c.2.s8 %v2642_v12  ;;  %v3018_v29 = vunpack.c.3.s8 %v2642_v12 }
 0x32e   :  { %5444 = vmatpush.bf16.msrb.mxu1 %v4994_v4  ;;  %v5122_v47 = vpack.c.bf16 %v4314_v33, %v4306_v5  ;;  %v3914_v14 = vcvt.s32.f32 %v2890_v10  ;;  %v3138_v30 = vunpack.c.2.s8 %v2674_v36  ;;  %v3146_v41 = vunpack.c.3.s8 %v2674_v36 }
 0x32f   :  { %5457 = vmatpush.bf16.msrb.mxu2 %v5058_v0  ;;  %v4034_v21 = vcvt.s32.f32 %v3010_v13  ;;  %v4042_v2 = vcvt.s32.f32 %v3018_v29  ;;  %v3266_v51 = vunpack.c.2.s8 %v2706_v11  ;;  %v3274_v22 = vunpack.c.3.s8 %v2706_v11 }
 0x330   :  { %5470 = vmatpush.bf16.msrb.mxu3 %v5122_v47  ;;  %v4922_v25 = vpack.c.bf16 %v3914_v14, %v3906_v7  ;;  %v4162_v6 = vcvt.s32.f32 %v3138_v30  ;;  %v4170_v56 = vcvt.s32.f32 %v3146_v41  ;;  %v2866_v19 = vunpack.c.0.s8 %v2610_v42 }
 0x331   :  { %v4986_v1 = vpack.c.bf16 %v4042_v2, %v4034_v21  ;;  %v4290_v28 = vcvt.s32.f32 %v3266_v51  ;;  %v4298_v50 = vcvt.s32.f32 %v3274_v22  ;;  %v2874_v23 = vunpack.c.1.s8 %v2610_v42 }
 0x332   :  { %5432 = vmatpush.bf16.msrb.mxu0 %v4922_v25  ;;  %v5050_v16 = vpack.c.bf16 %v4170_v56, %v4162_v6  ;;  %v3890_v39 = vcvt.s32.f32 %v2866_v19  ;;  %v2994_v37 = vunpack.c.0.s8 %v2642_v12  ;;  %v3002_v40 = vunpack.c.1.s8 %v2642_v12  ;;  %v2754_v6 = vld [vmem:[#allocation3 + $0x480] sm:$0xff] }
 0x333   :  { %5445 = vmatpush.bf16.msrb.mxu1 %v4986_v1  ;;  %v5114_v43 = vpack.c.bf16 %v4298_v50, %v4290_v28  ;;  %v3898_v34 = vcvt.s32.f32 %v2874_v23  ;;  %v3122_v58 = vunpack.c.0.s8 %v2674_v36  ;;  %v3130_v9 = vunpack.c.1.s8 %v2674_v36 }
 0x334   :  { %5458 = vmatpush.bf16.msrb.mxu2 %v5050_v16  ;;  %v4018_v32 = vcvt.s32.f32 %v2994_v37  ;;  %v4026_v46 = vcvt.s32.f32 %v3002_v40  ;;  %v3250_v59 = vunpack.c.0.s8 %v2706_v11  ;;  %v3258_v60 = vunpack.c.1.s8 %v2706_v11  ;;  %v2786_v37 = vld [vmem:[#allocation3 + $0x580] sm:$0xff] }
 0x335   :  { %5471 = vmatpush.bf16.msrb.mxu3 %v5114_v43  ;;  %v4914_v27 = vpack.c.bf16 %v3898_v34, %v3890_v39  ;;  %v4146_v42 = vcvt.s32.f32 %v3122_v58  ;;  %v4154_v63 = vcvt.s32.f32 %v3130_v9  ;;  %v3490_v35 = vunpack.c.2.s8 %v2762_v31  ;;  %v2818_v58 = vld [vmem:[#allocation3 + $0x680] sm:$0xff] }
 0x336   :  { %v4978_v3 = vpack.c.bf16 %v4026_v46, %v4018_v32  ;;  %v4274_v45 = vcvt.s32.f32 %v3250_v59  ;;  %v4282_v17 = vcvt.s32.f32 %v3258_v60  ;;  %v3498_v38 = vunpack.c.3.s8 %v2762_v31  ;;  %v2850_v60 = vld [vmem:[#allocation3 + $0x780] sm:$0xff] }
 0x337   :  { %5433 = vmatpush.bf16.msrb.mxu0 %v4914_v27  ;;  %v5042_v12 = vpack.c.bf16 %v4154_v63, %v4146_v42  ;;  %v4514_v24 = vcvt.s32.f32 %v3490_v35  ;;  %v3618_v18 = vunpack.c.2.s8 %v2794_v44  ;;  %v3626_v26 = vunpack.c.3.s8 %v2794_v44 }
 0x338   :  { %5446 = vmatpush.bf16.msrb.mxu1 %v4978_v3  ;;  %v5106_v61 = vpack.c.bf16 %v4282_v17, %v4274_v45  ;;  %v4522_v36 = vcvt.s32.f32 %v3498_v38  ;;  %v3746_v4 = vunpack.c.2.s8 %v2826_v53  ;;  %v3754_v5 = vunpack.c.3.s8 %v2826_v53 }
 0x339   :  { %5459 = vmatpush.bf16.msrb.mxu2 %v5042_v12  ;;  %v4642_v33 = vcvt.s32.f32 %v3618_v18  ;;  %v4650_v10 = vcvt.s32.f32 %v3626_v26  ;;  %v3874_v11 = vunpack.c.2.s8 %v2858_v15  ;;  %v3882_v0 = vunpack.c.3.s8 %v2858_v15 }
 0x33a   :  { %5472 = vmatpush.bf16.msrb.mxu3 %v5106_v61  ;;  %v5226_v7 = vpack.c.bf16 %v4522_v36, %v4514_v24  ;;  %v4770_v13 = vcvt.s32.f32 %v3746_v4  ;;  %v4778_v29 = vcvt.s32.f32 %v3754_v5  ;;  %v3474_v47 = vunpack.c.0.s8 %v2762_v31  ;;  %5434 = vmatmul.bf16.vlgmr.msrb.gmra.mxu0 %v9709_v52 }
 0x33b   :  { %v5290_v14 = vpack.c.bf16 %v4650_v10, %v4642_v33  ;;  %v4898_v30 = vcvt.s32.f32 %v3874_v11  ;;  %v4906_v41 = vcvt.s32.f32 %v3882_v0  ;;  %v3482_v21 = vunpack.c.1.s8 %v2762_v31  ;;  %5447 = vmatmul.bf16.vlgmr.msrb.gmra.mxu1 %v9711_v48 }
 0x33c   :  { %5478 = vmatpush.bf16.msra.mxu0 %v5226_v7  ;;  %v5354_v2 = vpack.c.bf16 %v4778_v29, %v4770_v13  ;;  %v4498_v51 = vcvt.s32.f32 %v3474_v47  ;;  %v3602_v22 = vunpack.c.0.s8 %v2794_v44  ;;  %v3610_v25 = vunpack.c.1.s8 %v2794_v44  ;;  %5460 = vmatmul.bf16.vlgmr.msrb.gmra.mxu2 %v9713_v62  ;;  %v2746_v13 = vld [vmem:[#allocation3 + $0x440] sm:$0xff] }
 0x33d   :  { %5491 = vmatpush.bf16.msra.mxu1 %v5290_v14  ;;  %v5418_v56 = vpack.c.bf16 %v4906_v41, %v4898_v30  ;;  %v4506_v19 = vcvt.s32.f32 %v3482_v21  ;;  %v3730_v1 = vunpack.c.0.s8 %v2826_v53  ;;  %v3738_v28 = vunpack.c.1.s8 %v2826_v53  ;;  %5473 = vmatmul.bf16.vlgmr.msrb.gmra.mxu3 %v9715_v54 }
 0x33e   :  { %5504 = vmatpush.bf16.msra.mxu2 %v5354_v2  ;;  %v4626_v50 = vcvt.s32.f32 %v3602_v22  ;;  %v4634_v23 = vcvt.s32.f32 %v3610_v25  ;;  %v3858_v16 = vunpack.c.0.s8 %v2858_v15  ;;  %v3866_v39 = vunpack.c.1.s8 %v2858_v15  ;;  %v2778_v22 = vld [vmem:[#allocation3 + $0x540] sm:$0xff] }
 0x33f   :  { %5517 = vmatpush.bf16.msra.mxu3 %v5418_v56  ;;  %v5218_v40 = vpack.c.bf16 %v4506_v19, %v4498_v51  ;;  %v4754_v31 = vcvt.s32.f32 %v3730_v1  ;;  %v4762_v43 = vcvt.s32.f32 %v3738_v28  ;;  %v3458_v34 = vunpack.c.2.s8 %v2754_v6  ;;  %v2810_v1 = vld [vmem:[#allocation3 + $0x640] sm:$0xff] }
 0x340   :  { %v5282_v9 = vpack.c.bf16 %v4634_v23, %v4626_v50  ;;  %v4882_v32 = vcvt.s32.f32 %v3858_v16  ;;  %v4890_v46 = vcvt.s32.f32 %v3866_v39  ;;  %v3466_v59 = vunpack.c.3.s8 %v2754_v6  ;;  %v2842_v39 = vld [vmem:[#allocation3 + $0x740] sm:$0xff] }
 0x341   :  { %5479 = vmatpush.bf16.msra.mxu0 %v5218_v40  ;;  %v5346_v44 = vpack.c.bf16 %v4762_v43, %v4754_v31  ;;  %v4482_v27 = vcvt.s32.f32 %v3458_v34  ;;  %v3586_v42 = vunpack.c.2.s8 %v2786_v37  ;;  %v3594_v63 = vunpack.c.3.s8 %v2786_v37 }
 0x342   :  { %5492 = vmatpush.bf16.msra.mxu1 %v5282_v9  ;;  %v5410_v35 = vpack.c.bf16 %v4890_v46, %v4882_v32  ;;  %v4490_v53 = vcvt.s32.f32 %v3466_v59  ;;  %v3714_v3 = vunpack.c.2.s8 %v2818_v58  ;;  %v3722_v45 = vunpack.c.3.s8 %v2818_v58 }
 0x343   :  { %5505 = vmatpush.bf16.msra.mxu2 %v5346_v44  ;;  %v4610_v17 = vcvt.s32.f32 %v3586_v42  ;;  %v4618_v38 = vcvt.s32.f32 %v3594_v63  ;;  %v3842_v15 = vunpack.c.2.s8 %v2850_v60  ;;  %v3850_v12 = vunpack.c.3.s8 %v2850_v60 }
 0x344   :  { %5518 = vmatpush.bf16.msra.mxu3 %v5410_v35  ;;  %v5210_v24 = vpack.c.bf16 %v4490_v53, %v4482_v27  ;;  %v4738_v18 = vcvt.s32.f32 %v3714_v3  ;;  %v4746_v26 = vcvt.s32.f32 %v3722_v45  ;;  %v3442_v61 = vunpack.c.0.s8 %v2754_v6 }
 0x345   :  { %v5274_v36 = vpack.c.bf16 %v4618_v38, %v4610_v17  ;;  %v4866_v4 = vcvt.s32.f32 %v3842_v15  ;;  %v4874_v5 = vcvt.s32.f32 %v3850_v12  ;;  %v3450_v33 = vunpack.c.1.s8 %v2754_v6 }
 0x346   :  { %5480 = vmatpush.bf16.msra.mxu0 %v5210_v24  ;;  %v5338_v10 = vpack.c.bf16 %v4746_v26, %v4738_v18  ;;  %v4466_v11 = vcvt.s32.f32 %v3442_v61  ;;  %v3570_v0 = vunpack.c.0.s8 %v2786_v37  ;;  %v3578_v7 = vunpack.c.1.s8 %v2786_v37  ;;  %v2738_v18 = vld [vmem:[#allocation3 + $0x400] sm:$0xff] }
 0x347   :  { %5493 = vmatpush.bf16.msra.mxu1 %v5274_v36  ;;  %v5402_v29 = vpack.c.bf16 %v4874_v5, %v4866_v4  ;;  %v4474_v47 = vcvt.s32.f32 %v3450_v33  ;;  %v3698_v14 = vunpack.c.0.s8 %v2818_v58  ;;  %v3706_v30 = vunpack.c.1.s8 %v2818_v58 }
 0x348   :  { %5506 = vmatpush.bf16.msra.mxu2 %v5338_v10  ;;  %v4594_v41 = vcvt.s32.f32 %v3570_v0  ;;  %v4602_v21 = vcvt.s32.f32 %v3578_v7  ;;  %v3826_v2 = vunpack.c.0.s8 %v2850_v60  ;;  %v3834_v51 = vunpack.c.1.s8 %v2850_v60  ;;  %v2770_v0 = vld [vmem:[#allocation3 + $0x500] sm:$0xff] }
 0x349   :  { %5519 = vmatpush.bf16.msra.mxu3 %v5402_v29  ;;  %v5202_v25 = vpack.c.bf16 %v4474_v47, %v4466_v11  ;;  %v4722_v6 = vcvt.s32.f32 %v3698_v14  ;;  %v4730_v56 = vcvt.s32.f32 %v3706_v30  ;;  %v3426_v19 = vunpack.c.2.s8 %v2746_v13  ;;  %v2802_v14 = vld [vmem:[#allocation3 + $0x600] sm:$0xff] }
 0x34a   :  { %v5266_v28 = vpack.c.bf16 %v4602_v21, %v4594_v41  ;;  %v4850_v50 = vcvt.s32.f32 %v3826_v2  ;;  %v4858_v23 = vcvt.s32.f32 %v3834_v51  ;;  %v3434_v16 = vunpack.c.3.s8 %v2746_v13  ;;  %v2834_v51 = vld [vmem:[#allocation3 + $0x700] sm:$0xff] }
 0x34b   :  { %5481 = vmatpush.bf16.msra.mxu0 %v5202_v25  ;;  %v5330_v37 = vpack.c.bf16 %v4730_v56, %v4722_v6  ;;  %v4450_v40 = vcvt.s32.f32 %v3426_v19  ;;  %v3554_v31 = vunpack.c.2.s8 %v2778_v22  ;;  %v3562_v43 = vunpack.c.3.s8 %v2778_v22 }
 0x34c   :  { %5494 = vmatpush.bf16.msra.mxu1 %v5266_v28  ;;  %v5394_v34 = vpack.c.bf16 %v4858_v23, %v4850_v50  ;;  %v4458_v58 = vcvt.s32.f32 %v3434_v16  ;;  %v3682_v9 = vunpack.c.2.s8 %v2810_v1  ;;  %v3690_v32 = vunpack.c.3.s8 %v2810_v1 }
 0x34d   :  { %5507 = vmatpush.bf16.msra.mxu2 %v5330_v37  ;;  %v4578_v46 = vcvt.s32.f32 %v3554_v31  ;;  %v4586_v59 = vcvt.s32.f32 %v3562_v43  ;;  %v3810_v60 = vunpack.c.2.s8 %v2842_v39  ;;  %v3818_v44 = vunpack.c.3.s8 %v2842_v39 }
 0x34e   :  { %5520 = vmatpush.bf16.msra.mxu3 %v5394_v34  ;;  %v5194_v27 = vpack.c.bf16 %v4458_v58, %v4450_v40  ;;  %v4706_v42 = vcvt.s32.f32 %v3682_v9  ;;  %v4714_v63 = vcvt.s32.f32 %v3690_v32  ;;  %v3410_v35 = vunpack.c.0.s8 %v2746_v13 }
 0x34f   :  { %v5258_v53 = vpack.c.bf16 %v4586_v59, %v4578_v46  ;;  %v4834_v3 = vcvt.s32.f32 %v3810_v60  ;;  %v4842_v45 = vcvt.s32.f32 %v3818_v44  ;;  %v3418_v17 = vunpack.c.1.s8 %v2746_v13 }
 0x350   :  { %5482 = vmatpush.bf16.msra.mxu0 %v5194_v27  ;;  %v5322_v38 = vpack.c.bf16 %v4714_v63, %v4706_v42  ;;  %v4434_v15 = vcvt.s32.f32 %v3410_v35  ;;  %v3538_v12 = vunpack.c.0.s8 %v2778_v22  ;;  %v3546_v24 = vunpack.c.1.s8 %v2778_v22  ;;  %v2635_v42 = vld [vmem:[#allocation3 + $0xc8] sm:$0xff] }
 0x351   :  { %5495 = vmatpush.bf16.msra.mxu1 %v5258_v53  ;;  %v5386_v26 = vpack.c.bf16 %v4842_v45, %v4834_v3  ;;  %v4442_v61 = vcvt.s32.f32 %v3418_v17  ;;  %v3666_v36 = vunpack.c.0.s8 %v2810_v1  ;;  %v3674_v4 = vunpack.c.1.s8 %v2810_v1 }
 0x352   :  { %5508 = vmatpush.bf16.msra.mxu2 %v5322_v38  ;;  %v4562_v5 = vcvt.s32.f32 %v3538_v12  ;;  %v4570_v33 = vcvt.s32.f32 %v3546_v24  ;;  %v3794_v10 = vunpack.c.0.s8 %v2842_v39  ;;  %v3802_v11 = vunpack.c.1.s8 %v2842_v39  ;;  %v2667_v12 = vld [vmem:[#allocation3 + $0x1c8] sm:$0xff] }
 0x353   :  { %5521 = vmatpush.bf16.msra.mxu3 %v5386_v26  ;;  %v5186_v7 = vpack.c.bf16 %v4442_v61, %v4434_v15  ;;  %v4690_v13 = vcvt.s32.f32 %v3666_v36  ;;  %v4698_v29 = vcvt.s32.f32 %v3674_v4  ;;  %v3394_v47 = vunpack.c.2.s8 %v2738_v18  ;;  %v2699_v36 = vld [vmem:[#allocation3 + $0x2c8] sm:$0xff] }
 0x354   :  { %v5250_v30 = vpack.c.bf16 %v4570_v33, %v4562_v5  ;;  %v4818_v41 = vcvt.s32.f32 %v3794_v10  ;;  %v4826_v21 = vcvt.s32.f32 %v3802_v11  ;;  %v3402_v2 = vunpack.c.3.s8 %v2738_v18  ;;  %v2731_v11 = vld [vmem:[#allocation3 + $0x3c8] sm:$0xff] }
 0x355   :  { %5483 = vmatpush.bf16.msra.mxu0 %v5186_v7  ;;  %v5314_v22 = vpack.c.bf16 %v4698_v29, %v4690_v13  ;;  %v4418_v25 = vcvt.s32.f32 %v3394_v47  ;;  %v3522_v6 = vunpack.c.2.s8 %v2770_v0  ;;  %v3530_v56 = vunpack.c.3.s8 %v2770_v0 }
 0x356   :  { %5496 = vmatpush.bf16.msra.mxu1 %v5250_v30  ;;  %v5378_v19 = vpack.c.bf16 %v4826_v21, %v4818_v41  ;;  %v4426_v1 = vcvt.s32.f32 %v3402_v2  ;;  %v3650_v28 = vunpack.c.2.s8 %v2802_v14  ;;  %v3658_v50 = vunpack.c.3.s8 %v2802_v14 }
 0x357   :  { %5509 = vmatpush.bf16.msra.mxu2 %v5314_v22  ;;  %v4546_v23 = vcvt.s32.f32 %v3522_v6  ;;  %v4554_v16 = vcvt.s32.f32 %v3530_v56  ;;  %v3778_v39 = vunpack.c.2.s8 %v2834_v51  ;;  %v3786_v37 = vunpack.c.3.s8 %v2834_v51 }
 0x358   :  { %5522 = vmatpush.bf16.msra.mxu3 %v5378_v19  ;;  %v5178_v40 = vpack.c.bf16 %v4426_v1, %v4418_v25  ;;  %v4674_v31 = vcvt.s32.f32 %v3650_v28  ;;  %v4682_v43 = vcvt.s32.f32 %v3658_v50  ;;  %v3378_v34 = vunpack.c.0.s8 %v2738_v18 }
 0x359   :  { %v5242_v58 = vpack.c.bf16 %v4554_v16, %v4546_v23  ;;  %v4802_v9 = vcvt.s32.f32 %v3778_v39  ;;  %v4810_v32 = vcvt.s32.f32 %v3786_v37  ;;  %v3386_v46 = vunpack.c.1.s8 %v2738_v18 }
 0x35a   :  { %5484 = vmatpush.bf16.msra.mxu0 %v5178_v40  ;;  %v5306_v59 = vpack.c.bf16 %v4682_v43, %v4674_v31  ;;  %v4402_v60 = vcvt.s32.f32 %v3378_v34  ;;  %v3506_v44 = vunpack.c.0.s8 %v2770_v0  ;;  %v3514_v27 = vunpack.c.1.s8 %v2770_v0  ;;  %v2627_v31 = vld [vmem:[#allocation3 + $0x88] sm:$0xff] }
 0x35b   :  { %5497 = vmatpush.bf16.msra.mxu1 %v5242_v58  ;;  %v5370_v63 = vpack.c.bf16 %v4810_v32, %v4802_v9  ;;  %v4410_v35 = vcvt.s32.f32 %v3386_v46  ;;  %v3634_v53 = vunpack.c.0.s8 %v2802_v14  ;;  %v3642_v3 = vunpack.c.1.s8 %v2802_v14 }
 0x35c   :  { %5510 = vmatpush.bf16.msra.mxu2 %v5306_v59  ;;  %v4530_v45 = vcvt.s32.f32 %v3506_v44  ;;  %v4538_v17 = vcvt.s32.f32 %v3514_v27  ;;  %v3762_v38 = vunpack.c.0.s8 %v2834_v51  ;;  %v3770_v15 = vunpack.c.1.s8 %v2834_v51  ;;  %v2659_v44 = vld [vmem:[#allocation3 + $0x188] sm:$0xff] }
 0x35d   :  { %5523 = vmatpush.bf16.msra.mxu3 %v5370_v63  ;;  %v5170_v24 = vpack.c.bf16 %v4410_v35, %v4402_v60  ;;  %v4658_v18 = vcvt.s32.f32 %v3634_v53  ;;  %v4666_v26 = vcvt.s32.f32 %v3642_v3  ;;  %v2979_v61 = vunpack.c.2.s8 %v2635_v42  ;;  %v2691_v53 = vld [vmem:[#allocation3 + $0x288] sm:$0xff] }
 0x35e   :  { %v5234_v4 = vpack.c.bf16 %v4538_v17, %v4530_v45  ;;  %v4786_v5 = vcvt.s32.f32 %v3762_v38  ;;  %v4794_v33 = vcvt.s32.f32 %v3770_v15  ;;  %v2987_v10 = vunpack.c.3.s8 %v2635_v42  ;;  %v2723_v15 = vld [vmem:[#allocation3 + $0x388] sm:$0xff] }
 0x35f   :  { %5485 = vmatpush.bf16.msra.mxu0 %v5170_v24  ;;  %v5298_v0 = vpack.c.bf16 %v4666_v26, %v4658_v18  ;;  %v4003_v7 = vcvt.s32.f32 %v2979_v61  ;;  %v3107_v13 = vunpack.c.2.s8 %v2667_v12  ;;  %v3115_v29 = vunpack.c.3.s8 %v2667_v12 }
 0x360   :  { %5498 = vmatpush.bf16.msra.mxu1 %v5234_v4  ;;  %v5362_v47 = vpack.c.bf16 %v4794_v33, %v4786_v5  ;;  %v4011_v14 = vcvt.s32.f32 %v2987_v10  ;;  %v3235_v30 = vunpack.c.2.s8 %v2699_v36  ;;  %v3243_v41 = vunpack.c.3.s8 %v2699_v36 }
 0x361   :  { %5511 = vmatpush.bf16.msra.mxu2 %v5298_v0  ;;  %v4131_v21 = vcvt.s32.f32 %v3107_v13  ;;  %v4139_v2 = vcvt.s32.f32 %v3115_v29  ;;  %v3363_v51 = vunpack.c.2.s8 %v2731_v11  ;;  %v3371_v22 = vunpack.c.3.s8 %v2731_v11 }
 0x362   :  { %5524 = vmatpush.bf16.msra.mxu3 %v5362_v47  ;;  %v4971_v25 = vpack.c.bf16 %v4011_v14, %v4003_v7  ;;  %v4259_v6 = vcvt.s32.f32 %v3235_v30  ;;  %v4267_v56 = vcvt.s32.f32 %v3243_v41  ;;  %5486 = vmatmul.bf16.vlgmr.msra.gmra.mxu0 %v9717_v20  ;;  %v2963_v19 = vunpack.c.0.s8 %v2635_v42 }
 0x363   :  { %v5035_v1 = vpack.c.bf16 %v4139_v2, %v4131_v21  ;;  %v4387_v28 = vcvt.s32.f32 %v3363_v51  ;;  %v4395_v50 = vcvt.s32.f32 %v3371_v22  ;;  %v2971_v23 = vunpack.c.1.s8 %v2635_v42  ;;  %5499 = vmatmul.bf16.vlgmr.msra.gmra.mxu1 %v9719_v55 }
 0x364   :  { %5530 = vmatpush.bf16.msrb.mxu0 %v4971_v25  ;;  %v5099_v16 = vpack.c.bf16 %v4267_v56, %v4259_v6  ;;  %5512 = vmatmul.bf16.vlgmr.msra.gmra.mxu2 %v9721_v57  ;;  %v3987_v39 = vcvt.s32.f32 %v2963_v19  ;;  %v3091_v37 = vunpack.c.0.s8 %v2667_v12  ;;  %v3099_v40 = vunpack.c.1.s8 %v2667_v12  ;;  %v2619_v6 = vld [vmem:[#allocation3 + $0x48] sm:$0xff] }
 0x365   :  { %5543 = vmatpush.bf16.msrb.mxu1 %v5035_v1  ;;  %v5163_v43 = vpack.c.bf16 %v4395_v50, %v4387_v28  ;;  %5525 = vmatmul.bf16.vlgmr.msra.gmra.mxu3 %v9723_v8  ;;  %v3995_v34 = vcvt.s32.f32 %v2971_v23  ;;  %v3219_v58 = vunpack.c.0.s8 %v2699_v36  ;;  %v3227_v9 = vunpack.c.1.s8 %v2699_v36 }
 0x366   :  { %5556 = vmatpush.bf16.msrb.mxu2 %v5099_v16  ;;  %v4115_v32 = vcvt.s32.f32 %v3091_v37  ;;  %v4123_v46 = vcvt.s32.f32 %v3099_v40  ;;  %v3347_v59 = vunpack.c.0.s8 %v2731_v11  ;;  %v3355_v60 = vunpack.c.1.s8 %v2731_v11  ;;  %v2651_v37 = vld [vmem:[#allocation3 + $0x148] sm:$0xff] }
 0x367   :  { %5569 = vmatpush.bf16.msrb.mxu3 %v5163_v43  ;;  %v4963_v27 = vpack.c.bf16 %v3995_v34, %v3987_v39  ;;  %v4243_v42 = vcvt.s32.f32 %v3219_v58  ;;  %v4251_v63 = vcvt.s32.f32 %v3227_v9  ;;  %v2947_v35 = vunpack.c.2.s8 %v2627_v31  ;;  %v2683_v58 = vld [vmem:[#allocation3 + $0x248] sm:$0xff] }
 0x368   :  { %v5027_v3 = vpack.c.bf16 %v4123_v46, %v4115_v32  ;;  %v4371_v45 = vcvt.s32.f32 %v3347_v59  ;;  %v4379_v17 = vcvt.s32.f32 %v3355_v60  ;;  %v2955_v38 = vunpack.c.3.s8 %v2627_v31  ;;  %v2715_v60 = vld [vmem:[#allocation3 + $0x348] sm:$0xff] }
 0x369   :  { %5531 = vmatpush.bf16.msrb.mxu0 %v4963_v27  ;;  %v5091_v12 = vpack.c.bf16 %v4251_v63, %v4243_v42  ;;  %v3971_v24 = vcvt.s32.f32 %v2947_v35  ;;  %v3075_v18 = vunpack.c.2.s8 %v2659_v44  ;;  %v3083_v26 = vunpack.c.3.s8 %v2659_v44 }
 0x36a   :  { %5544 = vmatpush.bf16.msrb.mxu1 %v5027_v3  ;;  %v5155_v61 = vpack.c.bf16 %v4379_v17, %v4371_v45  ;;  %v3979_v36 = vcvt.s32.f32 %v2955_v38  ;;  %v3203_v4 = vunpack.c.2.s8 %v2691_v53  ;;  %v3211_v5 = vunpack.c.3.s8 %v2691_v53 }
 0x36b   :  { %5557 = vmatpush.bf16.msrb.mxu2 %v5091_v12  ;;  %v4099_v33 = vcvt.s32.f32 %v3075_v18  ;;  %v4107_v10 = vcvt.s32.f32 %v3083_v26  ;;  %v3331_v11 = vunpack.c.2.s8 %v2723_v15  ;;  %v3339_v0 = vunpack.c.3.s8 %v2723_v15 }
 0x36c   :  { %5570 = vmatpush.bf16.msrb.mxu3 %v5155_v61  ;;  %v4955_v7 = vpack.c.bf16 %v3979_v36, %v3971_v24  ;;  %v4227_v13 = vcvt.s32.f32 %v3203_v4  ;;  %v4235_v29 = vcvt.s32.f32 %v3211_v5  ;;  %v2931_v47 = vunpack.c.0.s8 %v2627_v31 }
 0x36d   :  { %v5019_v14 = vpack.c.bf16 %v4107_v10, %v4099_v33  ;;  %v4355_v30 = vcvt.s32.f32 %v3331_v11  ;;  %v4363_v41 = vcvt.s32.f32 %v3339_v0  ;;  %v2939_v21 = vunpack.c.1.s8 %v2627_v31 }
 0x36e   :  { %5532 = vmatpush.bf16.msrb.mxu0 %v4955_v7  ;;  %v5083_v2 = vpack.c.bf16 %v4235_v29, %v4227_v13  ;;  %v3955_v51 = vcvt.s32.f32 %v2931_v47  ;;  %v3059_v22 = vunpack.c.0.s8 %v2659_v44  ;;  %v3067_v25 = vunpack.c.1.s8 %v2659_v44  ;;  %v2611_v13 = vld [vmem:[#allocation3 + $0x8] sm:$0xff] }
 0x36f   :  { %5545 = vmatpush.bf16.msrb.mxu1 %v5019_v14  ;;  %v5147_v56 = vpack.c.bf16 %v4363_v41, %v4355_v30  ;;  %v3963_v19 = vcvt.s32.f32 %v2939_v21  ;;  %v3187_v1 = vunpack.c.0.s8 %v2691_v53  ;;  %v3195_v28 = vunpack.c.1.s8 %v2691_v53 }
 0x370   :  { %5558 = vmatpush.bf16.msrb.mxu2 %v5083_v2  ;;  %v4083_v50 = vcvt.s32.f32 %v3059_v22  ;;  %v4091_v23 = vcvt.s32.f32 %v3067_v25  ;;  %v3315_v16 = vunpack.c.0.s8 %v2723_v15  ;;  %v3323_v39 = vunpack.c.1.s8 %v2723_v15  ;;  %v2643_v22 = vld [vmem:[#allocation3 + $0x108] sm:$0xff] }
 0x371   :  { %5571 = vmatpush.bf16.msrb.mxu3 %v5147_v56  ;;  %v4947_v40 = vpack.c.bf16 %v3963_v19, %v3955_v51  ;;  %v4211_v31 = vcvt.s32.f32 %v3187_v1  ;;  %v4219_v43 = vcvt.s32.f32 %v3195_v28  ;;  %v2915_v34 = vunpack.c.2.s8 %v2619_v6  ;;  %v2675_v1 = vld [vmem:[#allocation3 + $0x208] sm:$0xff] }
 0x372   :  { %v5011_v9 = vpack.c.bf16 %v4091_v23, %v4083_v50  ;;  %v4339_v32 = vcvt.s32.f32 %v3315_v16  ;;  %v4347_v46 = vcvt.s32.f32 %v3323_v39  ;;  %v2923_v59 = vunpack.c.3.s8 %v2619_v6  ;;  %v2707_v39 = vld [vmem:[#allocation3 + $0x308] sm:$0xff] }
 0x373   :  { %5533 = vmatpush.bf16.msrb.mxu0 %v4947_v40  ;;  %v5075_v44 = vpack.c.bf16 %v4219_v43, %v4211_v31  ;;  %v3939_v27 = vcvt.s32.f32 %v2915_v34  ;;  %v3043_v42 = vunpack.c.2.s8 %v2651_v37  ;;  %v3051_v63 = vunpack.c.3.s8 %v2651_v37 }
 0x374   :  { %5546 = vmatpush.bf16.msrb.mxu1 %v5011_v9  ;;  %v5139_v35 = vpack.c.bf16 %v4347_v46, %v4339_v32  ;;  %v3947_v53 = vcvt.s32.f32 %v2923_v59  ;;  %v3171_v3 = vunpack.c.2.s8 %v2683_v58  ;;  %v3179_v45 = vunpack.c.3.s8 %v2683_v58 }
 0x375   :  { %5559 = vmatpush.bf16.msrb.mxu2 %v5075_v44  ;;  %v4067_v17 = vcvt.s32.f32 %v3043_v42  ;;  %v4075_v38 = vcvt.s32.f32 %v3051_v63  ;;  %v3299_v15 = vunpack.c.2.s8 %v2715_v60  ;;  %v3307_v12 = vunpack.c.3.s8 %v2715_v60 }
 0x376   :  { %5572 = vmatpush.bf16.msrb.mxu3 %v5139_v35  ;;  %v4939_v24 = vpack.c.bf16 %v3947_v53, %v3939_v27  ;;  %v4195_v18 = vcvt.s32.f32 %v3171_v3  ;;  %v4203_v26 = vcvt.s32.f32 %v3179_v45  ;;  %v2899_v61 = vunpack.c.0.s8 %v2619_v6 }
 0x377   :  { %v5003_v36 = vpack.c.bf16 %v4075_v38, %v4067_v17  ;;  %v4323_v4 = vcvt.s32.f32 %v3299_v15  ;;  %v4331_v5 = vcvt.s32.f32 %v3307_v12  ;;  %v2907_v33 = vunpack.c.1.s8 %v2619_v6 }
 0x378   :  { %5534 = vmatpush.bf16.msrb.mxu0 %v4939_v24  ;;  %v5067_v10 = vpack.c.bf16 %v4203_v26, %v4195_v18  ;;  %v3923_v11 = vcvt.s32.f32 %v2899_v61  ;;  %v3027_v0 = vunpack.c.0.s8 %v2651_v37  ;;  %v3035_v7 = vunpack.c.1.s8 %v2651_v37  ;;  %v2763_v18 = vld [vmem:[#allocation3 + $0x4c8] sm:$0xff] }
 0x379   :  { %5547 = vmatpush.bf16.msrb.mxu1 %v5003_v36  ;;  %v5131_v29 = vpack.c.bf16 %v4331_v5, %v4323_v4  ;;  %v3931_v47 = vcvt.s32.f32 %v2907_v33  ;;  %v3155_v14 = vunpack.c.0.s8 %v2683_v58  ;;  %v3163_v30 = vunpack.c.1.s8 %v2683_v58 }
 0x37a   :  { %5560 = vmatpush.bf16.msrb.mxu2 %v5067_v10  ;;  %v4051_v41 = vcvt.s32.f32 %v3027_v0  ;;  %v4059_v21 = vcvt.s32.f32 %v3035_v7  ;;  %v3283_v2 = vunpack.c.0.s8 %v2715_v60  ;;  %v3291_v51 = vunpack.c.1.s8 %v2715_v60  ;;  %v2795_v0 = vld [vmem:[#allocation3 + $0x5c8] sm:$0xff] }
 0x37b   :  { %5573 = vmatpush.bf16.msrb.mxu3 %v5131_v29  ;;  %v4931_v25 = vpack.c.bf16 %v3931_v47, %v3923_v11  ;;  %v4179_v6 = vcvt.s32.f32 %v3155_v14  ;;  %v4187_v56 = vcvt.s32.f32 %v3163_v30  ;;  %v2883_v19 = vunpack.c.2.s8 %v2611_v13  ;;  %v2827_v14 = vld [vmem:[#allocation3 + $0x6c8] sm:$0xff] }
 0x37c   :  { %v4995_v28 = vpack.c.bf16 %v4059_v21, %v4051_v41  ;;  %v4307_v50 = vcvt.s32.f32 %v3283_v2  ;;  %v4315_v23 = vcvt.s32.f32 %v3291_v51  ;;  %v2891_v16 = vunpack.c.3.s8 %v2611_v13  ;;  %v2859_v51 = vld [vmem:[#allocation3 + $0x7c8] sm:$0xff] }
 0x37d   :  { %5535 = vmatpush.bf16.msrb.mxu0 %v4931_v25  ;;  %v5059_v37 = vpack.c.bf16 %v4187_v56, %v4179_v6  ;;  %v3907_v40 = vcvt.s32.f32 %v2883_v19  ;;  %v3011_v31 = vunpack.c.2.s8 %v2643_v22  ;;  %v3019_v43 = vunpack.c.3.s8 %v2643_v22 }
 0x37e   :  { %5548 = vmatpush.bf16.msrb.mxu1 %v4995_v28  ;;  %v5123_v34 = vpack.c.bf16 %v4315_v23, %v4307_v50  ;;  %v3915_v58 = vcvt.s32.f32 %v2891_v16  ;;  %v3139_v9 = vunpack.c.2.s8 %v2675_v1  ;;  %v3147_v32 = vunpack.c.3.s8 %v2675_v1 }
 0x37f   :  { %5561 = vmatpush.bf16.msrb.mxu2 %v5059_v37  ;;  %v4035_v46 = vcvt.s32.f32 %v3011_v31  ;;  %v4043_v59 = vcvt.s32.f32 %v3019_v43  ;;  %v3267_v60 = vunpack.c.2.s8 %v2707_v39  ;;  %v3275_v44 = vunpack.c.3.s8 %v2707_v39 }
 0x380   :  { %5574 = vmatpush.bf16.msrb.mxu3 %v5123_v34  ;;  %v4923_v27 = vpack.c.bf16 %v3915_v58, %v3907_v40  ;;  %v4163_v42 = vcvt.s32.f32 %v3139_v9  ;;  %v4171_v63 = vcvt.s32.f32 %v3147_v32  ;;  %v2867_v35 = vunpack.c.0.s8 %v2611_v13 }
 0x381   :  { %v4987_v53 = vpack.c.bf16 %v4043_v59, %v4035_v46  ;;  %v4291_v3 = vcvt.s32.f32 %v3267_v60  ;;  %v4299_v45 = vcvt.s32.f32 %v3275_v44  ;;  %v2875_v17 = vunpack.c.1.s8 %v2611_v13 }
 0x382   :  { %5536 = vmatpush.bf16.msrb.mxu0 %v4923_v27  ;;  %v5051_v38 = vpack.c.bf16 %v4171_v63, %v4163_v42  ;;  %v3891_v15 = vcvt.s32.f32 %v2867_v35  ;;  %v2995_v12 = vunpack.c.0.s8 %v2643_v22  ;;  %v3003_v24 = vunpack.c.1.s8 %v2643_v22  ;;  %v2755_v42 = vld [vmem:[#allocation3 + $0x488] sm:$0xff] }
 0x383   :  { %5549 = vmatpush.bf16.msrb.mxu1 %v4987_v53  ;;  %v5115_v26 = vpack.c.bf16 %v4299_v45, %v4291_v3  ;;  %v3899_v61 = vcvt.s32.f32 %v2875_v17  ;;  %v3123_v36 = vunpack.c.0.s8 %v2675_v1  ;;  %v3131_v4 = vunpack.c.1.s8 %v2675_v1 }
 0x384   :  { %5562 = vmatpush.bf16.msrb.mxu2 %v5051_v38  ;;  %v4019_v5 = vcvt.s32.f32 %v2995_v12  ;;  %v4027_v33 = vcvt.s32.f32 %v3003_v24  ;;  %v3251_v10 = vunpack.c.0.s8 %v2707_v39  ;;  %v3259_v11 = vunpack.c.1.s8 %v2707_v39  ;;  %v2787_v12 = vld [vmem:[#allocation3 + $0x588] sm:$0xff] }
 0x385   :  { %5575 = vmatpush.bf16.msrb.mxu3 %v5115_v26  ;;  %v4915_v7 = vpack.c.bf16 %v3899_v61, %v3891_v15  ;;  %v4147_v13 = vcvt.s32.f32 %v3123_v36  ;;  %v4155_v29 = vcvt.s32.f32 %v3131_v4  ;;  %v3491_v47 = vunpack.c.2.s8 %v2763_v18  ;;  %v2819_v36 = vld [vmem:[#allocation3 + $0x688] sm:$0xff] }
 0x386   :  { %v4979_v30 = vpack.c.bf16 %v4027_v33, %v4019_v5  ;;  %v4275_v41 = vcvt.s32.f32 %v3251_v10  ;;  %v4283_v21 = vcvt.s32.f32 %v3259_v11  ;;  %v3499_v2 = vunpack.c.3.s8 %v2763_v18  ;;  %v2851_v11 = vld [vmem:[#allocation3 + $0x788] sm:$0xff] }
 0x387   :  { %5537 = vmatpush.bf16.msrb.mxu0 %v4915_v7  ;;  %v5043_v22 = vpack.c.bf16 %v4155_v29, %v4147_v13  ;;  %v4515_v25 = vcvt.s32.f32 %v3491_v47  ;;  %v3619_v6 = vunpack.c.2.s8 %v2795_v0  ;;  %v3627_v56 = vunpack.c.3.s8 %v2795_v0 }
 0x388   :  { %5550 = vmatpush.bf16.msrb.mxu1 %v4979_v30  ;;  %v5107_v19 = vpack.c.bf16 %v4283_v21, %v4275_v41  ;;  %v4523_v1 = vcvt.s32.f32 %v3499_v2  ;;  %v3747_v28 = vunpack.c.2.s8 %v2827_v14  ;;  %v3755_v50 = vunpack.c.3.s8 %v2827_v14 }
 0x389   :  { %5563 = vmatpush.bf16.msrb.mxu2 %v5043_v22  ;;  %v4643_v23 = vcvt.s32.f32 %v3619_v6  ;;  %v4651_v16 = vcvt.s32.f32 %v3627_v56  ;;  %v3875_v39 = vunpack.c.2.s8 %v2859_v51  ;;  %v3883_v37 = vunpack.c.3.s8 %v2859_v51 }
 0x38a   :  { %5576 = vmatpush.bf16.msrb.mxu3 %v5107_v19  ;;  %v5227_v40 = vpack.c.bf16 %v4523_v1, %v4515_v25  ;;  %v4771_v31 = vcvt.s32.f32 %v3747_v28  ;;  %v4779_v43 = vcvt.s32.f32 %v3755_v50  ;;  %v3475_v34 = vunpack.c.0.s8 %v2763_v18  ;;  %5538 = vmatmul.bf16.vlgmr.msrb.gmra.mxu0 %v9709_v52 }
 0x38b   :  { %v5291_v58 = vpack.c.bf16 %v4651_v16, %v4643_v23  ;;  %v4899_v9 = vcvt.s32.f32 %v3875_v39  ;;  %v4907_v32 = vcvt.s32.f32 %v3883_v37  ;;  %v3483_v46 = vunpack.c.1.s8 %v2763_v18  ;;  %5551 = vmatmul.bf16.vlgmr.msrb.gmra.mxu1 %v9711_v48 }
 0x38c   :  { %5582 = vmatpush.bf16.msra.mxu0 %v5227_v40  ;;  %v5355_v59 = vpack.c.bf16 %v4779_v43, %v4771_v31  ;;  %v4499_v60 = vcvt.s32.f32 %v3475_v34  ;;  %v3603_v44 = vunpack.c.0.s8 %v2795_v0  ;;  %v3611_v27 = vunpack.c.1.s8 %v2795_v0  ;;  %5564 = vmatmul.bf16.vlgmr.msrb.gmra.mxu2 %v9713_v62  ;;  %v2747_v31 = vld [vmem:[#allocation3 + $0x448] sm:$0xff] }
 0x38d   :  { %5595 = vmatpush.bf16.msra.mxu1 %v5291_v58  ;;  %v5419_v63 = vpack.c.bf16 %v4907_v32, %v4899_v9  ;;  %v4507_v35 = vcvt.s32.f32 %v3483_v46  ;;  %v3731_v53 = vunpack.c.0.s8 %v2827_v14  ;;  %v3739_v3 = vunpack.c.1.s8 %v2827_v14  ;;  %5577 = vmatmul.bf16.vlgmr.msrb.gmra.mxu3 %v9715_v54 }
 0x38e   :  { %5608 = vmatpush.bf16.msra.mxu2 %v5355_v59  ;;  %v4627_v45 = vcvt.s32.f32 %v3603_v44  ;;  %v4635_v17 = vcvt.s32.f32 %v3611_v27  ;;  %v3859_v38 = vunpack.c.0.s8 %v2859_v51  ;;  %v3867_v15 = vunpack.c.1.s8 %v2859_v51  ;;  %v2779_v44 = vld [vmem:[#allocation3 + $0x548] sm:$0xff] }
 0x38f   :  { %5621 = vmatpush.bf16.msra.mxu3 %v5419_v63  ;;  %v5219_v24 = vpack.c.bf16 %v4507_v35, %v4499_v60  ;;  %v4755_v18 = vcvt.s32.f32 %v3731_v53  ;;  %v4763_v26 = vcvt.s32.f32 %v3739_v3  ;;  %v3459_v61 = vunpack.c.2.s8 %v2755_v42  ;;  %v2811_v53 = vld [vmem:[#allocation3 + $0x648] sm:$0xff] }
 0x390   :  { %v5283_v4 = vpack.c.bf16 %v4635_v17, %v4627_v45  ;;  %v4883_v5 = vcvt.s32.f32 %v3859_v38  ;;  %v4891_v33 = vcvt.s32.f32 %v3867_v15  ;;  %v3467_v10 = vunpack.c.3.s8 %v2755_v42  ;;  %v2843_v15 = vld [vmem:[#allocation3 + $0x748] sm:$0xff] }
 0x391   :  { %5583 = vmatpush.bf16.msra.mxu0 %v5219_v24  ;;  %v5347_v0 = vpack.c.bf16 %v4763_v26, %v4755_v18  ;;  %v4483_v7 = vcvt.s32.f32 %v3459_v61  ;;  %v3587_v13 = vunpack.c.2.s8 %v2787_v12  ;;  %v3595_v29 = vunpack.c.3.s8 %v2787_v12 }
 0x392   :  { %5596 = vmatpush.bf16.msra.mxu1 %v5283_v4  ;;  %v5411_v47 = vpack.c.bf16 %v4891_v33, %v4883_v5  ;;  %v4491_v14 = vcvt.s32.f32 %v3467_v10  ;;  %v3715_v30 = vunpack.c.2.s8 %v2819_v36  ;;  %v3723_v41 = vunpack.c.3.s8 %v2819_v36 }
 0x393   :  { %5609 = vmatpush.bf16.msra.mxu2 %v5347_v0  ;;  %v4611_v21 = vcvt.s32.f32 %v3587_v13  ;;  %v4619_v2 = vcvt.s32.f32 %v3595_v29  ;;  %v3843_v51 = vunpack.c.2.s8 %v2851_v11  ;;  %v3851_v22 = vunpack.c.3.s8 %v2851_v11 }
 0x394   :  { %5622 = vmatpush.bf16.msra.mxu3 %v5411_v47  ;;  %v5211_v25 = vpack.c.bf16 %v4491_v14, %v4483_v7  ;;  %v4739_v6 = vcvt.s32.f32 %v3715_v30  ;;  %v4747_v56 = vcvt.s32.f32 %v3723_v41  ;;  %v3443_v19 = vunpack.c.0.s8 %v2755_v42 }
 0x395   :  { %v5275_v1 = vpack.c.bf16 %v4619_v2, %v4611_v21  ;;  %v4867_v28 = vcvt.s32.f32 %v3843_v51  ;;  %v4875_v50 = vcvt.s32.f32 %v3851_v22  ;;  %v3451_v23 = vunpack.c.1.s8 %v2755_v42 }
 0x396   :  { %5584 = vmatpush.bf16.msra.mxu0 %v5211_v25  ;;  %v5339_v16 = vpack.c.bf16 %v4747_v56, %v4739_v6  ;;  %v4467_v39 = vcvt.s32.f32 %v3443_v19  ;;  %v3571_v37 = vunpack.c.0.s8 %v2787_v12  ;;  %v3579_v40 = vunpack.c.1.s8 %v2787_v12  ;;  %v2739_v6 = vld [vmem:[#allocation3 + $0x408] sm:$0xff] }
 0x397   :  { %5597 = vmatpush.bf16.msra.mxu1 %v5275_v1  ;;  %v5403_v43 = vpack.c.bf16 %v4875_v50, %v4867_v28  ;;  %v4475_v34 = vcvt.s32.f32 %v3451_v23  ;;  %v3699_v58 = vunpack.c.0.s8 %v2819_v36  ;;  %v3707_v9 = vunpack.c.1.s8 %v2819_v36 }
 0x398   :  { %5610 = vmatpush.bf16.msra.mxu2 %v5339_v16  ;;  %v4595_v32 = vcvt.s32.f32 %v3571_v37  ;;  %v4603_v46 = vcvt.s32.f32 %v3579_v40  ;;  %v3827_v59 = vunpack.c.0.s8 %v2851_v11  ;;  %v3835_v60 = vunpack.c.1.s8 %v2851_v11  ;;  %v2771_v37 = vld [vmem:[#allocation3 + $0x508] sm:$0xff] }
 0x399   :  { %5623 = vmatpush.bf16.msra.mxu3 %v5403_v43  ;;  %v5203_v27 = vpack.c.bf16 %v4475_v34, %v4467_v39  ;;  %v4723_v42 = vcvt.s32.f32 %v3699_v58  ;;  %v4731_v63 = vcvt.s32.f32 %v3707_v9  ;;  %v3427_v35 = vunpack.c.2.s8 %v2747_v31  ;;  %v2803_v58 = vld [vmem:[#allocation3 + $0x608] sm:$0xff] }
 0x39a   :  { %v5267_v3 = vpack.c.bf16 %v4603_v46, %v4595_v32  ;;  %v4851_v45 = vcvt.s32.f32 %v3827_v59  ;;  %v4859_v17 = vcvt.s32.f32 %v3835_v60  ;;  %v3435_v38 = vunpack.c.3.s8 %v2747_v31  ;;  %v2835_v60 = vld [vmem:[#allocation3 + $0x708] sm:$0xff] }
 0x39b   :  { %5585 = vmatpush.bf16.msra.mxu0 %v5203_v27  ;;  %v5331_v12 = vpack.c.bf16 %v4731_v63, %v4723_v42  ;;  %v4451_v24 = vcvt.s32.f32 %v3427_v35  ;;  %v3555_v18 = vunpack.c.2.s8 %v2779_v44  ;;  %v3563_v26 = vunpack.c.3.s8 %v2779_v44 }
 0x39c   :  { %5598 = vmatpush.bf16.msra.mxu1 %v5267_v3  ;;  %v5395_v61 = vpack.c.bf16 %v4859_v17, %v4851_v45  ;;  %v4459_v36 = vcvt.s32.f32 %v3435_v38  ;;  %v3683_v4 = vunpack.c.2.s8 %v2811_v53  ;;  %v3691_v5 = vunpack.c.3.s8 %v2811_v53 }
 0x39d   :  { %5611 = vmatpush.bf16.msra.mxu2 %v5331_v12  ;;  %v4579_v33 = vcvt.s32.f32 %v3555_v18  ;;  %v4587_v10 = vcvt.s32.f32 %v3563_v26  ;;  %v3811_v11 = vunpack.c.2.s8 %v2843_v15  ;;  %v3819_v0 = vunpack.c.3.s8 %v2843_v15 }
 0x39e   :  { %5624 = vmatpush.bf16.msra.mxu3 %v5395_v61  ;;  %v5195_v7 = vpack.c.bf16 %v4459_v36, %v4451_v24  ;;  %v4707_v13 = vcvt.s32.f32 %v3683_v4  ;;  %v4715_v29 = vcvt.s32.f32 %v3691_v5  ;;  %v3411_v47 = vunpack.c.0.s8 %v2747_v31 }
 0x39f   :  { %v5259_v14 = vpack.c.bf16 %v4587_v10, %v4579_v33  ;;  %v4835_v30 = vcvt.s32.f32 %v3811_v11  ;;  %v4843_v41 = vcvt.s32.f32 %v3819_v0  ;;  %v3419_v21 = vunpack.c.1.s8 %v2747_v31 }
 0x3a0   :  { %5586 = vmatpush.bf16.msra.mxu0 %v5195_v7  ;;  %v5323_v2 = vpack.c.bf16 %v4715_v29, %v4707_v13  ;;  %v4435_v51 = vcvt.s32.f32 %v3411_v47  ;;  %v3539_v22 = vunpack.c.0.s8 %v2779_v44  ;;  %v3547_v25 = vunpack.c.1.s8 %v2779_v44  ;;  %v2636_v13 = vld [vmem:[#allocation3 + $0xd0] sm:$0xff] }
 0x3a1   :  { %5599 = vmatpush.bf16.msra.mxu1 %v5259_v14  ;;  %v5387_v56 = vpack.c.bf16 %v4843_v41, %v4835_v30  ;;  %v4443_v19 = vcvt.s32.f32 %v3419_v21  ;;  %v3667_v1 = vunpack.c.0.s8 %v2811_v53  ;;  %v3675_v28 = vunpack.c.1.s8 %v2811_v53 }
 0x3a2   :  { %5612 = vmatpush.bf16.msra.mxu2 %v5323_v2  ;;  %v4563_v50 = vcvt.s32.f32 %v3539_v22  ;;  %v4571_v23 = vcvt.s32.f32 %v3547_v25  ;;  %v3795_v16 = vunpack.c.0.s8 %v2843_v15  ;;  %v3803_v39 = vunpack.c.1.s8 %v2843_v15  ;;  %v2668_v22 = vld [vmem:[#allocation3 + $0x1d0] sm:$0xff] }
 0x3a3   :  { %5625 = vmatpush.bf16.msra.mxu3 %v5387_v56  ;;  %v5187_v40 = vpack.c.bf16 %v4443_v19, %v4435_v51  ;;  %v4691_v31 = vcvt.s32.f32 %v3667_v1  ;;  %v4699_v43 = vcvt.s32.f32 %v3675_v28  ;;  %v3395_v34 = vunpack.c.2.s8 %v2739_v6  ;;  %v2700_v1 = vld [vmem:[#allocation3 + $0x2d0] sm:$0xff] }
 0x3a4   :  { %v5251_v9 = vpack.c.bf16 %v4571_v23, %v4563_v50  ;;  %v4819_v32 = vcvt.s32.f32 %v3795_v16  ;;  %v4827_v46 = vcvt.s32.f32 %v3803_v39  ;;  %v3403_v59 = vunpack.c.3.s8 %v2739_v6  ;;  %v2732_v39 = vld [vmem:[#allocation3 + $0x3d0] sm:$0xff] }
 0x3a5   :  { %5587 = vmatpush.bf16.msra.mxu0 %v5187_v40  ;;  %v5315_v44 = vpack.c.bf16 %v4699_v43, %v4691_v31  ;;  %v4419_v27 = vcvt.s32.f32 %v3395_v34  ;;  %v3523_v42 = vunpack.c.2.s8 %v2771_v37  ;;  %v3531_v63 = vunpack.c.3.s8 %v2771_v37 }
 0x3a6   :  { %5600 = vmatpush.bf16.msra.mxu1 %v5251_v9  ;;  %v5379_v35 = vpack.c.bf16 %v4827_v46, %v4819_v32  ;;  %v4427_v53 = vcvt.s32.f32 %v3403_v59  ;;  %v3651_v3 = vunpack.c.2.s8 %v2803_v58  ;;  %v3659_v45 = vunpack.c.3.s8 %v2803_v58 }
 0x3a7   :  { %5613 = vmatpush.bf16.msra.mxu2 %v5315_v44  ;;  %v4547_v17 = vcvt.s32.f32 %v3523_v42  ;;  %v4555_v38 = vcvt.s32.f32 %v3531_v63  ;;  %v3779_v15 = vunpack.c.2.s8 %v2835_v60  ;;  %v3787_v12 = vunpack.c.3.s8 %v2835_v60 }
 0x3a8   :  { %5626 = vmatpush.bf16.msra.mxu3 %v5379_v35  ;;  %v5179_v24 = vpack.c.bf16 %v4427_v53, %v4419_v27  ;;  %v4675_v18 = vcvt.s32.f32 %v3651_v3  ;;  %v4683_v26 = vcvt.s32.f32 %v3659_v45  ;;  %v3379_v61 = vunpack.c.0.s8 %v2739_v6 }
 0x3a9   :  { %v5243_v36 = vpack.c.bf16 %v4555_v38, %v4547_v17  ;;  %v4803_v4 = vcvt.s32.f32 %v3779_v15  ;;  %v4811_v5 = vcvt.s32.f32 %v3787_v12  ;;  %v3387_v33 = vunpack.c.1.s8 %v2739_v6 }
 0x3aa   :  { %5588 = vmatpush.bf16.msra.mxu0 %v5179_v24  ;;  %v5307_v10 = vpack.c.bf16 %v4683_v26, %v4675_v18  ;;  %v4403_v11 = vcvt.s32.f32 %v3379_v61  ;;  %v3507_v0 = vunpack.c.0.s8 %v2771_v37  ;;  %v3515_v7 = vunpack.c.1.s8 %v2771_v37  ;;  %v2628_v18 = vld [vmem:[#allocation3 + $0x90] sm:$0xff] }
 0x3ab   :  { %5601 = vmatpush.bf16.msra.mxu1 %v5243_v36  ;;  %v5371_v29 = vpack.c.bf16 %v4811_v5, %v4803_v4  ;;  %v4411_v47 = vcvt.s32.f32 %v3387_v33  ;;  %v3635_v14 = vunpack.c.0.s8 %v2803_v58  ;;  %v3643_v30 = vunpack.c.1.s8 %v2803_v58 }
 0x3ac   :  { %5614 = vmatpush.bf16.msra.mxu2 %v5307_v10  ;;  %v4531_v41 = vcvt.s32.f32 %v3507_v0  ;;  %v4539_v21 = vcvt.s32.f32 %v3515_v7  ;;  %v3763_v2 = vunpack.c.0.s8 %v2835_v60  ;;  %v3771_v51 = vunpack.c.1.s8 %v2835_v60  ;;  %v2660_v0 = vld [vmem:[#allocation3 + $0x190] sm:$0xff] }
 0x3ad   :  { %5627 = vmatpush.bf16.msra.mxu3 %v5371_v29  ;;  %v5171_v25 = vpack.c.bf16 %v4411_v47, %v4403_v11  ;;  %v4659_v6 = vcvt.s32.f32 %v3635_v14  ;;  %v4667_v56 = vcvt.s32.f32 %v3643_v30  ;;  %v2980_v19 = vunpack.c.2.s8 %v2636_v13  ;;  %v2692_v14 = vld [vmem:[#allocation3 + $0x290] sm:$0xff] }
 0x3ae   :  { %v5235_v28 = vpack.c.bf16 %v4539_v21, %v4531_v41  ;;  %v4787_v50 = vcvt.s32.f32 %v3763_v2  ;;  %v4795_v23 = vcvt.s32.f32 %v3771_v51  ;;  %v2988_v16 = vunpack.c.3.s8 %v2636_v13  ;;  %v2724_v51 = vld [vmem:[#allocation3 + $0x390] sm:$0xff] }
 0x3af   :  { %5589 = vmatpush.bf16.msra.mxu0 %v5171_v25  ;;  %v5299_v37 = vpack.c.bf16 %v4667_v56, %v4659_v6  ;;  %v4004_v40 = vcvt.s32.f32 %v2980_v19  ;;  %v3108_v31 = vunpack.c.2.s8 %v2668_v22  ;;  %v3116_v43 = vunpack.c.3.s8 %v2668_v22 }
 0x3b0   :  { %5602 = vmatpush.bf16.msra.mxu1 %v5235_v28  ;;  %v5363_v34 = vpack.c.bf16 %v4795_v23, %v4787_v50  ;;  %v4012_v58 = vcvt.s32.f32 %v2988_v16  ;;  %v3236_v9 = vunpack.c.2.s8 %v2700_v1  ;;  %v3244_v32 = vunpack.c.3.s8 %v2700_v1 }
 0x3b1   :  { %5615 = vmatpush.bf16.msra.mxu2 %v5299_v37  ;;  %v4132_v46 = vcvt.s32.f32 %v3108_v31  ;;  %v4140_v59 = vcvt.s32.f32 %v3116_v43  ;;  %v3364_v60 = vunpack.c.2.s8 %v2732_v39  ;;  %v3372_v44 = vunpack.c.3.s8 %v2732_v39 }
 0x3b2   :  { %5628 = vmatpush.bf16.msra.mxu3 %v5363_v34  ;;  %v4972_v27 = vpack.c.bf16 %v4012_v58, %v4004_v40  ;;  %v4260_v42 = vcvt.s32.f32 %v3236_v9  ;;  %v4268_v63 = vcvt.s32.f32 %v3244_v32  ;;  %5590 = vmatmul.bf16.vlgmr.msra.gmra.mxu0 %v9717_v20  ;;  %v2964_v35 = vunpack.c.0.s8 %v2636_v13 }
 0x3b3   :  { %v5036_v53 = vpack.c.bf16 %v4140_v59, %v4132_v46  ;;  %v4388_v3 = vcvt.s32.f32 %v3364_v60  ;;  %v4396_v45 = vcvt.s32.f32 %v3372_v44  ;;  %v2972_v17 = vunpack.c.1.s8 %v2636_v13  ;;  %5603 = vmatmul.bf16.vlgmr.msra.gmra.mxu1 %v9719_v55 }
 0x3b4   :  { %5634 = vmatpush.bf16.msrb.mxu0 %v4972_v27  ;;  %v5100_v38 = vpack.c.bf16 %v4268_v63, %v4260_v42  ;;  %5616 = vmatmul.bf16.vlgmr.msra.gmra.mxu2 %v9721_v57  ;;  %v3988_v15 = vcvt.s32.f32 %v2964_v35  ;;  %v3092_v12 = vunpack.c.0.s8 %v2668_v22  ;;  %v3100_v24 = vunpack.c.1.s8 %v2668_v22  ;;  %v2620_v42 = vld [vmem:[#allocation3 + $0x50] sm:$0xff] }
 0x3b5   :  { %5647 = vmatpush.bf16.msrb.mxu1 %v5036_v53  ;;  %v5164_v26 = vpack.c.bf16 %v4396_v45, %v4388_v3  ;;  %5629 = vmatmul.bf16.vlgmr.msra.gmra.mxu3 %v9723_v8  ;;  %v3996_v61 = vcvt.s32.f32 %v2972_v17  ;;  %v3220_v36 = vunpack.c.0.s8 %v2700_v1  ;;  %v3228_v4 = vunpack.c.1.s8 %v2700_v1 }
 0x3b6   :  { %5660 = vmatpush.bf16.msrb.mxu2 %v5100_v38  ;;  %v4116_v5 = vcvt.s32.f32 %v3092_v12  ;;  %v4124_v33 = vcvt.s32.f32 %v3100_v24  ;;  %v3348_v10 = vunpack.c.0.s8 %v2732_v39  ;;  %v3356_v11 = vunpack.c.1.s8 %v2732_v39  ;;  %v2652_v12 = vld [vmem:[#allocation3 + $0x150] sm:$0xff] }
 0x3b7   :  { %5673 = vmatpush.bf16.msrb.mxu3 %v5164_v26  ;;  %v4964_v7 = vpack.c.bf16 %v3996_v61, %v3988_v15  ;;  %v4244_v13 = vcvt.s32.f32 %v3220_v36  ;;  %v4252_v29 = vcvt.s32.f32 %v3228_v4  ;;  %v2948_v47 = vunpack.c.2.s8 %v2628_v18  ;;  %v2684_v36 = vld [vmem:[#allocation3 + $0x250] sm:$0xff] }
 0x3b8   :  { %v5028_v30 = vpack.c.bf16 %v4124_v33, %v4116_v5  ;;  %v4372_v41 = vcvt.s32.f32 %v3348_v10  ;;  %v4380_v21 = vcvt.s32.f32 %v3356_v11  ;;  %v2956_v2 = vunpack.c.3.s8 %v2628_v18  ;;  %v2716_v11 = vld [vmem:[#allocation3 + $0x350] sm:$0xff] }
 0x3b9   :  { %5635 = vmatpush.bf16.msrb.mxu0 %v4964_v7  ;;  %v5092_v22 = vpack.c.bf16 %v4252_v29, %v4244_v13  ;;  %v3972_v25 = vcvt.s32.f32 %v2948_v47  ;;  %v3076_v6 = vunpack.c.2.s8 %v2660_v0  ;;  %v3084_v56 = vunpack.c.3.s8 %v2660_v0 }
 0x3ba   :  { %5648 = vmatpush.bf16.msrb.mxu1 %v5028_v30  ;;  %v5156_v19 = vpack.c.bf16 %v4380_v21, %v4372_v41  ;;  %v3980_v1 = vcvt.s32.f32 %v2956_v2  ;;  %v3204_v28 = vunpack.c.2.s8 %v2692_v14  ;;  %v3212_v50 = vunpack.c.3.s8 %v2692_v14 }
 0x3bb   :  { %5661 = vmatpush.bf16.msrb.mxu2 %v5092_v22  ;;  %v4100_v23 = vcvt.s32.f32 %v3076_v6  ;;  %v4108_v16 = vcvt.s32.f32 %v3084_v56  ;;  %v3332_v39 = vunpack.c.2.s8 %v2724_v51  ;;  %v3340_v37 = vunpack.c.3.s8 %v2724_v51 }
 0x3bc   :  { %5674 = vmatpush.bf16.msrb.mxu3 %v5156_v19  ;;  %v4956_v40 = vpack.c.bf16 %v3980_v1, %v3972_v25  ;;  %v4228_v31 = vcvt.s32.f32 %v3204_v28  ;;  %v4236_v43 = vcvt.s32.f32 %v3212_v50  ;;  %v2932_v34 = vunpack.c.0.s8 %v2628_v18 }
 0x3bd   :  { %v5020_v58 = vpack.c.bf16 %v4108_v16, %v4100_v23  ;;  %v4356_v9 = vcvt.s32.f32 %v3332_v39  ;;  %v4364_v32 = vcvt.s32.f32 %v3340_v37  ;;  %v2940_v46 = vunpack.c.1.s8 %v2628_v18 }
 0x3be   :  { %5636 = vmatpush.bf16.msrb.mxu0 %v4956_v40  ;;  %v5084_v59 = vpack.c.bf16 %v4236_v43, %v4228_v31  ;;  %v3956_v60 = vcvt.s32.f32 %v2932_v34  ;;  %v3060_v44 = vunpack.c.0.s8 %v2660_v0  ;;  %v3068_v27 = vunpack.c.1.s8 %v2660_v0  ;;  %v2612_v31 = vld [vmem:[#allocation3 + $0x10] sm:$0xff] }
 0x3bf   :  { %5649 = vmatpush.bf16.msrb.mxu1 %v5020_v58  ;;  %v5148_v63 = vpack.c.bf16 %v4364_v32, %v4356_v9  ;;  %v3964_v35 = vcvt.s32.f32 %v2940_v46  ;;  %v3188_v53 = vunpack.c.0.s8 %v2692_v14  ;;  %v3196_v3 = vunpack.c.1.s8 %v2692_v14 }
 0x3c0   :  { %5662 = vmatpush.bf16.msrb.mxu2 %v5084_v59  ;;  %v4084_v45 = vcvt.s32.f32 %v3060_v44  ;;  %v4092_v17 = vcvt.s32.f32 %v3068_v27  ;;  %v3316_v38 = vunpack.c.0.s8 %v2724_v51  ;;  %v3324_v15 = vunpack.c.1.s8 %v2724_v51  ;;  %v2644_v44 = vld [vmem:[#allocation3 + $0x110] sm:$0xff] }
 0x3c1   :  { %5675 = vmatpush.bf16.msrb.mxu3 %v5148_v63  ;;  %v4948_v24 = vpack.c.bf16 %v3964_v35, %v3956_v60  ;;  %v4212_v18 = vcvt.s32.f32 %v3188_v53  ;;  %v4220_v26 = vcvt.s32.f32 %v3196_v3  ;;  %v2916_v61 = vunpack.c.2.s8 %v2620_v42  ;;  %v2676_v53 = vld [vmem:[#allocation3 + $0x210] sm:$0xff] }
 0x3c2   :  { %v5012_v4 = vpack.c.bf16 %v4092_v17, %v4084_v45  ;;  %v4340_v5 = vcvt.s32.f32 %v3316_v38  ;;  %v4348_v33 = vcvt.s32.f32 %v3324_v15  ;;  %v2924_v10 = vunpack.c.3.s8 %v2620_v42  ;;  %v2708_v15 = vld [vmem:[#allocation3 + $0x310] sm:$0xff] }
 0x3c3   :  { %5637 = vmatpush.bf16.msrb.mxu0 %v4948_v24  ;;  %v5076_v0 = vpack.c.bf16 %v4220_v26, %v4212_v18  ;;  %v3940_v7 = vcvt.s32.f32 %v2916_v61  ;;  %v3044_v13 = vunpack.c.2.s8 %v2652_v12  ;;  %v3052_v29 = vunpack.c.3.s8 %v2652_v12 }
 0x3c4   :  { %5650 = vmatpush.bf16.msrb.mxu1 %v5012_v4  ;;  %v5140_v47 = vpack.c.bf16 %v4348_v33, %v4340_v5  ;;  %v3948_v14 = vcvt.s32.f32 %v2924_v10  ;;  %v3172_v30 = vunpack.c.2.s8 %v2684_v36  ;;  %v3180_v41 = vunpack.c.3.s8 %v2684_v36 }
 0x3c5   :  { %5663 = vmatpush.bf16.msrb.mxu2 %v5076_v0  ;;  %v4068_v21 = vcvt.s32.f32 %v3044_v13  ;;  %v4076_v2 = vcvt.s32.f32 %v3052_v29  ;;  %v3300_v51 = vunpack.c.2.s8 %v2716_v11  ;;  %v3308_v22 = vunpack.c.3.s8 %v2716_v11 }
 0x3c6   :  { %5676 = vmatpush.bf16.msrb.mxu3 %v5140_v47  ;;  %v4940_v25 = vpack.c.bf16 %v3948_v14, %v3940_v7  ;;  %v4196_v6 = vcvt.s32.f32 %v3172_v30  ;;  %v4204_v56 = vcvt.s32.f32 %v3180_v41  ;;  %v2900_v19 = vunpack.c.0.s8 %v2620_v42 }
 0x3c7   :  { %v5004_v1 = vpack.c.bf16 %v4076_v2, %v4068_v21  ;;  %v4324_v28 = vcvt.s32.f32 %v3300_v51  ;;  %v4332_v50 = vcvt.s32.f32 %v3308_v22  ;;  %v2908_v23 = vunpack.c.1.s8 %v2620_v42 }
 0x3c8   :  { %5638 = vmatpush.bf16.msrb.mxu0 %v4940_v25  ;;  %v5068_v16 = vpack.c.bf16 %v4204_v56, %v4196_v6  ;;  %v3924_v39 = vcvt.s32.f32 %v2900_v19  ;;  %v3028_v37 = vunpack.c.0.s8 %v2652_v12  ;;  %v3036_v40 = vunpack.c.1.s8 %v2652_v12  ;;  %v2764_v6 = vld [vmem:[#allocation3 + $0x4d0] sm:$0xff] }
 0x3c9   :  { %5651 = vmatpush.bf16.msrb.mxu1 %v5004_v1  ;;  %v5132_v43 = vpack.c.bf16 %v4332_v50, %v4324_v28  ;;  %v3932_v34 = vcvt.s32.f32 %v2908_v23  ;;  %v3156_v58 = vunpack.c.0.s8 %v2684_v36  ;;  %v3164_v9 = vunpack.c.1.s8 %v2684_v36 }
 0x3ca   :  { %5664 = vmatpush.bf16.msrb.mxu2 %v5068_v16  ;;  %v4052_v32 = vcvt.s32.f32 %v3028_v37  ;;  %v4060_v46 = vcvt.s32.f32 %v3036_v40  ;;  %v3284_v59 = vunpack.c.0.s8 %v2716_v11  ;;  %v3292_v60 = vunpack.c.1.s8 %v2716_v11  ;;  %v2796_v37 = vld [vmem:[#allocation3 + $0x5d0] sm:$0xff] }
 0x3cb   :  { %5677 = vmatpush.bf16.msrb.mxu3 %v5132_v43  ;;  %v4932_v27 = vpack.c.bf16 %v3932_v34, %v3924_v39  ;;  %v4180_v42 = vcvt.s32.f32 %v3156_v58  ;;  %v4188_v63 = vcvt.s32.f32 %v3164_v9  ;;  %v2884_v35 = vunpack.c.2.s8 %v2612_v31  ;;  %v2828_v58 = vld [vmem:[#allocation3 + $0x6d0] sm:$0xff] }
 0x3cc   :  { %v4996_v3 = vpack.c.bf16 %v4060_v46, %v4052_v32  ;;  %v4308_v45 = vcvt.s32.f32 %v3284_v59  ;;  %v4316_v17 = vcvt.s32.f32 %v3292_v60  ;;  %v2892_v38 = vunpack.c.3.s8 %v2612_v31  ;;  %v2860_v60 = vld [vmem:[#allocation3 + $0x7d0] sm:$0xff] }
 0x3cd   :  { %5639 = vmatpush.bf16.msrb.mxu0 %v4932_v27  ;;  %v5060_v12 = vpack.c.bf16 %v4188_v63, %v4180_v42  ;;  %v3908_v24 = vcvt.s32.f32 %v2884_v35  ;;  %v3012_v18 = vunpack.c.2.s8 %v2644_v44  ;;  %v3020_v26 = vunpack.c.3.s8 %v2644_v44 }
 0x3ce   :  { %5652 = vmatpush.bf16.msrb.mxu1 %v4996_v3  ;;  %v5124_v61 = vpack.c.bf16 %v4316_v17, %v4308_v45  ;;  %v3916_v36 = vcvt.s32.f32 %v2892_v38  ;;  %v3140_v4 = vunpack.c.2.s8 %v2676_v53  ;;  %v3148_v5 = vunpack.c.3.s8 %v2676_v53 }
 0x3cf   :  { %5665 = vmatpush.bf16.msrb.mxu2 %v5060_v12  ;;  %v4036_v33 = vcvt.s32.f32 %v3012_v18  ;;  %v4044_v10 = vcvt.s32.f32 %v3020_v26  ;;  %v3268_v11 = vunpack.c.2.s8 %v2708_v15  ;;  %v3276_v0 = vunpack.c.3.s8 %v2708_v15 }
 0x3d0   :  { %5678 = vmatpush.bf16.msrb.mxu3 %v5124_v61  ;;  %v4924_v7 = vpack.c.bf16 %v3916_v36, %v3908_v24  ;;  %v4164_v13 = vcvt.s32.f32 %v3140_v4  ;;  %v4172_v29 = vcvt.s32.f32 %v3148_v5  ;;  %v2868_v47 = vunpack.c.0.s8 %v2612_v31 }
 0x3d1   :  { %v4988_v14 = vpack.c.bf16 %v4044_v10, %v4036_v33  ;;  %v4292_v30 = vcvt.s32.f32 %v3268_v11  ;;  %v4300_v41 = vcvt.s32.f32 %v3276_v0  ;;  %v2876_v21 = vunpack.c.1.s8 %v2612_v31 }
 0x3d2   :  { %5640 = vmatpush.bf16.msrb.mxu0 %v4924_v7  ;;  %v5052_v2 = vpack.c.bf16 %v4172_v29, %v4164_v13  ;;  %v3892_v51 = vcvt.s32.f32 %v2868_v47  ;;  %v2996_v22 = vunpack.c.0.s8 %v2644_v44  ;;  %v3004_v25 = vunpack.c.1.s8 %v2644_v44  ;;  %v2756_v13 = vld [vmem:[#allocation3 + $0x490] sm:$0xff] }
 0x3d3   :  { %5653 = vmatpush.bf16.msrb.mxu1 %v4988_v14  ;;  %v5116_v56 = vpack.c.bf16 %v4300_v41, %v4292_v30  ;;  %v3900_v19 = vcvt.s32.f32 %v2876_v21  ;;  %v3124_v1 = vunpack.c.0.s8 %v2676_v53  ;;  %v3132_v28 = vunpack.c.1.s8 %v2676_v53  ;;  %v9745_v41 = vpop.f32.mrf.mxu0  ;;  %v9747_v21 = vpop.f32.mrf.mxu1 }
 0x3d4   :  { %5666 = vmatpush.bf16.msrb.mxu2 %v5052_v2  ;;  %v4020_v50 = vcvt.s32.f32 %v2996_v22  ;;  %v4028_v23 = vcvt.s32.f32 %v3004_v25  ;;  %v3252_v16 = vunpack.c.0.s8 %v2708_v15  ;;  %v3260_v39 = vunpack.c.1.s8 %v2708_v15 }
 0x3d5   :  { %5679 = vmatpush.bf16.msrb.mxu3 %v5116_v56  ;;  %v4916_v40 = vpack.c.bf16 %v3900_v19, %v3892_v51  ;;  %v4148_v31 = vcvt.s32.f32 %v3124_v1  ;;  %v4156_v43 = vcvt.s32.f32 %v3132_v28  ;;  %v3492_v34 = vunpack.c.2.s8 %v2764_v6 }
 0x3d6   :  { %v4980_v9 = vpack.c.bf16 %v4028_v23, %v4020_v50  ;;  %v4276_v32 = vcvt.s32.f32 %v3252_v16  ;;  %v4284_v46 = vcvt.s32.f32 %v3260_v39  ;;  %v3500_v59 = vunpack.c.3.s8 %v2764_v6  ;;  %v2820_v50 = vld [vmem:[#allocation3 + $0x690] sm:$0xff] }
 0x3d7   :  { %5641 = vmatpush.bf16.msrb.mxu0 %v4916_v40  ;;  %v5044_v44 = vpack.c.bf16 %v4156_v43, %v4148_v31  ;;  %v4516_v27 = vcvt.s32.f32 %v3492_v34  ;;  %v3620_v42 = vunpack.c.2.s8 %v2796_v37  ;;  %v3628_v63 = vunpack.c.3.s8 %v2796_v37  ;;  %v2852_v40 = vld [vmem:[#allocation3 + $0x790] sm:$0xff] }
 0x3d8   :  { %5654 = vmatpush.bf16.msrb.mxu1 %v4980_v9  ;;  %v5108_v35 = vpack.c.bf16 %v4284_v46, %v4276_v32  ;;  %v4524_v53 = vcvt.s32.f32 %v3500_v59  ;;  %v3748_v3 = vunpack.c.2.s8 %v2828_v58  ;;  %v3756_v45 = vunpack.c.3.s8 %v2828_v58 }
 0x3d9   :  { %5667 = vmatpush.bf16.msrb.mxu2 %v5044_v44  ;;  %v4644_v17 = vcvt.s32.f32 %v3620_v42  ;;  %v4652_v38 = vcvt.s32.f32 %v3628_v63  ;;  %v3876_v15 = vunpack.c.2.s8 %v2860_v60  ;;  %v3884_v12 = vunpack.c.3.s8 %v2860_v60 }
 0x3da   :  { %5680 = vmatpush.bf16.msrb.mxu3 %v5108_v35  ;;  %v5228_v24 = vpack.c.bf16 %v4524_v53, %v4516_v27  ;;  %v4772_v18 = vcvt.s32.f32 %v3748_v3  ;;  %v4780_v26 = vcvt.s32.f32 %v3756_v45  ;;  %v3476_v61 = vunpack.c.0.s8 %v2764_v6  ;;  %5642 = vmatmul.bf16.vlgmr.msrb.gmra.mxu0 %v9709_v52 }
 0x3db   :  { %v5292_v36 = vpack.c.bf16 %v4652_v38, %v4644_v17  ;;  %v4900_v4 = vcvt.s32.f32 %v3876_v15  ;;  %v4908_v5 = vcvt.s32.f32 %v3884_v12  ;;  %v3484_v33 = vunpack.c.1.s8 %v2764_v6  ;;  %5655 = vmatmul.bf16.vlgmr.msrb.gmra.mxu1 %v9711_v48  ;;  %v2788_v6 = vld [vmem:[#allocation3 + $0x590] sm:$0xff]  ;;  %v5437_v12 = vpop.f32.mrf.mxu0 }
 0x3dc   :  { %5686 = vmatpush.bf16.msra.mxu0 %v5228_v24  ;;  %v5356_v10 = vpack.c.bf16 %v4780_v26, %v4772_v18  ;;  %v4500_v11 = vcvt.s32.f32 %v3476_v61  ;;  %v3604_v0 = vunpack.c.0.s8 %v2796_v37  ;;  %v3612_v7 = vunpack.c.1.s8 %v2796_v37  ;;  %5668 = vmatmul.bf16.vlgmr.msrb.gmra.mxu2 %v9713_v62  ;;  %v5450_v24 = vpop.f32.mrf.mxu1 }
 0x3dd   :  { %5699 = vmatpush.bf16.msra.mxu1 %v5292_v36  ;;  %v5420_v29 = vpack.c.bf16 %v4908_v5, %v4900_v4  ;;  %v4508_v47 = vcvt.s32.f32 %v3484_v33  ;;  %v3732_v14 = vunpack.c.0.s8 %v2828_v58  ;;  %v3740_v30 = vunpack.c.1.s8 %v2828_v58  ;;  %5681 = vmatmul.bf16.vlgmr.msrb.gmra.mxu3 %v9715_v54  ;;  %v2748_v4 = vld [vmem:[#allocation3 + $0x450] sm:$0xff] }
 0x3de   :  { %5712 = vmatpush.bf16.msra.mxu2 %v5356_v10  ;;  %v4628_v2 = vcvt.s32.f32 %v3604_v0  ;;  %v4636_v51 = vcvt.s32.f32 %v3612_v7  ;;  %v3860_v22 = vunpack.c.0.s8 %v2860_v60  ;;  %v3868_v25 = vunpack.c.1.s8 %v2860_v60  ;;  %v9749_v0 = vpop.f32.mrf.mxu2  ;;  %v9751_v7 = vpop.f32.mrf.mxu3  ;;  %v2740_v24 = vld [vmem:[#allocation3 + $0x410] sm:$0xff] }
 0x3df   :  { %5725 = vmatpush.bf16.msra.mxu3 %v5420_v29  ;;  %v5220_v56 = vpack.c.bf16 %v4508_v47, %v4500_v11  ;;  %v4756_v19 = vcvt.s32.f32 %v3732_v14  ;;  %v4764_v1 = vcvt.s32.f32 %v3740_v30  ;;  %v3460_v28 = vunpack.c.2.s8 %v2756_v13  ;;  %v2780_v30 = vld [vmem:[#allocation3 + $0x550] sm:$0xff] }
 0x3e0   :  { %v5284_v23 = vpack.c.bf16 %v4636_v51, %v4628_v2  ;;  %v4884_v16 = vcvt.s32.f32 %v3860_v22  ;;  %v4892_v39 = vcvt.s32.f32 %v3868_v25  ;;  %v3468_v37 = vunpack.c.3.s8 %v2756_v13 }
 0x3e1   :  { %5687 = vmatpush.bf16.msra.mxu0 %v5220_v56  ;;  %v5348_v31 = vpack.c.bf16 %v4764_v1, %v4756_v19  ;;  %v4484_v43 = vcvt.s32.f32 %v3460_v28  ;;  %v3588_v34 = vunpack.c.2.s8 %v2788_v6  ;;  %v3596_v58 = vunpack.c.3.s8 %v2788_v6 }
 0x3e2   :  { %5700 = vmatpush.bf16.msra.mxu1 %v5284_v23  ;;  %v5412_v9 = vpack.c.bf16 %v4892_v39, %v4884_v16  ;;  %v4492_v32 = vcvt.s32.f32 %v3468_v37  ;;  %v3716_v46 = vunpack.c.2.s8 %v2820_v50  ;;  %v3724_v59 = vunpack.c.3.s8 %v2820_v50 }
 0x3e3   :  { %5713 = vmatpush.bf16.msra.mxu2 %v5348_v31  ;;  %v4612_v60 = vcvt.s32.f32 %v3588_v34  ;;  %v4620_v44 = vcvt.s32.f32 %v3596_v58  ;;  %v3844_v27 = vunpack.c.2.s8 %v2852_v40  ;;  %v3852_v42 = vunpack.c.3.s8 %v2852_v40 }
 0x3e4   :  { %5726 = vmatpush.bf16.msra.mxu3 %v5412_v9  ;;  %v5212_v63 = vpack.c.bf16 %v4492_v32, %v4484_v43  ;;  %v4740_v35 = vcvt.s32.f32 %v3716_v46  ;;  %v4748_v53 = vcvt.s32.f32 %v3724_v59  ;;  %v3444_v3 = vunpack.c.0.s8 %v2756_v13 }
 0x3e5   :  { %v5276_v45 = vpack.c.bf16 %v4620_v44, %v4612_v60  ;;  %v4868_v17 = vcvt.s32.f32 %v3844_v27  ;;  %v4876_v38 = vcvt.s32.f32 %v3852_v42  ;;  %v3452_v15 = vunpack.c.1.s8 %v2756_v13 }
 0x3e6   :  { %5688 = vmatpush.bf16.msra.mxu0 %v5212_v63  ;;  %v5340_v18 = vpack.c.bf16 %v4748_v53, %v4740_v35  ;;  %v4468_v26 = vcvt.s32.f32 %v3444_v3  ;;  %v3572_v61 = vunpack.c.0.s8 %v2788_v6  ;;  %v3580_v36 = vunpack.c.1.s8 %v2788_v6  ;;  %v2812_v6 = vld [vmem:[#allocation3 + $0x650] sm:$0xff]  ;;  %v5463_v3 = vpop.f32.mrf.mxu2 }
 0x3e7   :  { %5701 = vmatpush.bf16.msra.mxu1 %v5276_v45  ;;  %v5404_v5 = vpack.c.bf16 %v4876_v38, %v4868_v17  ;;  %v4476_v33 = vcvt.s32.f32 %v3452_v15  ;;  %v3700_v10 = vunpack.c.0.s8 %v2820_v50  ;;  %v3708_v11 = vunpack.c.1.s8 %v2820_v50  ;;  %v2844_v50 = vld [vmem:[#allocation3 + $0x750] sm:$0xff]  ;;  %v5476_v45 = vpop.f32.mrf.mxu3 }
 0x3e8   :  { %5714 = vmatpush.bf16.msra.mxu2 %v5340_v18  ;;  %v4596_v29 = vcvt.s32.f32 %v3572_v61  ;;  %v4604_v13 = vcvt.s32.f32 %v3580_v36  ;;  %v3828_v47 = vunpack.c.0.s8 %v2852_v40  ;;  %v3836_v14 = vunpack.c.1.s8 %v2852_v40  ;;  %v9759_v45 = vld [vmem:[#allocation3 + $0xd8] sm:$0xff] }
 0x3e9   :  { %5727 = vmatpush.bf16.msra.mxu3 %v5404_v5  ;;  %v5204_v2 = vpack.c.bf16 %v4476_v33, %v4468_v26  ;;  %v4724_v51 = vcvt.s32.f32 %v3700_v10  ;;  %v4732_v22 = vcvt.s32.f32 %v3708_v11  ;;  %v3428_v25 = vunpack.c.2.s8 %v2748_v4 }
 0x3ea   :  { %v5268_v56 = vpack.c.bf16 %v4604_v13, %v4596_v29  ;;  %v4852_v19 = vcvt.s32.f32 %v3828_v47  ;;  %v4860_v1 = vcvt.s32.f32 %v3836_v14  ;;  %v3436_v28 = vunpack.c.3.s8 %v2748_v4  ;;  %v2772_v29 = vld [vmem:[#allocation3 + $0x510] sm:$0xff] }
 0x3eb   :  { %5689 = vmatpush.bf16.msra.mxu0 %v5204_v2  ;;  %v5332_v23 = vpack.c.bf16 %v4732_v22, %v4724_v51  ;;  %v4452_v16 = vcvt.s32.f32 %v3428_v25  ;;  %v3556_v39 = vunpack.c.2.s8 %v2780_v30  ;;  %v3564_v37 = vunpack.c.3.s8 %v2780_v30  ;;  %v2804_v2 = vld [vmem:[#allocation3 + $0x610] sm:$0xff] }
 0x3ec   :  { %5702 = vmatpush.bf16.msra.mxu1 %v5268_v56  ;;  %v5396_v31 = vpack.c.bf16 %v4860_v1, %v4852_v19  ;;  %v4460_v40 = vcvt.s32.f32 %v3436_v28  ;;  %v3684_v43 = vunpack.c.2.s8 %v2812_v6  ;;  %v3692_v34 = vunpack.c.3.s8 %v2812_v6  ;;  %v2836_v56 = vld [vmem:[#allocation3 + $0x710] sm:$0xff] }
 0x3ed   :  { %5715 = vmatpush.bf16.msra.mxu2 %v5332_v23  ;;  %v4580_v58 = vcvt.s32.f32 %v3556_v39  ;;  %v4588_v9 = vcvt.s32.f32 %v3564_v37  ;;  %v3812_v32 = vunpack.c.2.s8 %v2844_v50  ;;  %v3820_v46 = vunpack.c.3.s8 %v2844_v50 }
 0x3ee   :  { %5728 = vmatpush.bf16.msra.mxu3 %v5396_v31  ;;  %v5196_v59 = vpack.c.bf16 %v4460_v40, %v4452_v16  ;;  %v4708_v60 = vcvt.s32.f32 %v3684_v43  ;;  %v4716_v44 = vcvt.s32.f32 %v3692_v34  ;;  %v3412_v27 = vunpack.c.0.s8 %v2748_v4  ;;  %v9753_v34 = vpop.f32.mrf.mxu0 }
 0x3ef   :  { %v5260_v42 = vpack.c.bf16 %v4588_v9, %v4580_v58  ;;  %v4836_v63 = vcvt.s32.f32 %v3812_v32  ;;  %v4844_v35 = vcvt.s32.f32 %v3820_v46  ;;  %v3420_v53 = vunpack.c.1.s8 %v2748_v4  ;;  %v9755_v58 = vpop.f32.mrf.mxu1 }
 0x3f0   :  { %5690 = vmatpush.bf16.msra.mxu0 %v5196_v59  ;;  %v5324_v17 = vpack.c.bf16 %v4716_v44, %v4708_v60  ;;  %v4436_v38 = vcvt.s32.f32 %v3412_v27  ;;  %v3540_v15 = vunpack.c.0.s8 %v2780_v30  ;;  %v3548_v12 = vunpack.c.1.s8 %v2780_v30 }
 0x3f1   :  { %5703 = vmatpush.bf16.msra.mxu1 %v5260_v42  ;;  %v5388_v18 = vpack.c.bf16 %v4844_v35, %v4836_v63  ;;  %v4444_v26 = vcvt.s32.f32 %v3420_v53  ;;  %v3668_v61 = vunpack.c.0.s8 %v2812_v6  ;;  %v3676_v36 = vunpack.c.1.s8 %v2812_v6 }
 0x3f2   :  { %5716 = vmatpush.bf16.msra.mxu2 %v5324_v17  ;;  %v4564_v5 = vcvt.s32.f32 %v3540_v15  ;;  %v4572_v33 = vcvt.s32.f32 %v3548_v12  ;;  %v3796_v10 = vunpack.c.0.s8 %v2844_v50  ;;  %v3804_v11 = vunpack.c.1.s8 %v2844_v50 }
 0x3f3   :  { %5729 = vmatpush.bf16.msra.mxu3 %v5388_v18  ;;  %v5188_v4 = vpack.c.bf16 %v4444_v26, %v4436_v38  ;;  %v4692_v13 = vcvt.s32.f32 %v3668_v61  ;;  %v4700_v47 = vcvt.s32.f32 %v3676_v36  ;;  %v3396_v14 = vunpack.c.2.s8 %v2740_v24  ;;  %v2669_v61 = vld [vmem:[#allocation3 + $0x1d8] sm:$0xff]  ;;  %v9761_v36 = vpop.f32.mrf.mxu2 }
 0x3f4   :  { %v5252_v51 = vpack.c.bf16 %v4572_v33, %v4564_v5  ;;  %v4820_v30 = vcvt.s32.f32 %v3796_v10  ;;  %v4828_v22 = vcvt.s32.f32 %v3804_v11  ;;  %v3404_v25 = vunpack.c.3.s8 %v2740_v24  ;;  %v9763_v5 = vpop.f32.mrf.mxu3 }
 0x3f5   :  { %5691 = vmatpush.bf16.msra.mxu0 %v5188_v4  ;;  %v5316_v19 = vpack.c.bf16 %v4700_v47, %v4692_v13  ;;  %v4420_v6 = vcvt.s32.f32 %v3396_v14  ;;  %v3524_v1 = vunpack.c.2.s8 %v2772_v29  ;;  %v3532_v28 = vunpack.c.3.s8 %v2772_v29 }
 0x3f6   :  { %5704 = vmatpush.bf16.msra.mxu1 %v5252_v51  ;;  %v5380_v23 = vpack.c.bf16 %v4828_v22, %v4820_v30  ;;  %v4428_v50 = vcvt.s32.f32 %v3404_v25  ;;  %v3652_v16 = vunpack.c.2.s8 %v2804_v2  ;;  %v3660_v39 = vunpack.c.3.s8 %v2804_v2 }
 0x3f7   :  { %5717 = vmatpush.bf16.msra.mxu2 %v5316_v19  ;;  %v4548_v37 = vcvt.s32.f32 %v3524_v1  ;;  %v4556_v31 = vcvt.s32.f32 %v3532_v28  ;;  %v3780_v40 = vunpack.c.2.s8 %v2836_v56  ;;  %v3788_v43 = vunpack.c.3.s8 %v2836_v56  ;;  %v5489_v19 = vpop.f32.mrf.mxu0 }
 0x3f8   :  { %5730 = vmatpush.bf16.msra.mxu3 %v5380_v23  ;;  %v5180_v9 = vpack.c.bf16 %v4428_v50, %v4420_v6  ;;  %v4676_v32 = vcvt.s32.f32 %v3652_v16  ;;  %v4684_v46 = vcvt.s32.f32 %v3660_v39  ;;  %v5449_v59 = vadd.f32 %v9747_v21, %v9745_v41  ;;  %v5502_v6 = vpop.f32.mrf.mxu1 }
 0x3f9   :  { %v5244_v60 = vpack.c.bf16 %v4556_v31, %v4548_v37  ;;  %v4804_v44 = vcvt.s32.f32 %v3780_v40  ;;  %v4812_v27 = vcvt.s32.f32 %v3788_v43  ;;  %v3380_v42 = vunpack.c.0.s8 %v2740_v24 }
 0x3fa   :  { %5692 = vmatpush.bf16.msra.mxu0 %v5180_v9  ;;  %v5308_v63 = vpack.c.bf16 %v4684_v46, %v4676_v32  ;;  %v3388_v35 = vunpack.c.1.s8 %v2740_v24  ;;  %v3508_v53 = vunpack.c.0.s8 %v2772_v29  ;;  %v3516_v3 = vunpack.c.1.s8 %v2772_v29  ;;  %v2701_v29 = vld [vmem:[#allocation3 + $0x2d8] sm:$0xff] }
 0x3fb   :  { %5705 = vmatpush.bf16.msra.mxu1 %v5244_v60  ;;  %v5372_v17 = vpack.c.bf16 %v4812_v27, %v4804_v44  ;;  %v4404_v38 = vcvt.s32.f32 %v3380_v42  ;;  %v3636_v15 = vunpack.c.0.s8 %v2804_v2  ;;  %v3644_v12 = vunpack.c.1.s8 %v2804_v2  ;;  %v9767_v2 = vld [vmem:[#allocation3 + $0x3d8] sm:$0xff] }
 0x3fc   :  { %5718 = vmatpush.bf16.msra.mxu2 %v5308_v63  ;;  %v4412_v18 = vcvt.s32.f32 %v3388_v35  ;;  %v4532_v26 = vcvt.s32.f32 %v3508_v53  ;;  %v4540_v41 = vcvt.s32.f32 %v3516_v3  ;;  %v3764_v21 = vunpack.c.0.s8 %v2836_v56  ;;  %v9776_v53 = vld [vmem:[#allocation3 + $0x98] sm:$0xff]  ;;  %v5515_v3 = vpop.f32.mrf.mxu2 }
 0x3fd   :  { %5731 = vmatpush.bf16.msra.mxu3 %v5372_v17  ;;  %v4660_v24 = vcvt.s32.f32 %v3636_v15  ;;  %v4668_v33 = vcvt.s32.f32 %v3644_v12  ;;  %v3772_v10 = vunpack.c.1.s8 %v2836_v56  ;;  %v2981_v11 = vunpack.c.2.s8 %v9759_v45  ;;  %v5528_v17 = vpop.f32.mrf.mxu3 }
 0x3fe   :  { %v5172_v4 = vpack.c.bf16 %v4412_v18, %v4404_v38  ;;  %v5236_v13 = vpack.c.bf16 %v4540_v41, %v4532_v26  ;;  %v4788_v47 = vcvt.s32.f32 %v3764_v21  ;;  %v2989_v14 = vunpack.c.3.s8 %v9759_v45 }
 0x3ff   :  { %v5300_v51 = vpack.c.bf16 %v4668_v33, %v4660_v24  ;;  %v4796_v30 = vcvt.s32.f32 %v3772_v10  ;;  %v4005_v22 = vcvt.s32.f32 %v2981_v11  ;;  %v3109_v25 = vunpack.c.2.s8 %v2669_v61 }
 0x400   :  { %5693 = vmatpush.bf16.msra.mxu0 %v5172_v4  ;;  %5706 = vmatpush.bf16.msra.mxu1 %v5236_v13  ;;  %v4013_v1 = vcvt.s32.f32 %v2989_v14  ;;  %v3117_v56 = vunpack.c.3.s8 %v2669_v61  ;;  %v3237_v28 = vunpack.c.2.s8 %v2701_v29  ;;  %v3245_v23 = vunpack.c.3.s8 %v2701_v29  ;;  %v2693_v13 = vld [vmem:[#allocation3 + $0x298] sm:$0xff] }
 0x401   :  { %5719 = vmatpush.bf16.msra.mxu2 %v5300_v51  ;;  %v5364_v50 = vpack.c.bf16 %v4796_v30, %v4788_v47  ;;  %v4133_v16 = vcvt.s32.f32 %v3109_v25  ;;  %v3365_v39 = vunpack.c.2.s8 %v9767_v2  ;;  %v3373_v37 = vunpack.c.3.s8 %v9767_v2  ;;  %v2725_v47 = vld [vmem:[#allocation3 + $0x398] sm:$0xff] }
 0x402   :  { %v4973_v31 = vpack.c.bf16 %v4013_v1, %v4005_v22  ;;  %v4141_v40 = vcvt.s32.f32 %v3117_v56  ;;  %v4261_v43 = vcvt.s32.f32 %v3237_v28  ;;  %v4269_v9 = vcvt.s32.f32 %v3245_v23 }
 0x403   :  { %5732 = vmatpush.bf16.msra.mxu3 %v5364_v50  ;;  %v4389_v32 = vcvt.s32.f32 %v3365_v39  ;;  %v4397_v46 = vcvt.s32.f32 %v3373_v37  ;;  %v5462_v60 = vadd.f32 %v9749_v0, %v5449_v59  ;;  %5694 = vmatmul.bf16.vlgmr.msra.gmra.mxu0 %v9717_v20  ;;  %v2965_v44 = vunpack.c.0.s8 %v9759_v45 }
 0x404   :  { %5738 = vmatpush.bf16.msrb.mxu0 %v4973_v31  ;;  %v5037_v27 = vpack.c.bf16 %v4141_v40, %v4133_v16  ;;  %v5101_v42 = vpack.c.bf16 %v4269_v9, %v4261_v43  ;;  %5720 = vmatmul.bf16.vlgmr.msra.gmra.mxu2 %v9721_v57  ;;  %v2973_v63 = vunpack.c.1.s8 %v9759_v45  ;;  %v3093_v35 = vunpack.c.0.s8 %v2669_v61 }
 0x405   :  { %v5165_v38 = vpack.c.bf16 %v4397_v46, %v4389_v32  ;;  %v9779_v15 = vadd.f32 %v9751_v7, %v5462_v60  ;;  %v3989_v0 = vcvt.s32.f32 %v2965_v44  ;;  %v3101_v59 = vunpack.c.1.s8 %v2669_v61  ;;  %5707 = vmatmul.bf16.vlgmr.msra.gmra.mxu1 %v9719_v55  ;;  %v2661_v7 = vld [vmem:[#allocation3 + $0x198] sm:$0xff] }
 0x406   :  { %5751 = vmatpush.bf16.msrb.mxu1 %v5037_v27  ;;  %5764 = vmatpush.bf16.msrb.mxu2 %v5101_v42  ;;  %v3997_v12 = vcvt.s32.f32 %v2973_v63  ;;  %v4117_v18 = vcvt.s32.f32 %v3093_v35  ;;  %v3221_v26 = vunpack.c.0.s8 %v2701_v29  ;;  %v3229_v41 = vunpack.c.1.s8 %v2701_v29  ;;  %v2621_v35 = vld [vmem:[#allocation3 + $0x58] sm:$0xff] }
 0x407   :  { %5777 = vmatpush.bf16.msrb.mxu3 %v5165_v38  ;;  %v4125_v45 = vcvt.s32.f32 %v3101_v59  ;;  %v3349_v21 = vunpack.c.0.s8 %v9767_v2  ;;  %v3357_v24 = vunpack.c.1.s8 %v9767_v2  ;;  %v2949_v33 = vunpack.c.2.s8 %v9776_v53 }
 0x408   :  { %5733 = vmatmul.bf16.vlgmr.msra.gmra.mxu3 %v9723_v8  ;;  %v4965_v61 = vpack.c.bf16 %v3997_v12, %v3989_v0  ;;  %v4245_v10 = vcvt.s32.f32 %v3221_v26  ;;  %v4253_v11 = vcvt.s32.f32 %v3229_v41  ;;  %v2957_v4 = vunpack.c.3.s8 %v9776_v53  ;;  %v2653_v41 = vld [vmem:[#allocation3 + $0x158] sm:$0xff] }
 0x409   :  { %v5029_v14 = vpack.c.bf16 %v4125_v45, %v4117_v18  ;;  %v4373_v29 = vcvt.s32.f32 %v3349_v21  ;;  %v4381_v51 = vcvt.s32.f32 %v3357_v24  ;;  %v3973_v30 = vcvt.s32.f32 %v2949_v33  ;;  %v2685_v33 = vld [vmem:[#allocation3 + $0x258] sm:$0xff] }
 0x40a   :  { %5739 = vmatpush.bf16.msrb.mxu0 %v4965_v61  ;;  %v5093_v22 = vpack.c.bf16 %v4253_v11, %v4245_v10  ;;  %v3981_v25 = vcvt.s32.f32 %v2957_v4  ;;  %v3077_v2 = vunpack.c.2.s8 %v2661_v7  ;;  %v3085_v19 = vunpack.c.3.s8 %v2661_v7  ;;  %v2717_v4 = vld [vmem:[#allocation3 + $0x358] sm:$0xff] }
 0x40b   :  { %5752 = vmatpush.bf16.msrb.mxu1 %v5029_v14  ;;  %v5157_v6 = vpack.c.bf16 %v4381_v51, %v4373_v29  ;;  %v3205_v1 = vunpack.c.2.s8 %v2693_v13  ;;  %v3213_v56 = vunpack.c.3.s8 %v2693_v13  ;;  %v3333_v28 = vunpack.c.2.s8 %v2725_v47 }
 0x40c   :  { %5765 = vmatpush.bf16.msrb.mxu2 %v5093_v22  ;;  %v4957_v23 = vpack.c.bf16 %v3981_v25, %v3973_v30  ;;  %v4101_v50 = vcvt.s32.f32 %v3077_v2  ;;  %v4109_v16 = vcvt.s32.f32 %v3085_v19  ;;  %v3341_v39 = vunpack.c.3.s8 %v2725_v47 }
 0x40d   :  { %5778 = vmatpush.bf16.msrb.mxu3 %v5157_v6  ;;  %v4229_v37 = vcvt.s32.f32 %v3205_v1  ;;  %v4237_v31 = vcvt.s32.f32 %v3213_v56  ;;  %v4357_v40 = vcvt.s32.f32 %v3333_v28  ;;  %v2933_v43 = vunpack.c.0.s8 %v9776_v53 }
 0x40e   :  { %5740 = vmatpush.bf16.msrb.mxu0 %v4957_v23  ;;  %v5021_v9 = vpack.c.bf16 %v4109_v16, %v4101_v50  ;;  %v4365_v32 = vcvt.s32.f32 %v3341_v39  ;;  %v2941_v46 = vunpack.c.1.s8 %v9776_v53  ;;  %v3061_v60 = vunpack.c.0.s8 %v2661_v7 }
 0x40f   :  { %v5085_v44 = vpack.c.bf16 %v4237_v31, %v4229_v37  ;;  %v3957_v27 = vcvt.s32.f32 %v2933_v43  ;;  %v3069_v42 = vunpack.c.1.s8 %v2661_v7  ;;  %v3189_v63 = vunpack.c.0.s8 %v2693_v13 }
 0x410   :  { %5753 = vmatpush.bf16.msrb.mxu1 %v5021_v9  ;;  %v5149_v3 = vpack.c.bf16 %v4365_v32, %v4357_v40  ;;  %v3965_v17 = vcvt.s32.f32 %v2941_v46  ;;  %v4085_v38 = vcvt.s32.f32 %v3061_v60  ;;  %v3197_v0 = vunpack.c.1.s8 %v2693_v13 }
 0x411   :  { %5766 = vmatpush.bf16.msrb.mxu2 %v5085_v44  ;;  %v4093_v59 = vcvt.s32.f32 %v3069_v42  ;;  %v4213_v12 = vcvt.s32.f32 %v3189_v63  ;;  %v3317_v18 = vunpack.c.0.s8 %v2725_v47  ;;  %v3325_v26 = vunpack.c.1.s8 %v2725_v47  ;;  %v2613_v44 = vld [vmem:[#allocation3 + $0x18] sm:$0xff] }
 0x412   :  { %5779 = vmatpush.bf16.msrb.mxu3 %v5149_v3  ;;  %v4949_v45 = vpack.c.bf16 %v3965_v17, %v3957_v27  ;;  %v4221_v53 = vcvt.s32.f32 %v3197_v0  ;;  %v5488_v21 = vadd.f32 %v9753_v34, %v9779_v15  ;;  %v2917_v24 = vunpack.c.2.s8 %v2621_v35 }
 0x413   :  { %v5013_v7 = vpack.c.bf16 %v4093_v59, %v4085_v38  ;;  %v4341_v61 = vcvt.s32.f32 %v3317_v18  ;;  %v4349_v10 = vcvt.s32.f32 %v3325_v26  ;;  %v2925_v11 = vunpack.c.3.s8 %v2621_v35  ;;  %v2677_v18 = vld [vmem:[#allocation3 + $0x218] sm:$0xff] }
 0x414   :  { %5741 = vmatpush.bf16.msrb.mxu0 %v4949_v45  ;;  %v5077_v13 = vpack.c.bf16 %v4221_v53, %v4213_v12  ;;  %v5501_v14 = vadd.f32 %v9755_v58, %v5488_v21  ;;  %v3941_v29 = vcvt.s32.f32 %v2917_v24  ;;  %v3045_v47 = vunpack.c.2.s8 %v2653_v41  ;;  %v2709_v53 = vld [vmem:[#allocation3 + $0x318] sm:$0xff] }
 0x415   :  { %5754 = vmatpush.bf16.msrb.mxu1 %v5013_v7  ;;  %v5141_v51 = vpack.c.bf16 %v4349_v10, %v4341_v61  ;;  %v3949_v30 = vcvt.s32.f32 %v2925_v11  ;;  %v3053_v22 = vunpack.c.3.s8 %v2653_v41  ;;  %v3173_v25 = vunpack.c.2.s8 %v2685_v33 }
 0x416   :  { %5767 = vmatpush.bf16.msrb.mxu2 %v5077_v13  ;;  %v4069_v34 = vcvt.s32.f32 %v3045_v47  ;;  %v3181_v15 = vunpack.c.3.s8 %v2685_v33  ;;  %v3301_v2 = vunpack.c.2.s8 %v2717_v4  ;;  %v3309_v19 = vunpack.c.3.s8 %v2717_v4 }
 0x417   :  { %5780 = vmatpush.bf16.msrb.mxu3 %v5141_v51  ;;  %v4941_v6 = vpack.c.bf16 %v3949_v30, %v3941_v29  ;;  %v4077_v1 = vcvt.s32.f32 %v3053_v22  ;;  %v4197_v56 = vcvt.s32.f32 %v3173_v25  ;;  %v5514_v28 = vadd.f32 %v9761_v36, %v5501_v14 }
 0x418   :  { %v4205_v23 = vcvt.s32.f32 %v3181_v15  ;;  %v4325_v58 = vcvt.s32.f32 %v3301_v2  ;;  %v4333_v50 = vcvt.s32.f32 %v3309_v19  ;;  %v2901_v16 = vunpack.c.0.s8 %v2621_v35 }
 0x419   :  { %5742 = vmatpush.bf16.msrb.mxu0 %v4941_v6  ;;  %v5005_v39 = vpack.c.bf16 %v4077_v1, %v4069_v34  ;;  %v9794_v37 = vadd.f32 %v9763_v5, %v5514_v28  ;;  %v2909_v31 = vunpack.c.1.s8 %v2621_v35  ;;  %v3029_v32 = vunpack.c.0.s8 %v2653_v41  ;;  %v2645_v5 = vld [vmem:[#allocation3 + $0x118] sm:$0xff] }
 0x41a   :  { %v5069_v40 = vpack.c.bf16 %v4205_v23, %v4197_v56  ;;  %v5133_v43 = vpack.c.bf16 %v4333_v50, %v4325_v58  ;;  %v3925_v9 = vcvt.s32.f32 %v2901_v16  ;;  %v3037_v60 = vunpack.c.1.s8 %v2653_v41  ;;  %v2765_v58 = vld [vmem:[#allocation3 + $0x4d8] sm:$0xff] }
 0x41b   :  { %5755 = vmatpush.bf16.msrb.mxu1 %v5005_v39  ;;  %v3933_v46 = vcvt.s32.f32 %v2909_v31  ;;  %v4053_v36 = vcvt.s32.f32 %v3029_v32  ;;  %v3157_v27 = vunpack.c.0.s8 %v2685_v33  ;;  %v3165_v42 = vunpack.c.1.s8 %v2685_v33  ;;  %v2797_v32 = vld [vmem:[#allocation3 + $0x5d8] sm:$0xff] }
 0x41c   :  { %5768 = vmatpush.bf16.msrb.mxu2 %v5069_v40  ;;  %5781 = vmatpush.bf16.msrb.mxu3 %v5133_v43  ;;  %v3285_v63 = vunpack.c.0.s8 %v2717_v4  ;;  %v4061_v17 = vcvt.s32.f32 %v3037_v60  ;;  %v3293_v38 = vunpack.c.1.s8 %v2717_v4  ;;  %v2885_v12 = vunpack.c.2.s8 %v2613_v44 }
 0x41d   :  { %v4933_v3 = vpack.c.bf16 %v3933_v46, %v3925_v9  ;;  %v4181_v0 = vcvt.s32.f32 %v3157_v27  ;;  %v4189_v35 = vcvt.s32.f32 %v3165_v42  ;;  %v2893_v41 = vunpack.c.3.s8 %v2613_v44 }
 0x41e   :  { %v4309_v59 = vcvt.s32.f32 %v3285_v63  ;;  %v4997_v26 = vpack.c.bf16 %v4061_v17, %v4053_v36  ;;  %v4317_v45 = vcvt.s32.f32 %v3293_v38  ;;  %v3909_v24 = vcvt.s32.f32 %v2885_v12  ;;  %v2829_v36 = vld [vmem:[#allocation3 + $0x6d8] sm:$0xff] }
 0x41f   :  { %5743 = vmatpush.bf16.msrb.mxu0 %v4933_v3  ;;  %v5061_v21 = vpack.c.bf16 %v4189_v35, %v4181_v0  ;;  %v3013_v7 = vunpack.c.2.s8 %v2645_v5  ;;  %v3021_v61 = vunpack.c.3.s8 %v2645_v5  ;;  %v3917_v10 = vcvt.s32.f32 %v2893_v41  ;;  %v2861_v0 = vld [vmem:[#allocation3 + $0x7d8] sm:$0xff] }
 0x420   :  { %5756 = vmatpush.bf16.msrb.mxu1 %v4997_v26  ;;  %v5125_v33 = vpack.c.bf16 %v4317_v45, %v4309_v59  ;;  %v3141_v11 = vunpack.c.2.s8 %v2677_v18  ;;  %v3149_v14 = vunpack.c.3.s8 %v2677_v18  ;;  %v3269_v29 = vunpack.c.2.s8 %v2709_v53 }
 0x421   :  { %5769 = vmatpush.bf16.msrb.mxu2 %v5061_v21  ;;  %v4037_v4 = vcvt.s32.f32 %v3013_v7  ;;  %v4045_v13 = vcvt.s32.f32 %v3021_v61  ;;  %v4925_v47 = vpack.c.bf16 %v3917_v10, %v3909_v24  ;;  %v3277_v30 = vunpack.c.3.s8 %v2709_v53 }
 0x422   :  { %5782 = vmatpush.bf16.msrb.mxu3 %v5125_v33  ;;  %v4165_v51 = vcvt.s32.f32 %v3141_v11  ;;  %v4173_v25 = vcvt.s32.f32 %v3149_v14  ;;  %v4293_v34 = vcvt.s32.f32 %v3269_v29  ;;  %v2869_v15 = vunpack.c.0.s8 %v2613_v44 }
 0x423   :  { %v4989_v22 = vpack.c.bf16 %v4045_v13, %v4037_v4  ;;  %5744 = vmatpush.bf16.msrb.mxu0 %v4925_v47  ;;  %v4301_v2 = vcvt.s32.f32 %v3277_v30  ;;  %v2877_v19 = vunpack.c.1.s8 %v2613_v44  ;;  %v2997_v6 = vunpack.c.0.s8 %v2645_v5 }
 0x424   :  { %v5053_v1 = vpack.c.bf16 %v4173_v25, %v4165_v51  ;;  %v3893_v56 = vcvt.s32.f32 %v2869_v15  ;;  %v3005_v28 = vunpack.c.1.s8 %v2645_v5  ;;  %v3125_v23 = vunpack.c.0.s8 %v2677_v18  ;;  %v2757_v15 = vld [vmem:[#allocation3 + $0x498] sm:$0xff] }
 0x425   :  { %5757 = vmatpush.bf16.msrb.mxu1 %v4989_v22  ;;  %v5117_v50 = vpack.c.bf16 %v4301_v2, %v4293_v34  ;;  %v3901_v16 = vcvt.s32.f32 %v2877_v19  ;;  %v4021_v39 = vcvt.s32.f32 %v2997_v6  ;;  %v3133_v40 = vunpack.c.1.s8 %v2677_v18 }
 0x426   :  { %5770 = vmatpush.bf16.msrb.mxu2 %v5053_v1  ;;  %v4029_v31 = vcvt.s32.f32 %v3005_v28  ;;  %v4149_v43 = vcvt.s32.f32 %v3125_v23  ;;  %v3253_v9 = vunpack.c.0.s8 %v2709_v53  ;;  %v3261_v60 = vunpack.c.1.s8 %v2709_v53  ;;  %v2789_v1 = vld [vmem:[#allocation3 + $0x598] sm:$0xff] }
 0x427   :  { %5783 = vmatpush.bf16.msrb.mxu3 %v5117_v50  ;;  %v4917_v46 = vpack.c.bf16 %v3901_v16, %v3893_v56  ;;  %v3493_v44 = vunpack.c.2.s8 %v2765_v58  ;;  %v4157_v42 = vcvt.s32.f32 %v3133_v40  ;;  %v3501_v3 = vunpack.c.3.s8 %v2765_v58 }
 0x428   :  { %v4981_v27 = vpack.c.bf16 %v4029_v31, %v4021_v39  ;;  %v4277_v63 = vcvt.s32.f32 %v3253_v9  ;;  %v4285_v17 = vcvt.s32.f32 %v3261_v60  ;;  %v3621_v5 = vunpack.c.2.s8 %v2797_v32  ;;  %v2821_v31 = vld [vmem:[#allocation3 + $0x698] sm:$0xff] }
 0x429   :  { %5745 = vmatpush.bf16.msrb.mxu0 %v4917_v46  ;;  %v4517_v38 = vcvt.s32.f32 %v3493_v44  ;;  %v5045_v35 = vpack.c.bf16 %v4157_v42, %v4149_v43  ;;  %v4525_v59 = vcvt.s32.f32 %v3501_v3  ;;  %v3629_v12 = vunpack.c.3.s8 %v2797_v32  ;;  %v2853_v46 = vld [vmem:[#allocation3 + $0x798] sm:$0xff]  ;;  %v9802_v42 = vpop.f32.mrf.mxu1 }
 0x42a   :  { %5758 = vmatpush.bf16.msrb.mxu1 %v4981_v27  ;;  %v3749_v18 = vunpack.c.2.s8 %v2829_v36  ;;  %v5109_v26 = vpack.c.bf16 %v4285_v17, %v4277_v63  ;;  %v4645_v45 = vcvt.s32.f32 %v3621_v5  ;;  %v3757_v41 = vunpack.c.3.s8 %v2829_v36  ;;  %v9800_v27 = vpop.f32.mrf.mxu0 }
 0x42b   :  { %5771 = vmatpush.bf16.msrb.mxu2 %v5045_v35  ;;  %v5229_v53 = vpack.c.bf16 %v4525_v59, %v4517_v38  ;;  %v4653_v21 = vcvt.s32.f32 %v3629_v12  ;;  %v3877_v7 = vunpack.c.2.s8 %v2861_v0  ;;  %v3885_v33 = vunpack.c.3.s8 %v2861_v0 }
 0x42c   :  { %v4773_v24 = vcvt.s32.f32 %v3749_v18  ;;  %5746 = vmatmul.bf16.vlgmr.msrb.gmra.mxu0 %v9709_v52  ;;  %5784 = vmatpush.bf16.msrb.mxu3 %v5109_v26  ;;  %v4781_v61 = vcvt.s32.f32 %v3757_v41  ;;  %v3477_v10 = vunpack.c.0.s8 %v2765_v58  ;;  %v3485_v13 = vunpack.c.1.s8 %v2765_v58 }
 0x42d   :  { %5759 = vmatmul.bf16.vlgmr.msrb.gmra.mxu1 %v9711_v48  ;;  %5790 = vmatpush.bf16.msra.mxu0 %v5229_v53  ;;  %v5293_v11 = vpack.c.bf16 %v4653_v21, %v4645_v45  ;;  %v4901_v4 = vcvt.s32.f32 %v3877_v7  ;;  %v3605_v14 = vunpack.c.0.s8 %v2797_v32  ;;  %v4909_v47 = vcvt.s32.f32 %v3885_v33 }
 0x42e   :  { %v5357_v29 = vpack.c.bf16 %v4781_v61, %v4773_v24  ;;  %v4501_v51 = vcvt.s32.f32 %v3477_v10  ;;  %5772 = vmatmul.bf16.vlgmr.msrb.gmra.mxu2 %v9713_v62  ;;  %v4509_v30 = vcvt.s32.f32 %v3485_v13  ;;  %v3613_v22 = vunpack.c.1.s8 %v2797_v32 }
 0x42f   :  { %5803 = vmatpush.bf16.msra.mxu1 %v5293_v11  ;;  %v4629_v25 = vcvt.s32.f32 %v3605_v14  ;;  %v3733_v34 = vunpack.c.0.s8 %v2829_v36  ;;  %5785 = vmatmul.bf16.vlgmr.msrb.gmra.mxu3 %v9715_v54  ;;  %v5421_v2 = vpack.c.bf16 %v4909_v47, %v4901_v4  ;;  %v3741_v19 = vunpack.c.1.s8 %v2829_v36  ;;  %v2749_v47 = vld [vmem:[#allocation3 + $0x458] sm:$0xff] }
 0x430   :  { %5816 = vmatpush.bf16.msra.mxu2 %v5357_v29  ;;  %v3861_v6 = vunpack.c.0.s8 %v2861_v0  ;;  %v5221_v56 = vpack.c.bf16 %v4509_v30, %v4501_v51  ;;  %v4637_v28 = vcvt.s32.f32 %v3613_v22  ;;  %v3869_v58 = vunpack.c.1.s8 %v2861_v0  ;;  %v2781_v51 = vld [vmem:[#allocation3 + $0x558] sm:$0xff] }
 0x431   :  { %v4757_v23 = vcvt.s32.f32 %v3733_v34  ;;  %5829 = vmatpush.bf16.msra.mxu3 %v5421_v2  ;;  %v4765_v50 = vcvt.s32.f32 %v3741_v19  ;;  %v3461_v39 = vunpack.c.2.s8 %v2757_v15  ;;  %v3469_v9 = vunpack.c.3.s8 %v2757_v15  ;;  %v5554_v34 = vpop.f32.mrf.mxu1 }
 0x432   :  { %v4885_v16 = vcvt.s32.f32 %v3861_v6  ;;  %5791 = vmatpush.bf16.msra.mxu0 %v5221_v56  ;;  %v5285_v40 = vpack.c.bf16 %v4637_v28, %v4629_v25  ;;  %v4893_v43 = vcvt.s32.f32 %v3869_v58  ;;  %v3589_v32 = vunpack.c.2.s8 %v2789_v1  ;;  %v5541_v25 = vpop.f32.mrf.mxu0  ;;  %v2813_v56 = vld [vmem:[#allocation3 + $0x658] sm:$0xff] }
 0x433   :  { %v5349_v60 = vpack.c.bf16 %v4765_v50, %v4757_v23  ;;  %v4485_v44 = vcvt.s32.f32 %v3461_v39  ;;  %v3597_v36 = vunpack.c.3.s8 %v2789_v1  ;;  %v4493_v3 = vcvt.s32.f32 %v3469_v9  ;;  %v2845_v50 = vld [vmem:[#allocation3 + $0x758] sm:$0xff]  ;;  %v9806_v39 = vpop.f32.mrf.mxu3 }
 0x434   :  { %5804 = vmatpush.bf16.msra.mxu1 %v5285_v40  ;;  %v5413_v63 = vpack.c.bf16 %v4893_v43, %v4885_v16  ;;  %v4613_v17 = vcvt.s32.f32 %v3589_v32  ;;  %v3717_v38 = vunpack.c.2.s8 %v2821_v31  ;;  %v3725_v0 = vunpack.c.3.s8 %v2821_v31  ;;  %v9804_v16 = vpop.f32.mrf.mxu2 }
 0x435   :  { %5817 = vmatpush.bf16.msra.mxu2 %v5349_v60  ;;  %v4621_v5 = vcvt.s32.f32 %v3597_v36  ;;  %v3845_v35 = vunpack.c.2.s8 %v2853_v46  ;;  %v5213_v59 = vpack.c.bf16 %v4493_v3, %v4485_v44  ;;  %v3853_v18 = vunpack.c.3.s8 %v2853_v46 }
 0x436   :  { %5830 = vmatpush.bf16.msra.mxu3 %v5413_v63  ;;  %v4741_v12 = vcvt.s32.f32 %v3717_v38  ;;  %v3445_v26 = vunpack.c.0.s8 %v2757_v15  ;;  %v4749_v41 = vcvt.s32.f32 %v3725_v0  ;;  %v3453_v24 = vunpack.c.1.s8 %v2757_v15 }
 0x437   :  { %v5277_v45 = vpack.c.bf16 %v4621_v5, %v4613_v17  ;;  %v4869_v53 = vcvt.s32.f32 %v3845_v35  ;;  %5792 = vmatpush.bf16.msra.mxu0 %v5213_v59  ;;  %v4877_v21 = vcvt.s32.f32 %v3853_v18  ;;  %v3573_v61 = vunpack.c.0.s8 %v2789_v1 }
 0x438   :  { %v4469_v7 = vcvt.s32.f32 %v3445_v26  ;;  %v5341_v33 = vpack.c.bf16 %v4749_v41, %v4741_v12  ;;  %v3581_v10 = vunpack.c.1.s8 %v2789_v1  ;;  %v3701_v11 = vunpack.c.0.s8 %v2821_v31 }
 0x439   :  { %5805 = vmatpush.bf16.msra.mxu1 %v5277_v45  ;;  %v5405_v4 = vpack.c.bf16 %v4877_v21, %v4869_v53  ;;  %v4477_v13 = vcvt.s32.f32 %v3453_v24  ;;  %v4597_v14 = vcvt.s32.f32 %v3573_v61  ;;  %v3709_v29 = vunpack.c.1.s8 %v2821_v31 }
 0x43a   :  { %5818 = vmatpush.bf16.msra.mxu2 %v5341_v33  ;;  %v4605_v30 = vcvt.s32.f32 %v3581_v10  ;;  %v4725_v22 = vcvt.s32.f32 %v3701_v11  ;;  %v3829_v19 = vunpack.c.0.s8 %v2853_v46  ;;  %v3837_v6 = vunpack.c.1.s8 %v2853_v46  ;;  %v2741_v11 = vld [vmem:[#allocation3 + $0x418] sm:$0xff] }
 0x43b   :  { %5831 = vmatpush.bf16.msra.mxu3 %v5405_v4  ;;  %v5205_v2 = vpack.c.bf16 %v4477_v13, %v4469_v7  ;;  %v4733_v15 = vcvt.s32.f32 %v3709_v29  ;;  %v3429_v1 = vunpack.c.2.s8 %v2749_v47  ;;  %v3437_v23 = vunpack.c.3.s8 %v2749_v47  ;;  %v5580_v13 = vpop.f32.mrf.mxu3 }
 0x43c   :  { %v5269_v28 = vpack.c.bf16 %v4605_v30, %v4597_v14  ;;  %v3557_v58 = vunpack.c.2.s8 %v2781_v51  ;;  %v4853_v40 = vcvt.s32.f32 %v3829_v19  ;;  %v4861_v43 = vcvt.s32.f32 %v3837_v6  ;;  %v5567_v4 = vpop.f32.mrf.mxu2  ;;  %v9816_v13 = vld [vmem:[#allocation3 + $0x1e0] sm:$0xff] }
 0x43d   :  { %5793 = vmatpush.bf16.msra.mxu0 %v5205_v2  ;;  %v5333_v31 = vpack.c.bf16 %v4733_v15, %v4725_v22  ;;  %v3565_v9 = vunpack.c.3.s8 %v2781_v51  ;;  %v4453_v32 = vcvt.s32.f32 %v3429_v1  ;;  %v4461_v60 = vcvt.s32.f32 %v3437_v23  ;;  %v2773_v22 = vld [vmem:[#allocation3 + $0x518] sm:$0xff] }
 0x43e   :  { %5806 = vmatpush.bf16.msra.mxu1 %v5269_v28  ;;  %v4581_v44 = vcvt.s32.f32 %v3557_v58  ;;  %v3685_v46 = vunpack.c.2.s8 %v2813_v56  ;;  %v5397_v36 = vpack.c.bf16 %v4861_v43, %v4853_v40  ;;  %v3693_v3 = vunpack.c.3.s8 %v2813_v56  ;;  %v2805_v15 = vld [vmem:[#allocation3 + $0x618] sm:$0xff] }
 0x43f   :  { %5819 = vmatpush.bf16.msra.mxu2 %v5333_v31  ;;  %v4589_v63 = vcvt.s32.f32 %v3565_v9  ;;  %v3813_v17 = vunpack.c.2.s8 %v2845_v50  ;;  %v5197_v38 = vpack.c.bf16 %v4461_v60, %v4453_v32  ;;  %v3821_v0 = vunpack.c.3.s8 %v2845_v50  ;;  %v2837_v58 = vld [vmem:[#allocation3 + $0x718] sm:$0xff] }
 0x440   :  { %v4709_v5 = vcvt.s32.f32 %v3685_v46  ;;  %v3413_v35 = vunpack.c.0.s8 %v2749_v47  ;;  %5832 = vmatpush.bf16.msra.mxu3 %v5397_v36  ;;  %v4717_v12 = vcvt.s32.f32 %v3693_v3  ;;  %v3421_v45 = vunpack.c.1.s8 %v2749_v47  ;;  %v9810_v3 = vpop.f32.mrf.mxu1 }
 0x441   :  { %v5261_v59 = vpack.c.bf16 %v4589_v63, %v4581_v44  ;;  %5794 = vmatpush.bf16.msra.mxu0 %v5197_v38  ;;  %v4837_v18 = vcvt.s32.f32 %v3813_v17  ;;  %v4845_v26 = vcvt.s32.f32 %v3821_v0  ;;  %v3541_v21 = vunpack.c.0.s8 %v2781_v51  ;;  %v9808_v63 = vpop.f32.mrf.mxu0 }
 0x442   :  { %v4437_v41 = vcvt.s32.f32 %v3413_v35  ;;  %v5325_v53 = vpack.c.bf16 %v4717_v12, %v4709_v5  ;;  %v3549_v24 = vunpack.c.1.s8 %v2781_v51  ;;  %v4445_v61 = vcvt.s32.f32 %v3421_v45 }
 0x443   :  { %5807 = vmatpush.bf16.msra.mxu1 %v5261_v59  ;;  %v5389_v7 = vpack.c.bf16 %v4845_v26, %v4837_v18  ;;  %v3669_v33 = vunpack.c.0.s8 %v2813_v56  ;;  %v3677_v10 = vunpack.c.1.s8 %v2813_v56  ;;  %v4565_v14 = vcvt.s32.f32 %v3541_v21 }
 0x444   :  { %5820 = vmatpush.bf16.msra.mxu2 %v5325_v53  ;;  %v4573_v29 = vcvt.s32.f32 %v3549_v24  ;;  %v3797_v30 = vunpack.c.0.s8 %v2845_v50  ;;  %v5189_v25 = vpack.c.bf16 %v4445_v61, %v4437_v41  ;;  %v3805_v2 = vunpack.c.1.s8 %v2845_v50 }
 0x445   :  { %5833 = vmatpush.bf16.msra.mxu3 %v5389_v7  ;;  %v4693_v47 = vcvt.s32.f32 %v3669_v33  ;;  %v4701_v34 = vcvt.s32.f32 %v3677_v10  ;;  %v3397_v6 = vunpack.c.2.s8 %v2741_v11  ;;  %v3405_v1 = vunpack.c.3.s8 %v2741_v11  ;;  %v9814_v33 = vld [vmem:[#allocation3 + $0xe0] sm:$0xff] }
 0x446   :  { %v5253_v19 = vpack.c.bf16 %v4573_v29, %v4565_v14  ;;  %v4821_v51 = vcvt.s32.f32 %v3797_v30  ;;  %5795 = vmatpush.bf16.msra.mxu0 %v5189_v25  ;;  %v4829_v56 = vcvt.s32.f32 %v3805_v2  ;;  %v3525_v23 = vunpack.c.2.s8 %v2773_v22  ;;  %v9820_v14 = vpop.f32.mrf.mxu3 }
 0x447   :  { %v5317_v28 = vpack.c.bf16 %v4701_v34, %v4693_v47  ;;  %v4421_v31 = vcvt.s32.f32 %v3397_v6  ;;  %v3533_v40 = vunpack.c.3.s8 %v2773_v22  ;;  %v3653_v43 = vunpack.c.2.s8 %v2805_v15  ;;  %v2702_v47 = vld [vmem:[#allocation3 + $0x2e0] sm:$0xff] }
 0x448   :  { %5808 = vmatpush.bf16.msra.mxu1 %v5253_v19  ;;  %v5381_v9 = vpack.c.bf16 %v4829_v56, %v4821_v51  ;;  %v4429_v32 = vcvt.s32.f32 %v3405_v1  ;;  %v4549_v60 = vcvt.s32.f32 %v3525_v23  ;;  %v3661_v44 = vunpack.c.3.s8 %v2805_v15  ;;  %v2734_v51 = vld [vmem:[#allocation3 + $0x3e0] sm:$0xff] }
 0x449   :  { %5821 = vmatpush.bf16.msra.mxu2 %v5317_v28  ;;  %v4557_v50 = vcvt.s32.f32 %v3533_v40  ;;  %v4677_v46 = vcvt.s32.f32 %v3653_v43  ;;  %v3781_v36 = vunpack.c.2.s8 %v2837_v58  ;;  %v3789_v5 = vunpack.c.3.s8 %v2837_v58  ;;  %v5593_v23 = vpop.f32.mrf.mxu0 }
 0x44a   :  { %5834 = vmatpush.bf16.msra.mxu3 %v5381_v9  ;;  %v5181_v17 = vpack.c.bf16 %v4429_v32, %v4421_v31  ;;  %v4685_v38 = vcvt.s32.f32 %v3661_v44  ;;  %v5553_v0 = vadd.f32 %v9802_v42, %v9800_v27  ;;  %v3381_v12 = vunpack.c.0.s8 %v2741_v11  ;;  %v5606_v31 = vpop.f32.mrf.mxu1 }
 0x44b   :  { %v5245_v35 = vpack.c.bf16 %v4557_v50, %v4549_v60  ;;  %v4805_v59 = vcvt.s32.f32 %v3781_v36  ;;  %v3389_v18 = vunpack.c.1.s8 %v2741_v11  ;;  %v4813_v45 = vcvt.s32.f32 %v3789_v5  ;;  %v9818_v11 = vpop.f32.mrf.mxu2 }
 0x44c   :  { %5796 = vmatpush.bf16.msra.mxu0 %v5181_v17  ;;  %v5309_v26 = vpack.c.bf16 %v4685_v38, %v4677_v46  ;;  %v3509_v41 = vunpack.c.0.s8 %v2773_v22  ;;  %v3517_v53 = vunpack.c.1.s8 %v2773_v22  ;;  %v4405_v21 = vcvt.s32.f32 %v3381_v12 }
 0x44d   :  { %5809 = vmatpush.bf16.msra.mxu1 %v5245_v35  ;;  %v4413_v24 = vcvt.s32.f32 %v3389_v18  ;;  %v3637_v7 = vunpack.c.0.s8 %v2805_v15  ;;  %v3645_v61 = vunpack.c.1.s8 %v2805_v15  ;;  %v5373_v10 = vpack.c.bf16 %v4813_v45, %v4805_v59 }
 0x44e   :  { %5822 = vmatpush.bf16.msra.mxu2 %v5309_v26  ;;  %v4533_v4 = vcvt.s32.f32 %v3509_v41  ;;  %v4541_v27 = vcvt.s32.f32 %v3517_v53  ;;  %v3765_v42 = vunpack.c.0.s8 %v2837_v58  ;;  %v3773_v25 = vunpack.c.1.s8 %v2837_v58 }
 0x44f   :  { %v5173_v29 = vpack.c.bf16 %v4413_v24, %v4405_v21  ;;  %v4661_v30 = vcvt.s32.f32 %v3637_v7  ;;  %v4669_v22 = vcvt.s32.f32 %v3645_v61  ;;  %5835 = vmatpush.bf16.msra.mxu3 %v5373_v10  ;;  %v2982_v15 = vunpack.c.2.s8 %v9814_v33  ;;  %v5632_v21 = vpop.f32.mrf.mxu3  ;;  %v2630_v61 = vld [vmem:[#allocation3 + $0xa0] sm:$0xff] }
 0x450   :  { %v5237_v34 = vpack.c.bf16 %v4541_v27, %v4533_v4  ;;  %v4789_v2 = vcvt.s32.f32 %v3765_v42  ;;  %v2990_v19 = vunpack.c.3.s8 %v9814_v33  ;;  %v4797_v28 = vcvt.s32.f32 %v3773_v25  ;;  %v2662_v42 = vld [vmem:[#allocation3 + $0x1a0] sm:$0xff] }
 0x451   :  { %5797 = vmatpush.bf16.msra.mxu0 %v5173_v29  ;;  %v5301_v6 = vpack.c.bf16 %v4669_v22, %v4661_v30  ;;  %v3110_v56 = vunpack.c.2.s8 %v9816_v13  ;;  %v3118_v1 = vunpack.c.3.s8 %v9816_v13  ;;  %v4006_v58 = vcvt.s32.f32 %v2982_v15 }
 0x452   :  { %5810 = vmatpush.bf16.msra.mxu1 %v5237_v34  ;;  %v4014_v40 = vcvt.s32.f32 %v2990_v19  ;;  %v3238_v43 = vunpack.c.2.s8 %v2702_v47  ;;  %v3246_v9 = vunpack.c.3.s8 %v2702_v47  ;;  %v5365_v32 = vpack.c.bf16 %v4797_v28, %v4789_v2 }
 0x453   :  { %5823 = vmatpush.bf16.msra.mxu2 %v5301_v6  ;;  %v4134_v60 = vcvt.s32.f32 %v3110_v56  ;;  %v4142_v44 = vcvt.s32.f32 %v3118_v1  ;;  %v3366_v50 = vunpack.c.2.s8 %v2734_v51  ;;  %v3374_v38 = vunpack.c.3.s8 %v2734_v51  ;;  %v5619_v53 = vpop.f32.mrf.mxu2  ;;  %v2726_v1 = vld [vmem:[#allocation3 + $0x3a0] sm:$0xff] }
 0x454   :  { %v4974_v46 = vpack.c.bf16 %v4014_v40, %v4006_v58  ;;  %v4262_v36 = vcvt.s32.f32 %v3238_v43  ;;  %v4270_v17 = vcvt.s32.f32 %v3246_v9  ;;  %5798 = vmatmul.bf16.vlgmr.msra.gmra.mxu0 %v9717_v20  ;;  %5836 = vmatpush.bf16.msra.mxu3 %v5365_v32  ;;  %v5566_v59 = vadd.f32 %v9804_v16, %v5553_v0  ;;  %v2622_v53 = vld [vmem:[#allocation3 + $0x60] sm:$0xff] }
 0x455   :  { %v5038_v5 = vpack.c.bf16 %v4142_v44, %v4134_v60  ;;  %v4390_v35 = vcvt.s32.f32 %v3366_v50  ;;  %v2966_v12 = vunpack.c.0.s8 %v9814_v33  ;;  %5811 = vmatmul.bf16.vlgmr.msra.gmra.mxu1 %v9719_v55  ;;  %v4398_v26 = vcvt.s32.f32 %v3374_v38 }
 0x456   :  { %5842 = vmatpush.bf16.msrb.mxu0 %v4974_v46  ;;  %v5102_v18 = vpack.c.bf16 %v4270_v17, %v4262_v36  ;;  %5824 = vmatmul.bf16.vlgmr.msra.gmra.mxu2 %v9721_v57  ;;  %v2974_v45 = vunpack.c.1.s8 %v9814_v33  ;;  %v3094_v41 = vunpack.c.0.s8 %v9816_v13  ;;  %v9834_v24 = vadd.f32 %v9806_v39, %v5566_v59 }
 0x457   :  { %5855 = vmatpush.bf16.msrb.mxu1 %v5038_v5  ;;  %v3990_v16 = vcvt.s32.f32 %v2966_v12  ;;  %v3102_v0 = vunpack.c.1.s8 %v9816_v13  ;;  %v3222_v7 = vunpack.c.0.s8 %v2702_v47  ;;  %v5166_v10 = vpack.c.bf16 %v4398_v26, %v4390_v35  ;;  %5837 = vmatmul.bf16.vlgmr.msra.gmra.mxu3 %v9723_v8  ;;  %v2694_v13 = vld [vmem:[#allocation3 + $0x2a0] sm:$0xff] }
 0x458   :  { %5868 = vmatpush.bf16.msrb.mxu2 %v5102_v18  ;;  %v3998_v4 = vcvt.s32.f32 %v2974_v45  ;;  %v4118_v27 = vcvt.s32.f32 %v3094_v41  ;;  %v3230_v33 = vunpack.c.1.s8 %v2702_v47  ;;  %v3350_v22 = vunpack.c.0.s8 %v2734_v51 }
 0x459   :  { %v4126_v29 = vcvt.s32.f32 %v3102_v0  ;;  %v4246_v30 = vcvt.s32.f32 %v3222_v7  ;;  %v3358_v25 = vunpack.c.1.s8 %v2734_v51  ;;  %5881 = vmatpush.bf16.msrb.mxu3 %v5166_v10  ;;  %v2950_v2 = vunpack.c.2.s8 %v2630_v61 }
 0x45a   :  { %v4966_v39 = vpack.c.bf16 %v3998_v4, %v3990_v16  ;;  %v4254_v34 = vcvt.s32.f32 %v3230_v33  ;;  %v2958_v15 = vunpack.c.3.s8 %v2630_v61  ;;  %v4374_v6 = vcvt.s32.f32 %v3350_v22  ;;  %v2654_v33 = vld [vmem:[#allocation3 + $0x160] sm:$0xff] }
 0x45b   :  { %v5030_v19 = vpack.c.bf16 %v4126_v29, %v4118_v27  ;;  %v4382_v28 = vcvt.s32.f32 %v3358_v25  ;;  %v3078_v56 = vunpack.c.2.s8 %v2662_v42  ;;  %v3974_v31 = vcvt.s32.f32 %v2950_v2 }
 0x45c   :  { %5843 = vmatpush.bf16.msrb.mxu0 %v4966_v39  ;;  %v5094_v23 = vpack.c.bf16 %v4254_v34, %v4246_v30  ;;  %v3982_v47 = vcvt.s32.f32 %v2958_v15  ;;  %v3086_v58 = vunpack.c.3.s8 %v2662_v42  ;;  %v3206_v51 = vunpack.c.2.s8 %v2694_v13 }
 0x45d   :  { %5856 = vmatpush.bf16.msrb.mxu1 %v5030_v19  ;;  %v5158_v40 = vpack.c.bf16 %v4382_v28, %v4374_v6  ;;  %v4102_v43 = vcvt.s32.f32 %v3078_v56  ;;  %v3214_v9 = vunpack.c.3.s8 %v2694_v13  ;;  %v3334_v44 = vunpack.c.2.s8 %v2726_v1 }
 0x45e   :  { %5869 = vmatpush.bf16.msrb.mxu2 %v5094_v23  ;;  %v4958_v32 = vpack.c.bf16 %v3982_v47, %v3974_v31  ;;  %v4110_v60 = vcvt.s32.f32 %v3086_v58  ;;  %v3342_v50 = vunpack.c.3.s8 %v2726_v1  ;;  %v4230_v46 = vcvt.s32.f32 %v3206_v51 }
 0x45f   :  { %5882 = vmatpush.bf16.msrb.mxu3 %v5158_v40  ;;  %v4238_v36 = vcvt.s32.f32 %v3214_v9  ;;  %v2934_v17 = vunpack.c.0.s8 %v2630_v61  ;;  %v2942_v38 = vunpack.c.1.s8 %v2630_v61  ;;  %v4358_v35 = vcvt.s32.f32 %v3334_v44 }
 0x460   :  { %5844 = vmatpush.bf16.msrb.mxu0 %v4958_v32  ;;  %v5022_v5 = vpack.c.bf16 %v4110_v60, %v4102_v43  ;;  %v4366_v59 = vcvt.s32.f32 %v3342_v50  ;;  %v3062_v12 = vunpack.c.0.s8 %v2662_v42  ;;  %v3070_v41 = vunpack.c.1.s8 %v2662_v42  ;;  %v2686_v42 = vld [vmem:[#allocation3 + $0x260] sm:$0xff] }
 0x461   :  { %v5086_v18 = vpack.c.bf16 %v4238_v36, %v4230_v46  ;;  %v3958_v26 = vcvt.s32.f32 %v2934_v17  ;;  %v3966_v45 = vcvt.s32.f32 %v2942_v38  ;;  %v3190_v0 = vunpack.c.0.s8 %v2694_v13 }
 0x462   :  { %5857 = vmatpush.bf16.msrb.mxu1 %v5022_v5  ;;  %v5150_v21 = vpack.c.bf16 %v4366_v59, %v4358_v35  ;;  %v4086_v16 = vcvt.s32.f32 %v3062_v12  ;;  %v3198_v7 = vunpack.c.1.s8 %v2694_v13  ;;  %v4094_v4 = vcvt.s32.f32 %v3070_v41  ;;  %v2718_v13 = vld [vmem:[#allocation3 + $0x360] sm:$0xff] }
 0x463   :  { %5870 = vmatpush.bf16.msrb.mxu2 %v5086_v18  ;;  %v4950_v10 = vpack.c.bf16 %v3966_v45, %v3958_v26  ;;  %v3318_v27 = vunpack.c.0.s8 %v2726_v1  ;;  %v3326_v61 = vunpack.c.1.s8 %v2726_v1  ;;  %v4214_v29 = vcvt.s32.f32 %v3190_v0  ;;  %v2614_v45 = vld [vmem:[#allocation3 + $0x20] sm:$0xff] }
 0x464   :  { %5883 = vmatpush.bf16.msrb.mxu3 %v5150_v21  ;;  %v4222_v30 = vcvt.s32.f32 %v3198_v7  ;;  %v5592_v22 = vadd.f32 %v9808_v63, %v9834_v24  ;;  %v2918_v25 = vunpack.c.2.s8 %v2622_v53  ;;  %v5014_v39 = vpack.c.bf16 %v4094_v4, %v4086_v16  ;;  %v2646_v0 = vld [vmem:[#allocation3 + $0x120] sm:$0xff] }
 0x465   :  { %5845 = vmatpush.bf16.msrb.mxu0 %v4950_v10  ;;  %v4342_v34 = vcvt.s32.f32 %v3318_v27  ;;  %v4350_v2 = vcvt.s32.f32 %v3326_v61  ;;  %v2926_v15 = vunpack.c.3.s8 %v2622_v53  ;;  %v3046_v56 = vunpack.c.2.s8 %v2654_v33 }
 0x466   :  { %v5078_v19 = vpack.c.bf16 %v4222_v30, %v4214_v29  ;;  %v5605_v6 = vadd.f32 %v9810_v3, %v5592_v22  ;;  %v3942_v28 = vcvt.s32.f32 %v2918_v25  ;;  %5858 = vmatpush.bf16.msrb.mxu1 %v5014_v39  ;;  %v3054_v31 = vunpack.c.3.s8 %v2654_v33  ;;  %v2678_v29 = vld [vmem:[#allocation3 + $0x220] sm:$0xff] }
 0x467   :  { %v5142_v1 = vpack.c.bf16 %v4350_v2, %v4342_v34  ;;  %v3950_v23 = vcvt.s32.f32 %v2926_v15  ;;  %v3174_v47 = vunpack.c.2.s8 %v2686_v42  ;;  %v4070_v63 = vcvt.s32.f32 %v3046_v56  ;;  %v2710_v25 = vld [vmem:[#allocation3 + $0x320] sm:$0xff] }
 0x468   :  { %5871 = vmatpush.bf16.msrb.mxu2 %v5078_v19  ;;  %v3182_v24 = vunpack.c.3.s8 %v2686_v42  ;;  %v3302_v58 = vunpack.c.2.s8 %v2718_v13  ;;  %v3310_v40 = vunpack.c.3.s8 %v2718_v13  ;;  %v4078_v51 = vcvt.s32.f32 %v3054_v31 }
 0x469   :  { %5884 = vmatpush.bf16.msrb.mxu3 %v5142_v1  ;;  %v4942_v43 = vpack.c.bf16 %v3950_v23, %v3942_v28  ;;  %v4198_v9 = vcvt.s32.f32 %v3174_v47  ;;  %v5618_v32 = vadd.f32 %v9818_v11, %v5605_v6  ;;  %v2902_v50 = vunpack.c.0.s8 %v2622_v53 }
 0x46a   :  { %v4206_v60 = vcvt.s32.f32 %v3182_v24  ;;  %v4326_v3 = vcvt.s32.f32 %v3302_v58  ;;  %v4334_v44 = vcvt.s32.f32 %v3310_v40  ;;  %v5006_v46 = vpack.c.bf16 %v4078_v51, %v4070_v63 }
 0x46b   :  { %5846 = vmatpush.bf16.msrb.mxu0 %v4942_v43  ;;  %v9843_v36 = vadd.f32 %v9820_v14, %v5618_v32  ;;  %v2910_v17 = vunpack.c.1.s8 %v2622_v53  ;;  %v3926_v35 = vcvt.s32.f32 %v2902_v50  ;;  %v3030_v59 = vunpack.c.0.s8 %v2654_v33  ;;  %v2766_v50 = vld [vmem:[#allocation3 + $0x4e0] sm:$0xff] }
 0x46c   :  { %v5070_v38 = vpack.c.bf16 %v4206_v60, %v4198_v9  ;;  %v5134_v5 = vpack.c.bf16 %v4334_v44, %v4326_v3  ;;  %5859 = vmatpush.bf16.msrb.mxu1 %v5006_v46  ;;  %v3038_v18 = vunpack.c.1.s8 %v2654_v33  ;;  %v3158_v26 = vunpack.c.0.s8 %v2686_v42 }
 0x46d   :  { %v3934_v12 = vcvt.s32.f32 %v2910_v17  ;;  %v4054_v11 = vcvt.s32.f32 %v3030_v59  ;;  %v3166_v41 = vunpack.c.1.s8 %v2686_v42  ;;  %v3286_v21 = vunpack.c.0.s8 %v2718_v13 }
 0x46e   :  { %5872 = vmatpush.bf16.msrb.mxu2 %v5070_v38  ;;  %5885 = vmatpush.bf16.msrb.mxu3 %v5134_v5  ;;  %v3294_v16 = vunpack.c.1.s8 %v2718_v13  ;;  %v4062_v14 = vcvt.s32.f32 %v3038_v18  ;;  %v4182_v10 = vcvt.s32.f32 %v3158_v26  ;;  %v2886_v61 = vunpack.c.2.s8 %v2614_v45  ;;  %v2798_v18 = vld [vmem:[#allocation3 + $0x5e0] sm:$0xff] }
 0x46f   :  { %v4934_v7 = vpack.c.bf16 %v3934_v12, %v3926_v35  ;;  %v4190_v53 = vcvt.s32.f32 %v3166_v41  ;;  %v4310_v4 = vcvt.s32.f32 %v3286_v21  ;;  %v2894_v33 = vunpack.c.3.s8 %v2614_v45  ;;  %v2830_v41 = vld [vmem:[#allocation3 + $0x6e0] sm:$0xff] }
 0x470   :  { %v4318_v27 = vcvt.s32.f32 %v3294_v16  ;;  %v4998_v30 = vpack.c.bf16 %v4062_v14, %v4054_v11  ;;  %v3014_v22 = vunpack.c.2.s8 %v2646_v0  ;;  %v3910_v2 = vcvt.s32.f32 %v2886_v61  ;;  %v2862_v14 = vld [vmem:[#allocation3 + $0x7e0] sm:$0xff] }
 0x471   :  { %5847 = vmatpush.bf16.msrb.mxu0 %v4934_v7  ;;  %v5062_v39 = vpack.c.bf16 %v4190_v53, %v4182_v10  ;;  %v3022_v42 = vunpack.c.3.s8 %v2646_v0  ;;  %v3918_v15 = vcvt.s32.f32 %v2894_v33  ;;  %v3142_v19 = vunpack.c.2.s8 %v2678_v29 }
 0x472   :  { %v5126_v34 = vpack.c.bf16 %v4318_v27, %v4310_v4  ;;  %5860 = vmatpush.bf16.msrb.mxu1 %v4998_v30  ;;  %v4038_v13 = vcvt.s32.f32 %v3014_v22  ;;  %v3150_v28 = vunpack.c.3.s8 %v2678_v29  ;;  %v3270_v56 = vunpack.c.2.s8 %v2710_v25 }
 0x473   :  { %5873 = vmatpush.bf16.msrb.mxu2 %v5062_v39  ;;  %v4046_v6 = vcvt.s32.f32 %v3022_v42  ;;  %v3278_v1 = vunpack.c.3.s8 %v2710_v25  ;;  %v4926_v23 = vpack.c.bf16 %v3918_v15, %v3910_v2  ;;  %v4166_v31 = vcvt.s32.f32 %v3142_v19 }
 0x474   :  { %5886 = vmatpush.bf16.msrb.mxu3 %v5126_v34  ;;  %v2870_v47 = vunpack.c.0.s8 %v2614_v45  ;;  %v4174_v24 = vcvt.s32.f32 %v3150_v28  ;;  %v4294_v58 = vcvt.s32.f32 %v3270_v56  ;;  %v2878_v43 = vunpack.c.1.s8 %v2614_v45 }
 0x475   :  { %v4990_v63 = vpack.c.bf16 %v4046_v6, %v4038_v13  ;;  %v4302_v40 = vcvt.s32.f32 %v3278_v1  ;;  %5848 = vmatpush.bf16.msrb.mxu0 %v4926_v23  ;;  %v2998_v9 = vunpack.c.0.s8 %v2646_v0  ;;  %v3006_v3 = vunpack.c.1.s8 %v2646_v0 }
 0x476   :  { %v3894_v51 = vcvt.s32.f32 %v2870_v47  ;;  %v5054_v32 = vpack.c.bf16 %v4174_v24, %v4166_v31  ;;  %v3126_v44 = vunpack.c.0.s8 %v2678_v29  ;;  %v3902_v46 = vcvt.s32.f32 %v2878_v43 }
 0x477   :  { %5861 = vmatpush.bf16.msrb.mxu1 %v4990_v63  ;;  %v5118_v60 = vpack.c.bf16 %v4302_v40, %v4294_v58  ;;  %v4022_v17 = vcvt.s32.f32 %v2998_v9  ;;  %v3134_v38 = vunpack.c.1.s8 %v2678_v29  ;;  %v4030_v5 = vcvt.s32.f32 %v3006_v3  ;;  %v2758_v63 = vld [vmem:[#allocation3 + $0x4a0] sm:$0xff] }
 0x478   :  { %5874 = vmatpush.bf16.msrb.mxu2 %v5054_v32  ;;  %v4150_v35 = vcvt.s32.f32 %v3126_v44  ;;  %v3254_v59 = vunpack.c.0.s8 %v2710_v25  ;;  %v3262_v12 = vunpack.c.1.s8 %v2710_v25  ;;  %v4918_v26 = vpack.c.bf16 %v3902_v46, %v3894_v51 }
 0x479   :  { %5887 = vmatpush.bf16.msrb.mxu3 %v5118_v60  ;;  %v4158_v45 = vcvt.s32.f32 %v3134_v38  ;;  %v3494_v11 = vunpack.c.2.s8 %v2766_v50  ;;  %v4982_v21 = vpack.c.bf16 %v4030_v5, %v4022_v17  ;;  %v3502_v0 = vunpack.c.3.s8 %v2766_v50  ;;  %v2790_v60 = vld [vmem:[#allocation3 + $0x5a0] sm:$0xff] }
 0x47a   :  { %v4278_v16 = vcvt.s32.f32 %v3254_v59  ;;  %v4286_v7 = vcvt.s32.f32 %v3262_v12  ;;  %5849 = vmatpush.bf16.msrb.mxu0 %v4918_v26  ;;  %v3622_v4 = vunpack.c.2.s8 %v2798_v18  ;;  %v3630_v29 = vunpack.c.3.s8 %v2798_v18  ;;  %v2822_v17 = vld [vmem:[#allocation3 + $0x6a0] sm:$0xff] }
 0x47b   :  { %v5046_v10 = vpack.c.bf16 %v4158_v45, %v4150_v35  ;;  %v4518_v53 = vcvt.s32.f32 %v3494_v11  ;;  %5862 = vmatpush.bf16.msrb.mxu1 %v4982_v21  ;;  %v4526_v61 = vcvt.s32.f32 %v3502_v0  ;;  %v3750_v30 = vunpack.c.2.s8 %v2830_v41  ;;  %v2854_v45 = vld [vmem:[#allocation3 + $0x7a0] sm:$0xff] }
 0x47c   :  { %v5110_v27 = vpack.c.bf16 %v4286_v7, %v4278_v16  ;;  %v4646_v33 = vcvt.s32.f32 %v3622_v4  ;;  %v3758_v22 = vunpack.c.3.s8 %v2830_v41  ;;  %v3878_v25 = vunpack.c.2.s8 %v2862_v14  ;;  %v9849_v16 = vpop.f32.mrf.mxu0  ;;  %v9851_v7 = vpop.f32.mrf.mxu1 }
 0x47d   :  { %5875 = vmatpush.bf16.msrb.mxu2 %v5046_v10  ;;  %v5230_v39 = vpack.c.bf16 %v4526_v61, %v4518_v53  ;;  %v4654_v34 = vcvt.s32.f32 %v3630_v29  ;;  %v4774_v2 = vcvt.s32.f32 %v3750_v30  ;;  %v3886_v42 = vunpack.c.3.s8 %v2862_v14  ;;  %5850 = vmatmul.bf16.vlgmr.msrb.gmra.mxu0 %v9709_v52 }
 0x47e   :  { %5888 = vmatpush.bf16.msrb.mxu3 %v5110_v27  ;;  %v4782_v15 = vcvt.s32.f32 %v3758_v22  ;;  %v4902_v13 = vcvt.s32.f32 %v3878_v25  ;;  %v3478_v19 = vunpack.c.0.s8 %v2766_v50  ;;  %5863 = vmatmul.bf16.vlgmr.msrb.gmra.mxu1 %v9711_v48  ;;  %v3486_v56 = vunpack.c.1.s8 %v2766_v50 }
 0x47f   :  { %5894 = vmatpush.bf16.msra.mxu0 %v5230_v39  ;;  %v5294_v6 = vpack.c.bf16 %v4654_v34, %v4646_v33  ;;  %v4910_v28 = vcvt.s32.f32 %v3886_v42  ;;  %v3606_v1 = vunpack.c.0.s8 %v2798_v18  ;;  %v3614_v47 = vunpack.c.1.s8 %v2798_v18 }
 0x480   :  { %5876 = vmatmul.bf16.vlgmr.msrb.gmra.mxu2 %v9713_v62  ;;  %v5358_v23 = vpack.c.bf16 %v4782_v15, %v4774_v2  ;;  %v4502_v31 = vcvt.s32.f32 %v3478_v19  ;;  %v4510_v58 = vcvt.s32.f32 %v3486_v56  ;;  %v3734_v43 = vunpack.c.0.s8 %v2830_v41 }
 0x481   :  { %5889 = vmatmul.bf16.vlgmr.msrb.gmra.mxu3 %v9715_v54  ;;  %5907 = vmatpush.bf16.msra.mxu1 %v5294_v6  ;;  %v5422_v24 = vpack.c.bf16 %v4910_v28, %v4902_v13  ;;  %v4630_v40 = vcvt.s32.f32 %v3606_v1  ;;  %v4638_v51 = vcvt.s32.f32 %v3614_v47  ;;  %v3742_v9 = vunpack.c.1.s8 %v2830_v41  ;;  %v2750_v47 = vld [vmem:[#allocation3 + $0x460] sm:$0xff] }
 0x482   :  { %5920 = vmatpush.bf16.msra.mxu2 %v5358_v23  ;;  %v3862_v32 = vunpack.c.0.s8 %v2862_v14  ;;  %v5222_v3 = vpack.c.bf16 %v4510_v58, %v4502_v31  ;;  %v4758_v44 = vcvt.s32.f32 %v3734_v43  ;;  %v3870_v50 = vunpack.c.1.s8 %v2862_v14  ;;  %v2814_v43 = vld [vmem:[#allocation3 + $0x660] sm:$0xff] }
 0x483   :  { %5933 = vmatpush.bf16.msra.mxu3 %v5422_v24  ;;  %v3462_v46 = vunpack.c.2.s8 %v2758_v63  ;;  %v5286_v38 = vpack.c.bf16 %v4638_v51, %v4630_v40  ;;  %v4766_v5 = vcvt.s32.f32 %v3742_v9  ;;  %v3470_v12 = vunpack.c.3.s8 %v2758_v63  ;;  %v2782_v24 = vld [vmem:[#allocation3 + $0x560] sm:$0xff] }
 0x484   :  { %v4886_v35 = vcvt.s32.f32 %v3862_v32  ;;  %5895 = vmatpush.bf16.msra.mxu0 %v5222_v3  ;;  %v4894_v59 = vcvt.s32.f32 %v3870_v50  ;;  %v3590_v26 = vunpack.c.2.s8 %v2790_v60  ;;  %v3598_v41 = vunpack.c.3.s8 %v2790_v60  ;;  %v5658_v51 = vpop.f32.mrf.mxu1 }
 0x485   :  { %v4486_v18 = vcvt.s32.f32 %v3462_v46  ;;  %5908 = vmatpush.bf16.msra.mxu1 %v5286_v38  ;;  %v5350_v11 = vpack.c.bf16 %v4766_v5, %v4758_v44  ;;  %v3718_v21 = vunpack.c.2.s8 %v2822_v17  ;;  %v4494_v14 = vcvt.s32.f32 %v3470_v12  ;;  %v2846_v5 = vld [vmem:[#allocation3 + $0x760] sm:$0xff] }
 0x486   :  { %v5414_v0 = vpack.c.bf16 %v4894_v59, %v4886_v35  ;;  %v4614_v10 = vcvt.s32.f32 %v3590_v26  ;;  %v3726_v53 = vunpack.c.3.s8 %v2822_v17  ;;  %v4622_v4 = vcvt.s32.f32 %v3598_v41  ;;  %v9855_v35 = vpop.f32.mrf.mxu3 }
 0x487   :  { %5921 = vmatpush.bf16.msra.mxu2 %v5350_v11  ;;  %v4742_v27 = vcvt.s32.f32 %v3718_v21  ;;  %v3846_v61 = vunpack.c.2.s8 %v2854_v45  ;;  %v5214_v29 = vpack.c.bf16 %v4494_v14, %v4486_v18  ;;  %v3854_v33 = vunpack.c.3.s8 %v2854_v45 }
 0x488   :  { %5934 = vmatpush.bf16.msra.mxu3 %v5414_v0  ;;  %v4750_v30 = vcvt.s32.f32 %v3726_v53  ;;  %v3446_v22 = vunpack.c.0.s8 %v2758_v63  ;;  %v5278_v25 = vpack.c.bf16 %v4622_v4, %v4614_v10  ;;  %v3454_v34 = vunpack.c.1.s8 %v2758_v63  ;;  %v5645_v63 = vpop.f32.mrf.mxu0 }
 0x489   :  { %v4870_v39 = vcvt.s32.f32 %v3846_v61  ;;  %5896 = vmatpush.bf16.msra.mxu0 %v5214_v29  ;;  %v4878_v42 = vcvt.s32.f32 %v3854_v33  ;;  %v3574_v13 = vunpack.c.0.s8 %v2790_v60  ;;  %v3582_v6 = vunpack.c.1.s8 %v2790_v60  ;;  %v2774_v63 = vld [vmem:[#allocation3 + $0x520] sm:$0xff] }
 0x48a   :  { %v5342_v2 = vpack.c.bf16 %v4750_v30, %v4742_v27  ;;  %v4470_v15 = vcvt.s32.f32 %v3446_v22  ;;  %5909 = vmatpush.bf16.msra.mxu1 %v5278_v25  ;;  %v4478_v19 = vcvt.s32.f32 %v3454_v34  ;;  %v3702_v28 = vunpack.c.0.s8 %v2822_v17 }
 0x48b   :  { %v5406_v56 = vpack.c.bf16 %v4878_v42, %v4870_v39  ;;  %v4598_v1 = vcvt.s32.f32 %v3574_v13  ;;  %v3710_v23 = vunpack.c.1.s8 %v2822_v17  ;;  %v3830_v31 = vunpack.c.0.s8 %v2854_v45  ;;  %v9853_v17 = vpop.f32.mrf.mxu2 }
 0x48c   :  { %5922 = vmatpush.bf16.msra.mxu2 %v5342_v2  ;;  %v5206_v58 = vpack.c.bf16 %v4478_v19, %v4470_v15  ;;  %v4606_v40 = vcvt.s32.f32 %v3582_v6  ;;  %v4726_v9 = vcvt.s32.f32 %v3702_v28  ;;  %v3838_v3 = vunpack.c.1.s8 %v2854_v45 }
 0x48d   :  { %5935 = vmatpush.bf16.msra.mxu3 %v5406_v56  ;;  %v4734_v32 = vcvt.s32.f32 %v3710_v23  ;;  %v4854_v44 = vcvt.s32.f32 %v3830_v31  ;;  %v3430_v50 = vunpack.c.2.s8 %v2750_v47  ;;  %v3438_v46 = vunpack.c.3.s8 %v2750_v47  ;;  %v2742_v56 = vld [vmem:[#allocation3 + $0x420] sm:$0xff] }
 0x48e   :  { %5897 = vmatpush.bf16.msra.mxu0 %v5206_v58  ;;  %v5270_v60 = vpack.c.bf16 %v4606_v40, %v4598_v1  ;;  %v3558_v38 = vunpack.c.2.s8 %v2782_v24  ;;  %v4862_v12 = vcvt.s32.f32 %v3838_v3  ;;  %v3566_v18 = vunpack.c.3.s8 %v2782_v24  ;;  %v5684_v23 = vpop.f32.mrf.mxu3  ;;  %v2806_v3 = vld [vmem:[#allocation3 + $0x620] sm:$0xff] }
 0x48f   :  { %v5334_v59 = vpack.c.bf16 %v4734_v32, %v4726_v9  ;;  %v3686_v26 = vunpack.c.2.s8 %v2814_v43  ;;  %v4454_v11 = vcvt.s32.f32 %v3430_v50  ;;  %v4462_v41 = vcvt.s32.f32 %v3438_v46 }
 0x490   :  { %5910 = vmatpush.bf16.msra.mxu1 %v5270_v60  ;;  %v4582_v21 = vcvt.s32.f32 %v3558_v38  ;;  %v3694_v45 = vunpack.c.3.s8 %v2814_v43  ;;  %v5398_v0 = vpack.c.bf16 %v4862_v12, %v4854_v44  ;;  %v4590_v14 = vcvt.s32.f32 %v3566_v18 }
 0x491   :  { %5923 = vmatpush.bf16.msra.mxu2 %v5334_v59  ;;  %v4710_v10 = vcvt.s32.f32 %v3686_v26  ;;  %v3814_v53 = vunpack.c.2.s8 %v2846_v5  ;;  %v5198_v4 = vpack.c.bf16 %v4462_v41, %v4454_v11  ;;  %v3822_v61 = vunpack.c.3.s8 %v2846_v5  ;;  %v2838_v59 = vld [vmem:[#allocation3 + $0x720] sm:$0xff] }
 0x492   :  { %v4718_v27 = vcvt.s32.f32 %v3694_v45  ;;  %v3414_v29 = vunpack.c.0.s8 %v2750_v47  ;;  %5936 = vmatpush.bf16.msra.mxu3 %v5398_v0  ;;  %v5262_v30 = vpack.c.bf16 %v4590_v14, %v4582_v21  ;;  %v3422_v39 = vunpack.c.1.s8 %v2750_v47 }
 0x493   :  { %v4838_v33 = vcvt.s32.f32 %v3814_v53  ;;  %5898 = vmatpush.bf16.msra.mxu0 %v5198_v4  ;;  %v4846_v25 = vcvt.s32.f32 %v3822_v61  ;;  %v3542_v2 = vunpack.c.0.s8 %v2782_v24  ;;  %v3550_v42 = vunpack.c.1.s8 %v2782_v24  ;;  %v5671_v1 = vpop.f32.mrf.mxu2  ;;  %v9859_v53 = vpop.f32.mrf.mxu1 }
 0x494   :  { %v5326_v22 = vpack.c.bf16 %v4718_v27, %v4710_v10  ;;  %v4438_v34 = vcvt.s32.f32 %v3414_v29  ;;  %5911 = vmatpush.bf16.msra.mxu1 %v5262_v30  ;;  %v3670_v15 = vunpack.c.0.s8 %v2814_v43  ;;  %v4446_v19 = vcvt.s32.f32 %v3422_v39  ;;  %v9857_v10 = vpop.f32.mrf.mxu0 }
 0x495   :  { %v5390_v13 = vpack.c.bf16 %v4846_v25, %v4838_v33  ;;  %v3678_v6 = vunpack.c.1.s8 %v2814_v43  ;;  %v3798_v28 = vunpack.c.0.s8 %v2846_v5  ;;  %v4566_v31 = vcvt.s32.f32 %v3542_v2 }
 0x496   :  { %5924 = vmatpush.bf16.msra.mxu2 %v5326_v22  ;;  %v4574_v58 = vcvt.s32.f32 %v3550_v42  ;;  %v4694_v40 = vcvt.s32.f32 %v3670_v15  ;;  %v5190_v51 = vpack.c.bf16 %v4446_v19, %v4438_v34  ;;  %v3806_v9 = vunpack.c.1.s8 %v2846_v5  ;;  %v9863_v19 = vld [vmem:[#allocation3 + $0xe8] sm:$0xff] }
 0x497   :  { %5937 = vmatpush.bf16.msra.mxu3 %v5390_v13  ;;  %v4702_v47 = vcvt.s32.f32 %v3678_v6  ;;  %v4822_v32 = vcvt.s32.f32 %v3798_v28  ;;  %v3398_v44 = vunpack.c.2.s8 %v2742_v56  ;;  %v3406_v60 = vunpack.c.3.s8 %v2742_v56 }
 0x498   :  { %v5254_v24 = vpack.c.bf16 %v4574_v58, %v4566_v31  ;;  %5899 = vmatpush.bf16.msra.mxu0 %v5190_v51  ;;  %v4830_v43 = vcvt.s32.f32 %v3806_v9  ;;  %v3526_v46 = vunpack.c.2.s8 %v2774_v63  ;;  %v3534_v38 = vunpack.c.3.s8 %v2774_v63  ;;  %v2671_v31 = vld [vmem:[#allocation3 + $0x1e8] sm:$0xff] }
 0x499   :  { %v5318_v50 = vpack.c.bf16 %v4702_v47, %v4694_v40  ;;  %v4422_v12 = vcvt.s32.f32 %v3398_v44  ;;  %v4430_v18 = vcvt.s32.f32 %v3406_v60  ;;  %v3654_v26 = vunpack.c.2.s8 %v2806_v3  ;;  %v9865_v40 = vld [vmem:[#allocation3 + $0x2e8] sm:$0xff]  ;;  %v9869_v47 = vpop.f32.mrf.mxu3 }
 0x49a   :  { %5912 = vmatpush.bf16.msra.mxu1 %v5254_v24  ;;  %v5382_v11 = vpack.c.bf16 %v4830_v43, %v4822_v32  ;;  %v4550_v41 = vcvt.s32.f32 %v3526_v46  ;;  %v4558_v21 = vcvt.s32.f32 %v3534_v38  ;;  %v3662_v5 = vunpack.c.3.s8 %v2806_v3  ;;  %v2735_v43 = vld [vmem:[#allocation3 + $0x3e8] sm:$0xff] }
 0x49b   :  { %5925 = vmatpush.bf16.msra.mxu2 %v5318_v50  ;;  %v5182_v45 = vpack.c.bf16 %v4430_v18, %v4422_v12  ;;  %v4678_v0 = vcvt.s32.f32 %v3654_v26  ;;  %v3782_v14 = vunpack.c.2.s8 %v2838_v59  ;;  %v3790_v61 = vunpack.c.3.s8 %v2838_v59  ;;  %v9867_v51 = vpop.f32.mrf.mxu2  ;;  %v5710_v38 = vpop.f32.mrf.mxu1 }
 0x49c   :  { %5938 = vmatpush.bf16.msra.mxu3 %v5382_v11  ;;  %v5246_v4 = vpack.c.bf16 %v4558_v21, %v4550_v41  ;;  %v4686_v27 = vcvt.s32.f32 %v3662_v5  ;;  %v5657_v30 = vadd.f32 %v9851_v7, %v9849_v16  ;;  %v3382_v33 = vunpack.c.0.s8 %v2742_v56  ;;  %v5697_v46 = vpop.f32.mrf.mxu0 }
 0x49d   :  { %5900 = vmatpush.bf16.msra.mxu0 %v5182_v45  ;;  %v4806_v29 = vcvt.s32.f32 %v3782_v14  ;;  %v3390_v22 = vunpack.c.1.s8 %v2742_v56  ;;  %v4814_v39 = vcvt.s32.f32 %v3790_v61  ;;  %v3510_v34 = vunpack.c.0.s8 %v2774_v63  ;;  %v2727_v46 = vld [vmem:[#allocation3 + $0x3a8] sm:$0xff] }
 0x49e   :  { %5913 = vmatpush.bf16.msra.mxu1 %v5246_v4  ;;  %v5310_v25 = vpack.c.bf16 %v4686_v27, %v4678_v0  ;;  %v4406_v2 = vcvt.s32.f32 %v3382_v33  ;;  %v3518_v15 = vunpack.c.1.s8 %v2774_v63  ;;  %v3638_v13 = vunpack.c.0.s8 %v2806_v3 }
 0x49f   :  { %v4414_v42 = vcvt.s32.f32 %v3390_v22  ;;  %v5374_v6 = vpack.c.bf16 %v4814_v39, %v4806_v29  ;;  %v4534_v28 = vcvt.s32.f32 %v3510_v34  ;;  %v3646_v1 = vunpack.c.1.s8 %v2806_v3 }
 0x4a0   :  { %5926 = vmatpush.bf16.msra.mxu2 %v5310_v25  ;;  %v3766_v23 = vunpack.c.0.s8 %v2838_v59  ;;  %v4542_v16 = vcvt.s32.f32 %v3518_v15  ;;  %v4662_v7 = vcvt.s32.f32 %v3638_v13  ;;  %v3774_v56 = vunpack.c.1.s8 %v2838_v59 }
 0x4a1   :  { %v5174_v58 = vpack.c.bf16 %v4414_v42, %v4406_v2  ;;  %5939 = vmatpush.bf16.msra.mxu3 %v5374_v6  ;;  %v4670_v63 = vcvt.s32.f32 %v3646_v1  ;;  %v2983_v32 = vunpack.c.2.s8 %v9863_v19  ;;  %v2991_v24 = vunpack.c.3.s8 %v9863_v19  ;;  %v5736_v6 = vpop.f32.mrf.mxu3 }
 0x4a2   :  { %v4790_v9 = vcvt.s32.f32 %v3766_v23  ;;  %v5238_v3 = vpack.c.bf16 %v4542_v16, %v4534_v28  ;;  %v4798_v44 = vcvt.s32.f32 %v3774_v56  ;;  %v3111_v60 = vunpack.c.2.s8 %v2671_v31 }
 0x4a3   :  { %5901 = vmatpush.bf16.msra.mxu0 %v5174_v58  ;;  %v3119_v50 = vunpack.c.3.s8 %v2671_v31  ;;  %v5302_v59 = vpack.c.bf16 %v4670_v63, %v4662_v7  ;;  %v4007_v12 = vcvt.s32.f32 %v2983_v32  ;;  %v4015_v18 = vcvt.s32.f32 %v2991_v24  ;;  %v2695_v24 = vld [vmem:[#allocation3 + $0x2a8] sm:$0xff] }
 0x4a4   :  { %v3239_v26 = vunpack.c.2.s8 %v9865_v40  ;;  %5914 = vmatpush.bf16.msra.mxu1 %v5238_v3  ;;  %v5366_v11 = vpack.c.bf16 %v4798_v44, %v4790_v9  ;;  %v4135_v41 = vcvt.s32.f32 %v3111_v60  ;;  %v3247_v5 = vunpack.c.3.s8 %v9865_v40 }
 0x4a5   :  { %v4143_v21 = vcvt.s32.f32 %v3119_v50  ;;  %5927 = vmatpush.bf16.msra.mxu2 %v5302_v59  ;;  %v4975_v45 = vpack.c.bf16 %v4015_v18, %v4007_v12  ;;  %v3367_v14 = vunpack.c.2.s8 %v2735_v43  ;;  %v3375_v4 = vunpack.c.3.s8 %v2735_v43 }
 0x4a6   :  { %v4263_v0 = vcvt.s32.f32 %v3239_v26  ;;  %5902 = vmatmul.bf16.vlgmr.msra.gmra.mxu0 %v9717_v20  ;;  %5940 = vmatpush.bf16.msra.mxu3 %v5366_v11  ;;  %v4271_v61 = vcvt.s32.f32 %v3247_v5  ;;  %v5670_v29 = vadd.f32 %v9853_v17, %v5657_v30  ;;  %v2967_v33 = vunpack.c.0.s8 %v9863_v19  ;;  %v2631_v17 = vld [vmem:[#allocation3 + $0xa8] sm:$0xff]  ;;  %v5723_v30 = vpop.f32.mrf.mxu2 }
 0x4a7   :  { %v5039_v27 = vpack.c.bf16 %v4143_v21, %v4135_v41  ;;  %5946 = vmatpush.bf16.msrb.mxu0 %v4975_v45  ;;  %v4391_v22 = vcvt.s32.f32 %v3367_v14  ;;  %v4399_v25 = vcvt.s32.f32 %v3375_v4  ;;  %v2975_v39 = vunpack.c.1.s8 %v9863_v19  ;;  %5915 = vmatmul.bf16.vlgmr.msra.gmra.mxu1 %v9719_v55 }
 0x4a8   :  { %v3095_v34 = vunpack.c.0.s8 %v2671_v31  ;;  %v5103_v2 = vpack.c.bf16 %v4271_v61, %v4263_v0  ;;  %5928 = vmatmul.bf16.vlgmr.msra.gmra.mxu2 %v9721_v57  ;;  %v9882_v42 = vadd.f32 %v9855_v35, %v5670_v29  ;;  %v3991_v15 = vcvt.s32.f32 %v2967_v33  ;;  %v2663_v35 = vld [vmem:[#allocation3 + $0x1a8] sm:$0xff] }
 0x4a9   :  { %5959 = vmatpush.bf16.msrb.mxu1 %v5039_v27  ;;  %v3103_v13 = vunpack.c.1.s8 %v2671_v31  ;;  %v5167_v28 = vpack.c.bf16 %v4399_v25, %v4391_v22  ;;  %5941 = vmatmul.bf16.vlgmr.msra.gmra.mxu3 %v9723_v8  ;;  %v3999_v1 = vcvt.s32.f32 %v2975_v39  ;;  %v3223_v23 = vunpack.c.0.s8 %v9865_v40 }
 0x4aa   :  { %v4119_v19 = vcvt.s32.f32 %v3095_v34  ;;  %5972 = vmatpush.bf16.msrb.mxu2 %v5103_v2  ;;  %v3231_v16 = vunpack.c.1.s8 %v9865_v40  ;;  %v3351_v7 = vunpack.c.0.s8 %v2735_v43  ;;  %v3359_v56 = vunpack.c.1.s8 %v2735_v43 }
 0x4ab   :  { %v4127_v58 = vcvt.s32.f32 %v3103_v13  ;;  %5985 = vmatpush.bf16.msrb.mxu3 %v5167_v28  ;;  %v4967_v63 = vpack.c.bf16 %v3999_v1, %v3991_v15  ;;  %v4247_v31 = vcvt.s32.f32 %v3223_v23  ;;  %v2951_v9 = vunpack.c.2.s8 %v2631_v17  ;;  %v2623_v28 = vld [vmem:[#allocation3 + $0x68] sm:$0xff] }
 0x4ac   :  { %v2959_v32 = vunpack.c.3.s8 %v2631_v17  ;;  %v4255_v44 = vcvt.s32.f32 %v3231_v16  ;;  %v4375_v60 = vcvt.s32.f32 %v3351_v7  ;;  %v4383_v50 = vcvt.s32.f32 %v3359_v56  ;;  %v2655_v16 = vld [vmem:[#allocation3 + $0x168] sm:$0xff] }
 0x4ad   :  { %v5031_v3 = vpack.c.bf16 %v4127_v58, %v4119_v19  ;;  %5947 = vmatpush.bf16.msrb.mxu0 %v4967_v63  ;;  %v3975_v38 = vcvt.s32.f32 %v2951_v9  ;;  %v3079_v12 = vunpack.c.2.s8 %v2663_v35  ;;  %v3087_v18 = vunpack.c.3.s8 %v2663_v35 }
 0x4ae   :  { %v3983_v59 = vcvt.s32.f32 %v2959_v32  ;;  %v5095_v40 = vpack.c.bf16 %v4255_v44, %v4247_v31  ;;  %v5159_v43 = vpack.c.bf16 %v4383_v50, %v4375_v60  ;;  %v3207_v26 = vunpack.c.2.s8 %v2695_v24  ;;  %v2687_v31 = vld [vmem:[#allocation3 + $0x268] sm:$0xff] }
 0x4af   :  { %5960 = vmatpush.bf16.msrb.mxu1 %v5031_v3  ;;  %v3215_v11 = vunpack.c.3.s8 %v2695_v24  ;;  %v4103_v21 = vcvt.s32.f32 %v3079_v12  ;;  %v4111_v5 = vcvt.s32.f32 %v3087_v18  ;;  %v3335_v45 = vunpack.c.2.s8 %v2727_v46 }
 0x4b0   :  { %v4959_v41 = vpack.c.bf16 %v3983_v59, %v3975_v38  ;;  %5973 = vmatpush.bf16.msrb.mxu2 %v5095_v40  ;;  %5986 = vmatpush.bf16.msrb.mxu3 %v5159_v43  ;;  %v4231_v0 = vcvt.s32.f32 %v3207_v26  ;;  %v3343_v4 = vunpack.c.3.s8 %v2727_v46  ;;  %v2935_v27 = vunpack.c.0.s8 %v2631_v17 }
 0x4b1   :  { %v4239_v14 = vcvt.s32.f32 %v3215_v11  ;;  %v5023_v61 = vpack.c.bf16 %v4111_v5, %v4103_v21  ;;  %v4359_v29 = vcvt.s32.f32 %v3335_v45  ;;  %v2943_v33 = vunpack.c.1.s8 %v2631_v17 }
 0x4b2   :  { %5948 = vmatpush.bf16.msrb.mxu0 %v4959_v41  ;;  %v3063_v22 = vunpack.c.0.s8 %v2663_v35  ;;  %v4367_v39 = vcvt.s32.f32 %v3343_v4  ;;  %v3959_v34 = vcvt.s32.f32 %v2935_v27  ;;  %v3071_v2 = vunpack.c.1.s8 %v2663_v35 }
 0x4b3   :  { %v5087_v25 = vpack.c.bf16 %v4239_v14, %v4231_v0  ;;  %5961 = vmatpush.bf16.msrb.mxu1 %v5023_v61  ;;  %v3967_v15 = vcvt.s32.f32 %v2943_v33  ;;  %v3191_v30 = vunpack.c.0.s8 %v2695_v24  ;;  %v3199_v6 = vunpack.c.1.s8 %v2695_v24  ;;  %v2719_v24 = vld [vmem:[#allocation3 + $0x368] sm:$0xff] }
 0x4b4   :  { %v4087_v13 = vcvt.s32.f32 %v3063_v22  ;;  %v5151_v1 = vpack.c.bf16 %v4367_v39, %v4359_v29  ;;  %v4095_v19 = vcvt.s32.f32 %v3071_v2  ;;  %v3319_v23 = vunpack.c.0.s8 %v2727_v46  ;;  %v2615_v2 = vld [vmem:[#allocation3 + $0x28] sm:$0xff] }
 0x4b5   :  { %5974 = vmatpush.bf16.msrb.mxu2 %v5087_v25  ;;  %v3327_v58 = vunpack.c.1.s8 %v2727_v46  ;;  %v4951_v7 = vpack.c.bf16 %v3967_v15, %v3959_v34  ;;  %v4215_v56 = vcvt.s32.f32 %v3191_v30  ;;  %v4223_v17 = vcvt.s32.f32 %v3199_v6 }
 0x4b6   :  { %v5696_v63 = vadd.f32 %v9857_v10, %v9882_v42  ;;  %5987 = vmatpush.bf16.msrb.mxu3 %v5151_v1  ;;  %v5015_v35 = vpack.c.bf16 %v4095_v19, %v4087_v13  ;;  %v4343_v9 = vcvt.s32.f32 %v3319_v23  ;;  %v2919_v3 = vunpack.c.2.s8 %v2623_v28  ;;  %v2647_v19 = vld [vmem:[#allocation3 + $0x128] sm:$0xff] }
 0x4b7   :  { %v4351_v32 = vcvt.s32.f32 %v3327_v58  ;;  %5949 = vmatpush.bf16.msrb.mxu0 %v4951_v7  ;;  %v5079_v44 = vpack.c.bf16 %v4223_v17, %v4215_v56  ;;  %v2927_v50 = vunpack.c.3.s8 %v2623_v28  ;;  %v3047_v46 = vunpack.c.2.s8 %v2655_v16  ;;  %v2679_v56 = vld [vmem:[#allocation3 + $0x228] sm:$0xff] }
 0x4b8   :  { %v5709_v60 = vadd.f32 %v9859_v53, %v5696_v63  ;;  %5962 = vmatpush.bf16.msrb.mxu1 %v5015_v35  ;;  %v3943_v59 = vcvt.s32.f32 %v2919_v3  ;;  %v3055_v12 = vunpack.c.3.s8 %v2655_v16  ;;  %v3175_v18 = vunpack.c.2.s8 %v2687_v31  ;;  %v2711_v35 = vld [vmem:[#allocation3 + $0x328] sm:$0xff] }
 0x4b9   :  { %v5143_v38 = vpack.c.bf16 %v4351_v32, %v4343_v9  ;;  %5975 = vmatpush.bf16.msrb.mxu2 %v5079_v44  ;;  %v3951_v10 = vcvt.s32.f32 %v2927_v50  ;;  %v4071_v42 = vcvt.s32.f32 %v3047_v46  ;;  %v3183_v40 = vunpack.c.3.s8 %v2687_v31 }
 0x4ba   :  { %v3303_v43 = vunpack.c.2.s8 %v2719_v24  ;;  %v4079_v26 = vcvt.s32.f32 %v3055_v12  ;;  %v4199_v11 = vcvt.s32.f32 %v3175_v18  ;;  %v3311_v41 = vunpack.c.3.s8 %v2719_v24 }
 0x4bb   :  { %5988 = vmatpush.bf16.msrb.mxu3 %v5143_v38  ;;  %v5722_v21 = vadd.f32 %v9867_v51, %v5709_v60  ;;  %v4943_v5 = vpack.c.bf16 %v3951_v10, %v3943_v59  ;;  %v4207_v53 = vcvt.s32.f32 %v3183_v40  ;;  %v2903_v0 = vunpack.c.0.s8 %v2623_v28 }
 0x4bc   :  { %v4327_v45 = vcvt.s32.f32 %v3303_v43  ;;  %v5007_v14 = vpack.c.bf16 %v4079_v26, %v4071_v42  ;;  %v4335_v4 = vcvt.s32.f32 %v3311_v41  ;;  %v2911_v29 = vunpack.c.1.s8 %v2623_v28 }
 0x4bd   :  { %v9892_v27 = vadd.f32 %v9869_v47, %v5722_v21  ;;  %5950 = vmatpush.bf16.msrb.mxu0 %v4943_v5  ;;  %v5071_v61 = vpack.c.bf16 %v4207_v53, %v4199_v11  ;;  %v3927_v33 = vcvt.s32.f32 %v2903_v0  ;;  %v3031_v22 = vunpack.c.0.s8 %v2655_v16 }
 0x4be   :  { %5963 = vmatpush.bf16.msrb.mxu1 %v5007_v14  ;;  %v5135_v25 = vpack.c.bf16 %v4335_v4, %v4327_v45  ;;  %v3039_v39 = vunpack.c.1.s8 %v2655_v16  ;;  %v3159_v34 = vunpack.c.0.s8 %v2687_v31  ;;  %v3935_v51 = vcvt.s32.f32 %v2911_v29  ;;  %v2767_v14 = vld [vmem:[#allocation3 + $0x4e8] sm:$0xff] }
 0x4bf   :  { %5976 = vmatpush.bf16.msrb.mxu2 %v5071_v61  ;;  %v4055_v15 = vcvt.s32.f32 %v3031_v22  ;;  %v3167_v13 = vunpack.c.1.s8 %v2687_v31  ;;  %v3287_v30 = vunpack.c.0.s8 %v2719_v24  ;;  %v3295_v47 = vunpack.c.1.s8 %v2719_v24 }
 0x4c0   :  { %5989 = vmatpush.bf16.msrb.mxu3 %v5135_v25  ;;  %v4063_v6 = vcvt.s32.f32 %v3039_v39  ;;  %v4183_v1 = vcvt.s32.f32 %v3159_v34  ;;  %v4935_v23 = vpack.c.bf16 %v3935_v51, %v3927_v33  ;;  %v2887_v7 = vunpack.c.2.s8 %v2615_v2  ;;  %v2799_v34 = vld [vmem:[#allocation3 + $0x5e8] sm:$0xff] }
 0x4c1   :  { %v4191_v58 = vcvt.s32.f32 %v3167_v13  ;;  %v4311_v28 = vcvt.s32.f32 %v3287_v30  ;;  %v4319_v63 = vcvt.s32.f32 %v3295_v47  ;;  %v2895_v16 = vunpack.c.3.s8 %v2615_v2  ;;  %v2831_v13 = vld [vmem:[#allocation3 + $0x6e8] sm:$0xff] }
 0x4c2   :  { %v4999_v17 = vpack.c.bf16 %v4063_v6, %v4055_v15  ;;  %5951 = vmatpush.bf16.msrb.mxu0 %v4935_v23  ;;  %v3911_v32 = vcvt.s32.f32 %v2887_v7  ;;  %v3015_v3 = vunpack.c.2.s8 %v2647_v19  ;;  %v3023_v31 = vunpack.c.3.s8 %v2647_v19 }
 0x4c3   :  { %v5063_v9 = vpack.c.bf16 %v4191_v58, %v4183_v1  ;;  %v5127_v44 = vpack.c.bf16 %v4319_v63, %v4311_v28  ;;  %v3919_v60 = vcvt.s32.f32 %v2895_v16  ;;  %v3143_v50 = vunpack.c.2.s8 %v2679_v56  ;;  %v2863_v28 = vld [vmem:[#allocation3 + $0x7e8] sm:$0xff] }
 0x4c4   :  { %5964 = vmatpush.bf16.msrb.mxu1 %v4999_v17  ;;  %v4039_v24 = vcvt.s32.f32 %v3015_v3  ;;  %v4047_v46 = vcvt.s32.f32 %v3023_v31  ;;  %v3151_v38 = vunpack.c.3.s8 %v2679_v56  ;;  %v3271_v59 = vunpack.c.2.s8 %v2711_v35 }
 0x4c5   :  { %5977 = vmatpush.bf16.msrb.mxu2 %v5063_v9  ;;  %5990 = vmatpush.bf16.msrb.mxu3 %v5127_v44  ;;  %v4927_v12 = vpack.c.bf16 %v3919_v60, %v3911_v32  ;;  %v4167_v18 = vcvt.s32.f32 %v3143_v50  ;;  %v3279_v10 = vunpack.c.3.s8 %v2711_v35  ;;  %v2871_v26 = vunpack.c.0.s8 %v2615_v2 }
 0x4c6   :  { %v4991_v42 = vpack.c.bf16 %v4047_v46, %v4039_v24  ;;  %v4175_v40 = vcvt.s32.f32 %v3151_v38  ;;  %v4295_v43 = vcvt.s32.f32 %v3271_v59  ;;  %v2879_v41 = vunpack.c.1.s8 %v2615_v2 }
 0x4c7   :  { %5952 = vmatpush.bf16.msrb.mxu0 %v4927_v12  ;;  %v4303_v11 = vcvt.s32.f32 %v3279_v10  ;;  %v2999_v21 = vunpack.c.0.s8 %v2647_v19  ;;  %v3895_v53 = vcvt.s32.f32 %v2871_v26  ;;  %v3007_v45 = vunpack.c.1.s8 %v2647_v19 }
 0x4c8   :  { %5965 = vmatpush.bf16.msrb.mxu1 %v4991_v42  ;;  %v5055_v5 = vpack.c.bf16 %v4175_v40, %v4167_v18  ;;  %v3127_v0 = vunpack.c.0.s8 %v2679_v56  ;;  %v3903_v61 = vcvt.s32.f32 %v2879_v41  ;;  %v3135_v22 = vunpack.c.1.s8 %v2679_v56  ;;  %v2759_v41 = vld [vmem:[#allocation3 + $0x4a8] sm:$0xff] }
 0x4c9   :  { %v5119_v4 = vpack.c.bf16 %v4303_v11, %v4295_v43  ;;  %v4023_v29 = vcvt.s32.f32 %v2999_v21  ;;  %v4031_v33 = vcvt.s32.f32 %v3007_v45  ;;  %v3255_v39 = vunpack.c.0.s8 %v2711_v35  ;;  %v2791_v45 = vld [vmem:[#allocation3 + $0x5a8] sm:$0xff] }
 0x4ca   :  { %5978 = vmatpush.bf16.msrb.mxu2 %v5055_v5  ;;  %v4151_v25 = vcvt.s32.f32 %v3127_v0  ;;  %v4919_v51 = vpack.c.bf16 %v3903_v61, %v3895_v53  ;;  %v3263_v15 = vunpack.c.1.s8 %v2711_v35  ;;  %v3495_v2 = vunpack.c.2.s8 %v2767_v14 }
 0x4cb   :  { %5991 = vmatpush.bf16.msrb.mxu3 %v5119_v4  ;;  %v4983_v30 = vpack.c.bf16 %v4031_v33, %v4023_v29  ;;  %v4159_v6 = vcvt.s32.f32 %v3135_v22  ;;  %v4279_v1 = vcvt.s32.f32 %v3255_v39  ;;  %v3503_v47 = vunpack.c.3.s8 %v2767_v14 }
 0x4cc   :  { %5953 = vmatpush.bf16.msrb.mxu0 %v4919_v51  ;;  %v4287_v19 = vcvt.s32.f32 %v3263_v15  ;;  %v4519_v23 = vcvt.s32.f32 %v3495_v2  ;;  %v3623_v58 = vunpack.c.2.s8 %v2799_v34  ;;  %v3631_v17 = vunpack.c.3.s8 %v2799_v34  ;;  %v2855_v2 = vld [vmem:[#allocation3 + $0x7a8] sm:$0xff] }
 0x4cd   :  { %5966 = vmatpush.bf16.msrb.mxu1 %v4983_v30  ;;  %v5047_v7 = vpack.c.bf16 %v4159_v6, %v4151_v25  ;;  %v4527_v56 = vcvt.s32.f32 %v3503_v47  ;;  %v3751_v63 = vunpack.c.2.s8 %v2831_v13  ;;  %v3759_v32 = vunpack.c.3.s8 %v2831_v13  ;;  %v2823_v25 = vld [vmem:[#allocation3 + $0x6a8] sm:$0xff]  ;;  %v9900_v47 = vpop.f32.mrf.mxu1 }
 0x4ce   :  { %v5111_v16 = vpack.c.bf16 %v4287_v19, %v4279_v1  ;;  %v4647_v9 = vcvt.s32.f32 %v3623_v58  ;;  %v4655_v3 = vcvt.s32.f32 %v3631_v17  ;;  %v3879_v44 = vunpack.c.2.s8 %v2863_v28  ;;  %v9898_v1 = vpop.f32.mrf.mxu0 }
 0x4cf   :  { %5979 = vmatpush.bf16.msrb.mxu2 %v5047_v7  ;;  %v5231_v35 = vpack.c.bf16 %v4527_v56, %v4519_v23  ;;  %v4775_v31 = vcvt.s32.f32 %v3751_v63  ;;  %5954 = vmatmul.bf16.vlgmr.msrb.gmra.mxu0 %v9709_v52  ;;  %v4783_v60 = vcvt.s32.f32 %v3759_v32  ;;  %v3887_v50 = vunpack.c.3.s8 %v2863_v28 }
 0x4d0   :  { %5992 = vmatpush.bf16.msrb.mxu3 %v5111_v16  ;;  %v3479_v24 = vunpack.c.0.s8 %v2767_v14  ;;  %5967 = vmatmul.bf16.vlgmr.msrb.gmra.mxu1 %v9711_v48  ;;  %v5295_v46 = vpack.c.bf16 %v4655_v3, %v4647_v9  ;;  %v4903_v38 = vcvt.s32.f32 %v3879_v44  ;;  %v3487_v59 = vunpack.c.1.s8 %v2767_v14 }
 0x4d1   :  { %5998 = vmatpush.bf16.msra.mxu0 %v5231_v35  ;;  %v3607_v12 = vunpack.c.0.s8 %v2799_v34  ;;  %v5359_v18 = vpack.c.bf16 %v4783_v60, %v4775_v31  ;;  %v4911_v10 = vcvt.s32.f32 %v3887_v50  ;;  %v3615_v43 = vunpack.c.1.s8 %v2799_v34 }
 0x4d2   :  { %v4503_v42 = vcvt.s32.f32 %v3479_v24  ;;  %5980 = vmatmul.bf16.vlgmr.msrb.gmra.mxu2 %v9713_v62  ;;  %6011 = vmatpush.bf16.msra.mxu1 %v5295_v46  ;;  %v4511_v40 = vcvt.s32.f32 %v3487_v59  ;;  %v3735_v11 = vunpack.c.0.s8 %v2831_v13  ;;  %v3743_v5 = vunpack.c.1.s8 %v2831_v13 }
 0x4d3   :  { %v4631_v26 = vcvt.s32.f32 %v3607_v12  ;;  %5993 = vmatmul.bf16.vlgmr.msrb.gmra.mxu3 %v9715_v54  ;;  %6024 = vmatpush.bf16.msra.mxu2 %v5359_v18  ;;  %v5423_v21 = vpack.c.bf16 %v4911_v10, %v4903_v38  ;;  %v3863_v53 = vunpack.c.0.s8 %v2863_v28  ;;  %v4639_v14 = vcvt.s32.f32 %v3615_v43  ;;  %v2783_v43 = vld [vmem:[#allocation3 + $0x568] sm:$0xff] }
 0x4d4   :  { %v5223_v0 = vpack.c.bf16 %v4511_v40, %v4503_v42  ;;  %v4759_v4 = vcvt.s32.f32 %v3735_v11  ;;  %v3871_v61 = vunpack.c.1.s8 %v2863_v28  ;;  %v4767_v29 = vcvt.s32.f32 %v3743_v5  ;;  %v2751_v40 = vld [vmem:[#allocation3 + $0x468] sm:$0xff] }
 0x4d5   :  { %6037 = vmatpush.bf16.msra.mxu3 %v5423_v21  ;;  %v4887_v33 = vcvt.s32.f32 %v3863_v53  ;;  %v3463_v22 = vunpack.c.2.s8 %v2759_v41  ;;  %v5287_v39 = vpack.c.bf16 %v4639_v14, %v4631_v26  ;;  %v3471_v51 = vunpack.c.3.s8 %v2759_v41  ;;  %v5762_v5 = vpop.f32.mrf.mxu1 }
 0x4d6   :  { %5999 = vmatpush.bf16.msra.mxu0 %v5223_v0  ;;  %v4895_v34 = vcvt.s32.f32 %v3871_v61  ;;  %v3591_v15 = vunpack.c.2.s8 %v2791_v45  ;;  %v5351_v30 = vpack.c.bf16 %v4767_v29, %v4759_v4  ;;  %v3599_v13 = vunpack.c.3.s8 %v2791_v45  ;;  %v5749_v21 = vpop.f32.mrf.mxu0  ;;  %v2815_v4 = vld [vmem:[#allocation3 + $0x668] sm:$0xff] }
 0x4d7   :  { %v4487_v6 = vcvt.s32.f32 %v3463_v22  ;;  %6012 = vmatpush.bf16.msra.mxu1 %v5287_v39  ;;  %v4495_v23 = vcvt.s32.f32 %v3471_v51  ;;  %v3719_v28 = vunpack.c.2.s8 %v2823_v25  ;;  %v3727_v56 = vunpack.c.3.s8 %v2823_v25  ;;  %v2847_v22 = vld [vmem:[#allocation3 + $0x768] sm:$0xff]  ;;  %v9902_v39 = vpop.f32.mrf.mxu2 }
 0x4d8   :  { %v5415_v19 = vpack.c.bf16 %v4895_v34, %v4887_v33  ;;  %v4615_v58 = vcvt.s32.f32 %v3591_v15  ;;  %6025 = vmatpush.bf16.msra.mxu2 %v5351_v30  ;;  %v4623_v7 = vcvt.s32.f32 %v3599_v13  ;;  %v3847_v17 = vunpack.c.2.s8 %v2855_v2  ;;  %v2775_v5 = vld [vmem:[#allocation3 + $0x528] sm:$0xff] }
 0x4d9   :  { %v5215_v63 = vpack.c.bf16 %v4495_v23, %v4487_v6  ;;  %v4743_v16 = vcvt.s32.f32 %v3719_v28  ;;  %v3855_v9 = vunpack.c.3.s8 %v2855_v2  ;;  %v3447_v32 = vunpack.c.0.s8 %v2759_v41 }
 0x4da   :  { %6038 = vmatpush.bf16.msra.mxu3 %v5415_v19  ;;  %v5279_v35 = vpack.c.bf16 %v4623_v7, %v4615_v58  ;;  %v4751_v3 = vcvt.s32.f32 %v3727_v56  ;;  %v4871_v31 = vcvt.s32.f32 %v3847_v17  ;;  %v3455_v60 = vunpack.c.1.s8 %v2759_v41 }
 0x4db   :  { %6000 = vmatpush.bf16.msra.mxu0 %v5215_v63  ;;  %v4879_v44 = vcvt.s32.f32 %v3855_v9  ;;  %v4471_v50 = vcvt.s32.f32 %v3447_v32  ;;  %v3575_v24 = vunpack.c.0.s8 %v2791_v45  ;;  %v3583_v38 = vunpack.c.1.s8 %v2791_v45 }
 0x4dc   :  { %6013 = vmatpush.bf16.msra.mxu1 %v5279_v35  ;;  %v5343_v46 = vpack.c.bf16 %v4751_v3, %v4743_v16  ;;  %v3703_v59 = vunpack.c.0.s8 %v2823_v25  ;;  %v4479_v18 = vcvt.s32.f32 %v3455_v60  ;;  %v3711_v42 = vunpack.c.1.s8 %v2823_v25  ;;  %v9904_v25 = vpop.f32.mrf.mxu3 }
 0x4dd   :  { %v5407_v12 = vpack.c.bf16 %v4879_v44, %v4871_v31  ;;  %v4599_v10 = vcvt.s32.f32 %v3575_v24  ;;  %v4607_v26 = vcvt.s32.f32 %v3583_v38  ;;  %v3831_v0 = vunpack.c.0.s8 %v2855_v2 }
 0x4de   :  { %6026 = vmatpush.bf16.msra.mxu2 %v5343_v46  ;;  %v4727_v11 = vcvt.s32.f32 %v3703_v59  ;;  %v5207_v53 = vpack.c.bf16 %v4479_v18, %v4471_v50  ;;  %v4735_v41 = vcvt.s32.f32 %v3711_v42  ;;  %v3839_v14 = vunpack.c.1.s8 %v2855_v2  ;;  %v2743_v18 = vld [vmem:[#allocation3 + $0x428] sm:$0xff] }
 0x4df   :  { %6039 = vmatpush.bf16.msra.mxu3 %v5407_v12  ;;  %v5271_v61 = vpack.c.bf16 %v4607_v26, %v4599_v10  ;;  %v3431_v45 = vunpack.c.2.s8 %v2751_v40  ;;  %v3439_v29 = vunpack.c.3.s8 %v2751_v40  ;;  %v3559_v33 = vunpack.c.2.s8 %v2783_v43  ;;  %v5775_v10 = vpop.f32.mrf.mxu2 }
 0x4e0   :  { %6001 = vmatpush.bf16.msra.mxu0 %v5207_v53  ;;  %v5335_v34 = vpack.c.bf16 %v4735_v41, %v4727_v11  ;;  %v4855_v51 = vcvt.s32.f32 %v3831_v0  ;;  %v4863_v15 = vcvt.s32.f32 %v3839_v14  ;;  %v3567_v30 = vunpack.c.3.s8 %v2783_v43  ;;  %v2807_v14 = vld [vmem:[#allocation3 + $0x628] sm:$0xff] }
 0x4e1   :  { %6014 = vmatpush.bf16.msra.mxu1 %v5271_v61  ;;  %v4455_v6 = vcvt.s32.f32 %v3431_v45  ;;  %v4463_v13 = vcvt.s32.f32 %v3439_v29  ;;  %v4583_v19 = vcvt.s32.f32 %v3559_v33  ;;  %v3687_v2 = vunpack.c.2.s8 %v2815_v4 }
 0x4e2   :  { %6027 = vmatpush.bf16.msra.mxu2 %v5335_v34  ;;  %v5399_v23 = vpack.c.bf16 %v4863_v15, %v4855_v51  ;;  %v4591_v58 = vcvt.s32.f32 %v3567_v30  ;;  %v3695_v28 = vunpack.c.3.s8 %v2815_v4  ;;  %v3815_v7 = vunpack.c.2.s8 %v2847_v22  ;;  %v2839_v51 = vld [vmem:[#allocation3 + $0x728] sm:$0xff] }
 0x4e3   :  { %v5199_v56 = vpack.c.bf16 %v4463_v13, %v4455_v6  ;;  %v4711_v17 = vcvt.s32.f32 %v3687_v2  ;;  %v3823_v63 = vunpack.c.3.s8 %v2847_v22  ;;  %v3415_v16 = vunpack.c.0.s8 %v2751_v40 }
 0x4e4   :  { %6040 = vmatpush.bf16.msra.mxu3 %v5399_v23  ;;  %v5263_v9 = vpack.c.bf16 %v4591_v58, %v4583_v19  ;;  %v4719_v32 = vcvt.s32.f32 %v3695_v28  ;;  %v4839_v35 = vcvt.s32.f32 %v3815_v7  ;;  %v3423_v31 = vunpack.c.1.s8 %v2751_v40  ;;  %v5788_v42 = vpop.f32.mrf.mxu3  ;;  %v9906_v7 = vpop.f32.mrf.mxu0 }
 0x4e5   :  { %6002 = vmatpush.bf16.msra.mxu0 %v5199_v56  ;;  %v4847_v3 = vcvt.s32.f32 %v3823_v63  ;;  %v4439_v44 = vcvt.s32.f32 %v3415_v16  ;;  %v3543_v50 = vunpack.c.0.s8 %v2783_v43  ;;  %v3551_v24 = vunpack.c.1.s8 %v2783_v43  ;;  %v9908_v56 = vpop.f32.mrf.mxu1 }
 0x4e6   :  { %6015 = vmatpush.bf16.msra.mxu1 %v5263_v9  ;;  %v5327_v60 = vpack.c.bf16 %v4719_v32, %v4711_v17  ;;  %v4447_v38 = vcvt.s32.f32 %v3423_v31  ;;  %v3671_v59 = vunpack.c.0.s8 %v2815_v4  ;;  %v3679_v12 = vunpack.c.1.s8 %v2815_v4 }
 0x4e7   :  { %v5391_v46 = vpack.c.bf16 %v4847_v3, %v4839_v35  ;;  %v4567_v26 = vcvt.s32.f32 %v3543_v50  ;;  %v4575_v11 = vcvt.s32.f32 %v3551_v24  ;;  %v3799_v21 = vunpack.c.0.s8 %v2847_v22 }
 0x4e8   :  { %6028 = vmatpush.bf16.msra.mxu2 %v5327_v60  ;;  %v5191_v53 = vpack.c.bf16 %v4447_v38, %v4439_v44  ;;  %v4695_v40 = vcvt.s32.f32 %v3671_v59  ;;  %v4703_v41 = vcvt.s32.f32 %v3679_v12  ;;  %v3807_v0 = vunpack.c.1.s8 %v2847_v22  ;;  %v9912_v12 = vld [vmem:[#allocation3 + $0xf0] sm:$0xff] }
 0x4e9   :  { %6041 = vmatpush.bf16.msra.mxu3 %v5391_v46  ;;  %v5255_v61 = vpack.c.bf16 %v4575_v11, %v4567_v26  ;;  %v4823_v43 = vcvt.s32.f32 %v3799_v21  ;;  %v3399_v45 = vunpack.c.2.s8 %v2743_v18  ;;  %v3407_v33 = vunpack.c.3.s8 %v2743_v18  ;;  %v2672_v21 = vld [vmem:[#allocation3 + $0x1f0] sm:$0xff] }
 0x4ea   :  { %6003 = vmatpush.bf16.msra.mxu0 %v5191_v53  ;;  %v5319_v29 = vpack.c.bf16 %v4703_v41, %v4695_v40  ;;  %v4831_v4 = vcvt.s32.f32 %v3807_v0  ;;  %v3527_v34 = vunpack.c.2.s8 %v2775_v5  ;;  %v3535_v30 = vunpack.c.3.s8 %v2775_v5  ;;  %v9914_v41 = vld [vmem:[#allocation3 + $0x2f0] sm:$0xff] }
 0x4eb   :  { %6016 = vmatpush.bf16.msra.mxu1 %v5255_v61  ;;  %v4423_v15 = vcvt.s32.f32 %v3399_v45  ;;  %v3655_v6 = vunpack.c.2.s8 %v2807_v14  ;;  %v4431_v19 = vcvt.s32.f32 %v3407_v33  ;;  %v3663_v23 = vunpack.c.3.s8 %v2807_v14  ;;  %v9922_v45 = vld [vmem:[#allocation3 + $0x3f0] sm:$0xff] }
 0x4ec   :  { %6029 = vmatpush.bf16.msra.mxu2 %v5319_v29  ;;  %v5383_v13 = vpack.c.bf16 %v4831_v4, %v4823_v43  ;;  %v4551_v2 = vcvt.s32.f32 %v3527_v34  ;;  %v4559_v22 = vcvt.s32.f32 %v3535_v30  ;;  %v3783_v28 = vunpack.c.2.s8 %v2839_v51  ;;  %v9918_v0 = vpop.f32.mrf.mxu3 }
 0x4ed   :  { %v4679_v58 = vcvt.s32.f32 %v3655_v6  ;;  %v5183_v17 = vpack.c.bf16 %v4431_v19, %v4423_v15  ;;  %v4687_v63 = vcvt.s32.f32 %v3663_v23  ;;  %v3791_v16 = vunpack.c.3.s8 %v2839_v51  ;;  %v5814_v15 = vpop.f32.mrf.mxu1 }
 0x4ee   :  { %6042 = vmatpush.bf16.msra.mxu3 %v5383_v13  ;;  %v5247_v9 = vpack.c.bf16 %v4559_v22, %v4551_v2  ;;  %v4807_v32 = vcvt.s32.f32 %v3783_v28  ;;  %v5761_v35 = vadd.f32 %v9900_v47, %v9898_v1  ;;  %v3383_v3 = vunpack.c.0.s8 %v2743_v18  ;;  %v2728_v15 = vld [vmem:[#allocation3 + $0x3b0] sm:$0xff] }
 0x4ef   :  { %6004 = vmatpush.bf16.msra.mxu0 %v5183_v17  ;;  %v5311_v31 = vpack.c.bf16 %v4687_v63, %v4679_v58  ;;  %v4815_v44 = vcvt.s32.f32 %v3791_v16  ;;  %v3391_v60 = vunpack.c.1.s8 %v2743_v18  ;;  %v3511_v50 = vunpack.c.0.s8 %v2775_v5  ;;  %v9916_v18 = vpop.f32.mrf.mxu2 }
 0x4f0   :  { %6017 = vmatpush.bf16.msra.mxu1 %v5247_v9  ;;  %v4407_v24 = vcvt.s32.f32 %v3383_v3  ;;  %v3519_v46 = vunpack.c.1.s8 %v2775_v5  ;;  %v3639_v38 = vunpack.c.0.s8 %v2807_v14  ;;  %v3647_v59 = vunpack.c.1.s8 %v2807_v14 }
 0x4f1   :  { %6030 = vmatpush.bf16.msra.mxu2 %v5311_v31  ;;  %v5375_v10 = vpack.c.bf16 %v4815_v44, %v4807_v32  ;;  %v4415_v42 = vcvt.s32.f32 %v3391_v60  ;;  %v4535_v26 = vcvt.s32.f32 %v3511_v50  ;;  %v3767_v11 = vunpack.c.0.s8 %v2839_v51 }
 0x4f2   :  { %v4543_v1 = vcvt.s32.f32 %v3519_v46  ;;  %v4663_v47 = vcvt.s32.f32 %v3639_v38  ;;  %v4671_v53 = vcvt.s32.f32 %v3647_v59  ;;  %v3775_v40 = vunpack.c.1.s8 %v2839_v51  ;;  %v5801_v51 = vpop.f32.mrf.mxu0 }
 0x4f3   :  { %6043 = vmatpush.bf16.msra.mxu3 %v5375_v10  ;;  %v5175_v5 = vpack.c.bf16 %v4415_v42, %v4407_v24  ;;  %v4791_v14 = vcvt.s32.f32 %v3767_v11  ;;  %v2984_v61 = vunpack.c.2.s8 %v9912_v12  ;;  %v2992_v43 = vunpack.c.3.s8 %v9912_v12 }
 0x4f4   :  { %v5239_v29 = vpack.c.bf16 %v4543_v1, %v4535_v26  ;;  %v5303_v4 = vpack.c.bf16 %v4671_v53, %v4663_v47  ;;  %v4799_v33 = vcvt.s32.f32 %v3775_v40  ;;  %v3112_v34 = vunpack.c.2.s8 %v2672_v21  ;;  %v5840_v42 = vpop.f32.mrf.mxu3  ;;  %v2664_v40 = vld [vmem:[#allocation3 + $0x1b0] sm:$0xff] }
 0x4f5   :  { %6005 = vmatpush.bf16.msra.mxu0 %v5175_v5  ;;  %v4008_v30 = vcvt.s32.f32 %v2984_v61  ;;  %v4016_v6 = vcvt.s32.f32 %v2992_v43  ;;  %v3120_v13 = vunpack.c.3.s8 %v2672_v21  ;;  %v3240_v19 = vunpack.c.2.s8 %v9914_v41 }
 0x4f6   :  { %6018 = vmatpush.bf16.msra.mxu1 %v5239_v29  ;;  %6031 = vmatpush.bf16.msra.mxu2 %v5303_v4  ;;  %v5367_v2 = vpack.c.bf16 %v4799_v33, %v4791_v14  ;;  %v4136_v23 = vcvt.s32.f32 %v3112_v34  ;;  %v3248_v22 = vunpack.c.3.s8 %v9914_v41  ;;  %v3368_v58 = vunpack.c.2.s8 %v9922_v45  ;;  %v2696_v29 = vld [vmem:[#allocation3 + $0x2b0] sm:$0xff] }
 0x4f7   :  { %v4976_v28 = vpack.c.bf16 %v4016_v6, %v4008_v30  ;;  %v4144_v17 = vcvt.s32.f32 %v3120_v13  ;;  %v4264_v63 = vcvt.s32.f32 %v3240_v19  ;;  %v3376_v16 = vunpack.c.3.s8 %v9922_v45 }
 0x4f8   :  { %6044 = vmatpush.bf16.msra.mxu3 %v5367_v2  ;;  %v4272_v9 = vcvt.s32.f32 %v3248_v22  ;;  %v4392_v32 = vcvt.s32.f32 %v3368_v58  ;;  %v5774_v3 = vadd.f32 %v9902_v39, %v5761_v35  ;;  %6006 = vmatmul.bf16.vlgmr.msra.gmra.mxu0 %v9717_v20  ;;  %v2968_v31 = vunpack.c.0.s8 %v9912_v12  ;;  %v2632_v39 = vld [vmem:[#allocation3 + $0xb0] sm:$0xff]  ;;  %v5827_v35 = vpop.f32.mrf.mxu2 }
 0x4f9   :  { %6050 = vmatpush.bf16.msrb.mxu0 %v4976_v28  ;;  %v5040_v44 = vpack.c.bf16 %v4144_v17, %v4136_v23  ;;  %v4400_v60 = vcvt.s32.f32 %v3376_v16  ;;  %6032 = vmatmul.bf16.vlgmr.msra.gmra.mxu2 %v9721_v57  ;;  %v2976_v50 = vunpack.c.1.s8 %v9912_v12  ;;  %v3096_v24 = vunpack.c.0.s8 %v2672_v21 }
 0x4fa   :  { %v5104_v46 = vpack.c.bf16 %v4272_v9, %v4264_v63  ;;  %v9934_v38 = vadd.f32 %v9904_v25, %v5774_v3  ;;  %v3992_v59 = vcvt.s32.f32 %v2968_v31  ;;  %v3104_v10 = vunpack.c.1.s8 %v2672_v21  ;;  %6019 = vmatmul.bf16.vlgmr.msra.gmra.mxu1 %v9719_v55 }
 0x4fb   :  { %6063 = vmatpush.bf16.msrb.mxu1 %v5040_v44  ;;  %v5168_v26 = vpack.c.bf16 %v4400_v60, %v4392_v32  ;;  %6045 = vmatmul.bf16.vlgmr.msra.gmra.mxu3 %v9723_v8  ;;  %v4000_v11 = vcvt.s32.f32 %v2976_v50  ;;  %v4120_v1 = vcvt.s32.f32 %v3096_v24  ;;  %v3224_v12 = vunpack.c.0.s8 %v9914_v41 }
 0x4fc   :  { %6076 = vmatpush.bf16.msrb.mxu2 %v5104_v46  ;;  %v4128_v47 = vcvt.s32.f32 %v3104_v10  ;;  %v3232_v25 = vunpack.c.1.s8 %v9914_v41  ;;  %v3352_v53 = vunpack.c.0.s8 %v9922_v45  ;;  %v3360_v21 = vunpack.c.1.s8 %v9922_v45 }
 0x4fd   :  { %6089 = vmatpush.bf16.msrb.mxu3 %v5168_v26  ;;  %v4968_v5 = vpack.c.bf16 %v4000_v11, %v3992_v59  ;;  %v4248_v14 = vcvt.s32.f32 %v3224_v12  ;;  %v2952_v61 = vunpack.c.2.s8 %v2632_v39  ;;  %v2960_v43 = vunpack.c.3.s8 %v2632_v39  ;;  %v2624_v11 = vld [vmem:[#allocation3 + $0x70] sm:$0xff] }
 0x4fe   :  { %v5032_v4 = vpack.c.bf16 %v4128_v47, %v4120_v1  ;;  %v4256_v33 = vcvt.s32.f32 %v3232_v25  ;;  %v4376_v34 = vcvt.s32.f32 %v3352_v53  ;;  %v4384_v51 = vcvt.s32.f32 %v3360_v21  ;;  %v2656_v53 = vld [vmem:[#allocation3 + $0x170] sm:$0xff] }
 0x4ff   :  { %6051 = vmatpush.bf16.msrb.mxu0 %v4968_v5  ;;  %v3976_v30 = vcvt.s32.f32 %v2952_v61  ;;  %v3984_v6 = vcvt.s32.f32 %v2960_v43  ;;  %v3080_v41 = vunpack.c.2.s8 %v2664_v40  ;;  %v3088_v13 = vunpack.c.3.s8 %v2664_v40  ;;  %v2688_v61 = vld [vmem:[#allocation3 + $0x270] sm:$0xff] }
 0x500   :  { %6064 = vmatpush.bf16.msrb.mxu1 %v5032_v4  ;;  %v5096_v19 = vpack.c.bf16 %v4256_v33, %v4248_v14  ;;  %v5160_v45 = vpack.c.bf16 %v4384_v51, %v4376_v34  ;;  %v3208_v2 = vunpack.c.2.s8 %v2696_v29  ;;  %v3216_v23 = vunpack.c.3.s8 %v2696_v29 }
 0x501   :  { %v4960_v22 = vpack.c.bf16 %v3984_v6, %v3976_v30  ;;  %v4104_v58 = vcvt.s32.f32 %v3080_v41  ;;  %v4112_v28 = vcvt.s32.f32 %v3088_v13  ;;  %v3336_v17 = vunpack.c.2.s8 %v2728_v15 }
 0x502   :  { %6077 = vmatpush.bf16.msrb.mxu2 %v5096_v19  ;;  %6090 = vmatpush.bf16.msrb.mxu3 %v5160_v45  ;;  %v4232_v63 = vcvt.s32.f32 %v3208_v2  ;;  %v4240_v16 = vcvt.s32.f32 %v3216_v23  ;;  %v3344_v9 = vunpack.c.3.s8 %v2728_v15  ;;  %v2936_v32 = vunpack.c.0.s8 %v2632_v39 }
 0x503   :  { %6052 = vmatpush.bf16.msrb.mxu0 %v4960_v22  ;;  %v5024_v3 = vpack.c.bf16 %v4112_v28, %v4104_v58  ;;  %v4360_v31 = vcvt.s32.f32 %v3336_v17  ;;  %v2944_v44 = vunpack.c.1.s8 %v2632_v39  ;;  %v3064_v60 = vunpack.c.0.s8 %v2664_v40 }
 0x504   :  { %v5088_v50 = vpack.c.bf16 %v4240_v16, %v4232_v63  ;;  %v4368_v24 = vcvt.s32.f32 %v3344_v9  ;;  %v3960_v46 = vcvt.s32.f32 %v2936_v32  ;;  %v3072_v59 = vunpack.c.1.s8 %v2664_v40 }
 0x505   :  { %6065 = vmatpush.bf16.msrb.mxu1 %v5024_v3  ;;  %v3968_v10 = vcvt.s32.f32 %v2944_v44  ;;  %v4088_v35 = vcvt.s32.f32 %v3064_v60  ;;  %v3192_v42 = vunpack.c.0.s8 %v2696_v29  ;;  %v3200_v26 = vunpack.c.1.s8 %v2696_v29  ;;  %v2720_v29 = vld [vmem:[#allocation3 + $0x370] sm:$0xff] }
 0x506   :  { %6078 = vmatpush.bf16.msrb.mxu2 %v5088_v50  ;;  %v5152_v1 = vpack.c.bf16 %v4368_v24, %v4360_v31  ;;  %v4096_v12 = vcvt.s32.f32 %v3072_v59  ;;  %v3320_v47 = vunpack.c.0.s8 %v2728_v15  ;;  %v3328_v25 = vunpack.c.1.s8 %v2728_v15 }
 0x507   :  { %v4952_v21 = vpack.c.bf16 %v3968_v10, %v3960_v46  ;;  %v4216_v5 = vcvt.s32.f32 %v3192_v42  ;;  %v4224_v39 = vcvt.s32.f32 %v3200_v26  ;;  %v5800_v14 = vadd.f32 %v9906_v7, %v9934_v38  ;;  %v2616_v10 = vld [vmem:[#allocation3 + $0x30] sm:$0xff] }
 0x508   :  { %6091 = vmatpush.bf16.msrb.mxu3 %v5152_v1  ;;  %v5016_v40 = vpack.c.bf16 %v4096_v12, %v4088_v35  ;;  %v4344_v43 = vcvt.s32.f32 %v3320_v47  ;;  %v4352_v4 = vcvt.s32.f32 %v3328_v25  ;;  %v2920_v33 = vunpack.c.2.s8 %v2624_v11  ;;  %v2648_v47 = vld [vmem:[#allocation3 + $0x130] sm:$0xff] }
 0x509   :  { %6053 = vmatpush.bf16.msrb.mxu0 %v4952_v21  ;;  %v5080_v34 = vpack.c.bf16 %v4224_v39, %v4216_v5  ;;  %v5813_v51 = vadd.f32 %v9908_v56, %v5800_v14  ;;  %v2928_v30 = vunpack.c.3.s8 %v2624_v11  ;;  %v3048_v15 = vunpack.c.2.s8 %v2656_v53  ;;  %v2680_v39 = vld [vmem:[#allocation3 + $0x230] sm:$0xff] }
 0x50a   :  { %6066 = vmatpush.bf16.msrb.mxu1 %v5016_v40  ;;  %v5144_v6 = vpack.c.bf16 %v4352_v4, %v4344_v43  ;;  %v3944_v41 = vcvt.s32.f32 %v2920_v33  ;;  %v3056_v13 = vunpack.c.3.s8 %v2656_v53  ;;  %v3176_v19 = vunpack.c.2.s8 %v2688_v61  ;;  %v2712_v43 = vld [vmem:[#allocation3 + $0x330] sm:$0xff] }
 0x50b   :  { %6079 = vmatpush.bf16.msrb.mxu2 %v5080_v34  ;;  %v3952_v7 = vcvt.s32.f32 %v2928_v30  ;;  %v4072_v38 = vcvt.s32.f32 %v3048_v15  ;;  %v3184_v45 = vunpack.c.3.s8 %v2688_v61  ;;  %v3304_v2 = vunpack.c.2.s8 %v2720_v29 }
 0x50c   :  { %6092 = vmatpush.bf16.msrb.mxu3 %v5144_v6  ;;  %v4080_v23 = vcvt.s32.f32 %v3056_v13  ;;  %v4200_v22 = vcvt.s32.f32 %v3176_v19  ;;  %v3312_v58 = vunpack.c.3.s8 %v2720_v29  ;;  %v5826_v28 = vadd.f32 %v9916_v18, %v5813_v51 }
 0x50d   :  { %v4944_v17 = vpack.c.bf16 %v3952_v7, %v3944_v41  ;;  %v4208_v56 = vcvt.s32.f32 %v3184_v45  ;;  %v4328_v63 = vcvt.s32.f32 %v3304_v2  ;;  %v2904_v16 = vunpack.c.0.s8 %v2624_v11 }
 0x50e   :  { %v5008_v9 = vpack.c.bf16 %v4080_v23, %v4072_v38  ;;  %v4336_v32 = vcvt.s32.f32 %v3312_v58  ;;  %v9947_v3 = vadd.f32 %v9918_v0, %v5826_v28  ;;  %v2912_v44 = vunpack.c.1.s8 %v2624_v11 }
 0x50f   :  { %6054 = vmatpush.bf16.msrb.mxu0 %v4944_v17  ;;  %v5072_v31 = vpack.c.bf16 %v4208_v56, %v4200_v22  ;;  %v3928_v60 = vcvt.s32.f32 %v2904_v16  ;;  %v3032_v50 = vunpack.c.0.s8 %v2656_v53  ;;  %v3040_v46 = vunpack.c.1.s8 %v2656_v53 }
 0x510   :  { %6067 = vmatpush.bf16.msrb.mxu1 %v5008_v9  ;;  %v5136_v24 = vpack.c.bf16 %v4336_v32, %v4328_v63  ;;  %v3160_v59 = vunpack.c.0.s8 %v2688_v61  ;;  %v3936_v18 = vcvt.s32.f32 %v2912_v44  ;;  %v3168_v42 = vunpack.c.1.s8 %v2688_v61  ;;  %v2768_v32 = vld [vmem:[#allocation3 + $0x4f0] sm:$0xff] }
 0x511   :  { %6080 = vmatpush.bf16.msrb.mxu2 %v5072_v31  ;;  %v4056_v35 = vcvt.s32.f32 %v3032_v50  ;;  %v3288_v26 = vunpack.c.0.s8 %v2720_v29  ;;  %v4064_v1 = vcvt.s32.f32 %v3040_v46  ;;  %v3296_v0 = vunpack.c.1.s8 %v2720_v29 }
 0x512   :  { %6093 = vmatpush.bf16.msrb.mxu3 %v5136_v24  ;;  %v4184_v12 = vcvt.s32.f32 %v3160_v59  ;;  %v4936_v25 = vpack.c.bf16 %v3936_v18, %v3928_v60  ;;  %v4192_v21 = vcvt.s32.f32 %v3168_v42  ;;  %v2888_v5 = vunpack.c.2.s8 %v2616_v10  ;;  %v2800_v18 = vld [vmem:[#allocation3 + $0x5f0] sm:$0xff] }
 0x513   :  { %v4312_v11 = vcvt.s32.f32 %v3288_v26  ;;  %v5000_v14 = vpack.c.bf16 %v4064_v1, %v4056_v35  ;;  %v4320_v40 = vcvt.s32.f32 %v3296_v0  ;;  %v2896_v53 = vunpack.c.3.s8 %v2616_v10  ;;  %v2832_v26 = vld [vmem:[#allocation3 + $0x6f0] sm:$0xff] }
 0x514   :  { %6055 = vmatpush.bf16.msrb.mxu0 %v4936_v25  ;;  %v5064_v4 = vpack.c.bf16 %v4192_v21, %v4184_v12  ;;  %v3912_v33 = vcvt.s32.f32 %v2888_v5  ;;  %v3016_v34 = vunpack.c.2.s8 %v2648_v47  ;;  %v3024_v61 = vunpack.c.3.s8 %v2648_v47  ;;  %v2864_v5 = vld [vmem:[#allocation3 + $0x7f0] sm:$0xff] }
 0x515   :  { %6068 = vmatpush.bf16.msrb.mxu1 %v5000_v14  ;;  %v5128_v51 = vpack.c.bf16 %v4320_v40, %v4312_v11  ;;  %v3920_v30 = vcvt.s32.f32 %v2896_v53  ;;  %v3144_v15 = vunpack.c.2.s8 %v2680_v39  ;;  %v3152_v41 = vunpack.c.3.s8 %v2680_v39 }
 0x516   :  { %6081 = vmatpush.bf16.msrb.mxu2 %v5064_v4  ;;  %v4040_v29 = vcvt.s32.f32 %v3016_v34  ;;  %v4048_v6 = vcvt.s32.f32 %v3024_v61  ;;  %v3272_v13 = vunpack.c.2.s8 %v2712_v43  ;;  %v3280_v38 = vunpack.c.3.s8 %v2712_v43 }
 0x517   :  { %6094 = vmatpush.bf16.msrb.mxu3 %v5128_v51  ;;  %v4928_v19 = vpack.c.bf16 %v3920_v30, %v3912_v33  ;;  %v4168_v7 = vcvt.s32.f32 %v3144_v15  ;;  %v4176_v2 = vcvt.s32.f32 %v3152_v41  ;;  %v2872_v22 = vunpack.c.0.s8 %v2616_v10 }
 0x518   :  { %v4992_v45 = vpack.c.bf16 %v4048_v6, %v4040_v29  ;;  %v4296_v23 = vcvt.s32.f32 %v3272_v13  ;;  %v4304_v58 = vcvt.s32.f32 %v3280_v38  ;;  %v2880_v28 = vunpack.c.1.s8 %v2616_v10 }
 0x519   :  { %6056 = vmatpush.bf16.msrb.mxu0 %v4928_v19  ;;  %v3000_v17 = vunpack.c.0.s8 %v2648_v47  ;;  %v5056_v56 = vpack.c.bf16 %v4176_v2, %v4168_v7  ;;  %v3896_v63 = vcvt.s32.f32 %v2872_v22  ;;  %v3008_v16 = vunpack.c.1.s8 %v2648_v47 }
 0x51a   :  { %6069 = vmatpush.bf16.msrb.mxu1 %v4992_v45  ;;  %v3128_v9 = vunpack.c.0.s8 %v2680_v39  ;;  %v5120_v31 = vpack.c.bf16 %v4304_v58, %v4296_v23  ;;  %v3904_v44 = vcvt.s32.f32 %v2880_v28  ;;  %v3136_v24 = vunpack.c.1.s8 %v2680_v39 }
 0x51b   :  { %v4024_v60 = vcvt.s32.f32 %v3000_v17  ;;  %6082 = vmatpush.bf16.msrb.mxu2 %v5056_v56  ;;  %v4032_v50 = vcvt.s32.f32 %v3008_v16  ;;  %v3256_v59 = vunpack.c.0.s8 %v2712_v43  ;;  %v3264_v42 = vunpack.c.1.s8 %v2712_v43  ;;  %v2760_v17 = vld [vmem:[#allocation3 + $0x4b0] sm:$0xff] }
 0x51c   :  { %v4152_v46 = vcvt.s32.f32 %v3128_v9  ;;  %6095 = vmatpush.bf16.msrb.mxu3 %v5120_v31  ;;  %v4920_v35 = vpack.c.bf16 %v3904_v44, %v3896_v63  ;;  %v3496_v10 = vunpack.c.2.s8 %v2768_v32  ;;  %v4160_v12 = vcvt.s32.f32 %v3136_v24  ;;  %v2792_v9 = vld [vmem:[#allocation3 + $0x5b0] sm:$0xff] }
 0x51d   :  { %v4984_v1 = vpack.c.bf16 %v4032_v50, %v4024_v60  ;;  %v4280_v0 = vcvt.s32.f32 %v3256_v59  ;;  %v3504_v47 = vunpack.c.3.s8 %v2768_v32  ;;  %v4288_v25 = vcvt.s32.f32 %v3264_v42  ;;  %v2824_v59 = vld [vmem:[#allocation3 + $0x6b0] sm:$0xff] }
 0x51e   :  { %6057 = vmatpush.bf16.msrb.mxu0 %v4920_v35  ;;  %v4520_v21 = vcvt.s32.f32 %v3496_v10  ;;  %v3624_v11 = vunpack.c.2.s8 %v2800_v18  ;;  %v5048_v14 = vpack.c.bf16 %v4160_v12, %v4152_v46  ;;  %v3632_v40 = vunpack.c.3.s8 %v2800_v18 }
 0x51f   :  { %6070 = vmatpush.bf16.msrb.mxu1 %v4984_v1  ;;  %v4528_v39 = vcvt.s32.f32 %v3504_v47  ;;  %v3752_v53 = vunpack.c.2.s8 %v2832_v26  ;;  %v5112_v4 = vpack.c.bf16 %v4288_v25, %v4280_v0  ;;  %v3760_v34 = vunpack.c.3.s8 %v2832_v26  ;;  %v2856_v1 = vld [vmem:[#allocation3 + $0x7b0] sm:$0xff]  ;;  %v9953_v47 = vpop.f32.mrf.mxu0  ;;  %v9955_v25 = vpop.f32.mrf.mxu1 }
 0x520   :  { %v4648_v33 = vcvt.s32.f32 %v3624_v11  ;;  %6083 = vmatpush.bf16.msrb.mxu2 %v5048_v14  ;;  %v4656_v61 = vcvt.s32.f32 %v3632_v40  ;;  %v3880_v30 = vunpack.c.2.s8 %v2864_v5  ;;  %v3888_v29 = vunpack.c.3.s8 %v2864_v5 }
 0x521   :  { %v5232_v43 = vpack.c.bf16 %v4528_v39, %v4520_v21  ;;  %v4776_v51 = vcvt.s32.f32 %v3752_v53  ;;  %6058 = vmatmul.bf16.vlgmr.msrb.gmra.mxu0 %v9709_v52  ;;  %6096 = vmatpush.bf16.msrb.mxu3 %v5112_v4  ;;  %v4784_v15 = vcvt.s32.f32 %v3760_v34  ;;  %v3480_v6 = vunpack.c.0.s8 %v2768_v32 }
 0x522   :  { %6071 = vmatmul.bf16.vlgmr.msrb.gmra.mxu1 %v9711_v48  ;;  %v5296_v41 = vpack.c.bf16 %v4656_v61, %v4648_v33  ;;  %v4904_v13 = vcvt.s32.f32 %v3880_v30  ;;  %v3488_v19 = vunpack.c.1.s8 %v2768_v32  ;;  %v3608_v7 = vunpack.c.0.s8 %v2800_v18 }
 0x523   :  { %6102 = vmatpush.bf16.msra.mxu0 %v5232_v43  ;;  %v5360_v38 = vpack.c.bf16 %v4784_v15, %v4776_v51  ;;  %v4912_v45 = vcvt.s32.f32 %v3888_v29  ;;  %v4504_v2 = vcvt.s32.f32 %v3480_v6  ;;  %6084 = vmatmul.bf16.vlgmr.msrb.gmra.mxu2 %v9713_v62  ;;  %v3616_v22 = vunpack.c.1.s8 %v2800_v18 }
 0x524   :  { %6115 = vmatpush.bf16.msra.mxu1 %v5296_v41  ;;  %v4512_v23 = vcvt.s32.f32 %v3488_v19  ;;  %v4632_v58 = vcvt.s32.f32 %v3608_v7  ;;  %v3736_v28 = vunpack.c.0.s8 %v2832_v26  ;;  %6097 = vmatmul.bf16.vlgmr.msrb.gmra.mxu3 %v9715_v54  ;;  %v3744_v63 = vunpack.c.1.s8 %v2832_v26 }
 0x525   :  { %6128 = vmatpush.bf16.msra.mxu2 %v5360_v38  ;;  %v5424_v56 = vpack.c.bf16 %v4912_v45, %v4904_v13  ;;  %v3864_v16 = vunpack.c.0.s8 %v2864_v5  ;;  %v4640_v31 = vcvt.s32.f32 %v3616_v22  ;;  %v3872_v60 = vunpack.c.1.s8 %v2864_v5  ;;  %v2752_v22 = vld [vmem:[#allocation3 + $0x470] sm:$0xff] }
 0x526   :  { %v5224_v32 = vpack.c.bf16 %v4512_v23, %v4504_v2  ;;  %v4760_v44 = vcvt.s32.f32 %v3736_v28  ;;  %v4768_v50 = vcvt.s32.f32 %v3744_v63  ;;  %v3464_v46 = vunpack.c.2.s8 %v2760_v17 }
 0x527   :  { %6141 = vmatpush.bf16.msra.mxu3 %v5424_v56  ;;  %v4888_v24 = vcvt.s32.f32 %v3864_v16  ;;  %v5288_v18 = vpack.c.bf16 %v4640_v31, %v4632_v58  ;;  %v4896_v35 = vcvt.s32.f32 %v3872_v60  ;;  %v3472_v42 = vunpack.c.3.s8 %v2760_v17  ;;  %v2784_v58 = vld [vmem:[#allocation3 + $0x570] sm:$0xff]  ;;  %v5853_v63 = vpop.f32.mrf.mxu0  ;;  %v5866_v16 = vpop.f32.mrf.mxu1 }
 0x528   :  { %6103 = vmatpush.bf16.msra.mxu0 %v5224_v32  ;;  %v3592_v10 = vunpack.c.2.s8 %v2792_v9  ;;  %v5352_v12 = vpack.c.bf16 %v4768_v50, %v4760_v44  ;;  %v4488_v0 = vcvt.s32.f32 %v3464_v46  ;;  %v3600_v26 = vunpack.c.3.s8 %v2792_v9  ;;  %v2816_v60 = vld [vmem:[#allocation3 + $0x670] sm:$0xff] }
 0x529   :  { %6116 = vmatpush.bf16.msra.mxu1 %v5288_v18  ;;  %v5416_v21 = vpack.c.bf16 %v4896_v35, %v4888_v24  ;;  %v4496_v11 = vcvt.s32.f32 %v3472_v42  ;;  %v3720_v14 = vunpack.c.2.s8 %v2824_v59  ;;  %v3728_v40 = vunpack.c.3.s8 %v2824_v59  ;;  %v2848_v18 = vld [vmem:[#allocation3 + $0x770] sm:$0xff]  ;;  %v9957_v35 = vpop.f32.mrf.mxu2 }
 0x52a   :  { %v4616_v5 = vcvt.s32.f32 %v3592_v10  ;;  %6129 = vmatpush.bf16.msra.mxu2 %v5352_v12  ;;  %v4624_v39 = vcvt.s32.f32 %v3600_v26  ;;  %v3848_v53 = vunpack.c.2.s8 %v2856_v1  ;;  %v3856_v34 = vunpack.c.3.s8 %v2856_v1 }
 0x52b   :  { %6142 = vmatpush.bf16.msra.mxu3 %v5416_v21  ;;  %v5216_v4 = vpack.c.bf16 %v4496_v11, %v4488_v0  ;;  %v4744_v33 = vcvt.s32.f32 %v3720_v14  ;;  %v3448_v43 = vunpack.c.0.s8 %v2760_v17  ;;  %v4752_v51 = vcvt.s32.f32 %v3728_v40 }
 0x52c   :  { %v5280_v61 = vpack.c.bf16 %v4624_v39, %v4616_v5  ;;  %v4872_v30 = vcvt.s32.f32 %v3848_v53  ;;  %v4880_v15 = vcvt.s32.f32 %v3856_v34  ;;  %v3456_v29 = vunpack.c.1.s8 %v2760_v17 }
 0x52d   :  { %6104 = vmatpush.bf16.msra.mxu0 %v5216_v4  ;;  %v4472_v6 = vcvt.s32.f32 %v3448_v43  ;;  %v3576_v41 = vunpack.c.0.s8 %v2792_v9  ;;  %v5344_v13 = vpack.c.bf16 %v4752_v51, %v4744_v33  ;;  %v3584_v19 = vunpack.c.1.s8 %v2792_v9 }
 0x52e   :  { %6117 = vmatpush.bf16.msra.mxu1 %v5280_v61  ;;  %v3704_v7 = vunpack.c.0.s8 %v2824_v59  ;;  %v5408_v38 = vpack.c.bf16 %v4880_v15, %v4872_v30  ;;  %v4480_v45 = vcvt.s32.f32 %v3456_v29  ;;  %v3712_v23 = vunpack.c.1.s8 %v2824_v59  ;;  %v9959_v59 = vpop.f32.mrf.mxu3 }
 0x52f   :  { %v4600_v2 = vcvt.s32.f32 %v3576_v41  ;;  %6130 = vmatpush.bf16.msra.mxu2 %v5344_v13  ;;  %v4608_v28 = vcvt.s32.f32 %v3584_v19  ;;  %v3832_v31 = vunpack.c.0.s8 %v2856_v1  ;;  %v3840_v44 = vunpack.c.1.s8 %v2856_v1 }
 0x530   :  { %v4728_v56 = vcvt.s32.f32 %v3704_v7  ;;  %6143 = vmatpush.bf16.msra.mxu3 %v5408_v38  ;;  %v5208_v32 = vpack.c.bf16 %v4480_v45, %v4472_v6  ;;  %v4736_v17 = vcvt.s32.f32 %v3712_v23  ;;  %v3432_v9 = vunpack.c.2.s8 %v2752_v22 }
 0x531   :  { %v5272_v50 = vpack.c.bf16 %v4608_v28, %v4600_v2  ;;  %v3440_v24 = vunpack.c.3.s8 %v2752_v22  ;;  %v3560_v46 = vunpack.c.2.s8 %v2784_v58  ;;  %v4856_v10 = vcvt.s32.f32 %v3832_v31  ;;  %v2744_v2 = vld [vmem:[#allocation3 + $0x430] sm:$0xff]  ;;  %v5879_v23 = vpop.f32.mrf.mxu2 }
 0x532   :  { %6105 = vmatpush.bf16.msra.mxu0 %v5208_v32  ;;  %v5336_v42 = vpack.c.bf16 %v4736_v17, %v4728_v56  ;;  %v4864_v12 = vcvt.s32.f32 %v3840_v44  ;;  %v3568_v0 = vunpack.c.3.s8 %v2784_v58  ;;  %v4456_v26 = vcvt.s32.f32 %v3432_v9  ;;  %v2776_v32 = vld [vmem:[#allocation3 + $0x530] sm:$0xff] }
 0x533   :  { %6118 = vmatpush.bf16.msra.mxu1 %v5272_v50  ;;  %v4464_v21 = vcvt.s32.f32 %v3440_v24  ;;  %v4584_v11 = vcvt.s32.f32 %v3560_v46  ;;  %v3688_v1 = vunpack.c.2.s8 %v2816_v60  ;;  %v3696_v39 = vunpack.c.3.s8 %v2816_v60  ;;  %v2808_v50 = vld [vmem:[#allocation3 + $0x630] sm:$0xff] }
 0x534   :  { %6131 = vmatpush.bf16.msra.mxu2 %v5336_v42  ;;  %v5400_v5 = vpack.c.bf16 %v4864_v12, %v4856_v10  ;;  %v4592_v14 = vcvt.s32.f32 %v3568_v0  ;;  %v3816_v40 = vunpack.c.2.s8 %v2848_v18  ;;  %v3824_v33 = vunpack.c.3.s8 %v2848_v18  ;;  %v2840_v12 = vld [vmem:[#allocation3 + $0x730] sm:$0xff] }
 0x535   :  { %v5200_v53 = vpack.c.bf16 %v4464_v21, %v4456_v26  ;;  %v4712_v4 = vcvt.s32.f32 %v3688_v1  ;;  %v3416_v34 = vunpack.c.0.s8 %v2752_v22  ;;  %v4720_v61 = vcvt.s32.f32 %v3696_v39 }
 0x536   :  { %6144 = vmatpush.bf16.msra.mxu3 %v5400_v5  ;;  %v5264_v43 = vpack.c.bf16 %v4592_v14, %v4584_v11  ;;  %v4840_v51 = vcvt.s32.f32 %v3816_v40  ;;  %v4848_v30 = vcvt.s32.f32 %v3824_v33  ;;  %v3424_v15 = vunpack.c.1.s8 %v2752_v22  ;;  %v5892_v28 = vpop.f32.mrf.mxu3 }
 0x537   :  { %6106 = vmatpush.bf16.msra.mxu0 %v5200_v53  ;;  %v4440_v29 = vcvt.s32.f32 %v3416_v34  ;;  %v5328_v6 = vpack.c.bf16 %v4720_v61, %v4712_v4  ;;  %v3544_v41 = vunpack.c.0.s8 %v2784_v58  ;;  %v3552_v13 = vunpack.c.1.s8 %v2784_v58  ;;  %v9961_v34 = vpop.f32.mrf.mxu0 }
 0x538   :  { %6119 = vmatpush.bf16.msra.mxu1 %v5264_v43  ;;  %v5392_v19 = vpack.c.bf16 %v4848_v30, %v4840_v51  ;;  %v4448_v7 = vcvt.s32.f32 %v3424_v15  ;;  %v3672_v38 = vunpack.c.0.s8 %v2816_v60  ;;  %v3680_v45 = vunpack.c.1.s8 %v2816_v60  ;;  %v9963_v43 = vpop.f32.mrf.mxu1 }
 0x539   :  { %6132 = vmatpush.bf16.msra.mxu2 %v5328_v6  ;;  %v4568_v56 = vcvt.s32.f32 %v3544_v41  ;;  %v4576_v63 = vcvt.s32.f32 %v3552_v13  ;;  %v3800_v16 = vunpack.c.0.s8 %v2848_v18  ;;  %v3808_v44 = vunpack.c.1.s8 %v2848_v18 }
 0x53a   :  { %6145 = vmatpush.bf16.msra.mxu3 %v5392_v19  ;;  %v5192_v17 = vpack.c.bf16 %v4448_v7, %v4440_v29  ;;  %v4696_v22 = vcvt.s32.f32 %v3672_v38  ;;  %v4704_v31 = vcvt.s32.f32 %v3680_v45  ;;  %v3400_v24 = vunpack.c.2.s8 %v2744_v2  ;;  %v9967_v38 = vld [vmem:[#allocation3 + $0xf8] sm:$0xff] }
 0x53b   :  { %v5256_v9 = vpack.c.bf16 %v4576_v63, %v4568_v56  ;;  %v4824_v58 = vcvt.s32.f32 %v3800_v16  ;;  %v4832_v60 = vcvt.s32.f32 %v3808_v44  ;;  %v3408_v42 = vunpack.c.3.s8 %v2744_v2 }
 0x53c   :  { %6107 = vmatpush.bf16.msra.mxu0 %v5192_v17  ;;  %v5320_v46 = vpack.c.bf16 %v4704_v31, %v4696_v22  ;;  %v3528_v10 = vunpack.c.2.s8 %v2776_v32  ;;  %v4424_v0 = vcvt.s32.f32 %v3400_v24  ;;  %v3536_v26 = vunpack.c.3.s8 %v2776_v32  ;;  %v9971_v22 = vpop.f32.mrf.mxu2 }
 0x53d   :  { %6120 = vmatpush.bf16.msra.mxu1 %v5256_v9  ;;  %v3656_v21 = vunpack.c.2.s8 %v2808_v50  ;;  %v5384_v11 = vpack.c.bf16 %v4832_v60, %v4824_v58  ;;  %v4432_v1 = vcvt.s32.f32 %v3408_v42  ;;  %v3664_v14 = vunpack.c.3.s8 %v2808_v50  ;;  %v2705_v58 = vld [vmem:[#allocation3 + $0x2f8] sm:$0xff] }
 0x53e   :  { %6133 = vmatpush.bf16.msra.mxu2 %v5320_v46  ;;  %v4552_v5 = vcvt.s32.f32 %v3528_v10  ;;  %v4560_v18 = vcvt.s32.f32 %v3536_v26  ;;  %v3784_v40 = vunpack.c.2.s8 %v2840_v12  ;;  %v3792_v33 = vunpack.c.3.s8 %v2840_v12  ;;  %v2737_v42 = vld [vmem:[#allocation3 + $0x3f8] sm:$0xff] }
 0x53f   :  { %v4680_v39 = vcvt.s32.f32 %v3656_v21  ;;  %6146 = vmatpush.bf16.msra.mxu3 %v5384_v11  ;;  %v5184_v53 = vpack.c.bf16 %v4432_v1, %v4424_v0  ;;  %v4688_v4 = vcvt.s32.f32 %v3664_v14  ;;  %v5865_v30 = vadd.f32 %v9955_v25, %v9953_v47  ;;  %v9969_v25 = vld [vmem:[#allocation3 + $0x1f8] sm:$0xff]  ;;  %v5905_v21 = vpop.f32.mrf.mxu0 }
 0x540   :  { %v5248_v61 = vpack.c.bf16 %v4560_v18, %v4552_v5  ;;  %v4808_v51 = vcvt.s32.f32 %v3784_v40  ;;  %v3384_v15 = vunpack.c.0.s8 %v2744_v2  ;;  %v4816_v6 = vcvt.s32.f32 %v3792_v33  ;;  %v5918_v11 = vpop.f32.mrf.mxu1 }
 0x541   :  { %6108 = vmatpush.bf16.msra.mxu0 %v5184_v53  ;;  %v5312_v29 = vpack.c.bf16 %v4688_v4, %v4680_v39  ;;  %v3392_v41 = vunpack.c.1.s8 %v2744_v2  ;;  %v3512_v19 = vunpack.c.0.s8 %v2776_v32  ;;  %v3520_v7 = vunpack.c.1.s8 %v2776_v32  ;;  %v9973_v2 = vpop.f32.mrf.mxu3 }
 0x542   :  { %6121 = vmatpush.bf16.msra.mxu1 %v5248_v61  ;;  %v4408_v13 = vcvt.s32.f32 %v3384_v15  ;;  %v5376_v45 = vpack.c.bf16 %v4816_v6, %v4808_v51  ;;  %v3640_v28 = vunpack.c.0.s8 %v2808_v50  ;;  %v3648_v56 = vunpack.c.1.s8 %v2808_v50 }
 0x543   :  { %6134 = vmatpush.bf16.msra.mxu2 %v5312_v29  ;;  %v4416_v23 = vcvt.s32.f32 %v3392_v41  ;;  %v4536_v63 = vcvt.s32.f32 %v3512_v19  ;;  %v4544_v16 = vcvt.s32.f32 %v3520_v7  ;;  %v3768_v17 = vunpack.c.0.s8 %v2840_v12 }
 0x544   :  { %v3776_v47 = vunpack.c.1.s8 %v2840_v12  ;;  %6147 = vmatpush.bf16.msra.mxu3 %v5376_v45  ;;  %v4664_v32 = vcvt.s32.f32 %v3640_v28  ;;  %v4672_v44 = vcvt.s32.f32 %v3648_v56  ;;  %v2985_v9 = vunpack.c.2.s8 %v9967_v38 }
 0x545   :  { %v5176_v31 = vpack.c.bf16 %v4416_v23, %v4408_v13  ;;  %v5240_v24 = vpack.c.bf16 %v4544_v16, %v4536_v63  ;;  %v4792_v46 = vcvt.s32.f32 %v3768_v17  ;;  %v2993_v60 = vunpack.c.3.s8 %v9967_v38  ;;  %v5931_v23 = vpop.f32.mrf.mxu2 }
 0x546   :  { %v4800_v50 = vcvt.s32.f32 %v3776_v47  ;;  %v5304_v10 = vpack.c.bf16 %v4672_v44, %v4664_v32  ;;  %v4009_v12 = vcvt.s32.f32 %v2985_v9  ;;  %v3113_v0 = vunpack.c.2.s8 %v9969_v25  ;;  %v2665_v44 = vld [vmem:[#allocation3 + $0x1b8] sm:$0xff] }
 0x547   :  { %6109 = vmatpush.bf16.msra.mxu0 %v5176_v31  ;;  %v3121_v26 = vunpack.c.3.s8 %v9969_v25  ;;  %6122 = vmatpush.bf16.msra.mxu1 %v5240_v24  ;;  %v4017_v5 = vcvt.s32.f32 %v2993_v60  ;;  %v3241_v14 = vunpack.c.2.s8 %v2705_v58  ;;  %v3249_v18 = vunpack.c.3.s8 %v2705_v58 }
 0x548   :  { %v5368_v1 = vpack.c.bf16 %v4800_v50, %v4792_v46  ;;  %6135 = vmatpush.bf16.msra.mxu2 %v5304_v10  ;;  %v4137_v39 = vcvt.s32.f32 %v3113_v0  ;;  %v3369_v53 = vunpack.c.2.s8 %v2737_v42  ;;  %v3377_v4 = vunpack.c.3.s8 %v2737_v42  ;;  %v2697_v50 = vld [vmem:[#allocation3 + $0x2b8] sm:$0xff] }
 0x549   :  { %v4145_v40 = vcvt.s32.f32 %v3121_v26  ;;  %v4977_v33 = vpack.c.bf16 %v4017_v5, %v4009_v12  ;;  %v4265_v61 = vcvt.s32.f32 %v3241_v14  ;;  %v4273_v51 = vcvt.s32.f32 %v3249_v18  ;;  %v5944_v28 = vpop.f32.mrf.mxu3  ;;  %v2729_v26 = vld [vmem:[#allocation3 + $0x3b8] sm:$0xff] }
 0x54a   :  { %6148 = vmatpush.bf16.msra.mxu3 %v5368_v1  ;;  %v5878_v15 = vadd.f32 %v9957_v35, %v5865_v30  ;;  %6110 = vmatmul.bf16.vlgmr.msra.gmra.mxu0 %v9717_v20  ;;  %v4393_v6 = vcvt.s32.f32 %v3369_v53  ;;  %v4401_v41 = vcvt.s32.f32 %v3377_v4  ;;  %v2969_v13 = vunpack.c.0.s8 %v9967_v38  ;;  %v2633_v30 = vld [vmem:[#allocation3 + $0xb8] sm:$0xff] }
 0x54b   :  { %v5041_v29 = vpack.c.bf16 %v4145_v40, %v4137_v39  ;;  %6123 = vmatmul.bf16.vlgmr.msra.gmra.mxu1 %v9719_v55  ;;  %6154 = vmatpush.bf16.msrb.mxu0 %v4977_v33  ;;  %v5105_v19 = vpack.c.bf16 %v4273_v51, %v4265_v61  ;;  %v2977_v45 = vunpack.c.1.s8 %v9967_v38  ;;  %v3097_v35 = vunpack.c.0.s8 %v9969_v25 }
 0x54c   :  { %6136 = vmatmul.bf16.vlgmr.msra.gmra.mxu2 %v9721_v57  ;;  %v9985_v7 = vadd.f32 %v9959_v59, %v5878_v15  ;;  %v5169_v56 = vpack.c.bf16 %v4401_v41, %v4393_v6  ;;  %v3993_v63 = vcvt.s32.f32 %v2969_v13  ;;  %v3105_v16 = vunpack.c.1.s8 %v9969_v25 }
 0x54d   :  { %6167 = vmatpush.bf16.msrb.mxu1 %v5041_v29  ;;  %6149 = vmatmul.bf16.vlgmr.msra.gmra.mxu3 %v9723_v8  ;;  %v3225_v17 = vunpack.c.0.s8 %v2705_v58  ;;  %v4001_v47 = vcvt.s32.f32 %v2977_v45  ;;  %v4121_v31 = vcvt.s32.f32 %v3097_v35  ;;  %v3233_v59 = vunpack.c.1.s8 %v2705_v58 }
 0x54e   :  { %6180 = vmatpush.bf16.msrb.mxu2 %v5105_v19  ;;  %v3353_v32 = vunpack.c.0.s8 %v2737_v42  ;;  %6193 = vmatpush.bf16.msrb.mxu3 %v5169_v56  ;;  %v4129_v38 = vcvt.s32.f32 %v3105_v16  ;;  %v3361_v24 = vunpack.c.1.s8 %v2737_v42  ;;  %v2953_v46 = vunpack.c.2.s8 %v2633_v30  ;;  %v2625_v16 = vld [vmem:[#allocation3 + $0x78] sm:$0xff] }
 0x54f   :  { %v4249_v9 = vcvt.s32.f32 %v3225_v17  ;;  %v4969_v60 = vpack.c.bf16 %v4001_v47, %v3993_v63  ;;  %v4257_v10 = vcvt.s32.f32 %v3233_v59  ;;  %v2961_v0 = vunpack.c.3.s8 %v2633_v30 }
 0x550   :  { %v4377_v12 = vcvt.s32.f32 %v3353_v32  ;;  %v5033_v21 = vpack.c.bf16 %v4129_v38, %v4121_v31  ;;  %v4385_v25 = vcvt.s32.f32 %v3361_v24  ;;  %v3977_v11 = vcvt.s32.f32 %v2953_v46  ;;  %v2657_v32 = vld [vmem:[#allocation3 + $0x178] sm:$0xff] }
 0x551   :  { %v3081_v1 = vunpack.c.2.s8 %v2665_v44  ;;  %6155 = vmatpush.bf16.msrb.mxu0 %v4969_v60  ;;  %v5097_v5 = vpack.c.bf16 %v4257_v10, %v4249_v9  ;;  %v3985_v58 = vcvt.s32.f32 %v2961_v0  ;;  %v3089_v14 = vunpack.c.3.s8 %v2665_v44 }
 0x552   :  { %v3209_v18 = vunpack.c.2.s8 %v2697_v50  ;;  %6168 = vmatpush.bf16.msrb.mxu1 %v5033_v21  ;;  %v5161_v39 = vpack.c.bf16 %v4385_v25, %v4377_v12  ;;  %v3217_v42 = vunpack.c.3.s8 %v2697_v50  ;;  %v3337_v53 = vunpack.c.2.s8 %v2729_v26  ;;  %v2689_v12 = vld [vmem:[#allocation3 + $0x278] sm:$0xff] }
 0x553   :  { %v4105_v40 = vcvt.s32.f32 %v3081_v1  ;;  %6181 = vmatpush.bf16.msrb.mxu2 %v5097_v5  ;;  %v4961_v4 = vpack.c.bf16 %v3985_v58, %v3977_v11  ;;  %v4113_v33 = vcvt.s32.f32 %v3089_v14  ;;  %v3345_v51 = vunpack.c.3.s8 %v2729_v26 }
 0x554   :  { %v4233_v61 = vcvt.s32.f32 %v3209_v18  ;;  %6194 = vmatpush.bf16.msrb.mxu3 %v5161_v39  ;;  %v4241_v15 = vcvt.s32.f32 %v3217_v42  ;;  %v4361_v29 = vcvt.s32.f32 %v3337_v53  ;;  %v2937_v6 = vunpack.c.0.s8 %v2633_v30 }
 0x555   :  { %v2945_v41 = vunpack.c.1.s8 %v2633_v30  ;;  %6156 = vmatpush.bf16.msrb.mxu0 %v4961_v4  ;;  %v5025_v13 = vpack.c.bf16 %v4113_v33, %v4105_v40  ;;  %v4369_v19 = vcvt.s32.f32 %v3345_v51  ;;  %v3065_v45 = vunpack.c.0.s8 %v2665_v44 }
 0x556   :  { %v3073_v35 = vunpack.c.1.s8 %v2665_v44  ;;  %v5089_v23 = vpack.c.bf16 %v4241_v15, %v4233_v61  ;;  %v3961_v28 = vcvt.s32.f32 %v2937_v6  ;;  %v3193_v63 = vunpack.c.0.s8 %v2697_v50 }
 0x557   :  { %v3969_v56 = vcvt.s32.f32 %v2945_v41  ;;  %6169 = vmatpush.bf16.msrb.mxu1 %v5025_v13  ;;  %v5153_v17 = vpack.c.bf16 %v4369_v19, %v4361_v29  ;;  %v4089_v47 = vcvt.s32.f32 %v3065_v45  ;;  %v3201_v59 = vunpack.c.1.s8 %v2697_v50  ;;  %v2721_v50 = vld [vmem:[#allocation3 + $0x378] sm:$0xff] }
 0x558   :  { %v4097_v31 = vcvt.s32.f32 %v3073_v35  ;;  %6182 = vmatpush.bf16.msrb.mxu2 %v5089_v23  ;;  %v4217_v9 = vcvt.s32.f32 %v3193_v63  ;;  %v3321_v30 = vunpack.c.0.s8 %v2729_v26  ;;  %v3329_v24 = vunpack.c.1.s8 %v2729_v26 }
 0x559   :  { %v4953_v38 = vpack.c.bf16 %v3969_v56, %v3961_v28  ;;  %6195 = vmatpush.bf16.msrb.mxu3 %v5153_v17  ;;  %v4225_v60 = vcvt.s32.f32 %v3201_v59  ;;  %v5904_v44 = vadd.f32 %v9961_v34, %v9985_v7  ;;  %v2921_v10 = vunpack.c.2.s8 %v2625_v16 }
 0x55a   :  { %v5017_v46 = vpack.c.bf16 %v4097_v31, %v4089_v47  ;;  %v4345_v0 = vcvt.s32.f32 %v3321_v30  ;;  %v4353_v21 = vcvt.s32.f32 %v3329_v24  ;;  %v2929_v25 = vunpack.c.3.s8 %v2625_v16  ;;  %v2681_v24 = vld [vmem:[#allocation3 + $0x238] sm:$0xff] }
 0x55b   :  { %6157 = vmatpush.bf16.msrb.mxu0 %v4953_v38  ;;  %v3049_v11 = vunpack.c.2.s8 %v2657_v32  ;;  %v5081_v1 = vpack.c.bf16 %v4225_v60, %v4217_v9  ;;  %v5917_v5 = vadd.f32 %v9963_v43, %v5904_v44  ;;  %v3945_v58 = vcvt.s32.f32 %v2921_v10  ;;  %v2649_v9 = vld [vmem:[#allocation3 + $0x138] sm:$0xff] }
 0x55c   :  { %6170 = vmatpush.bf16.msrb.mxu1 %v5017_v46  ;;  %v3057_v26 = vunpack.c.3.s8 %v2657_v32  ;;  %v5145_v14 = vpack.c.bf16 %v4353_v21, %v4345_v0  ;;  %v3953_v18 = vcvt.s32.f32 %v2929_v25  ;;  %v3177_v40 = vunpack.c.2.s8 %v2689_v12  ;;  %v2713_v21 = vld [vmem:[#allocation3 + $0x338] sm:$0xff] }
 0x55d   :  { %v4073_v39 = vcvt.s32.f32 %v3049_v11  ;;  %6183 = vmatpush.bf16.msrb.mxu2 %v5081_v1  ;;  %v3185_v7 = vunpack.c.3.s8 %v2689_v12  ;;  %v3305_v42 = vunpack.c.2.s8 %v2721_v50  ;;  %v3313_v53 = vunpack.c.3.s8 %v2721_v50 }
 0x55e   :  { %v4081_v34 = vcvt.s32.f32 %v3057_v26  ;;  %6196 = vmatpush.bf16.msrb.mxu3 %v5145_v14  ;;  %v4945_v4 = vpack.c.bf16 %v3953_v18, %v3945_v58  ;;  %v4201_v33 = vcvt.s32.f32 %v3177_v40  ;;  %v5930_v61 = vadd.f32 %v9971_v22, %v5917_v5  ;;  %v2617_v22 = vld [vmem:[#allocation3 + $0x38] sm:$0xff] }
 0x55f   :  { %v2905_v51 = vunpack.c.0.s8 %v2625_v16  ;;  %v4209_v29 = vcvt.s32.f32 %v3185_v7  ;;  %v4329_v43 = vcvt.s32.f32 %v3305_v42  ;;  %v4337_v6 = vcvt.s32.f32 %v3313_v53 }
 0x560   :  { %v5009_v15 = vpack.c.bf16 %v4081_v34, %v4073_v39  ;;  %6158 = vmatpush.bf16.msrb.mxu0 %v4945_v4  ;;  %v9996_v41 = vadd.f32 %v9973_v2, %v5930_v61  ;;  %v2913_v13 = vunpack.c.1.s8 %v2625_v16  ;;  %v3033_v23 = vunpack.c.0.s8 %v2657_v32 }
 0x561   :  { %v3929_v19 = vcvt.s32.f32 %v2905_v51  ;;  %v5073_v45 = vpack.c.bf16 %v4209_v29, %v4201_v33  ;;  %v5137_v35 = vpack.c.bf16 %v4337_v6, %v4329_v43  ;;  %v3041_v28 = vunpack.c.1.s8 %v2657_v32 }
 0x562   :  { %6171 = vmatpush.bf16.msrb.mxu1 %v5009_v15  ;;  %v3937_v56 = vcvt.s32.f32 %v2913_v13  ;;  %v3161_v63 = vunpack.c.0.s8 %v2689_v12  ;;  %v3169_v17 = vunpack.c.1.s8 %v2689_v12  ;;  %v4057_v47 = vcvt.s32.f32 %v3033_v23 }
 0x563   :  { %6184 = vmatpush.bf16.msrb.mxu2 %v5073_v45  ;;  %6197 = vmatpush.bf16.msrb.mxu3 %v5137_v35  ;;  %v4065_v31 = vcvt.s32.f32 %v3041_v28  ;;  %v3289_v59 = vunpack.c.0.s8 %v2721_v50  ;;  %v3297_v38 = vunpack.c.1.s8 %v2721_v50  ;;  %v2889_v10 = vunpack.c.2.s8 %v2617_v22  ;;  %v2769_v45 = vld [vmem:[#allocation3 + $0x4f8] sm:$0xff] }
 0x564   :  { %v4937_v2 = vpack.c.bf16 %v3937_v56, %v3929_v19  ;;  %v4185_v30 = vcvt.s32.f32 %v3161_v63  ;;  %v4193_v16 = vcvt.s32.f32 %v3169_v17  ;;  %v2897_v0 = vunpack.c.3.s8 %v2617_v22  ;;  %v2801_v56 = vld [vmem:[#allocation3 + $0x5f8] sm:$0xff] }
 0x565   :  { %v5001_v46 = vpack.c.bf16 %v4065_v31, %v4057_v47  ;;  %v4313_v60 = vcvt.s32.f32 %v3289_v59  ;;  %v4321_v44 = vcvt.s32.f32 %v3297_v38  ;;  %v3017_v12 = vunpack.c.2.s8 %v2649_v9 }
 0x566   :  { %6159 = vmatpush.bf16.msrb.mxu0 %v4937_v2  ;;  %v5065_v32 = vpack.c.bf16 %v4193_v16, %v4185_v30  ;;  %v3913_v11 = vcvt.s32.f32 %v2889_v10  ;;  %v3025_v1 = vunpack.c.3.s8 %v2649_v9  ;;  %v3145_v5 = vunpack.c.2.s8 %v2681_v24  ;;  %v2833_v2 = vld [vmem:[#allocation3 + $0x6f8] sm:$0xff] }
 0x567   :  { %6172 = vmatpush.bf16.msrb.mxu1 %v5001_v46  ;;  %v5129_v25 = vpack.c.bf16 %v4321_v44, %v4313_v60  ;;  %v3921_v50 = vcvt.s32.f32 %v2897_v0  ;;  %v4041_v58 = vcvt.s32.f32 %v3017_v12  ;;  %v3153_v26 = vunpack.c.3.s8 %v2681_v24  ;;  %v2865_v60 = vld [vmem:[#allocation3 + $0x7f8] sm:$0xff] }
 0x568   :  { %6185 = vmatpush.bf16.msrb.mxu2 %v5065_v32  ;;  %v4049_v14 = vcvt.s32.f32 %v3025_v1  ;;  %v4169_v18 = vcvt.s32.f32 %v3145_v5  ;;  %v3273_v39 = vunpack.c.2.s8 %v2713_v21  ;;  %v3281_v40 = vunpack.c.3.s8 %v2713_v21 }
 0x569   :  { %6198 = vmatpush.bf16.msrb.mxu3 %v5129_v25  ;;  %v4929_v34 = vpack.c.bf16 %v3921_v50, %v3913_v11  ;;  %v4177_v7 = vcvt.s32.f32 %v3153_v26  ;;  %v2873_v42 = vunpack.c.0.s8 %v2617_v22  ;;  %v2881_v61 = vunpack.c.1.s8 %v2617_v22 }
 0x56a   :  { %v4993_v53 = vpack.c.bf16 %v4049_v14, %v4041_v58  ;;  %v4297_v4 = vcvt.s32.f32 %v3273_v39  ;;  %v4305_v33 = vcvt.s32.f32 %v3281_v40  ;;  %v3001_v29 = vunpack.c.0.s8 %v2649_v9 }
 0x56b   :  { %6160 = vmatpush.bf16.msrb.mxu0 %v4929_v34  ;;  %v5057_v51 = vpack.c.bf16 %v4177_v7, %v4169_v18  ;;  %v3897_v15 = vcvt.s32.f32 %v2873_v42  ;;  %v3905_v6 = vcvt.s32.f32 %v2881_v61  ;;  %v3009_v13 = vunpack.c.1.s8 %v2649_v9 }
 0x56c   :  { %6173 = vmatpush.bf16.msrb.mxu1 %v4993_v53  ;;  %v5121_v43 = vpack.c.bf16 %v4305_v33, %v4297_v4  ;;  %v3129_v19 = vunpack.c.0.s8 %v2681_v24  ;;  %v4025_v35 = vcvt.s32.f32 %v3001_v29  ;;  %v3137_v23 = vunpack.c.1.s8 %v2681_v24  ;;  %v2761_v33 = vld [vmem:[#allocation3 + $0x4b8] sm:$0xff] }
 0x56d   :  { %6186 = vmatpush.bf16.msrb.mxu2 %v5057_v51  ;;  %v3257_v28 = vunpack.c.0.s8 %v2713_v21  ;;  %v4921_v63 = vpack.c.bf16 %v3905_v6, %v3897_v15  ;;  %v4033_v17 = vcvt.s32.f32 %v3009_v13  ;;  %v3265_v22 = vunpack.c.1.s8 %v2713_v21  ;;  %v2793_v13 = vld [vmem:[#allocation3 + $0x5b8] sm:$0xff] }
 0x56e   :  { %6199 = vmatpush.bf16.msrb.mxu3 %v5121_v43  ;;  %v4153_v47 = vcvt.s32.f32 %v3129_v19  ;;  %v4161_v31 = vcvt.s32.f32 %v3137_v23  ;;  %v3497_v38 = vunpack.c.2.s8 %v2769_v45  ;;  %v3505_v9 = vunpack.c.3.s8 %v2769_v45  ;;  %v2825_v23 = vld [vmem:[#allocation3 + $0x6b8] sm:$0xff] }
 0x56f   :  { %v4281_v59 = vcvt.s32.f32 %v3257_v28  ;;  %6161 = vmatpush.bf16.msrb.mxu0 %v4921_v63  ;;  %v4985_v30 = vpack.c.bf16 %v4033_v17, %v4025_v35  ;;  %v4289_v16 = vcvt.s32.f32 %v3265_v22  ;;  %v3625_v46 = vunpack.c.2.s8 %v2801_v56  ;;  %v10002_v17 = vld [vmem:[#allocation3 + $0x7b8] sm:$0xff] }
 0x570   :  { %v5049_v44 = vpack.c.bf16 %v4161_v31, %v4153_v47  ;;  %v4521_v10 = vcvt.s32.f32 %v3497_v38  ;;  %v3633_v24 = vunpack.c.3.s8 %v2801_v56  ;;  %v4529_v0 = vcvt.s32.f32 %v3505_v9 }
 0x571   :  { %6174 = vmatpush.bf16.msrb.mxu1 %v4985_v30  ;;  %v5113_v32 = vpack.c.bf16 %v4289_v16, %v4281_v59  ;;  %v4649_v12 = vcvt.s32.f32 %v3625_v46  ;;  %v3753_v25 = vunpack.c.2.s8 %v2833_v2  ;;  %v3761_v11 = vunpack.c.3.s8 %v2833_v2  ;;  %v10004_v30 = vpop.f32.mrf.mxu0  ;;  %v10006_v16 = vpop.f32.mrf.mxu1 }
 0x572   :  { %6187 = vmatpush.bf16.msrb.mxu2 %v5049_v44  ;;  %v4657_v21 = vcvt.s32.f32 %v3633_v24  ;;  %v3881_v1 = vunpack.c.2.s8 %v2865_v60  ;;  %6162 = vmatmul.bf16.vlgmr.msrb.gmra.mxu0 %v9709_v52  ;;  %v5233_v5 = vpack.c.bf16 %v4529_v0, %v4521_v10  ;;  %v3889_v58 = vunpack.c.3.s8 %v2865_v60 }
 0x573   :  { %6200 = vmatpush.bf16.msrb.mxu3 %v5113_v32  ;;  %v4777_v50 = vcvt.s32.f32 %v3753_v25  ;;  %v3481_v26 = vunpack.c.0.s8 %v2769_v45  ;;  %v4785_v18 = vcvt.s32.f32 %v3761_v11  ;;  %v3489_v34 = vunpack.c.1.s8 %v2769_v45 }
 0x574   :  { %v5297_v14 = vpack.c.bf16 %v4657_v21, %v4649_v12  ;;  %v4905_v39 = vcvt.s32.f32 %v3881_v1  ;;  %6175 = vmatmul.bf16.vlgmr.msrb.gmra.mxu1 %v9711_v48  ;;  %6206 = vmatpush.bf16.msra.mxu0 %v5233_v5  ;;  %v4913_v40 = vcvt.s32.f32 %v3889_v58  ;;  %v3609_v42 = vunpack.c.0.s8 %v2801_v56 }
 0x575   :  { %v4505_v7 = vcvt.s32.f32 %v3481_v26  ;;  %6188 = vmatmul.bf16.vlgmr.msrb.gmra.mxu2 %v9713_v62  ;;  %v5361_v53 = vpack.c.bf16 %v4785_v18, %v4777_v50  ;;  %v3617_v52 = vunpack.c.1.s8 %v2801_v56  ;;  %v3737_v4 = vunpack.c.0.s8 %v2833_v2  ;;  %v10010_v18 = vpop.f32.mrf.mxu2 }
 0x576   :  { %6219 = vmatpush.bf16.msra.mxu1 %v5297_v14  ;;  %6201 = vmatmul.bf16.vlgmr.msrb.gmra.mxu3 %v9715_v54  ;;  %v5425_v61 = vpack.c.bf16 %v4913_v40, %v4905_v39  ;;  %v4513_v51 = vcvt.s32.f32 %v3489_v34  ;;  %v4633_v15 = vcvt.s32.f32 %v3609_v42  ;;  %v3745_v29 = vunpack.c.1.s8 %v2833_v2 }
 0x577   :  { %6232 = vmatpush.bf16.msra.mxu2 %v5361_v53  ;;  %v4641_v48 = vcvt.s32.f32 %v3617_v52  ;;  %v4761_v43 = vcvt.s32.f32 %v3737_v4  ;;  %v3865_v6 = vunpack.c.0.s8 %v2865_v60  ;;  %v3873_v62 = vunpack.c.1.s8 %v2865_v60  ;;  %v2753_v4 = vld [vmem:[#allocation3 + $0x478] sm:$0xff] }
 0x578   :  { %6245 = vmatpush.bf16.msra.mxu3 %v5425_v61  ;;  %v5225_v19 = vpack.c.bf16 %v4513_v51, %v4505_v7  ;;  %v4769_v45 = vcvt.s32.f32 %v3745_v29  ;;  %v3465_v35 = vunpack.c.2.s8 %v2761_v33  ;;  %v3473_v63 = vunpack.c.3.s8 %v2761_v33  ;;  %v2785_v61 = vld [vmem:[#allocation3 + $0x578] sm:$0xff]  ;;  %v10013_v29 = vpop.f32.mrf.mxu3 }
 0x579   :  { %v5289_v28 = vpack.c.bf16 %v4641_v48, %v4633_v15  ;;  %v4889_v56 = vcvt.s32.f32 %v3865_v6  ;;  %v4897_v47 = vcvt.s32.f32 %v3873_v62  ;;  %v3593_v31 = vunpack.c.2.s8 %v2793_v13  ;;  %v2817_v15 = vld [vmem:[#allocation3 + $0x678] sm:$0xff]  ;;  %v5957_v48 = vpop.f32.mrf.mxu0 }
 0x57a   :  { %6207 = vmatpush.bf16.msra.mxu0 %v5225_v19  ;;  %v5353_v54 = vpack.c.bf16 %v4769_v45, %v4761_v43  ;;  %v4489_v22 = vcvt.s32.f32 %v3465_v35  ;;  %v4497_v59 = vcvt.s32.f32 %v3473_v63  ;;  %v3601_v38 = vunpack.c.3.s8 %v2793_v13  ;;  %v5970_v45 = vpop.f32.mrf.mxu1 }
 0x57b   :  { %6220 = vmatpush.bf16.msra.mxu1 %v5289_v28  ;;  %v3721_v2 = vunpack.c.2.s8 %v2825_v23  ;;  %v5417_v9 = vpack.c.bf16 %v4897_v47, %v4889_v56  ;;  %v4617_v46 = vcvt.s32.f32 %v3593_v31  ;;  %v3729_v60 = vunpack.c.3.s8 %v2825_v23  ;;  %v2849_v56 = vld [vmem:[#allocation3 + $0x778] sm:$0xff] }
 0x57c   :  { %6233 = vmatpush.bf16.msra.mxu2 %v5353_v54  ;;  %v3849_v44 = vunpack.c.2.s8 %v10002_v17  ;;  %v5217_v10 = vpack.c.bf16 %v4497_v59, %v4489_v22  ;;  %v4625_v24 = vcvt.s32.f32 %v3601_v38  ;;  %v3857_v12 = vunpack.c.3.s8 %v10002_v17  ;;  %v2809_v45 = vld [vmem:[#allocation3 + $0x638] sm:$0xff] }
 0x57d   :  { %v4745_v32 = vcvt.s32.f32 %v3721_v2  ;;  %6246 = vmatpush.bf16.msra.mxu3 %v5417_v9  ;;  %v4753_v0 = vcvt.s32.f32 %v3729_v60  ;;  %v3449_v21 = vunpack.c.0.s8 %v2761_v33  ;;  %v3457_v1 = vunpack.c.1.s8 %v2761_v33 }
 0x57e   :  { %v4873_v25 = vcvt.s32.f32 %v3849_v44  ;;  %6208 = vmatpush.bf16.msra.mxu0 %v5217_v10  ;;  %v5281_v11 = vpack.c.bf16 %v4625_v24, %v4617_v46  ;;  %v3577_v5 = vunpack.c.0.s8 %v2793_v13  ;;  %v4881_v58 = vcvt.s32.f32 %v3857_v12  ;;  %v5983_v44 = vpop.f32.mrf.mxu2 }
 0x57f   :  { %v5345_v50 = vpack.c.bf16 %v4753_v0, %v4745_v32  ;;  %v4473_v26 = vcvt.s32.f32 %v3449_v21  ;;  %v3585_v14 = vunpack.c.1.s8 %v2793_v13  ;;  %v4481_v39 = vcvt.s32.f32 %v3457_v1 }
 0x580   :  { %6221 = vmatpush.bf16.msra.mxu1 %v5281_v11  ;;  %v4601_v40 = vcvt.s32.f32 %v3577_v5  ;;  %v3705_v34 = vunpack.c.0.s8 %v2825_v23  ;;  %v5409_v7 = vpack.c.bf16 %v4881_v58, %v4873_v25  ;;  %v3713_v53 = vunpack.c.1.s8 %v2825_v23 }
 0x581   :  { %6234 = vmatpush.bf16.msra.mxu2 %v5345_v50  ;;  %v4609_v42 = vcvt.s32.f32 %v3585_v14  ;;  %v3833_v52 = vunpack.c.0.s8 %v10002_v17  ;;  %v5209_v33 = vpack.c.bf16 %v4481_v39, %v4473_v26  ;;  %v3841_v13 = vunpack.c.1.s8 %v10002_v17  ;;  %v5996_v50 = vpop.f32.mrf.mxu3  ;;  %v10016_v58 = vpop.f32.mrf.mxu0 }
 0x582   :  { %v4729_v51 = vcvt.s32.f32 %v3705_v34  ;;  %6247 = vmatpush.bf16.msra.mxu3 %v5409_v7  ;;  %v4737_v6 = vcvt.s32.f32 %v3713_v53  ;;  %v3433_v62 = vunpack.c.2.s8 %v2753_v4  ;;  %v3441_v35 = vunpack.c.3.s8 %v2753_v4  ;;  %v10018_v34 = vpop.f32.mrf.mxu1 }
 0x583   :  { %v5273_v43 = vpack.c.bf16 %v4609_v42, %v4601_v40  ;;  %v4857_v19 = vcvt.s32.f32 %v3833_v52  ;;  %6209 = vmatpush.bf16.msra.mxu0 %v5209_v33  ;;  %v3561_v23 = vunpack.c.2.s8 %v2785_v61  ;;  %v3569_v28 = vunpack.c.3.s8 %v2785_v61  ;;  %v2745_v40 = vld [vmem:[#allocation3 + $0x438] sm:$0xff] }
 0x584   :  { %v5337_v63 = vpack.c.bf16 %v4737_v6, %v4729_v51  ;;  %v4865_v54 = vcvt.s32.f32 %v3841_v13  ;;  %v3689_v47 = vunpack.c.2.s8 %v2817_v15  ;;  %v3697_v22 = vunpack.c.3.s8 %v2817_v15 }
 0x585   :  { %6222 = vmatpush.bf16.msra.mxu1 %v5273_v43  ;;  %v4457_v31 = vcvt.s32.f32 %v3433_v62  ;;  %v4465_v59 = vcvt.s32.f32 %v3441_v35  ;;  %v4585_v38 = vcvt.s32.f32 %v3561_v23  ;;  %v4593_v2 = vcvt.s32.f32 %v3569_v28  ;;  %v2841_v35 = vld [vmem:[#allocation3 + $0x738] sm:$0xff] }
 0x586   :  { %6235 = vmatpush.bf16.msra.mxu2 %v5337_v63  ;;  %v5401_v9 = vpack.c.bf16 %v4865_v54, %v4857_v19  ;;  %v4713_v17 = vcvt.s32.f32 %v3689_v47  ;;  %v4721_v46 = vcvt.s32.f32 %v3697_v22  ;;  %v3817_v60 = vunpack.c.2.s8 %v2849_v56  ;;  %v10020_v23 = vpop.f32.mrf.mxu2 }
 0x587   :  { %v5201_v10 = vpack.c.bf16 %v4465_v59, %v4457_v31  ;;  %v5265_v24 = vpack.c.bf16 %v4593_v2, %v4585_v38  ;;  %v3825_v32 = vunpack.c.3.s8 %v2849_v56  ;;  %v3417_v0 = vunpack.c.0.s8 %v2753_v4 }
 0x588   :  { %6248 = vmatpush.bf16.msra.mxu3 %v5401_v9  ;;  %v5329_v12 = vpack.c.bf16 %v4721_v46, %v4713_v17  ;;  %v4841_v25 = vcvt.s32.f32 %v3817_v60  ;;  %v3425_v11 = vunpack.c.1.s8 %v2753_v4  ;;  %v3545_v5 = vunpack.c.0.s8 %v2785_v61  ;;  %v2777_v4 = vld [vmem:[#allocation3 + $0x538] sm:$0xff] }
 0x589   :  { %6210 = vmatpush.bf16.msra.mxu0 %v5201_v10  ;;  %6223 = vmatpush.bf16.msra.mxu1 %v5265_v24  ;;  %v4849_v21 = vcvt.s32.f32 %v3825_v32  ;;  %v4441_v1 = vcvt.s32.f32 %v3417_v0  ;;  %v3553_v26 = vunpack.c.1.s8 %v2785_v61  ;;  %v3673_v14 = vunpack.c.0.s8 %v2817_v15  ;;  %v6046_v17 = vpop.f32.mrf.mxu3  ;;  %v6009_v46 = vpop.f32.mrf.mxu0 }
 0x58a   :  { %6236 = vmatpush.bf16.msra.mxu2 %v5329_v12  ;;  %v3681_v39 = vunpack.c.1.s8 %v2817_v15  ;;  %v4449_v42 = vcvt.s32.f32 %v3425_v11  ;;  %v4569_v53 = vcvt.s32.f32 %v3545_v5  ;;  %v3801_v52 = vunpack.c.0.s8 %v2849_v56  ;;  %v6022_v24 = vpop.f32.mrf.mxu1 }
 0x58b   :  { %v5393_v7 = vpack.c.bf16 %v4849_v21, %v4841_v25  ;;  %v4577_v33 = vcvt.s32.f32 %v3553_v26  ;;  %v4697_v51 = vcvt.s32.f32 %v3673_v14  ;;  %v3809_v6 = vunpack.c.1.s8 %v2849_v56 }
 0x58c   :  { %v4705_v48 = vcvt.s32.f32 %v3681_v39  ;;  %v5193_v43 = vpack.c.bf16 %v4449_v42, %v4441_v1  ;;  %v4825_v13 = vcvt.s32.f32 %v3801_v52  ;;  %v3401_v19 = vunpack.c.2.s8 %v2745_v40 }
 0x58d   :  { %6249 = vmatpush.bf16.msra.mxu3 %v5393_v7  ;;  %v5257_v61 = vpack.c.bf16 %v4577_v33, %v4569_v53  ;;  %v3409_v15 = vunpack.c.3.s8 %v2745_v40  ;;  %v4833_v28 = vcvt.s32.f32 %v3809_v6  ;;  %v3529_v54 = vunpack.c.2.s8 %v2777_v4 }
 0x58e   :  { %v5321_v62 = vpack.c.bf16 %v4705_v48, %v4697_v51  ;;  %6211 = vmatpush.bf16.msra.mxu0 %v5193_v43  ;;  %v4425_v63 = vcvt.s32.f32 %v3401_v19  ;;  %v3537_v47 = vunpack.c.3.s8 %v2777_v4  ;;  %v3657_v31 = vunpack.c.2.s8 %v2809_v45  ;;  %v6035_v52 = vpop.f32.mrf.mxu2 }
 0x58f   :  { %6224 = vmatpush.bf16.msra.mxu1 %v5257_v61  ;;  %v4433_v22 = vcvt.s32.f32 %v3409_v15  ;;  %v3665_v59 = vunpack.c.3.s8 %v2809_v45  ;;  %v5385_v56 = vpack.c.bf16 %v4833_v28, %v4825_v13  ;;  %v4553_v38 = vcvt.s32.f32 %v3529_v54 }
 0x590   :  { %6237 = vmatpush.bf16.msra.mxu2 %v5321_v62  ;;  %v4561_v2 = vcvt.s32.f32 %v3537_v47  ;;  %v3785_v9 = vunpack.c.2.s8 %v2841_v35  ;;  %v4681_v44 = vcvt.s32.f32 %v3657_v31  ;;  %v3793_v0 = vunpack.c.3.s8 %v2841_v35 }
 0x591   :  { %v5185_v60 = vpack.c.bf16 %v4433_v22, %v4425_v63  ;;  %v4689_v10 = vcvt.s32.f32 %v3665_v59  ;;  %6250 = vmatpush.bf16.msra.mxu3 %v5385_v56  ;;  %v5969_v21 = vadd.f32 %v10006_v16, %v10004_v30  ;;  %v3385_v11 = vunpack.c.0.s8 %v2745_v40 }
 0x592   :  { %v5249_v32 = vpack.c.bf16 %v4561_v2, %v4553_v38  ;;  %v4809_v12 = vcvt.s32.f32 %v3785_v9  ;;  %v3393_v1 = vunpack.c.1.s8 %v2745_v40  ;;  %v4817_v5 = vcvt.s32.f32 %v3793_v0 }
 0x593   :  { %6212 = vmatpush.bf16.msra.mxu0 %v5185_v60  ;;  %v5313_v25 = vpack.c.bf16 %v4689_v10, %v4681_v44  ;;  %v3513_v50 = vunpack.c.0.s8 %v2777_v4  ;;  %v3521_v26 = vunpack.c.1.s8 %v2777_v4  ;;  %v3641_v14 = vunpack.c.0.s8 %v2809_v45  ;;  %v6048_v4 = vpop.f32.mrf.mxu3 }
 0x594   :  { %6225 = vmatpush.bf16.msra.mxu1 %v5249_v32  ;;  %v4409_v39 = vcvt.s32.f32 %v3385_v11  ;;  %v4417_v7 = vcvt.s32.f32 %v3393_v1  ;;  %v3649_v42 = vunpack.c.1.s8 %v2809_v45  ;;  %v3769_v53 = vunpack.c.0.s8 %v2841_v35 }
 0x595   :  { %6238 = vmatpush.bf16.msra.mxu2 %v5313_v25  ;;  %v5377_v33 = vpack.c.bf16 %v4817_v5, %v4809_v12  ;;  %v4537_v51 = vcvt.s32.f32 %v3513_v50  ;;  %v4545_v48 = vcvt.s32.f32 %v3521_v26  ;;  %v4665_v43 = vcvt.s32.f32 %v3641_v14 }
 0x596   :  { %v5177_v6 = vpack.c.bf16 %v4417_v7, %v4409_v39  ;;  %v4673_v13 = vcvt.s32.f32 %v3649_v42  ;;  %v3777_v30 = vunpack.c.1.s8 %v2841_v35  ;;  %v4793_v16 = vcvt.s32.f32 %v3769_v53 }
 0x597   :  { %6251 = vmatpush.bf16.msra.mxu3 %v5377_v33  ;;  %v5241_v40 = vpack.c.bf16 %v4545_v48, %v4537_v51  ;;  %v5982_v19 = vadd.f32 %v10010_v18, %v5969_v21  ;;  %v6261_v12 = vrot.slane %v9794_v37, 4  ;;  %v6279_v25 = vrot.slane %v9947_v3, 4 }
 0x598   :  { %6213 = vmatpush.bf16.msra.mxu0 %v5177_v6  ;;  %v5305_v61 = vpack.c.bf16 %v4673_v13, %v4665_v43  ;;  %v4801_v62 = vcvt.s32.f32 %v3777_v30  ;;  %v6267_v21 = vrot.slane %v9843_v36, 4  ;;  %v6273_v11 = vrot.slane %v9892_v27, 4 }
 0x599   :  { %6226 = vmatpush.bf16.msra.mxu1 %v5241_v40  ;;  %v5995_v45 = vadd.f32 %v10013_v29, %v5982_v19  ;;  %v6262_v1 = vadd.f32 %v6261_v12, %v9794_v37  ;;  %v6280_v50 = vadd.f32 %v6279_v25, %v9947_v3  ;;  %v6285_v26 = vrot.slane %v9996_v41, 4 }
 0x59a   :  { %6239 = vmatpush.bf16.msra.mxu2 %v5305_v61  ;;  %v5369_v15 = vpack.c.bf16 %v4801_v62, %v4793_v16  ;;  %v6268_v39 = vadd.f32 %v6267_v21, %v9843_v36  ;;  %v6274_v53 = vadd.f32 %v6273_v11, %v9892_v27 }
 0x59b   :  { %6214 = vmatmul.bf16.vlgmr.msra.gmra.mxu0 %v9717_v20  ;;  %v6008_v28 = vadd.f32 %v10016_v58, %v5995_v45  ;;  %v6263_v51 = vrot.slane %v6262_v1, 2  ;;  %v6281_v43 = vrot.slane %v6280_v50, 2  ;;  %v6286_v6 = vadd.f32 %v6285_v26, %v9996_v41 }
 0x59c   :  { %6252 = vmatpush.bf16.msra.mxu3 %v5369_v15  ;;  %6227 = vmatmul.bf16.vlgmr.msra.gmra.mxu1 %v9719_v55  ;;  %v6269_v13 = vrot.slane %v6268_v39, 2  ;;  %v6275_v16 = vrot.slane %v6274_v53, 2 }
 0x59d   :  { %6240 = vmatmul.bf16.vlgmr.msra.gmra.mxu2 %v9721_v57  ;;  %v6021_v18 = vadd.f32 %v10018_v34, %v6008_v28  ;;  %v6264_v40 = vadd.f32 %v6263_v51, %v6262_v1  ;;  %v6282_v4 = vadd.f32 %v6281_v43, %v6280_v50  ;;  %v6287_v61 = vrot.slane %v6286_v6, 2 }
 0x59e   :  { %v6059_v29 = vpop.f32.mrf.mxu0  ;;  %v6270_v62 = vadd.f32 %v6269_v13, %v6268_v39  ;;  %v6276_v28 = vadd.f32 %v6275_v16, %v6274_v53 }
 0x59f   :  { %6253 = vmatmul.bf16.vlgmr.msra.gmra.mxu3 %v9723_v8  ;;  %v6034_v35 = vadd.f32 %v10020_v23, %v6021_v18  ;;  %v6072_v54 = vpop.f32.mrf.mxu1 }
 0x5a0   :  { %v6073_v20 = vadd.f32 %v6072_v54, %v6059_v29  ;;  %v6283_v54 = vrot.slane %v6282_v4, 1 }
 0x5a1   :  { %v10033_v63 = vadd.f32 %v6046_v17, %v6034_v35  ;;  %v6265_v35 = vrot.slane %v6264_v40, 1 }
 0x5a3   :  { %v6291_v5 = vrot.slane %v10033_v63, 4 }
 0x5a5   :  { %v6292_v48 = vadd.f32 %v6291_v5, %v10033_v63 }
 0x5a6   :  { %v6085_v47 = vpop.f32.mrf.mxu2  ;;  %v6061_v31 = vpop.f32.mrf.mxu0 }
 0x5a7   :  { %v6098_v22 = vpop.f32.mrf.mxu3  ;;  %v6086_v58 = vadd.f32 %v6085_v47, %v6073_v20  ;;  %v6074_v59 = vpop.f32.mrf.mxu1  ;;  %v6293_v19 = vrot.slane %v6292_v48, 2  ;;  %v6288_v47 = vadd.f32 %v6287_v61, %v6286_v6  ;;  %v6277_v31 = vrot.slane %v6276_v28, 1 }
 0x5a9   :  { %v6099_v56 = vadd.f32 %v6098_v22, %v6086_v58  ;;  %v6294_v29 = vadd.f32 %v6293_v19, %v6292_v48  ;;  %v6271_v22 = vrot.slane %v6270_v62, 1  ;;  %v6266_v58 = vadd.f32 %v6265_v35, %v6264_v40 }
 0x5ab   :  { %v6295_v59 = vrot.slane %v6294_v29, 1 }
 0x5ae   :  { %v6087_v55 = vpop.f32.mrf.mxu2 }
 0x5af   :  { %v6100_v38 = vpop.f32.mrf.mxu3  ;;  %v6289_v55 = vrot.slane %v6288_v47, 1 }
 0x5b0   :  { %v6272_v38 = vadd.f32 %v6271_v22, %v6270_v62 }
 0x5c7   :  { %v6111_v57 = vpop.f32.mrf.mxu0 }
 0x5c8   :  { %v6112_v2 = vadd.f32 %v6111_v57, %v6099_v56  ;;  %v6124_v34 = vpop.f32.mrf.mxu1  ;;  %v6284_v56 = vadd.f32 %v6283_v54, %v6282_v4 }
 0x5ca   :  { %v6125_v9 = vadd.f32 %v6124_v34, %v6112_v2  ;;  %v6278_v2 = vadd.f32 %v6277_v31, %v6276_v28  ;;  %v10060_v34 = vmul.f32 %v6266_v58, %v9331_v49 }
 0x5cf   :  { %v6137_v8 = vpop.f32.mrf.mxu2  ;;  %v6113_v60 = vpop.f32.mrf.mxu0 }
 0x5d0   :  { %v6138_v46 = vadd.f32 %v6137_v8, %v6125_v9  ;;  %v6150_v23 = vpop.f32.mrf.mxu3  ;;  %v6126_v44 = vpop.f32.mrf.mxu1  ;;  %v6296_v9 = vadd.f32 %v6295_v59, %v6294_v29  ;;  %v10063_v8 = vmul.f32 %v6284_v56, %v9331_v49 }
 0x5d1   :  { %v10069_v44 = vmul.f32 %v6278_v2, %v9331_v49 }
 0x5d2   :  { %v10035_v17 = vadd.f32 %v6150_v23, %v6138_v46  ;;  %v6290_v46 = vadd.f32 %v6289_v55, %v6288_v47  ;;  %v10066_v23 = vmul.f32 %v6272_v38, %v9331_v49  ;;  %v6320_v12 = vsub.f32 %v9947_v3, %v10063_v8 }
 0x5d3   :  { %v6319_v1 = vsub.f32 %v9892_v27, %v10069_v44 }
 0x5d4   :  { %v6297_v7 = vrot.slane %v10035_v17, 4  ;;  %v10079_v25 = vmul.f32 %v6290_v46, %v9331_v49  ;;  %v6318_v21 = vsub.f32 %v9843_v36, %v10066_v23  ;;  %v6328_v26 = vmul.f32 %v6320_v12, %v6320_v12 }
 0x5d5   :  { %v6327_v53 = vmul.f32 %v6319_v1, %v6319_v1  ;;  %v10098_v1 = vld [vmem:[#allocation12 + $0x38] sm:$0xff] }
 0x5d6   :  { %v6298_v30 = vadd.f32 %v6297_v7, %v10035_v17  ;;  %v6326_v39 = vmul.f32 %v6318_v21, %v6318_v21  ;;  %v6351_v43 = vrot.slane %v6328_v26, 4 }
 0x5d7   :  { %v6139_v10 = vpop.f32.mrf.mxu2  ;;  %v6345_v16 = vrot.slane %v6327_v53, 4 }
 0x5d8   :  { %v6152_v24 = vpop.f32.mrf.mxu3  ;;  %v6299_v45 = vrot.slane %v6298_v30, 2  ;;  %v6317_v10 = vsub.f32 %v9794_v37, %v10060_v34  ;;  %v6339_v13 = vrot.slane %v6326_v39, 4  ;;  %v6352_v61 = vadd.f32 %v6351_v43, %v6328_v26 }
 0x5d9   :  { %v10074_v24 = vmul.f32 %v6296_v9, %v9331_v49  ;;  %v6346_v28 = vadd.f32 %v6345_v16, %v6327_v53 }
 0x5da   :  { %v6300_v20 = vadd.f32 %v6299_v45, %v6298_v30  ;;  %v6325_v5 = vmul.f32 %v6317_v10, %v6317_v10  ;;  %v6340_v45 = vadd.f32 %v6339_v13, %v6326_v39 }
 0x5db   :  { %v6322_v50 = vsub.f32 %v10033_v63, %v10074_v24  ;;  %v6347_v58 = vrot.slane %v6346_v28, 2 }
 0x5dc   :  { %v6301_v57 = vrot.slane %v6300_v20, 1  ;;  %v6341_v22 = vrot.slane %v6340_v45, 2 }
 0x5dd   :  { %v6330_v51 = vmul.f32 %v6322_v50, %v6322_v50  ;;  %v6348_v9 = vadd.f32 %v6347_v58, %v6346_v28 }
 0x5de   :  { %v6302_v60 = vadd.f32 %v6301_v57, %v6300_v20  ;;  %v6342_v38 = vadd.f32 %v6341_v22, %v6340_v45 }
 0x5df   :  { %v6363_v19 = vrot.slane %v6330_v51, 4  ;;  %v6349_v53 = vrot.slane %v6348_v9, 1 }
 0x5e0   :  { %v10084_v11 = vmul.f32 %v6302_v60, %v9331_v49 }
 0x5e1   :  { %v6364_v29 = vadd.f32 %v6363_v19, %v6330_v51  ;;  %v10104_v51 = vmul.f32 %v10098_v1, %v10098_v1  ;;  %v6350_v19 = vadd.f32 %v6349_v53, %v6348_v9 }
 0x5e2   :  { %v6323_v7 = vsub.f32 %v10035_v17, %v10084_v11 }
 0x5e3   :  { %v6365_v56 = vrot.slane %v6364_v29, 2  ;;  %v6383_v22 = vmul.f32 %v6350_v19, %v9331_v49  ;;  %v6398_v9 = vperm.slane %v10104_v51, 6 }
 0x5e4   :  { %v6331_v30 = vmul.f32 %v6323_v7, %v6323_v7 }
 0x5e5   :  { %v6366_v12 = vadd.f32 %v6365_v56, %v6364_v29 }
 0x5ef   :  { %v10037_v32 = vpop.f32.mrf.mxu0 }
 0x5f1   :  { %v10039_v0 = vpop.f32.mrf.mxu1 }
 0x5f2   :  { %v6177_v48 = vadd.f32 %v10039_v0, %v10037_v32  ;;  %v6353_v0 = vrot.slane %v6352_v61, 2 }
 0x5f7   :  { %v6165_v14 = vpop.f32.mrf.mxu0 }
 0x5f8   :  { %v10051_v42 = vpop.f32.mrf.mxu2  ;;  %v6321_v14 = vsub.f32 %v9996_v41, %v10079_v25 }
 0x5f9   :  { %v10054_v52 = vpop.f32.mrf.mxu3  ;;  %v6178_v33 = vpop.f32.mrf.mxu1  ;;  %v6190_v4 = vadd.f32 %v10051_v42, %v6177_v48  ;;  %v6354_v42 = vadd.f32 %v6353_v0, %v6352_v61  ;;  %v6367_v48 = vrot.slane %v6366_v12, 1 }
 0x5fa   :  { %v6333_v33 = vrot.slane %v6325_v5, 4  ;;  %v6329_v6 = vmul.f32 %v6321_v14, %v6321_v14  ;;  %v6343_v14 = vrot.slane %v6342_v38, 1 }
 0x5fb   :  { %v6203_v54 = vadd.f32 %v10054_v52, %v6190_v4  ;;  %v6368_v45 = vadd.f32 %v6367_v48, %v6366_v12 }
 0x5fc   :  { %v6334_v40 = vadd.f32 %v6333_v33, %v6325_v5  ;;  %v6357_v62 = vrot.slane %v6329_v6, 4  ;;  %v6355_v5 = vrot.slane %v6354_v42, 1 }
 0x5fd   :  { %v6386_v58 = vmul.f32 %v6368_v45, %v9331_v49 }
 0x5fe   :  { %v6335_v35 = vrot.slane %v6334_v40, 2  ;;  %v6358_v47 = vadd.f32 %v6357_v62, %v6329_v6  ;;  %v6356_v6 = vadd.f32 %v6355_v5, %v6354_v42  ;;  %v6392_v62 = vperm.slane %v10104_v51, 0 }
 0x600   :  { %v6191_v15 = vpop.f32.mrf.mxu2  ;;  %v6336_v59 = vadd.f32 %v6335_v35, %v6334_v40  ;;  %v6359_v55 = vrot.slane %v6358_v47, 2  ;;  %v6384_v28 = vmul.f32 %v6356_v6, %v9331_v49 }
 0x601   :  { %v6204_v18 = vpop.f32.mrf.mxu3  ;;  %v6369_v15 = vrot.slane %v6331_v30, 4 }
 0x602   :  { %v6337_v10 = vrot.slane %v6336_v59, 1  ;;  %v6360_v50 = vadd.f32 %v6359_v55, %v6358_v47 }
 0x603   :  { %v6370_v20 = vadd.f32 %v6369_v15, %v6331_v30  ;;  %v6344_v30 = vadd.f32 %v6343_v14, %v6342_v38  ;;  %v6396_v38 = vperm.slane %v10104_v51, 4 }
 0x604   :  { %v6338_v33 = vadd.f32 %v6337_v10, %v6336_v59  ;;  %v6361_v13 = vrot.slane %v6360_v50, 1  ;;  %v6397_v59 = vperm.slane %v10104_v51, 5 }
 0x605   :  { %v6371_v57 = vrot.slane %v6370_v20, 2 }
 0x606   :  { %v6381_v61 = vmul.f32 %v6338_v33, %v9331_v49  ;;  %v6362_v35 = vadd.f32 %v6361_v13, %v6360_v50  ;;  %v6413_v12 = vmul.f32 %v6397_v59, %v6386_v58 }
 0x607   :  { %v6372_v39 = vadd.f32 %v6371_v57, %v6370_v20  ;;  %v6394_v20 = vperm.slane %v10104_v51, 2 }
 0x608   :  { %v6385_v55 = vmul.f32 %v6362_v35, %v9331_v49  ;;  %v10136_v53 = vadd.f32 1e-05, %v6413_v12 }
 0x609   :  { %v6373_v16 = vrot.slane %v6372_v39, 1 }
 0x60a   :  { %v6412_v5 = vmul.f32 %v6396_v38, %v6385_v55  ;;  %vm6480_vm2 = vweird.f32 %v10136_v53 }
 0x60b   :  { %v6374_v0 = vadd.f32 %v6373_v16, %v6372_v39 }
 0x60c   :  { %v10139_v48 = vadd.f32 1e-05, %v6412_v5 }
 0x618   :  { %v6215_v18 = vpop.f32.mrf.mxu0 }
 0x619   :  { %v6228_v32 = vpop.f32.mrf.mxu1  ;;  %v6216_v31 = vadd.f32 %v6215_v18, %v6203_v54  ;;  %v6395_v18 = vperm.slane %v10104_v51, 3  ;;  %v6382_v54 = vmul.f32 %v6344_v30, %v9331_v49 }
 0x61b   :  { %v6229_v2 = vadd.f32 %v6228_v32, %v6216_v31  ;;  %v6393_v32 = vperm.slane %v10104_v51, 1  ;;  %v6408_v31 = vmul.f32 %v6392_v62, %v6381_v61  ;;  %v6411_v42 = vmul.f32 %v6395_v18, %v6384_v28 }
 0x61d   :  { %v6409_v57 = vmul.f32 %v6393_v32, %v6382_v54  ;;  %v10122_v10 = vadd.f32 1e-05, %v6408_v31  ;;  %v6399_v32 = vperm.slane %v10104_v51, 7 }
 0x61f   :  { %v10129_v50 = vadd.f32 1e-05, %v6409_v57  ;;  %9013 = vrsqrt.f32 %v10122_v10 }
 0x620   :  { %v6241_v46 = vpop.f32.mrf.mxu2  ;;  %v6217_v60 = vpop.f32.mrf.mxu0 }
 0x621   :  { %v6242_v52 = vadd.f32 %v6241_v46, %v6229_v2  ;;  %v6230_v21 = vpop.f32.mrf.mxu1  ;;  %v6387_v2 = vmul.f32 %v6374_v0, %v9331_v49  ;;  %v6410_v60 = vmul.f32 %v6394_v20, %v6383_v22  ;;  %vm6440_vm7 = vweird.f32 %v10129_v50 }
 0x622   :  { %v6254_v26 = vpop.f32.mrf.mxu3  ;;  %v10127_v21 = vadd.f32 1e-05, %v6411_v42 }
 0x623   :  { %v10100_v7 = vadd.f32 %v6254_v26, %v6242_v52  ;;  %v6414_v26 = vmul.f32 %v6398_v9, %v6387_v2  ;;  %v10133_v39 = vadd.f32 1e-05, %v6410_v60 }
 0x624   :  { %9015 = vrsqrt.f32 %v10127_v21  ;;  %vm6460_vm6 = vweird.f32 %v10127_v21 }
 0x625   :  { %v6303_v43 = vrot.slane %v10100_v7, 4  ;;  %9017 = vrsqrt.f32 %v10129_v50  ;;  %v10147_v30 = vpop.eup %9013  ;;  %vm6450_vm15 = vweird.f32 %v10133_v39 }
 0x626   :  { %9019 = vrsqrt.f32 %v10133_v39  ;;  %v6425_v31 = vmul.f32 %v10147_v30, %v10122_v10 }
 0x627   :  { %v6304_v40 = vadd.f32 %v6303_v43, %v10100_v7  ;;  %v10142_v43 = vadd.f32 1e-05, %v6414_v26  ;;  %9021 = vrsqrt.f32 %v10136_v53 }
 0x628   :  { %v6243_v4 = vpop.f32.mrf.mxu2  ;;  %9023 = vrsqrt.f32 %v10139_v48  ;;  %v6426_v2 = vmul.f32 %v10147_v30, %v6425_v31 }
 0x629   :  { %v6305_v15 = vrot.slane %v6304_v40, 2  ;;  %9025 = vrsqrt.f32 %v10142_v43 }
 0x62a   :  { %v6256_v29 = vpop.f32.mrf.mxu3 }
 0x62b   :  { %v6306_v47 = vadd.f32 %v6305_v15, %v6304_v40  ;;  %v10150_v40 = vpop.eup %9015 }
 0x62c   :  { %v10152_v19 = vpop.eup %9017  ;;  %v6455_v45 = vmul.f32 %v10150_v40, %v10127_v21  ;;  %vm6461_vm3 = vweird.f32 %v10150_v40 }
 0x62d   :  { %v6307_v56 = vrot.slane %v6306_v47, 1  ;;  %v10154_v61 = vpop.eup %9019  ;;  %v6435_v35 = vmul.f32 %v10152_v19, %v10129_v50  ;;  %vm6441_vm4 = vweird.f32 %v10152_v19  ;;  %vm10193_vm8 = vmor %vm6460_vm6, %vm6461_vm3 }
 0x62e   :  { %v10156_v62 = vpop.eup %9021  ;;  %v6445_v29 = vmul.f32 %v10154_v61, %v10133_v39  ;;  %vm6451_vm5 = vweird.f32 %v10154_v61  ;;  %vm10199_vm10 = vmor %vm6440_vm7, %vm6441_vm4 }
 0x62f   :  { %v6308_v46 = vadd.f32 %v6307_v56, %v6306_v47  ;;  %v10160_v28 = vpop.eup %9023  ;;  %v6475_v0 = vmul.f32 %v10156_v62, %v10136_v53  ;;  %v6456_v47 = vmul.f32 %v10150_v40, %v6455_v45  ;;  %v6436_v59 = vmul.f32 %v10152_v19, %v6435_v35  ;;  %vm10209_vm6 = vmor %vm6450_vm15, %vm6451_vm5 }
 0x630   :  { %v10162_v18 = vpop.eup %9025  ;;  %v6465_v22 = vmul.f32 %v10160_v28, %v10139_v48  ;;  %v6446_v51 = vmul.f32 %v10154_v61, %v6445_v29  ;;  %vm6481_vm9 = vweird.f32 %v10156_v62  ;;  %vm6471_vm3 = vweird.f32 %v10160_v28 }
 0x631   :  { %v10125_v52 = vmul.f32 %v6308_v46, %v9331_v49  ;;  %v6485_v58 = vmul.f32 %v10162_v18, %v10142_v43  ;;  %v6476_v42 = vmul.f32 %v10156_v62, %v6475_v0  ;;  %v6457_v55 = vmul.f32 0.5, %v6456_v47  ;;  %vm10225_vm7 = vmor %vm6480_vm2, %vm6481_vm9 }
 0x632   :  { %v6466_v38 = vmul.f32 %v10160_v28, %v6465_v22  ;;  %v6437_v46 = vmul.f32 0.5, %v6436_v59  ;;  %v6447_v60 = vmul.f32 0.5, %v6446_v51  ;;  %vm6491_vm4 = vweird.f32 %v10162_v18 }
 0x633   :  { %v6324_v14 = vsub.f32 %v10100_v7, %v10125_v52  ;;  %v6486_v9 = vmul.f32 %v10162_v18, %v6485_v58  ;;  %v6477_v12 = vmul.f32 0.5, %v6476_v42  ;;  %v6458_v5 = vsub.f32 1.5, %v6457_v55 }
 0x634   :  { %v6467_v26 = vmul.f32 0.5, %v6466_v38  ;;  %vm6470_vm5 = vweird.f32 %v10139_v48 }
 0x635   :  { %v6332_v33 = vmul.f32 %v6324_v14, %v6324_v14  ;;  %v6427_v14 = vmul.f32 0.5, %v6426_v2  ;;  %v6459_v45 = vmul.f32 %v10150_v40, %v6458_v5 }
 0x637   :  { %v6375_v6 = vrot.slane %v6332_v33, 4  ;;  %v6428_v35 = vsub.f32 1.5, %v6427_v14  ;;  %v6463_v21 = vsel %vm10193_vm8, %v10150_v40, %v6459_v45  ;;  %vm10229_vm8 = vmor %vm6470_vm5, %vm6471_vm3  ;;  %vm6430_vm5 = vweird.f32 %v10122_v10 }
 0x639   :  { %v6376_v13 = vadd.f32 %v6375_v6, %v6332_v33  ;;  %v6487_v33 = vmul.f32 0.5, %v6486_v9  ;;  %v6438_v6 = vsub.f32 1.5, %v6437_v46  ;;  %v6429_v48 = vmul.f32 %v10147_v30, %v6428_v35 }
 0x63b   :  { %v6377_v16 = vrot.slane %v6376_v13, 2  ;;  %v6488_v29 = vsub.f32 1.5, %v6487_v33 }
 0x63d   :  { %v6378_v4 = vadd.f32 %v6377_v16, %v6376_v13  ;;  %v6448_v13 = vsub.f32 1.5, %v6447_v60  ;;  %v6478_v16 = vsub.f32 1.5, %v6477_v12  ;;  %v6489_v59 = vmul.f32 %v10162_v18, %v6488_v29 }
 0x63f   :  { %v6379_v15 = vrot.slane %v6378_v4, 1  ;;  %v6449_v0 = vmul.f32 %v10154_v61, %v6448_v13  ;;  %v6479_v22 = vmul.f32 %v10156_v62, %v6478_v16 }
 0x641   :  { %v6380_v54 = vadd.f32 %v6379_v15, %v6378_v4  ;;  %v6468_v15 = vsub.f32 1.5, %v6467_v26  ;;  %v6453_v40 = vsel %vm10209_vm6, %v10154_v61, %v6449_v0  ;;  %vm6431_vm6 = vweird.f32 %v10147_v30 }
 0x642   :  { %v6514_v61 = vrot.slane %v6463_v21, 5 }
 0x643   :  { %v6388_v20 = vmul.f32 %v6380_v54, %v9331_v49  ;;  %v6469_v50 = vmul.f32 %v10160_v28, %v6468_v15 }
 0x645   :  { %v6415_v56 = vmul.f32 %v6399_v32, %v6388_v20  ;;  %v6439_v32 = vmul.f32 %v10152_v19, %v6438_v6  ;;  %v6473_v55 = vsel %vm10229_vm8, %v10160_v28, %v6469_v50 }
 0x646   :  { %v6515_v5 = vrot.slane %v6473_v55, 4 }
 0x647   :  { %v6423_v57 = vadd.f32 1e-05, %v6415_v56  ;;  %v6443_v39 = vsel %vm10199_vm10, %v10152_v19, %v6439_v32  ;;  %v6483_v19 = vsel %vm10225_vm7, %v10156_v62, %v6479_v22  ;;  %vm6490_vm10 = vweird.f32 %v10142_v43  ;;  %v6258_v43 = vld [vmem:[#allocation12 + $0x18] sm:$0xff]  ;;  %vm6432_vm7 = vmor %vm6430_vm5, %vm6431_vm6 }
 0x648   :  { %vm6492_vm2 = vmor %vm6490_vm10, %vm6491_vm4  ;;  %v6512_v9 = vrot.slane %v6443_v39, 7  ;;  %v6513_v62 = vrot.slane %v6453_v40, 6  ;;  %v6516_v46 = vrot.slane %v6483_v19, 3  ;;  %v6433_v28 = vsel %vm6432_vm7, %v10147_v30, %v6429_v48 }
 0x649   :  { %9027 = vrsqrt.f32 %v6423_v57  ;;  %v6493_v38 = vsel %vm6492_vm2, %v10162_v18, %v6489_v59  ;;  %vm6500_vm9 = vweird.f32 %v6423_v57  ;;  %v6389_v18 = vmul.f32 %v10098_v1, %v6258_v43 }
 0x64a   :  { %v6520_v12 = vsel %vm350_vm14, %v6513_v62, %v6514_v61  ;;  %v6517_v26 = vrot.slane %v6493_v38, 2  ;;  %v6522_v33 = vsel %vm2498_vm11, %v6515_v5, %v6516_v46  ;;  %vm10493_vm4 = vcmask 1043456  }
 0x64b   :  { %vm10494_vm8 = vmmov %vm10493_vm4 }
 0x64f   :  { %v9028_v4 = vpop.eup %9027 }
 0x650   :  { %v6495_v54 = vmul.f32 %v9028_v4, %v6423_v57  ;;  %vm6501_vm15 = vweird.f32 %v9028_v4  ;;  %v6519_v57 = vsel %vm348_vm12, %v6433_v28, %v6512_v9 }
 0x651   :  { %vm6502_vm3 = vmor %vm6500_vm9, %vm6501_vm15  ;;  %v6521_v13 = vsel %vm352_vm0, %v6519_v57, %v6520_v12 }
 0x652   :  { %v6496_v20 = vmul.f32 %v9028_v4, %v6495_v54 }
 0x654   :  { %v6497_v51 = vmul.f32 0.5, %v6496_v20 }
 0x656   :  { %v6498_v42 = vsub.f32 1.5, %v6497_v51 }
 0x658   :  { %v6499_v2 = vmul.f32 %v9028_v4, %v6498_v42 }
 0x65a   :  { %v6503_v60 = vsel %vm6502_vm3, %v9028_v4, %v6499_v2 }
 0x65b   :  { %v6518_v14 = vrot.slane %v6503_v60, 1 }
 0x65d   :  { %v6523_v6 = vsel %vm2500_vm13, %v6517_v26, %v6518_v14 }
 0x65e   :  { %v6524_v10 = vsel %vm2502_vm1, %v6522_v33, %v6523_v6 }
 0x65f   :  { %v6525_v16 = vsel %vm10493_vm4, %v6521_v13, %v6524_v10 }
 0x660   :  { %v6527_v4 = vmul.f32 %v6525_v16, %v6389_v18 }
 0x662   :  { %v6529_v45 = vperm.slane %v6527_v4, 0  ;;  %v6530_v15 = vperm.slane %v6527_v4, 1  ;;  %v6531_v35 = vperm.slane %v6527_v4, 2  ;;  %v6532_v29 = vperm.slane %v6527_v4, 3 }
 0x663   :  { %v6533_v30 = vperm.slane %v6527_v4, 4  ;;  %v6534_v54 = vperm.slane %v6527_v4, 5  ;;  %v6535_v1 = vperm.slane %v6527_v4, 6  ;;  %v6536_v32 = vperm.slane %v6527_v4, 7 }
 0x664   :  { %v6546_v0 = vmul.f32 %v6530_v15, %v10066_v23  ;;  %v6547_v47 = vmul.f32 %v6531_v35, %v10069_v44  ;;  %v6548_v22 = vmul.f32 %v6532_v29, %v10063_v8  ;;  %v6545_v58 = vmul.f32 %v6529_v45, %v10060_v34 }
 0x665   :  { %v6549_v20 = vmul.f32 %v6533_v30, %v10079_v25  ;;  %v6550_v31 = vmul.f32 %v6534_v54, %v10074_v24  ;;  %v6551_v21 = vmul.f32 %v6535_v1, %v10084_v11  ;;  %v6552_v50 = vmul.f32 %v6536_v32, %v10125_v52  ;;  %v6259_v25 = vld [vmem:[#allocation12 + $0x20] sm:$0xff] }
 0x666   :  { %v6561_v59 = vrot.slane %v6546_v0, 7  ;;  %v6562_v51 = vrot.slane %v6547_v47, 6  ;;  %v6563_v39 = vrot.slane %v6548_v22, 5  ;;  %v6577_v42 = vmul.f32 %v6529_v45, %v9794_v37 }
 0x667   :  { %v6564_v40 = vrot.slane %v6549_v20, 4  ;;  %v6565_v56 = vrot.slane %v6550_v31, 3  ;;  %v6566_v23 = vrot.slane %v6551_v21, 2  ;;  %v6567_v53 = vrot.slane %v6552_v50, 1 }
 0x668   :  { %v6568_v44 = vsel %vm348_vm12, %v6545_v58, %v6561_v59  ;;  %v6569_v8 = vsel %vm350_vm14, %v6562_v51, %v6563_v39  ;;  %v6578_v61 = vmul.f32 %v6530_v15, %v9843_v36  ;;  %v6579_v55 = vmul.f32 %v6531_v35, %v9892_v27 }
 0x669   :  { %v6570_v24 = vsel %vm352_vm0, %v6568_v44, %v6569_v8  ;;  %v6571_v11 = vsel %vm2498_vm11, %v6564_v40, %v6565_v56  ;;  %v6572_v52 = vsel %vm2500_vm13, %v6566_v23, %v6567_v53  ;;  %v6580_v38 = vmul.f32 %v6532_v29, %v9947_v3 }
 0x66a   :  { %v6573_v34 = vsel %vm2502_vm1, %v6571_v11, %v6572_v52  ;;  %v6581_v2 = vmul.f32 %v6533_v30, %v9996_v41  ;;  %v6582_v9 = vmul.f32 %v6534_v54, %v10033_v63  ;;  %v6583_v62 = vmul.f32 %v6535_v1, %v10035_v17 }
 0x66b   :  { %v6574_v19 = vsel %vm10494_vm8, %v6570_v24, %v6573_v34  ;;  %v6584_v46 = vmul.f32 %v6536_v32, %v10100_v7 }
 0x66c   :  { %v6576_v48 = vsub.f32 %v6259_v25, %v6574_v19 }
 0x66e   :  { %v6586_v43 = vperm.slane %v6576_v48, 0  ;;  %v6587_v60 = vperm.slane %v6576_v48, 1  ;;  %v6588_v12 = vperm.slane %v6576_v48, 2  ;;  %v6589_v5 = vperm.slane %v6576_v48, 3 }
 0x66f   :  { %v6590_v37 = vperm.slane %v6576_v48, 4  ;;  %v6591_v26 = vperm.slane %v6576_v48, 5  ;;  %v6592_v14 = vperm.slane %v6576_v48, 6  ;;  %v6593_v36 = vperm.slane %v6576_v48, 7 }
 0x670   :  { %v6602_v28 = vadd.f32 %v6586_v43, %v6577_v42  ;;  %v6603_v27 = vadd.f32 %v6587_v60, %v6578_v61  ;;  %v6604_v18 = vadd.f32 %v6588_v12, %v6579_v55  ;;  %v6605_v3 = vadd.f32 %v6589_v5, %v6580_v38 }
 0x671   :  { %v6606_v57 = vadd.f32 %v6590_v37, %v6581_v2  ;;  %v6607_v41 = vadd.f32 %v6591_v26, %v6582_v9  ;;  %v6608_v33 = vadd.f32 %v6592_v14, %v6583_v62  ;;  %v6609_v63 = vadd.f32 %v6593_v36, %v6584_v46 }
 0x672   :  { %v6610_v6 = vmax.f32 %v6602_v28, 0.0  ;;  %v6611_v17 = vmax.f32 %v6603_v27, 0.0  ;;  %v6612_v13 = vmax.f32 %v6604_v18, 0.0  ;;  %v6613_v7 = vmax.f32 %v6605_v3, 0.0 }
 0x673   :  { %v6614_v10 = vmax.f32 %v6606_v57, 0.0  ;;  %v6615_v16 = vmax.f32 %v6607_v41, 0.0  ;;  %v6616_v4 = vmax.f32 %v6608_v33, 0.0  ;;  %v6617_v45 = vmax.f32 %v6609_v63, 0.0 }
 0x674   :  { %v10276_v15 = vpack.c.bf16 %v6610_v6, %v6610_v6  ;;  %v10278_v35 = vpack.c.bf16 %v6611_v17, %v6611_v17  ;;  %v10280_v29 = vpack.c.bf16 %v6612_v13, %v6612_v13  ;;  %v10282_v30 = vpack.c.bf16 %v6613_v7, %v6613_v7 }
 0x675   :  { %v10284_v54 = vpack.c.bf16 %v6614_v10, %v6614_v10  ;;  %v10286_v1 = vpack.c.bf16 %v6615_v16, %v6615_v16  ;;  %v10288_v32 = vpack.c.bf16 %v6616_v4, %v6616_v4  ;;  %v10290_v0 = vpack.c.bf16 %v6617_v45, %v6617_v45 }
 0x676   :  { %9239 = dma.done.wait [#allocation6 + $0x2], 16384 }
 0x677   :  { %9240 = vsyncadd [#allocation6 + $0x2], 4294950912  ;;  %v6641_v47 = vld [vmem:[#allocation4 + $0x60] sm:$0xff] }
 0x678   :  { %v6657_v22 = vld [vmem:[#allocation4 + $0xe0] sm:$0xff]  ;;  %v6813_v31 = vunpack.c.2.s8 %v6641_v47  ;;  %v6817_v21 = vunpack.c.3.s8 %v6641_v47  ;;  %v6805_v42 = vunpack.c.0.s8 %v6641_v47  ;;  %v6809_v48 = vunpack.c.1.s8 %v6641_v47 }
 0x679   :  { %v6673_v20 = vld [vmem:[#allocation4 + $0x160] sm:$0xff]  ;;  %v6877_v50 = vunpack.c.2.s8 %v6657_v22  ;;  %v6881_v58 = vunpack.c.3.s8 %v6657_v22  ;;  %v6869_v38 = vunpack.c.0.s8 %v6657_v22  ;;  %v6873_v2 = vunpack.c.1.s8 %v6657_v22 }
 0x67a   :  { %v6689_v59 = vld [vmem:[#allocation4 + $0x1e0] sm:$0xff]  ;;  %v6941_v51 = vunpack.c.2.s8 %v6673_v20  ;;  %v6945_v39 = vunpack.c.3.s8 %v6673_v20  ;;  %v7325_v23 = vcvt.s32.f32 %v6813_v31  ;;  %v7329_v53 = vcvt.s32.f32 %v6817_v21 }
 0x67b   :  { %v7005_v40 = vunpack.c.2.s8 %v6689_v59  ;;  %v7009_v56 = vunpack.c.3.s8 %v6689_v59  ;;  %v7389_v44 = vcvt.s32.f32 %v6877_v50  ;;  %v7393_v8 = vcvt.s32.f32 %v6881_v58  ;;  %v6637_v9 = vld [vmem:[#allocation4 + $0x40] sm:$0xff] }
 0x67c   :  { %v7453_v25 = vcvt.s32.f32 %v6941_v51  ;;  %v7457_v24 = vcvt.s32.f32 %v6945_v39  ;;  %v7809_v34 = vpack.c.bf16 %v7329_v53, %v7325_v23  ;;  %v7317_v62 = vcvt.s32.f32 %v6805_v42  ;;  %v6653_v14 = vld [vmem:[#allocation4 + $0xc0] sm:$0xff] }
 0x67d   :  { %v7517_v11 = vcvt.s32.f32 %v7005_v40  ;;  %v7521_v52 = vcvt.s32.f32 %v7009_v56  ;;  %v7841_v19 = vpack.c.bf16 %v7393_v8, %v7389_v44  ;;  %v7321_v46 = vcvt.s32.f32 %v6809_v48  ;;  %v6669_v3 = vld [vmem:[#allocation4 + $0x140] sm:$0xff] }
 0x67e   :  { %v7873_v61 = vpack.c.bf16 %v7457_v24, %v7453_v25  ;;  %8037 = vmatpush.bf16.msrb.mxu0 %v7809_v34  ;;  %v6933_v43 = vunpack.c.0.s8 %v6673_v20  ;;  %v6937_v60 = vunpack.c.1.s8 %v6673_v20  ;;  %v7381_v12 = vcvt.s32.f32 %v6869_v38  ;;  %v6685_v6 = vld [vmem:[#allocation4 + $0x1c0] sm:$0xff] }
 0x67f   :  { %v7905_v55 = vpack.c.bf16 %v7521_v52, %v7517_v11  ;;  %8050 = vmatpush.bf16.msrb.mxu1 %v7841_v19  ;;  %v7385_v5 = vcvt.s32.f32 %v6873_v2  ;;  %v6997_v37 = vunpack.c.0.s8 %v6689_v59  ;;  %v7001_v26 = vunpack.c.1.s8 %v6689_v59  ;;  %v6633_v24 = vld [vmem:[#allocation4 + $0x20] sm:$0xff] }
 0x680   :  { %8063 = vmatpush.bf16.msrb.mxu2 %v7873_v61  ;;  %v7805_v36 = vpack.c.bf16 %v7321_v46, %v7317_v62  ;;  %v7445_v28 = vcvt.s32.f32 %v6933_v43  ;;  %v7449_v27 = vcvt.s32.f32 %v6937_v60  ;;  %v6797_v18 = vunpack.c.2.s8 %v6637_v9  ;;  %v6649_v38 = vld [vmem:[#allocation4 + $0xa0] sm:$0xff] }
 0x681   :  { %8076 = vmatpush.bf16.msrb.mxu3 %v7905_v55  ;;  %v7837_v57 = vpack.c.bf16 %v7385_v5, %v7381_v12  ;;  %v7509_v41 = vcvt.s32.f32 %v6997_v37  ;;  %v7513_v33 = vcvt.s32.f32 %v7001_v26  ;;  %v6801_v63 = vunpack.c.3.s8 %v6637_v9  ;;  %v6665_v43 = vld [vmem:[#allocation4 + $0x120] sm:$0xff] }
 0x682   :  { %8038 = vmatpush.bf16.msrb.mxu0 %v7805_v36  ;;  %v7869_v17 = vpack.c.bf16 %v7449_v27, %v7445_v28  ;;  %v7309_v13 = vcvt.s32.f32 %v6797_v18  ;;  %v6861_v7 = vunpack.c.2.s8 %v6653_v14  ;;  %v6865_v10 = vunpack.c.3.s8 %v6653_v14  ;;  %v6681_v26 = vld [vmem:[#allocation4 + $0x1a0] sm:$0xff] }
 0x683   :  { %8051 = vmatpush.bf16.msrb.mxu1 %v7837_v57  ;;  %v7901_v16 = vpack.c.bf16 %v7513_v33, %v7509_v41  ;;  %v7313_v4 = vcvt.s32.f32 %v6801_v63  ;;  %v6925_v45 = vunpack.c.2.s8 %v6669_v3  ;;  %v6929_v47 = vunpack.c.3.s8 %v6669_v3 }
 0x684   :  { %8064 = vmatpush.bf16.msrb.mxu2 %v7869_v17  ;;  %v7373_v22 = vcvt.s32.f32 %v6861_v7  ;;  %v7377_v20 = vcvt.s32.f32 %v6865_v10  ;;  %v6989_v31 = vunpack.c.2.s8 %v6685_v6  ;;  %v6993_v21 = vunpack.c.3.s8 %v6685_v6 }
 0x685   :  { %8077 = vmatpush.bf16.msrb.mxu3 %v7901_v16  ;;  %v7801_v50 = vpack.c.bf16 %v7313_v4, %v7309_v13  ;;  %v7437_v58 = vcvt.s32.f32 %v6925_v45  ;;  %v7441_v59 = vcvt.s32.f32 %v6929_v47  ;;  %v6789_v51 = vunpack.c.0.s8 %v6637_v9 }
 0x686   :  { %v7833_v39 = vpack.c.bf16 %v7377_v20, %v7373_v22  ;;  %v7501_v40 = vcvt.s32.f32 %v6989_v31  ;;  %v7505_v56 = vcvt.s32.f32 %v6993_v21  ;;  %v6793_v23 = vunpack.c.1.s8 %v6637_v9 }
 0x687   :  { %8039 = vmatpush.bf16.msrb.mxu0 %v7801_v50  ;;  %v7865_v53 = vpack.c.bf16 %v7441_v59, %v7437_v58  ;;  %v7301_v44 = vcvt.s32.f32 %v6789_v51  ;;  %v6853_v8 = vunpack.c.0.s8 %v6653_v14  ;;  %v6857_v25 = vunpack.c.1.s8 %v6653_v14  ;;  %v6629_v58 = vld [vmem:[#allocation4] sm:$0xff] }
 0x688   :  { %8052 = vmatpush.bf16.msrb.mxu1 %v7833_v39  ;;  %v7897_v11 = vpack.c.bf16 %v7505_v56, %v7501_v40  ;;  %v7305_v52 = vcvt.s32.f32 %v6793_v23  ;;  %v6917_v34 = vunpack.c.0.s8 %v6669_v3  ;;  %v6921_v19 = vunpack.c.1.s8 %v6669_v3 }
 0x689   :  { %8065 = vmatpush.bf16.msrb.mxu2 %v7865_v53  ;;  %v7365_v42 = vcvt.s32.f32 %v6853_v8  ;;  %v7369_v48 = vcvt.s32.f32 %v6857_v25  ;;  %v6981_v61 = vunpack.c.0.s8 %v6685_v6  ;;  %v6985_v55 = vunpack.c.1.s8 %v6685_v6  ;;  %v6645_v8 = vld [vmem:[#allocation4 + $0x80] sm:$0xff] }
 0x68a   :  { %8078 = vmatpush.bf16.msrb.mxu3 %v7897_v11  ;;  %v7797_v2 = vpack.c.bf16 %v7305_v52, %v7301_v44  ;;  %v7429_v9 = vcvt.s32.f32 %v6917_v34  ;;  %v7433_v62 = vcvt.s32.f32 %v6921_v19  ;;  %v6781_v46 = vunpack.c.2.s8 %v6633_v24  ;;  %v6661_v34 = vld [vmem:[#allocation4 + $0x100] sm:$0xff] }
 0x68b   :  { %v7829_v60 = vpack.c.bf16 %v7369_v48, %v7365_v42  ;;  %v7493_v12 = vcvt.s32.f32 %v6981_v61  ;;  %v7497_v5 = vcvt.s32.f32 %v6985_v55  ;;  %v6785_v37 = vunpack.c.3.s8 %v6633_v24  ;;  %v6677_v55 = vld [vmem:[#allocation4 + $0x180] sm:$0xff] }
 0x68c   :  { %8040 = vmatpush.bf16.msrb.mxu0 %v7797_v2  ;;  %v7861_v14 = vpack.c.bf16 %v7433_v62, %v7429_v9  ;;  %v7293_v36 = vcvt.s32.f32 %v6781_v46  ;;  %v6845_v28 = vunpack.c.2.s8 %v6649_v38  ;;  %v6849_v27 = vunpack.c.3.s8 %v6649_v38 }
 0x68d   :  { %8053 = vmatpush.bf16.msrb.mxu1 %v7829_v60  ;;  %v7893_v18 = vpack.c.bf16 %v7497_v5, %v7493_v12  ;;  %v7297_v3 = vcvt.s32.f32 %v6785_v37  ;;  %v6909_v57 = vunpack.c.2.s8 %v6665_v43  ;;  %v6913_v41 = vunpack.c.3.s8 %v6665_v43 }
 0x68e   :  { %8066 = vmatpush.bf16.msrb.mxu2 %v7861_v14  ;;  %v7357_v33 = vcvt.s32.f32 %v6845_v28  ;;  %v7361_v63 = vcvt.s32.f32 %v6849_v27  ;;  %v6973_v6 = vunpack.c.2.s8 %v6681_v26  ;;  %v6977_v17 = vunpack.c.3.s8 %v6681_v26 }
 0x68f   :  { %8079 = vmatpush.bf16.msrb.mxu3 %v7893_v18  ;;  %v7793_v13 = vpack.c.bf16 %v7297_v3, %v7293_v36  ;;  %v7421_v7 = vcvt.s32.f32 %v6909_v57  ;;  %v7425_v10 = vcvt.s32.f32 %v6913_v41  ;;  %v6773_v16 = vunpack.c.0.s8 %v6633_v24 }
 0x690   :  { %v7825_v4 = vpack.c.bf16 %v7361_v63, %v7357_v33  ;;  %v7485_v45 = vcvt.s32.f32 %v6973_v6  ;;  %v7489_v47 = vcvt.s32.f32 %v6977_v17  ;;  %v6777_v22 = vunpack.c.1.s8 %v6633_v24 }
 0x691   :  { %8041 = vmatpush.bf16.msrb.mxu0 %v7793_v13  ;;  %v7857_v20 = vpack.c.bf16 %v7425_v10, %v7421_v7  ;;  %v7285_v31 = vcvt.s32.f32 %v6773_v16  ;;  %v6837_v21 = vunpack.c.0.s8 %v6649_v38  ;;  %v6841_v50 = vunpack.c.1.s8 %v6649_v38  ;;  %v6705_v7 = vld [vmem:[#allocation4 + $0x260] sm:$0xff] }
 0x692   :  { %8054 = vmatpush.bf16.msrb.mxu1 %v7825_v4  ;;  %v7889_v59 = vpack.c.bf16 %v7489_v47, %v7485_v45  ;;  %v7289_v51 = vcvt.s32.f32 %v6777_v22  ;;  %v6901_v39 = vunpack.c.0.s8 %v6665_v43  ;;  %v6905_v40 = vunpack.c.1.s8 %v6665_v43 }
 0x693   :  { %8067 = vmatpush.bf16.msrb.mxu2 %v7857_v20  ;;  %v7349_v56 = vcvt.s32.f32 %v6837_v21  ;;  %v7353_v23 = vcvt.s32.f32 %v6841_v50  ;;  %v6965_v53 = vunpack.c.0.s8 %v6681_v26  ;;  %v6969_v44 = vunpack.c.1.s8 %v6681_v26  ;;  %v6721_v21 = vld [vmem:[#allocation4 + $0x2e0] sm:$0xff] }
 0x694   :  { %8080 = vmatpush.bf16.msrb.mxu3 %v7889_v59  ;;  %v7789_v25 = vpack.c.bf16 %v7289_v51, %v7285_v31  ;;  %v7413_v24 = vcvt.s32.f32 %v6901_v39  ;;  %v7417_v11 = vcvt.s32.f32 %v6905_v40  ;;  %v6765_v52 = vunpack.c.2.s8 %v6629_v58  ;;  %v6737_v39 = vld [vmem:[#allocation4 + $0x360] sm:$0xff] }
 0x695   :  { %v7821_v19 = vpack.c.bf16 %v7353_v23, %v7349_v56  ;;  %v7477_v42 = vcvt.s32.f32 %v6965_v53  ;;  %v7481_v48 = vcvt.s32.f32 %v6969_v44  ;;  %v6769_v61 = vunpack.c.3.s8 %v6629_v58  ;;  %v6753_v44 = vld [vmem:[#allocation4 + $0x3e0] sm:$0xff] }
 0x696   :  { %8042 = vmatpush.bf16.msrb.mxu0 %v7789_v25  ;;  %v7853_v38 = vpack.c.bf16 %v7417_v11, %v7413_v24  ;;  %v7277_v2 = vcvt.s32.f32 %v6765_v52  ;;  %v6829_v9 = vunpack.c.2.s8 %v6645_v8  ;;  %v6833_v62 = vunpack.c.3.s8 %v6645_v8 }
 0x697   :  { %8055 = vmatpush.bf16.msrb.mxu1 %v7821_v19  ;;  %v7885_v46 = vpack.c.bf16 %v7481_v48, %v7477_v42  ;;  %v7281_v43 = vcvt.s32.f32 %v6769_v61  ;;  %v6893_v60 = vunpack.c.2.s8 %v6661_v34  ;;  %v6897_v12 = vunpack.c.3.s8 %v6661_v34 }
 0x698   :  { %8068 = vmatpush.bf16.msrb.mxu2 %v7853_v38  ;;  %v7341_v5 = vcvt.s32.f32 %v6829_v9  ;;  %v7345_v37 = vcvt.s32.f32 %v6833_v62  ;;  %v6957_v26 = vunpack.c.2.s8 %v6677_v55  ;;  %v6961_v14 = vunpack.c.3.s8 %v6677_v55 }
 0x699   :  { %8081 = vmatpush.bf16.msrb.mxu3 %v7885_v46  ;;  %v7785_v36 = vpack.c.bf16 %v7281_v43, %v7277_v2  ;;  %v7405_v28 = vcvt.s32.f32 %v6893_v60  ;;  %v7409_v27 = vcvt.s32.f32 %v6897_v12  ;;  %v6757_v18 = vunpack.c.0.s8 %v6629_v58 }
 0x69a   :  { %v7817_v3 = vpack.c.bf16 %v7345_v37, %v7341_v5  ;;  %v7469_v57 = vcvt.s32.f32 %v6957_v26  ;;  %v7473_v41 = vcvt.s32.f32 %v6961_v14  ;;  %v6761_v33 = vunpack.c.1.s8 %v6629_v58 }
 0x69b   :  { %8043 = vmatpush.bf16.msrb.mxu0 %v7785_v36  ;;  %v7849_v63 = vpack.c.bf16 %v7409_v27, %v7405_v28  ;;  %v7269_v6 = vcvt.s32.f32 %v6757_v18  ;;  %v6821_v17 = vunpack.c.0.s8 %v6645_v8  ;;  %v6825_v13 = vunpack.c.1.s8 %v6645_v8  ;;  %v6701_v28 = vld [vmem:[#allocation4 + $0x240] sm:$0xff] }
 0x69c   :  { %8056 = vmatpush.bf16.msrb.mxu1 %v7817_v3  ;;  %v7881_v10 = vpack.c.bf16 %v7473_v41, %v7469_v57  ;;  %v7273_v16 = vcvt.s32.f32 %v6761_v33  ;;  %v6885_v4 = vunpack.c.0.s8 %v6661_v34  ;;  %v6889_v45 = vunpack.c.1.s8 %v6661_v34 }
 0x69d   :  { %8069 = vmatpush.bf16.msrb.mxu2 %v7849_v63  ;;  %v7333_v47 = vcvt.s32.f32 %v6821_v17  ;;  %v7337_v22 = vcvt.s32.f32 %v6825_v13  ;;  %v6949_v20 = vunpack.c.0.s8 %v6677_v55  ;;  %v6953_v31 = vunpack.c.1.s8 %v6677_v55  ;;  %v6717_v17 = vld [vmem:[#allocation4 + $0x2c0] sm:$0xff] }
 0x69e   :  { %8082 = vmatpush.bf16.msrb.mxu3 %v7881_v10  ;;  %v7781_v50 = vpack.c.bf16 %v7273_v16, %v7269_v6  ;;  %v7397_v58 = vcvt.s32.f32 %v6885_v4  ;;  %v7401_v59 = vcvt.s32.f32 %v6889_v45  ;;  %v7069_v51 = vunpack.c.2.s8 %v6705_v7  ;;  %v6733_v4 = vld [vmem:[#allocation4 + $0x340] sm:$0xff] }
 0x69f   :  { %v7813_v40 = vpack.c.bf16 %v7337_v22, %v7333_v47  ;;  %v7461_v56 = vcvt.s32.f32 %v6949_v20  ;;  %v7465_v23 = vcvt.s32.f32 %v6953_v31  ;;  %v7073_v53 = vunpack.c.3.s8 %v6705_v7  ;;  %v6749_v31 = vld [vmem:[#allocation4 + $0x3c0] sm:$0xff] }
 0x6a0   :  { %8044 = vmatpush.bf16.msrb.mxu0 %v7781_v50  ;;  %v7845_v8 = vpack.c.bf16 %v7401_v59, %v7397_v58  ;;  %v7581_v25 = vcvt.s32.f32 %v7069_v51  ;;  %v7133_v24 = vunpack.c.2.s8 %v6721_v21  ;;  %v7137_v11 = vunpack.c.3.s8 %v6721_v21 }
 0x6a1   :  { %8057 = vmatpush.bf16.msrb.mxu1 %v7813_v40  ;;  %v7877_v52 = vpack.c.bf16 %v7465_v23, %v7461_v56  ;;  %v7585_v34 = vcvt.s32.f32 %v7073_v53  ;;  %v7197_v19 = vunpack.c.2.s8 %v6737_v39  ;;  %v7201_v42 = vunpack.c.3.s8 %v6737_v39 }
 0x6a2   :  { %8070 = vmatpush.bf16.msrb.mxu2 %v7845_v8  ;;  %v7645_v48 = vcvt.s32.f32 %v7133_v24  ;;  %v7649_v61 = vcvt.s32.f32 %v7137_v11  ;;  %v7261_v55 = vunpack.c.2.s8 %v6753_v44  ;;  %v7265_v38 = vunpack.c.3.s8 %v6753_v44 }
 0x6a3   :  { %8083 = vmatpush.bf16.msrb.mxu3 %v7877_v52  ;;  %v7937_v2 = vpack.c.bf16 %v7585_v34, %v7581_v25  ;;  %v7709_v9 = vcvt.s32.f32 %v7197_v19  ;;  %v7713_v62 = vcvt.s32.f32 %v7201_v42  ;;  %v7061_v46 = vunpack.c.0.s8 %v6705_v7  ;;  %8045 = vmatmul.bf16.vlgmr.msrb.gmra.mxu0 %v10276_v15 }
 0x6a4   :  { %v7969_v43 = vpack.c.bf16 %v7649_v61, %v7645_v48  ;;  %v7773_v60 = vcvt.s32.f32 %v7261_v55  ;;  %v7777_v12 = vcvt.s32.f32 %v7265_v38  ;;  %v7065_v5 = vunpack.c.1.s8 %v6705_v7  ;;  %8058 = vmatmul.bf16.vlgmr.msrb.gmra.mxu1 %v10278_v35 }
 0x6a5   :  { %8089 = vmatpush.bf16.msra.mxu0 %v7937_v2  ;;  %v8001_v37 = vpack.c.bf16 %v7713_v62, %v7709_v9  ;;  %v7573_v26 = vcvt.s32.f32 %v7061_v46  ;;  %v7125_v14 = vunpack.c.0.s8 %v6721_v21  ;;  %v7129_v36 = vunpack.c.1.s8 %v6721_v21  ;;  %8071 = vmatmul.bf16.vlgmr.msrb.gmra.mxu2 %v10280_v29  ;;  %v6697_v9 = vld [vmem:[#allocation4 + $0x220] sm:$0xff] }
 0x6a6   :  { %8102 = vmatpush.bf16.msra.mxu1 %v7969_v43  ;;  %v8033_v27 = vpack.c.bf16 %v7777_v12, %v7773_v60  ;;  %v7577_v18 = vcvt.s32.f32 %v7065_v5  ;;  %v7189_v3 = vunpack.c.0.s8 %v6737_v39  ;;  %v7193_v57 = vunpack.c.1.s8 %v6737_v39  ;;  %8084 = vmatmul.bf16.vlgmr.msrb.gmra.mxu3 %v10282_v30 }
 0x6a7   :  { %8115 = vmatpush.bf16.msra.mxu2 %v8001_v37  ;;  %v7637_v41 = vcvt.s32.f32 %v7125_v14  ;;  %v7641_v33 = vcvt.s32.f32 %v7129_v36  ;;  %v7253_v63 = vunpack.c.0.s8 %v6753_v44  ;;  %v7257_v6 = vunpack.c.1.s8 %v6753_v44  ;;  %v6713_v14 = vld [vmem:[#allocation4 + $0x2a0] sm:$0xff] }
 0x6a8   :  { %8128 = vmatpush.bf16.msra.mxu3 %v8033_v27  ;;  %v7933_v13 = vpack.c.bf16 %v7577_v18, %v7573_v26  ;;  %v7701_v7 = vcvt.s32.f32 %v7189_v3  ;;  %v7705_v10 = vcvt.s32.f32 %v7193_v57  ;;  %v7053_v16 = vunpack.c.2.s8 %v6701_v28  ;;  %v6729_v3 = vld [vmem:[#allocation4 + $0x320] sm:$0xff] }
 0x6a9   :  { %v7965_v45 = vpack.c.bf16 %v7641_v33, %v7637_v41  ;;  %v7765_v47 = vcvt.s32.f32 %v7253_v63  ;;  %v7769_v22 = vcvt.s32.f32 %v7257_v6  ;;  %v7057_v20 = vunpack.c.3.s8 %v6701_v28  ;;  %v6745_v6 = vld [vmem:[#allocation4 + $0x3a0] sm:$0xff] }
 0x6aa   :  { %8090 = vmatpush.bf16.msra.mxu0 %v7933_v13  ;;  %v7997_v21 = vpack.c.bf16 %v7705_v10, %v7701_v7  ;;  %v7565_v50 = vcvt.s32.f32 %v7053_v16  ;;  %v7117_v58 = vunpack.c.2.s8 %v6717_v17  ;;  %v7121_v59 = vunpack.c.3.s8 %v6717_v17 }
 0x6ab   :  { %8103 = vmatpush.bf16.msra.mxu1 %v7965_v45  ;;  %v8029_v51 = vpack.c.bf16 %v7769_v22, %v7765_v47  ;;  %v7569_v39 = vcvt.s32.f32 %v7057_v20  ;;  %v7181_v40 = vunpack.c.2.s8 %v6733_v4  ;;  %v7185_v56 = vunpack.c.3.s8 %v6733_v4 }
 0x6ac   :  { %8116 = vmatpush.bf16.msra.mxu2 %v7997_v21  ;;  %v7629_v23 = vcvt.s32.f32 %v7117_v58  ;;  %v7633_v53 = vcvt.s32.f32 %v7121_v59  ;;  %v7245_v44 = vunpack.c.2.s8 %v6749_v31  ;;  %v7249_v8 = vunpack.c.3.s8 %v6749_v31 }
 0x6ad   :  { %8129 = vmatpush.bf16.msra.mxu3 %v8029_v51  ;;  %v7929_v25 = vpack.c.bf16 %v7569_v39, %v7565_v50  ;;  %v7693_v24 = vcvt.s32.f32 %v7181_v40  ;;  %v7697_v11 = vcvt.s32.f32 %v7185_v56  ;;  %v7045_v52 = vunpack.c.0.s8 %v6701_v28 }
 0x6ae   :  { %v7961_v34 = vpack.c.bf16 %v7633_v53, %v7629_v23  ;;  %v7757_v19 = vcvt.s32.f32 %v7245_v44  ;;  %v7761_v42 = vcvt.s32.f32 %v7249_v8  ;;  %v7049_v48 = vunpack.c.1.s8 %v6701_v28 }
 0x6af   :  { %8091 = vmatpush.bf16.msra.mxu0 %v7929_v25  ;;  %v7993_v61 = vpack.c.bf16 %v7697_v11, %v7693_v24  ;;  %v7557_v55 = vcvt.s32.f32 %v7045_v52  ;;  %v7109_v38 = vunpack.c.0.s8 %v6717_v17  ;;  %v7113_v2 = vunpack.c.1.s8 %v6717_v17  ;;  %v6693_v24 = vld [vmem:[#allocation4 + $0x200] sm:$0xff] }
 0x6b0   :  { %8104 = vmatpush.bf16.msra.mxu1 %v7961_v34  ;;  %v8025_v62 = vpack.c.bf16 %v7761_v42, %v7757_v19  ;;  %v7561_v46 = vcvt.s32.f32 %v7049_v48  ;;  %v7173_v43 = vunpack.c.0.s8 %v6733_v4  ;;  %v7177_v60 = vunpack.c.1.s8 %v6733_v4 }
 0x6b1   :  { %8117 = vmatpush.bf16.msra.mxu2 %v7993_v61  ;;  %v7621_v12 = vcvt.s32.f32 %v7109_v38  ;;  %v7625_v5 = vcvt.s32.f32 %v7113_v2  ;;  %v7237_v37 = vunpack.c.0.s8 %v6749_v31  ;;  %v7241_v26 = vunpack.c.1.s8 %v6749_v31  ;;  %v6709_v38 = vld [vmem:[#allocation4 + $0x280] sm:$0xff] }
 0x6b2   :  { %8130 = vmatpush.bf16.msra.mxu3 %v8025_v62  ;;  %v7925_v36 = vpack.c.bf16 %v7561_v46, %v7557_v55  ;;  %v7685_v28 = vcvt.s32.f32 %v7173_v43  ;;  %v7689_v27 = vcvt.s32.f32 %v7177_v60  ;;  %v7037_v18 = vunpack.c.2.s8 %v6697_v9  ;;  %v6725_v43 = vld [vmem:[#allocation4 + $0x300] sm:$0xff] }
 0x6b3   :  { %v7957_v57 = vpack.c.bf16 %v7625_v5, %v7621_v12  ;;  %v7749_v41 = vcvt.s32.f32 %v7237_v37  ;;  %v7753_v33 = vcvt.s32.f32 %v7241_v26  ;;  %v7041_v63 = vunpack.c.3.s8 %v6697_v9  ;;  %v6741_v26 = vld [vmem:[#allocation4 + $0x380] sm:$0xff] }
 0x6b4   :  { %8092 = vmatpush.bf16.msra.mxu0 %v7925_v36  ;;  %v7989_v17 = vpack.c.bf16 %v7689_v27, %v7685_v28  ;;  %v7549_v13 = vcvt.s32.f32 %v7037_v18  ;;  %v7101_v7 = vunpack.c.2.s8 %v6713_v14  ;;  %v7105_v10 = vunpack.c.3.s8 %v6713_v14 }
 0x6b5   :  { %8105 = vmatpush.bf16.msra.mxu1 %v7957_v57  ;;  %v8021_v16 = vpack.c.bf16 %v7753_v33, %v7749_v41  ;;  %v7553_v4 = vcvt.s32.f32 %v7041_v63  ;;  %v7165_v45 = vunpack.c.2.s8 %v6729_v3  ;;  %v7169_v47 = vunpack.c.3.s8 %v6729_v3 }
 0x6b6   :  { %8118 = vmatpush.bf16.msra.mxu2 %v7989_v17  ;;  %v7613_v22 = vcvt.s32.f32 %v7101_v7  ;;  %v7617_v20 = vcvt.s32.f32 %v7105_v10  ;;  %v7229_v31 = vunpack.c.2.s8 %v6745_v6  ;;  %v7233_v21 = vunpack.c.3.s8 %v6745_v6 }
 0x6b7   :  { %8131 = vmatpush.bf16.msra.mxu3 %v8021_v16  ;;  %v7921_v50 = vpack.c.bf16 %v7553_v4, %v7549_v13  ;;  %v7677_v58 = vcvt.s32.f32 %v7165_v45  ;;  %v7681_v59 = vcvt.s32.f32 %v7169_v47  ;;  %v7029_v51 = vunpack.c.0.s8 %v6697_v9 }
 0x6b8   :  { %v7953_v39 = vpack.c.bf16 %v7617_v20, %v7613_v22  ;;  %v7741_v40 = vcvt.s32.f32 %v7229_v31  ;;  %v7745_v56 = vcvt.s32.f32 %v7233_v21  ;;  %v7033_v23 = vunpack.c.1.s8 %v6697_v9 }
 0x6b9   :  { %8093 = vmatpush.bf16.msra.mxu0 %v7921_v50  ;;  %v7985_v53 = vpack.c.bf16 %v7681_v59, %v7677_v58  ;;  %v7541_v44 = vcvt.s32.f32 %v7029_v51  ;;  %v7093_v8 = vunpack.c.0.s8 %v6713_v14  ;;  %v7097_v25 = vunpack.c.1.s8 %v6713_v14  ;;  %v6642_v58 = vld [vmem:[#allocation4 + $0x68] sm:$0xff] }
 0x6ba   :  { %8106 = vmatpush.bf16.msra.mxu1 %v7953_v39  ;;  %v8017_v11 = vpack.c.bf16 %v7745_v56, %v7741_v40  ;;  %v7545_v52 = vcvt.s32.f32 %v7033_v23  ;;  %v7157_v34 = vunpack.c.0.s8 %v6729_v3  ;;  %v7161_v19 = vunpack.c.1.s8 %v6729_v3 }
 0x6bb   :  { %8119 = vmatpush.bf16.msra.mxu2 %v7985_v53  ;;  %v7605_v42 = vcvt.s32.f32 %v7093_v8  ;;  %v7609_v48 = vcvt.s32.f32 %v7097_v25  ;;  %v7221_v61 = vunpack.c.0.s8 %v6745_v6  ;;  %v7225_v55 = vunpack.c.1.s8 %v6745_v6  ;;  %v6658_v8 = vld [vmem:[#allocation4 + $0xe8] sm:$0xff] }
 0x6bc   :  { %8132 = vmatpush.bf16.msra.mxu3 %v8017_v11  ;;  %v7917_v2 = vpack.c.bf16 %v7545_v52, %v7541_v44  ;;  %v7669_v9 = vcvt.s32.f32 %v7157_v34  ;;  %v7673_v62 = vcvt.s32.f32 %v7161_v19  ;;  %v7021_v46 = vunpack.c.2.s8 %v6693_v24  ;;  %v6674_v34 = vld [vmem:[#allocation4 + $0x168] sm:$0xff] }
 0x6bd   :  { %v7949_v60 = vpack.c.bf16 %v7609_v48, %v7605_v42  ;;  %v7733_v12 = vcvt.s32.f32 %v7221_v61  ;;  %v7737_v5 = vcvt.s32.f32 %v7225_v55  ;;  %v7025_v37 = vunpack.c.3.s8 %v6693_v24  ;;  %v6690_v55 = vld [vmem:[#allocation4 + $0x1e8] sm:$0xff] }
 0x6be   :  { %8094 = vmatpush.bf16.msra.mxu0 %v7917_v2  ;;  %v7981_v14 = vpack.c.bf16 %v7673_v62, %v7669_v9  ;;  %v7533_v36 = vcvt.s32.f32 %v7021_v46  ;;  %v7085_v28 = vunpack.c.2.s8 %v6709_v38  ;;  %v7089_v27 = vunpack.c.3.s8 %v6709_v38 }
 0x6bf   :  { %8107 = vmatpush.bf16.msra.mxu1 %v7949_v60  ;;  %v8013_v18 = vpack.c.bf16 %v7737_v5, %v7733_v12  ;;  %v7537_v3 = vcvt.s32.f32 %v7025_v37  ;;  %v7149_v57 = vunpack.c.2.s8 %v6725_v43  ;;  %v7153_v41 = vunpack.c.3.s8 %v6725_v43 }
 0x6c0   :  { %8120 = vmatpush.bf16.msra.mxu2 %v7981_v14  ;;  %v7597_v33 = vcvt.s32.f32 %v7085_v28  ;;  %v7601_v63 = vcvt.s32.f32 %v7089_v27  ;;  %v7213_v6 = vunpack.c.2.s8 %v6741_v26  ;;  %v7217_v17 = vunpack.c.3.s8 %v6741_v26 }
 0x6c1   :  { %8133 = vmatpush.bf16.msra.mxu3 %v8013_v18  ;;  %v7913_v13 = vpack.c.bf16 %v7537_v3, %v7533_v36  ;;  %v7661_v7 = vcvt.s32.f32 %v7149_v57  ;;  %v7665_v10 = vcvt.s32.f32 %v7153_v41  ;;  %v7013_v16 = vunpack.c.0.s8 %v6693_v24 }
 0x6c2   :  { %v7945_v4 = vpack.c.bf16 %v7601_v63, %v7597_v33  ;;  %v7725_v45 = vcvt.s32.f32 %v7213_v6  ;;  %v7729_v47 = vcvt.s32.f32 %v7217_v17  ;;  %v7017_v22 = vunpack.c.1.s8 %v6693_v24 }
 0x6c3   :  { %8095 = vmatpush.bf16.msra.mxu0 %v7913_v13  ;;  %v7977_v20 = vpack.c.bf16 %v7665_v10, %v7661_v7  ;;  %v7525_v31 = vcvt.s32.f32 %v7013_v16  ;;  %v7077_v21 = vunpack.c.0.s8 %v6709_v38  ;;  %v7081_v50 = vunpack.c.1.s8 %v6709_v38  ;;  %v6638_v7 = vld [vmem:[#allocation4 + $0x48] sm:$0xff] }
 0x6c4   :  { %8108 = vmatpush.bf16.msra.mxu1 %v7945_v4  ;;  %v8009_v59 = vpack.c.bf16 %v7729_v47, %v7725_v45  ;;  %v7529_v51 = vcvt.s32.f32 %v7017_v22  ;;  %v7141_v39 = vunpack.c.0.s8 %v6725_v43  ;;  %v7145_v40 = vunpack.c.1.s8 %v6725_v43 }
 0x6c5   :  { %8121 = vmatpush.bf16.msra.mxu2 %v7977_v20  ;;  %v7589_v56 = vcvt.s32.f32 %v7077_v21  ;;  %v7593_v23 = vcvt.s32.f32 %v7081_v50  ;;  %v7205_v53 = vunpack.c.0.s8 %v6741_v26  ;;  %v7209_v44 = vunpack.c.1.s8 %v6741_v26  ;;  %v6654_v21 = vld [vmem:[#allocation4 + $0xc8] sm:$0xff] }
 0x6c6   :  { %8134 = vmatpush.bf16.msra.mxu3 %v8009_v59  ;;  %v7909_v25 = vpack.c.bf16 %v7529_v51, %v7525_v31  ;;  %v7653_v24 = vcvt.s32.f32 %v7141_v39  ;;  %v7657_v11 = vcvt.s32.f32 %v7145_v40  ;;  %v6814_v52 = vunpack.c.2.s8 %v6642_v58  ;;  %v6670_v39 = vld [vmem:[#allocation4 + $0x148] sm:$0xff] }
 0x6c7   :  { %v7941_v19 = vpack.c.bf16 %v7593_v23, %v7589_v56  ;;  %v7717_v42 = vcvt.s32.f32 %v7205_v53  ;;  %v7721_v48 = vcvt.s32.f32 %v7209_v44  ;;  %v6818_v61 = vunpack.c.3.s8 %v6642_v58  ;;  %v6686_v44 = vld [vmem:[#allocation4 + $0x1c8] sm:$0xff] }
 0x6c8   :  { %8096 = vmatpush.bf16.msra.mxu0 %v7909_v25  ;;  %v7973_v38 = vpack.c.bf16 %v7657_v11, %v7653_v24  ;;  %v7326_v2 = vcvt.s32.f32 %v6814_v52  ;;  %v6878_v9 = vunpack.c.2.s8 %v6658_v8  ;;  %v6882_v62 = vunpack.c.3.s8 %v6658_v8 }
 0x6c9   :  { %8109 = vmatpush.bf16.msra.mxu1 %v7941_v19  ;;  %v8005_v46 = vpack.c.bf16 %v7721_v48, %v7717_v42  ;;  %v7330_v43 = vcvt.s32.f32 %v6818_v61  ;;  %v6942_v60 = vunpack.c.2.s8 %v6674_v34  ;;  %v6946_v12 = vunpack.c.3.s8 %v6674_v34 }
 0x6ca   :  { %8122 = vmatpush.bf16.msra.mxu2 %v7973_v38  ;;  %v7390_v5 = vcvt.s32.f32 %v6878_v9  ;;  %v7394_v37 = vcvt.s32.f32 %v6882_v62  ;;  %v7006_v26 = vunpack.c.2.s8 %v6690_v55  ;;  %v7010_v14 = vunpack.c.3.s8 %v6690_v55 }
 0x6cb   :  { %8135 = vmatpush.bf16.msra.mxu3 %v8005_v46  ;;  %v7810_v36 = vpack.c.bf16 %v7330_v43, %v7326_v2  ;;  %v7454_v28 = vcvt.s32.f32 %v6942_v60  ;;  %v7458_v27 = vcvt.s32.f32 %v6946_v12  ;;  %8097 = vmatmul.bf16.vlgmr.msra.gmra.mxu0 %v10284_v54  ;;  %v6806_v18 = vunpack.c.0.s8 %v6642_v58 }
 0x6cc   :  { %v7842_v3 = vpack.c.bf16 %v7394_v37, %v7390_v5  ;;  %v7518_v57 = vcvt.s32.f32 %v7006_v26  ;;  %v7522_v41 = vcvt.s32.f32 %v7010_v14  ;;  %v6810_v33 = vunpack.c.1.s8 %v6642_v58  ;;  %8110 = vmatmul.bf16.vlgmr.msra.gmra.mxu1 %v10286_v1 }
 0x6cd   :  { %8141 = vmatpush.bf16.msrb.mxu0 %v7810_v36  ;;  %v7874_v63 = vpack.c.bf16 %v7458_v27, %v7454_v28  ;;  %8123 = vmatmul.bf16.vlgmr.msra.gmra.mxu2 %v10288_v32  ;;  %v7318_v6 = vcvt.s32.f32 %v6806_v18  ;;  %v6870_v17 = vunpack.c.0.s8 %v6658_v8  ;;  %v6874_v13 = vunpack.c.1.s8 %v6658_v8  ;;  %v6634_v28 = vld [vmem:[#allocation4 + $0x28] sm:$0xff] }
 0x6ce   :  { %8154 = vmatpush.bf16.msrb.mxu1 %v7842_v3  ;;  %v7906_v10 = vpack.c.bf16 %v7522_v41, %v7518_v57  ;;  %8136 = vmatmul.bf16.vlgmr.msra.gmra.mxu3 %v10290_v0  ;;  %v7322_v16 = vcvt.s32.f32 %v6810_v33  ;;  %v6934_v4 = vunpack.c.0.s8 %v6674_v34  ;;  %v6938_v45 = vunpack.c.1.s8 %v6674_v34 }
 0x6cf   :  { %8167 = vmatpush.bf16.msrb.mxu2 %v7874_v63  ;;  %v7382_v47 = vcvt.s32.f32 %v6870_v17  ;;  %v7386_v22 = vcvt.s32.f32 %v6874_v13  ;;  %v6998_v20 = vunpack.c.0.s8 %v6690_v55  ;;  %v7002_v31 = vunpack.c.1.s8 %v6690_v55  ;;  %v6650_v17 = vld [vmem:[#allocation4 + $0xa8] sm:$0xff] }
 0x6d0   :  { %8180 = vmatpush.bf16.msrb.mxu3 %v7906_v10  ;;  %v7806_v50 = vpack.c.bf16 %v7322_v16, %v7318_v6  ;;  %v7446_v58 = vcvt.s32.f32 %v6934_v4  ;;  %v7450_v59 = vcvt.s32.f32 %v6938_v45  ;;  %v6798_v51 = vunpack.c.2.s8 %v6638_v7  ;;  %v6666_v4 = vld [vmem:[#allocation4 + $0x128] sm:$0xff] }
 0x6d1   :  { %v7838_v40 = vpack.c.bf16 %v7386_v22, %v7382_v47  ;;  %v7510_v56 = vcvt.s32.f32 %v6998_v20  ;;  %v7514_v23 = vcvt.s32.f32 %v7002_v31  ;;  %v6802_v53 = vunpack.c.3.s8 %v6638_v7  ;;  %v6682_v31 = vld [vmem:[#allocation4 + $0x1a8] sm:$0xff] }
 0x6d2   :  { %8142 = vmatpush.bf16.msrb.mxu0 %v7806_v50  ;;  %v7870_v8 = vpack.c.bf16 %v7450_v59, %v7446_v58  ;;  %v7310_v25 = vcvt.s32.f32 %v6798_v51  ;;  %v6862_v24 = vunpack.c.2.s8 %v6654_v21  ;;  %v6866_v11 = vunpack.c.3.s8 %v6654_v21 }
 0x6d3   :  { %8155 = vmatpush.bf16.msrb.mxu1 %v7838_v40  ;;  %v7902_v52 = vpack.c.bf16 %v7514_v23, %v7510_v56  ;;  %v7314_v34 = vcvt.s32.f32 %v6802_v53  ;;  %v6926_v19 = vunpack.c.2.s8 %v6670_v39  ;;  %v6930_v42 = vunpack.c.3.s8 %v6670_v39 }
 0x6d4   :  { %8168 = vmatpush.bf16.msrb.mxu2 %v7870_v8  ;;  %v7374_v48 = vcvt.s32.f32 %v6862_v24  ;;  %v7378_v61 = vcvt.s32.f32 %v6866_v11  ;;  %v6990_v55 = vunpack.c.2.s8 %v6686_v44  ;;  %v6994_v38 = vunpack.c.3.s8 %v6686_v44 }
 0x6d5   :  { %8181 = vmatpush.bf16.msrb.mxu3 %v7902_v52  ;;  %v7802_v2 = vpack.c.bf16 %v7314_v34, %v7310_v25  ;;  %v7438_v9 = vcvt.s32.f32 %v6926_v19  ;;  %v7442_v62 = vcvt.s32.f32 %v6930_v42  ;;  %v6790_v46 = vunpack.c.0.s8 %v6638_v7 }
 0x6d6   :  { %v7834_v43 = vpack.c.bf16 %v7378_v61, %v7374_v48  ;;  %v7502_v60 = vcvt.s32.f32 %v6990_v55  ;;  %v7506_v12 = vcvt.s32.f32 %v6994_v38  ;;  %v6794_v5 = vunpack.c.1.s8 %v6638_v7 }
 0x6d7   :  { %8143 = vmatpush.bf16.msrb.mxu0 %v7802_v2  ;;  %v7866_v37 = vpack.c.bf16 %v7442_v62, %v7438_v9  ;;  %v7302_v26 = vcvt.s32.f32 %v6790_v46  ;;  %v6854_v14 = vunpack.c.0.s8 %v6654_v21  ;;  %v6858_v36 = vunpack.c.1.s8 %v6654_v21  ;;  %v6630_v9 = vld [vmem:[#allocation4 + $0x8] sm:$0xff] }
 0x6d8   :  { %8156 = vmatpush.bf16.msrb.mxu1 %v7834_v43  ;;  %v7898_v27 = vpack.c.bf16 %v7506_v12, %v7502_v60  ;;  %v7306_v18 = vcvt.s32.f32 %v6794_v5  ;;  %v6918_v3 = vunpack.c.0.s8 %v6670_v39  ;;  %v6922_v57 = vunpack.c.1.s8 %v6670_v39 }
 0x6d9   :  { %8169 = vmatpush.bf16.msrb.mxu2 %v7866_v37  ;;  %v7366_v41 = vcvt.s32.f32 %v6854_v14  ;;  %v7370_v33 = vcvt.s32.f32 %v6858_v36  ;;  %v6982_v63 = vunpack.c.0.s8 %v6686_v44  ;;  %v6986_v6 = vunpack.c.1.s8 %v6686_v44  ;;  %v6646_v14 = vld [vmem:[#allocation4 + $0x88] sm:$0xff] }
 0x6da   :  { %8182 = vmatpush.bf16.msrb.mxu3 %v7898_v27  ;;  %v7798_v13 = vpack.c.bf16 %v7306_v18, %v7302_v26  ;;  %v7430_v7 = vcvt.s32.f32 %v6918_v3  ;;  %v7434_v10 = vcvt.s32.f32 %v6922_v57  ;;  %v6782_v16 = vunpack.c.2.s8 %v6634_v28  ;;  %v6662_v3 = vld [vmem:[#allocation4 + $0x108] sm:$0xff] }
 0x6db   :  { %v7830_v45 = vpack.c.bf16 %v7370_v33, %v7366_v41  ;;  %v7494_v47 = vcvt.s32.f32 %v6982_v63  ;;  %v7498_v22 = vcvt.s32.f32 %v6986_v6  ;;  %v6786_v20 = vunpack.c.3.s8 %v6634_v28  ;;  %v6678_v6 = vld [vmem:[#allocation4 + $0x188] sm:$0xff] }
 0x6dc   :  { %8144 = vmatpush.bf16.msrb.mxu0 %v7798_v13  ;;  %v7862_v21 = vpack.c.bf16 %v7434_v10, %v7430_v7  ;;  %v7294_v50 = vcvt.s32.f32 %v6782_v16  ;;  %v6846_v58 = vunpack.c.2.s8 %v6650_v17  ;;  %v6850_v59 = vunpack.c.3.s8 %v6650_v17 }
 0x6dd   :  { %8157 = vmatpush.bf16.msrb.mxu1 %v7830_v45  ;;  %v7894_v51 = vpack.c.bf16 %v7498_v22, %v7494_v47  ;;  %v7298_v39 = vcvt.s32.f32 %v6786_v20  ;;  %v6910_v40 = vunpack.c.2.s8 %v6666_v4  ;;  %v6914_v56 = vunpack.c.3.s8 %v6666_v4 }
 0x6de   :  { %8170 = vmatpush.bf16.msrb.mxu2 %v7862_v21  ;;  %v7358_v23 = vcvt.s32.f32 %v6846_v58  ;;  %v7362_v53 = vcvt.s32.f32 %v6850_v59  ;;  %v6974_v44 = vunpack.c.2.s8 %v6682_v31  ;;  %v6978_v8 = vunpack.c.3.s8 %v6682_v31 }
 0x6df   :  { %8183 = vmatpush.bf16.msrb.mxu3 %v7894_v51  ;;  %v7794_v25 = vpack.c.bf16 %v7298_v39, %v7294_v50  ;;  %v7422_v24 = vcvt.s32.f32 %v6910_v40  ;;  %v7426_v11 = vcvt.s32.f32 %v6914_v56  ;;  %v6774_v52 = vunpack.c.0.s8 %v6634_v28 }
 0x6e0   :  { %v7826_v34 = vpack.c.bf16 %v7362_v53, %v7358_v23  ;;  %v7486_v19 = vcvt.s32.f32 %v6974_v44  ;;  %v7490_v42 = vcvt.s32.f32 %v6978_v8  ;;  %v6778_v48 = vunpack.c.1.s8 %v6634_v28 }
 0x6e1   :  { %8145 = vmatpush.bf16.msrb.mxu0 %v7794_v25  ;;  %v7858_v61 = vpack.c.bf16 %v7426_v11, %v7422_v24  ;;  %v7286_v55 = vcvt.s32.f32 %v6774_v52  ;;  %v6838_v38 = vunpack.c.0.s8 %v6650_v17  ;;  %v6842_v2 = vunpack.c.1.s8 %v6650_v17  ;;  %v6706_v24 = vld [vmem:[#allocation4 + $0x268] sm:$0xff] }
 0x6e2   :  { %8158 = vmatpush.bf16.msrb.mxu1 %v7826_v34  ;;  %v7890_v62 = vpack.c.bf16 %v7490_v42, %v7486_v19  ;;  %v7290_v46 = vcvt.s32.f32 %v6778_v48  ;;  %v6902_v43 = vunpack.c.0.s8 %v6666_v4  ;;  %v6906_v60 = vunpack.c.1.s8 %v6666_v4 }
 0x6e3   :  { %8171 = vmatpush.bf16.msrb.mxu2 %v7858_v61  ;;  %v7350_v12 = vcvt.s32.f32 %v6838_v38  ;;  %v7354_v5 = vcvt.s32.f32 %v6842_v2  ;;  %v6966_v37 = vunpack.c.0.s8 %v6682_v31  ;;  %v6970_v26 = vunpack.c.1.s8 %v6682_v31  ;;  %v6722_v38 = vld [vmem:[#allocation4 + $0x2e8] sm:$0xff] }
 0x6e4   :  { %8184 = vmatpush.bf16.msrb.mxu3 %v7890_v62  ;;  %v7790_v36 = vpack.c.bf16 %v7290_v46, %v7286_v55  ;;  %v7414_v28 = vcvt.s32.f32 %v6902_v43  ;;  %v7418_v27 = vcvt.s32.f32 %v6906_v60  ;;  %v6766_v18 = vunpack.c.2.s8 %v6630_v9  ;;  %v6738_v43 = vld [vmem:[#allocation4 + $0x368] sm:$0xff] }
 0x6e5   :  { %v7822_v57 = vpack.c.bf16 %v7354_v5, %v7350_v12  ;;  %v7478_v41 = vcvt.s32.f32 %v6966_v37  ;;  %v7482_v33 = vcvt.s32.f32 %v6970_v26  ;;  %v6770_v63 = vunpack.c.3.s8 %v6630_v9  ;;  %v6754_v26 = vld [vmem:[#allocation4 + $0x3e8] sm:$0xff] }
 0x6e6   :  { %8146 = vmatpush.bf16.msrb.mxu0 %v7790_v36  ;;  %v7854_v17 = vpack.c.bf16 %v7418_v27, %v7414_v28  ;;  %v7278_v13 = vcvt.s32.f32 %v6766_v18  ;;  %v6830_v7 = vunpack.c.2.s8 %v6646_v14  ;;  %v6834_v10 = vunpack.c.3.s8 %v6646_v14 }
 0x6e7   :  { %8159 = vmatpush.bf16.msrb.mxu1 %v7822_v57  ;;  %v7886_v16 = vpack.c.bf16 %v7482_v33, %v7478_v41  ;;  %v7282_v4 = vcvt.s32.f32 %v6770_v63  ;;  %v6894_v45 = vunpack.c.2.s8 %v6662_v3  ;;  %v6898_v47 = vunpack.c.3.s8 %v6662_v3 }
 0x6e8   :  { %8172 = vmatpush.bf16.msrb.mxu2 %v7854_v17  ;;  %v7342_v22 = vcvt.s32.f32 %v6830_v7  ;;  %v7346_v20 = vcvt.s32.f32 %v6834_v10  ;;  %v6958_v31 = vunpack.c.2.s8 %v6678_v6  ;;  %v6962_v21 = vunpack.c.3.s8 %v6678_v6 }
 0x6e9   :  { %8185 = vmatpush.bf16.msrb.mxu3 %v7886_v16  ;;  %v7786_v50 = vpack.c.bf16 %v7282_v4, %v7278_v13  ;;  %v7406_v58 = vcvt.s32.f32 %v6894_v45  ;;  %v7410_v59 = vcvt.s32.f32 %v6898_v47  ;;  %v6758_v51 = vunpack.c.0.s8 %v6630_v9 }
 0x6ea   :  { %v7818_v39 = vpack.c.bf16 %v7346_v20, %v7342_v22  ;;  %v7470_v40 = vcvt.s32.f32 %v6958_v31  ;;  %v7474_v56 = vcvt.s32.f32 %v6962_v21  ;;  %v6762_v23 = vunpack.c.1.s8 %v6630_v9 }
 0x6eb   :  { %8147 = vmatpush.bf16.msrb.mxu0 %v7786_v50  ;;  %v7850_v53 = vpack.c.bf16 %v7410_v59, %v7406_v58  ;;  %v7270_v44 = vcvt.s32.f32 %v6758_v51  ;;  %v6822_v8 = vunpack.c.0.s8 %v6646_v14  ;;  %v6826_v25 = vunpack.c.1.s8 %v6646_v14  ;;  %v6702_v58 = vld [vmem:[#allocation4 + $0x248] sm:$0xff] }
 0x6ec   :  { %8160 = vmatpush.bf16.msrb.mxu1 %v7818_v39  ;;  %v7882_v11 = vpack.c.bf16 %v7474_v56, %v7470_v40  ;;  %v7274_v52 = vcvt.s32.f32 %v6762_v23  ;;  %v6886_v34 = vunpack.c.0.s8 %v6662_v3  ;;  %v6890_v19 = vunpack.c.1.s8 %v6662_v3 }
 0x6ed   :  { %8173 = vmatpush.bf16.msrb.mxu2 %v7850_v53  ;;  %v7334_v42 = vcvt.s32.f32 %v6822_v8  ;;  %v7338_v48 = vcvt.s32.f32 %v6826_v25  ;;  %v6950_v61 = vunpack.c.0.s8 %v6678_v6  ;;  %v6954_v55 = vunpack.c.1.s8 %v6678_v6  ;;  %v6718_v8 = vld [vmem:[#allocation4 + $0x2c8] sm:$0xff] }
 0x6ee   :  { %8186 = vmatpush.bf16.msrb.mxu3 %v7882_v11  ;;  %v7782_v2 = vpack.c.bf16 %v7274_v52, %v7270_v44  ;;  %v7398_v9 = vcvt.s32.f32 %v6886_v34  ;;  %v7402_v62 = vcvt.s32.f32 %v6890_v19  ;;  %v7070_v46 = vunpack.c.2.s8 %v6706_v24  ;;  %v6734_v34 = vld [vmem:[#allocation4 + $0x348] sm:$0xff] }
 0x6ef   :  { %v7814_v60 = vpack.c.bf16 %v7338_v48, %v7334_v42  ;;  %v7462_v12 = vcvt.s32.f32 %v6950_v61  ;;  %v7466_v5 = vcvt.s32.f32 %v6954_v55  ;;  %v7074_v37 = vunpack.c.3.s8 %v6706_v24  ;;  %v6750_v55 = vld [vmem:[#allocation4 + $0x3c8] sm:$0xff] }
 0x6f0   :  { %8148 = vmatpush.bf16.msrb.mxu0 %v7782_v2  ;;  %v7846_v14 = vpack.c.bf16 %v7402_v62, %v7398_v9  ;;  %v7582_v36 = vcvt.s32.f32 %v7070_v46  ;;  %v7134_v28 = vunpack.c.2.s8 %v6722_v38  ;;  %v7138_v27 = vunpack.c.3.s8 %v6722_v38 }
 0x6f1   :  { %8161 = vmatpush.bf16.msrb.mxu1 %v7814_v60  ;;  %v7878_v18 = vpack.c.bf16 %v7466_v5, %v7462_v12  ;;  %v7586_v3 = vcvt.s32.f32 %v7074_v37  ;;  %v7198_v57 = vunpack.c.2.s8 %v6738_v43  ;;  %v7202_v41 = vunpack.c.3.s8 %v6738_v43 }
 0x6f2   :  { %8174 = vmatpush.bf16.msrb.mxu2 %v7846_v14  ;;  %v7646_v33 = vcvt.s32.f32 %v7134_v28  ;;  %v7650_v63 = vcvt.s32.f32 %v7138_v27  ;;  %v7262_v6 = vunpack.c.2.s8 %v6754_v26  ;;  %v7266_v17 = vunpack.c.3.s8 %v6754_v26 }
 0x6f3   :  { %8187 = vmatpush.bf16.msrb.mxu3 %v7878_v18  ;;  %v7938_v13 = vpack.c.bf16 %v7586_v3, %v7582_v36  ;;  %v7710_v7 = vcvt.s32.f32 %v7198_v57  ;;  %v7714_v10 = vcvt.s32.f32 %v7202_v41  ;;  %v7062_v16 = vunpack.c.0.s8 %v6706_v24  ;;  %8149 = vmatmul.bf16.vlgmr.msrb.gmra.mxu0 %v10276_v15 }
 0x6f4   :  { %v7970_v4 = vpack.c.bf16 %v7650_v63, %v7646_v33  ;;  %v7774_v45 = vcvt.s32.f32 %v7262_v6  ;;  %v7778_v47 = vcvt.s32.f32 %v7266_v17  ;;  %v7066_v22 = vunpack.c.1.s8 %v6706_v24  ;;  %8162 = vmatmul.bf16.vlgmr.msrb.gmra.mxu1 %v10278_v35 }
 0x6f5   :  { %8193 = vmatpush.bf16.msra.mxu0 %v7938_v13  ;;  %v8002_v20 = vpack.c.bf16 %v7714_v10, %v7710_v7  ;;  %v7574_v31 = vcvt.s32.f32 %v7062_v16  ;;  %v7126_v21 = vunpack.c.0.s8 %v6722_v38  ;;  %v7130_v50 = vunpack.c.1.s8 %v6722_v38  ;;  %8175 = vmatmul.bf16.vlgmr.msrb.gmra.mxu2 %v10280_v29  ;;  %v6698_v7 = vld [vmem:[#allocation4 + $0x228] sm:$0xff] }
 0x6f6   :  { %8206 = vmatpush.bf16.msra.mxu1 %v7970_v4  ;;  %v8034_v59 = vpack.c.bf16 %v7778_v47, %v7774_v45  ;;  %v7578_v51 = vcvt.s32.f32 %v7066_v22  ;;  %v7190_v39 = vunpack.c.0.s8 %v6738_v43  ;;  %v7194_v40 = vunpack.c.1.s8 %v6738_v43  ;;  %8188 = vmatmul.bf16.vlgmr.msrb.gmra.mxu3 %v10282_v30 }
 0x6f7   :  { %8219 = vmatpush.bf16.msra.mxu2 %v8002_v20  ;;  %v7638_v56 = vcvt.s32.f32 %v7126_v21  ;;  %v7642_v23 = vcvt.s32.f32 %v7130_v50  ;;  %v7254_v53 = vunpack.c.0.s8 %v6754_v26  ;;  %v7258_v44 = vunpack.c.1.s8 %v6754_v26  ;;  %v6714_v21 = vld [vmem:[#allocation4 + $0x2a8] sm:$0xff] }
 0x6f8   :  { %8232 = vmatpush.bf16.msra.mxu3 %v8034_v59  ;;  %v7934_v25 = vpack.c.bf16 %v7578_v51, %v7574_v31  ;;  %v7702_v24 = vcvt.s32.f32 %v7190_v39  ;;  %v7706_v11 = vcvt.s32.f32 %v7194_v40  ;;  %v7054_v52 = vunpack.c.2.s8 %v6702_v58  ;;  %v6730_v39 = vld [vmem:[#allocation4 + $0x328] sm:$0xff] }
 0x6f9   :  { %v7966_v19 = vpack.c.bf16 %v7642_v23, %v7638_v56  ;;  %v7766_v42 = vcvt.s32.f32 %v7254_v53  ;;  %v7770_v48 = vcvt.s32.f32 %v7258_v44  ;;  %v7058_v61 = vunpack.c.3.s8 %v6702_v58  ;;  %v6746_v44 = vld [vmem:[#allocation4 + $0x3a8] sm:$0xff] }
 0x6fa   :  { %8194 = vmatpush.bf16.msra.mxu0 %v7934_v25  ;;  %v7998_v38 = vpack.c.bf16 %v7706_v11, %v7702_v24  ;;  %v7566_v2 = vcvt.s32.f32 %v7054_v52  ;;  %v7118_v9 = vunpack.c.2.s8 %v6718_v8  ;;  %v7122_v62 = vunpack.c.3.s8 %v6718_v8 }
 0x6fb   :  { %8207 = vmatpush.bf16.msra.mxu1 %v7966_v19  ;;  %v8030_v46 = vpack.c.bf16 %v7770_v48, %v7766_v42  ;;  %v7570_v43 = vcvt.s32.f32 %v7058_v61  ;;  %v7182_v60 = vunpack.c.2.s8 %v6734_v34  ;;  %v7186_v12 = vunpack.c.3.s8 %v6734_v34 }
 0x6fc   :  { %8220 = vmatpush.bf16.msra.mxu2 %v7998_v38  ;;  %v7630_v5 = vcvt.s32.f32 %v7118_v9  ;;  %v7634_v37 = vcvt.s32.f32 %v7122_v62  ;;  %v7246_v26 = vunpack.c.2.s8 %v6750_v55  ;;  %v7250_v14 = vunpack.c.3.s8 %v6750_v55 }
 0x6fd   :  { %8233 = vmatpush.bf16.msra.mxu3 %v8030_v46  ;;  %v7930_v36 = vpack.c.bf16 %v7570_v43, %v7566_v2  ;;  %v7694_v28 = vcvt.s32.f32 %v7182_v60  ;;  %v7698_v27 = vcvt.s32.f32 %v7186_v12  ;;  %v7046_v18 = vunpack.c.0.s8 %v6702_v58 }
 0x6fe   :  { %v7962_v3 = vpack.c.bf16 %v7634_v37, %v7630_v5  ;;  %v7758_v57 = vcvt.s32.f32 %v7246_v26  ;;  %v7762_v41 = vcvt.s32.f32 %v7250_v14  ;;  %v7050_v33 = vunpack.c.1.s8 %v6702_v58 }
 0x6ff   :  { %8195 = vmatpush.bf16.msra.mxu0 %v7930_v36  ;;  %v7994_v63 = vpack.c.bf16 %v7698_v27, %v7694_v28  ;;  %v7558_v6 = vcvt.s32.f32 %v7046_v18  ;;  %v7110_v17 = vunpack.c.0.s8 %v6718_v8  ;;  %v7114_v13 = vunpack.c.1.s8 %v6718_v8  ;;  %v6694_v28 = vld [vmem:[#allocation4 + $0x208] sm:$0xff] }
 0x700   :  { %8208 = vmatpush.bf16.msra.mxu1 %v7962_v3  ;;  %v8026_v10 = vpack.c.bf16 %v7762_v41, %v7758_v57  ;;  %v7562_v16 = vcvt.s32.f32 %v7050_v33  ;;  %v7174_v4 = vunpack.c.0.s8 %v6734_v34  ;;  %v7178_v45 = vunpack.c.1.s8 %v6734_v34 }
 0x701   :  { %8221 = vmatpush.bf16.msra.mxu2 %v7994_v63  ;;  %v7622_v47 = vcvt.s32.f32 %v7110_v17  ;;  %v7626_v22 = vcvt.s32.f32 %v7114_v13  ;;  %v7238_v20 = vunpack.c.0.s8 %v6750_v55  ;;  %v7242_v31 = vunpack.c.1.s8 %v6750_v55  ;;  %v6710_v17 = vld [vmem:[#allocation4 + $0x288] sm:$0xff] }
 0x702   :  { %8234 = vmatpush.bf16.msra.mxu3 %v8026_v10  ;;  %v7926_v50 = vpack.c.bf16 %v7562_v16, %v7558_v6  ;;  %v7686_v58 = vcvt.s32.f32 %v7174_v4  ;;  %v7690_v59 = vcvt.s32.f32 %v7178_v45  ;;  %v7038_v51 = vunpack.c.2.s8 %v6698_v7  ;;  %v6726_v4 = vld [vmem:[#allocation4 + $0x308] sm:$0xff] }
 0x703   :  { %v7958_v40 = vpack.c.bf16 %v7626_v22, %v7622_v47  ;;  %v7750_v56 = vcvt.s32.f32 %v7238_v20  ;;  %v7754_v23 = vcvt.s32.f32 %v7242_v31  ;;  %v7042_v53 = vunpack.c.3.s8 %v6698_v7  ;;  %v6742_v31 = vld [vmem:[#allocation4 + $0x388] sm:$0xff] }
 0x704   :  { %8196 = vmatpush.bf16.msra.mxu0 %v7926_v50  ;;  %v7990_v8 = vpack.c.bf16 %v7690_v59, %v7686_v58  ;;  %v7550_v25 = vcvt.s32.f32 %v7038_v51  ;;  %v7102_v24 = vunpack.c.2.s8 %v6714_v21  ;;  %v7106_v11 = vunpack.c.3.s8 %v6714_v21 }
 0x705   :  { %8209 = vmatpush.bf16.msra.mxu1 %v7958_v40  ;;  %v8022_v52 = vpack.c.bf16 %v7754_v23, %v7750_v56  ;;  %v7554_v34 = vcvt.s32.f32 %v7042_v53  ;;  %v7166_v19 = vunpack.c.2.s8 %v6730_v39  ;;  %v7170_v42 = vunpack.c.3.s8 %v6730_v39 }
 0x706   :  { %8222 = vmatpush.bf16.msra.mxu2 %v7990_v8  ;;  %v7614_v48 = vcvt.s32.f32 %v7102_v24  ;;  %v7618_v61 = vcvt.s32.f32 %v7106_v11  ;;  %v7230_v55 = vunpack.c.2.s8 %v6746_v44  ;;  %v7234_v38 = vunpack.c.3.s8 %v6746_v44 }
 0x707   :  { %8235 = vmatpush.bf16.msra.mxu3 %v8022_v52  ;;  %v7922_v2 = vpack.c.bf16 %v7554_v34, %v7550_v25  ;;  %v7678_v9 = vcvt.s32.f32 %v7166_v19  ;;  %v7682_v62 = vcvt.s32.f32 %v7170_v42  ;;  %v7030_v46 = vunpack.c.0.s8 %v6698_v7 }
 0x708   :  { %v7954_v43 = vpack.c.bf16 %v7618_v61, %v7614_v48  ;;  %v7742_v60 = vcvt.s32.f32 %v7230_v55  ;;  %v7746_v12 = vcvt.s32.f32 %v7234_v38  ;;  %v7034_v5 = vunpack.c.1.s8 %v6698_v7 }
 0x709   :  { %8197 = vmatpush.bf16.msra.mxu0 %v7922_v2  ;;  %v7986_v37 = vpack.c.bf16 %v7682_v62, %v7678_v9  ;;  %v7542_v26 = vcvt.s32.f32 %v7030_v46  ;;  %v7094_v14 = vunpack.c.0.s8 %v6714_v21  ;;  %v7098_v36 = vunpack.c.1.s8 %v6714_v21  ;;  %v6643_v9 = vld [vmem:[#allocation4 + $0x70] sm:$0xff] }
 0x70a   :  { %8210 = vmatpush.bf16.msra.mxu1 %v7954_v43  ;;  %v8018_v27 = vpack.c.bf16 %v7746_v12, %v7742_v60  ;;  %v7546_v18 = vcvt.s32.f32 %v7034_v5  ;;  %v7158_v3 = vunpack.c.0.s8 %v6730_v39  ;;  %v7162_v57 = vunpack.c.1.s8 %v6730_v39 }
 0x70b   :  { %8223 = vmatpush.bf16.msra.mxu2 %v7986_v37  ;;  %v7606_v41 = vcvt.s32.f32 %v7094_v14  ;;  %v7610_v33 = vcvt.s32.f32 %v7098_v36  ;;  %v7222_v63 = vunpack.c.0.s8 %v6746_v44  ;;  %v7226_v6 = vunpack.c.1.s8 %v6746_v44  ;;  %v6659_v14 = vld [vmem:[#allocation4 + $0xf0] sm:$0xff] }
 0x70c   :  { %8236 = vmatpush.bf16.msra.mxu3 %v8018_v27  ;;  %v7918_v13 = vpack.c.bf16 %v7546_v18, %v7542_v26  ;;  %v7670_v7 = vcvt.s32.f32 %v7158_v3  ;;  %v7674_v10 = vcvt.s32.f32 %v7162_v57  ;;  %v7022_v16 = vunpack.c.2.s8 %v6694_v28  ;;  %v6675_v3 = vld [vmem:[#allocation4 + $0x170] sm:$0xff] }
 0x70d   :  { %v7950_v45 = vpack.c.bf16 %v7610_v33, %v7606_v41  ;;  %v7734_v47 = vcvt.s32.f32 %v7222_v63  ;;  %v7738_v22 = vcvt.s32.f32 %v7226_v6  ;;  %v7026_v20 = vunpack.c.3.s8 %v6694_v28  ;;  %v6691_v6 = vld [vmem:[#allocation4 + $0x1f0] sm:$0xff] }
 0x70e   :  { %8198 = vmatpush.bf16.msra.mxu0 %v7918_v13  ;;  %v7982_v21 = vpack.c.bf16 %v7674_v10, %v7670_v7  ;;  %v7534_v50 = vcvt.s32.f32 %v7022_v16  ;;  %v7086_v58 = vunpack.c.2.s8 %v6710_v17  ;;  %v7090_v59 = vunpack.c.3.s8 %v6710_v17 }
 0x70f   :  { %8211 = vmatpush.bf16.msra.mxu1 %v7950_v45  ;;  %v8014_v51 = vpack.c.bf16 %v7738_v22, %v7734_v47  ;;  %v7538_v39 = vcvt.s32.f32 %v7026_v20  ;;  %v7150_v40 = vunpack.c.2.s8 %v6726_v4  ;;  %v7154_v56 = vunpack.c.3.s8 %v6726_v4 }
 0x710   :  { %8224 = vmatpush.bf16.msra.mxu2 %v7982_v21  ;;  %v7598_v23 = vcvt.s32.f32 %v7086_v58  ;;  %v7602_v53 = vcvt.s32.f32 %v7090_v59  ;;  %v7214_v44 = vunpack.c.2.s8 %v6742_v31  ;;  %v7218_v8 = vunpack.c.3.s8 %v6742_v31 }
 0x711   :  { %8237 = vmatpush.bf16.msra.mxu3 %v8014_v51  ;;  %v7914_v25 = vpack.c.bf16 %v7538_v39, %v7534_v50  ;;  %v7662_v24 = vcvt.s32.f32 %v7150_v40  ;;  %v7666_v11 = vcvt.s32.f32 %v7154_v56  ;;  %v7014_v52 = vunpack.c.0.s8 %v6694_v28 }
 0x712   :  { %v7946_v34 = vpack.c.bf16 %v7602_v53, %v7598_v23  ;;  %v7726_v19 = vcvt.s32.f32 %v7214_v44  ;;  %v7730_v42 = vcvt.s32.f32 %v7218_v8  ;;  %v7018_v48 = vunpack.c.1.s8 %v6694_v28 }
 0x713   :  { %8199 = vmatpush.bf16.msra.mxu0 %v7914_v25  ;;  %v7978_v61 = vpack.c.bf16 %v7666_v11, %v7662_v24  ;;  %v7526_v55 = vcvt.s32.f32 %v7014_v52  ;;  %v7078_v38 = vunpack.c.0.s8 %v6710_v17  ;;  %v7082_v2 = vunpack.c.1.s8 %v6710_v17  ;;  %v6639_v24 = vld [vmem:[#allocation4 + $0x50] sm:$0xff] }
 0x714   :  { %8212 = vmatpush.bf16.msra.mxu1 %v7946_v34  ;;  %v8010_v62 = vpack.c.bf16 %v7730_v42, %v7726_v19  ;;  %v7530_v46 = vcvt.s32.f32 %v7018_v48  ;;  %v7142_v43 = vunpack.c.0.s8 %v6726_v4  ;;  %v7146_v60 = vunpack.c.1.s8 %v6726_v4 }
 0x715   :  { %8225 = vmatpush.bf16.msra.mxu2 %v7978_v61  ;;  %v7590_v12 = vcvt.s32.f32 %v7078_v38  ;;  %v7594_v5 = vcvt.s32.f32 %v7082_v2  ;;  %v7206_v37 = vunpack.c.0.s8 %v6742_v31  ;;  %v7210_v26 = vunpack.c.1.s8 %v6742_v31  ;;  %v6655_v38 = vld [vmem:[#allocation4 + $0xd0] sm:$0xff] }
 0x716   :  { %8238 = vmatpush.bf16.msra.mxu3 %v8010_v62  ;;  %v7910_v36 = vpack.c.bf16 %v7530_v46, %v7526_v55  ;;  %v7654_v28 = vcvt.s32.f32 %v7142_v43  ;;  %v7658_v27 = vcvt.s32.f32 %v7146_v60  ;;  %v6815_v18 = vunpack.c.2.s8 %v6643_v9  ;;  %v6671_v43 = vld [vmem:[#allocation4 + $0x150] sm:$0xff] }
 0x717   :  { %v7942_v57 = vpack.c.bf16 %v7594_v5, %v7590_v12  ;;  %v7718_v41 = vcvt.s32.f32 %v7206_v37  ;;  %v7722_v33 = vcvt.s32.f32 %v7210_v26  ;;  %v6819_v63 = vunpack.c.3.s8 %v6643_v9  ;;  %v6687_v26 = vld [vmem:[#allocation4 + $0x1d0] sm:$0xff] }
 0x718   :  { %8200 = vmatpush.bf16.msra.mxu0 %v7910_v36  ;;  %v7974_v17 = vpack.c.bf16 %v7658_v27, %v7654_v28  ;;  %v7327_v13 = vcvt.s32.f32 %v6815_v18  ;;  %v6879_v7 = vunpack.c.2.s8 %v6659_v14  ;;  %v6883_v10 = vunpack.c.3.s8 %v6659_v14 }
 0x719   :  { %8213 = vmatpush.bf16.msra.mxu1 %v7942_v57  ;;  %v8006_v16 = vpack.c.bf16 %v7722_v33, %v7718_v41  ;;  %v7331_v4 = vcvt.s32.f32 %v6819_v63  ;;  %v6943_v45 = vunpack.c.2.s8 %v6675_v3  ;;  %v6947_v47 = vunpack.c.3.s8 %v6675_v3 }
 0x71a   :  { %8226 = vmatpush.bf16.msra.mxu2 %v7974_v17  ;;  %v7391_v22 = vcvt.s32.f32 %v6879_v7  ;;  %v7395_v20 = vcvt.s32.f32 %v6883_v10  ;;  %v7007_v31 = vunpack.c.2.s8 %v6691_v6  ;;  %v7011_v21 = vunpack.c.3.s8 %v6691_v6 }
 0x71b   :  { %8239 = vmatpush.bf16.msra.mxu3 %v8006_v16  ;;  %v7811_v50 = vpack.c.bf16 %v7331_v4, %v7327_v13  ;;  %v7455_v58 = vcvt.s32.f32 %v6943_v45  ;;  %v7459_v59 = vcvt.s32.f32 %v6947_v47  ;;  %8201 = vmatmul.bf16.vlgmr.msra.gmra.mxu0 %v10284_v54  ;;  %v6807_v51 = vunpack.c.0.s8 %v6643_v9 }
 0x71c   :  { %v7843_v39 = vpack.c.bf16 %v7395_v20, %v7391_v22  ;;  %v7519_v40 = vcvt.s32.f32 %v7007_v31  ;;  %v7523_v56 = vcvt.s32.f32 %v7011_v21  ;;  %v6811_v23 = vunpack.c.1.s8 %v6643_v9  ;;  %8214 = vmatmul.bf16.vlgmr.msra.gmra.mxu1 %v10286_v1 }
 0x71d   :  { %8245 = vmatpush.bf16.msrb.mxu0 %v7811_v50  ;;  %v7875_v53 = vpack.c.bf16 %v7459_v59, %v7455_v58  ;;  %8227 = vmatmul.bf16.vlgmr.msra.gmra.mxu2 %v10288_v32  ;;  %v7319_v44 = vcvt.s32.f32 %v6807_v51  ;;  %v6871_v8 = vunpack.c.0.s8 %v6659_v14  ;;  %v6875_v25 = vunpack.c.1.s8 %v6659_v14  ;;  %v6635_v58 = vld [vmem:[#allocation4 + $0x30] sm:$0xff] }
 0x71e   :  { %8258 = vmatpush.bf16.msrb.mxu1 %v7843_v39  ;;  %v7907_v11 = vpack.c.bf16 %v7523_v56, %v7519_v40  ;;  %8240 = vmatmul.bf16.vlgmr.msra.gmra.mxu3 %v10290_v0  ;;  %v7323_v52 = vcvt.s32.f32 %v6811_v23  ;;  %v6935_v34 = vunpack.c.0.s8 %v6675_v3  ;;  %v6939_v19 = vunpack.c.1.s8 %v6675_v3 }
 0x71f   :  { %8271 = vmatpush.bf16.msrb.mxu2 %v7875_v53  ;;  %v7383_v42 = vcvt.s32.f32 %v6871_v8  ;;  %v7387_v48 = vcvt.s32.f32 %v6875_v25  ;;  %v6999_v61 = vunpack.c.0.s8 %v6691_v6  ;;  %v7003_v55 = vunpack.c.1.s8 %v6691_v6  ;;  %v6651_v8 = vld [vmem:[#allocation4 + $0xb0] sm:$0xff] }
 0x720   :  { %8284 = vmatpush.bf16.msrb.mxu3 %v7907_v11  ;;  %v7807_v2 = vpack.c.bf16 %v7323_v52, %v7319_v44  ;;  %v7447_v9 = vcvt.s32.f32 %v6935_v34  ;;  %v7451_v62 = vcvt.s32.f32 %v6939_v19  ;;  %v6799_v46 = vunpack.c.2.s8 %v6639_v24  ;;  %v6667_v34 = vld [vmem:[#allocation4 + $0x130] sm:$0xff] }
 0x721   :  { %v7839_v60 = vpack.c.bf16 %v7387_v48, %v7383_v42  ;;  %v7511_v12 = vcvt.s32.f32 %v6999_v61  ;;  %v7515_v5 = vcvt.s32.f32 %v7003_v55  ;;  %v6803_v37 = vunpack.c.3.s8 %v6639_v24  ;;  %v6683_v55 = vld [vmem:[#allocation4 + $0x1b0] sm:$0xff] }
 0x722   :  { %8246 = vmatpush.bf16.msrb.mxu0 %v7807_v2  ;;  %v7871_v14 = vpack.c.bf16 %v7451_v62, %v7447_v9  ;;  %v7311_v36 = vcvt.s32.f32 %v6799_v46  ;;  %v6863_v28 = vunpack.c.2.s8 %v6655_v38  ;;  %v6867_v27 = vunpack.c.3.s8 %v6655_v38 }
 0x723   :  { %8259 = vmatpush.bf16.msrb.mxu1 %v7839_v60  ;;  %v7903_v18 = vpack.c.bf16 %v7515_v5, %v7511_v12  ;;  %v7315_v3 = vcvt.s32.f32 %v6803_v37  ;;  %v6927_v57 = vunpack.c.2.s8 %v6671_v43  ;;  %v6931_v41 = vunpack.c.3.s8 %v6671_v43 }
 0x724   :  { %8272 = vmatpush.bf16.msrb.mxu2 %v7871_v14  ;;  %v7375_v33 = vcvt.s32.f32 %v6863_v28  ;;  %v7379_v63 = vcvt.s32.f32 %v6867_v27  ;;  %v6991_v6 = vunpack.c.2.s8 %v6687_v26  ;;  %v6995_v17 = vunpack.c.3.s8 %v6687_v26 }
 0x725   :  { %8285 = vmatpush.bf16.msrb.mxu3 %v7903_v18  ;;  %v7803_v13 = vpack.c.bf16 %v7315_v3, %v7311_v36  ;;  %v7439_v7 = vcvt.s32.f32 %v6927_v57  ;;  %v7443_v10 = vcvt.s32.f32 %v6931_v41  ;;  %v6791_v16 = vunpack.c.0.s8 %v6639_v24 }
 0x726   :  { %v7835_v4 = vpack.c.bf16 %v7379_v63, %v7375_v33  ;;  %v7503_v45 = vcvt.s32.f32 %v6991_v6  ;;  %v7507_v47 = vcvt.s32.f32 %v6995_v17  ;;  %v6795_v22 = vunpack.c.1.s8 %v6639_v24 }
 0x727   :  { %8247 = vmatpush.bf16.msrb.mxu0 %v7803_v13  ;;  %v7867_v20 = vpack.c.bf16 %v7443_v10, %v7439_v7  ;;  %v7303_v31 = vcvt.s32.f32 %v6791_v16  ;;  %v6855_v21 = vunpack.c.0.s8 %v6655_v38  ;;  %v6859_v50 = vunpack.c.1.s8 %v6655_v38  ;;  %v6631_v7 = vld [vmem:[#allocation4 + $0x10] sm:$0xff] }
 0x728   :  { %8260 = vmatpush.bf16.msrb.mxu1 %v7835_v4  ;;  %v7899_v59 = vpack.c.bf16 %v7507_v47, %v7503_v45  ;;  %v7307_v51 = vcvt.s32.f32 %v6795_v22  ;;  %v6919_v39 = vunpack.c.0.s8 %v6671_v43  ;;  %v6923_v40 = vunpack.c.1.s8 %v6671_v43 }
 0x729   :  { %8273 = vmatpush.bf16.msrb.mxu2 %v7867_v20  ;;  %v7367_v56 = vcvt.s32.f32 %v6855_v21  ;;  %v7371_v23 = vcvt.s32.f32 %v6859_v50  ;;  %v6983_v53 = vunpack.c.0.s8 %v6687_v26  ;;  %v6987_v44 = vunpack.c.1.s8 %v6687_v26  ;;  %v6647_v21 = vld [vmem:[#allocation4 + $0x90] sm:$0xff] }
 0x72a   :  { %8286 = vmatpush.bf16.msrb.mxu3 %v7899_v59  ;;  %v7799_v25 = vpack.c.bf16 %v7307_v51, %v7303_v31  ;;  %v7431_v24 = vcvt.s32.f32 %v6919_v39  ;;  %v7435_v11 = vcvt.s32.f32 %v6923_v40  ;;  %v6783_v52 = vunpack.c.2.s8 %v6635_v58  ;;  %v6663_v39 = vld [vmem:[#allocation4 + $0x110] sm:$0xff] }
 0x72b   :  { %v7831_v19 = vpack.c.bf16 %v7371_v23, %v7367_v56  ;;  %v7495_v42 = vcvt.s32.f32 %v6983_v53  ;;  %v7499_v48 = vcvt.s32.f32 %v6987_v44  ;;  %v6787_v61 = vunpack.c.3.s8 %v6635_v58  ;;  %v6679_v44 = vld [vmem:[#allocation4 + $0x190] sm:$0xff] }
 0x72c   :  { %8248 = vmatpush.bf16.msrb.mxu0 %v7799_v25  ;;  %v7863_v38 = vpack.c.bf16 %v7435_v11, %v7431_v24  ;;  %v7295_v2 = vcvt.s32.f32 %v6783_v52  ;;  %v6847_v9 = vunpack.c.2.s8 %v6651_v8  ;;  %v6851_v62 = vunpack.c.3.s8 %v6651_v8 }
 0x72d   :  { %8261 = vmatpush.bf16.msrb.mxu1 %v7831_v19  ;;  %v7895_v46 = vpack.c.bf16 %v7499_v48, %v7495_v42  ;;  %v7299_v43 = vcvt.s32.f32 %v6787_v61  ;;  %v6911_v60 = vunpack.c.2.s8 %v6667_v34  ;;  %v6915_v12 = vunpack.c.3.s8 %v6667_v34 }
 0x72e   :  { %8274 = vmatpush.bf16.msrb.mxu2 %v7863_v38  ;;  %v7359_v5 = vcvt.s32.f32 %v6847_v9  ;;  %v7363_v37 = vcvt.s32.f32 %v6851_v62  ;;  %v6975_v26 = vunpack.c.2.s8 %v6683_v55  ;;  %v6979_v14 = vunpack.c.3.s8 %v6683_v55 }
 0x72f   :  { %8287 = vmatpush.bf16.msrb.mxu3 %v7895_v46  ;;  %v7795_v36 = vpack.c.bf16 %v7299_v43, %v7295_v2  ;;  %v7423_v28 = vcvt.s32.f32 %v6911_v60  ;;  %v7427_v27 = vcvt.s32.f32 %v6915_v12  ;;  %v6775_v18 = vunpack.c.0.s8 %v6635_v58 }
 0x730   :  { %v7827_v3 = vpack.c.bf16 %v7363_v37, %v7359_v5  ;;  %v7487_v57 = vcvt.s32.f32 %v6975_v26  ;;  %v7491_v41 = vcvt.s32.f32 %v6979_v14  ;;  %v6779_v33 = vunpack.c.1.s8 %v6635_v58 }
 0x731   :  { %8249 = vmatpush.bf16.msrb.mxu0 %v7795_v36  ;;  %v7859_v63 = vpack.c.bf16 %v7427_v27, %v7423_v28  ;;  %v7287_v6 = vcvt.s32.f32 %v6775_v18  ;;  %v6839_v17 = vunpack.c.0.s8 %v6651_v8  ;;  %v6843_v13 = vunpack.c.1.s8 %v6651_v8  ;;  %v6707_v28 = vld [vmem:[#allocation4 + $0x270] sm:$0xff] }
 0x732   :  { %8262 = vmatpush.bf16.msrb.mxu1 %v7827_v3  ;;  %v7891_v10 = vpack.c.bf16 %v7491_v41, %v7487_v57  ;;  %v7291_v16 = vcvt.s32.f32 %v6779_v33  ;;  %v6903_v4 = vunpack.c.0.s8 %v6667_v34  ;;  %v6907_v45 = vunpack.c.1.s8 %v6667_v34 }
 0x733   :  { %8275 = vmatpush.bf16.msrb.mxu2 %v7859_v63  ;;  %v7351_v47 = vcvt.s32.f32 %v6839_v17  ;;  %v7355_v22 = vcvt.s32.f32 %v6843_v13  ;;  %v6967_v20 = vunpack.c.0.s8 %v6683_v55  ;;  %v6971_v31 = vunpack.c.1.s8 %v6683_v55  ;;  %v6723_v17 = vld [vmem:[#allocation4 + $0x2f0] sm:$0xff] }
 0x734   :  { %8288 = vmatpush.bf16.msrb.mxu3 %v7891_v10  ;;  %v7791_v50 = vpack.c.bf16 %v7291_v16, %v7287_v6  ;;  %v7415_v58 = vcvt.s32.f32 %v6903_v4  ;;  %v7419_v59 = vcvt.s32.f32 %v6907_v45  ;;  %v6767_v51 = vunpack.c.2.s8 %v6631_v7  ;;  %v6739_v4 = vld [vmem:[#allocation4 + $0x370] sm:$0xff] }
 0x735   :  { %v7823_v40 = vpack.c.bf16 %v7355_v22, %v7351_v47  ;;  %v7479_v56 = vcvt.s32.f32 %v6967_v20  ;;  %v7483_v23 = vcvt.s32.f32 %v6971_v31  ;;  %v6771_v53 = vunpack.c.3.s8 %v6631_v7  ;;  %v6755_v31 = vld [vmem:[#allocation4 + $0x3f0] sm:$0xff] }
 0x736   :  { %8250 = vmatpush.bf16.msrb.mxu0 %v7791_v50  ;;  %v7855_v8 = vpack.c.bf16 %v7419_v59, %v7415_v58  ;;  %v7279_v25 = vcvt.s32.f32 %v6767_v51  ;;  %v6831_v24 = vunpack.c.2.s8 %v6647_v21  ;;  %v6835_v11 = vunpack.c.3.s8 %v6647_v21 }
 0x737   :  { %8263 = vmatpush.bf16.msrb.mxu1 %v7823_v40  ;;  %v7887_v52 = vpack.c.bf16 %v7483_v23, %v7479_v56  ;;  %v7283_v34 = vcvt.s32.f32 %v6771_v53  ;;  %v6895_v19 = vunpack.c.2.s8 %v6663_v39  ;;  %v6899_v42 = vunpack.c.3.s8 %v6663_v39 }
 0x738   :  { %8276 = vmatpush.bf16.msrb.mxu2 %v7855_v8  ;;  %v7343_v48 = vcvt.s32.f32 %v6831_v24  ;;  %v7347_v61 = vcvt.s32.f32 %v6835_v11  ;;  %v6959_v55 = vunpack.c.2.s8 %v6679_v44  ;;  %v6963_v38 = vunpack.c.3.s8 %v6679_v44 }
 0x739   :  { %8289 = vmatpush.bf16.msrb.mxu3 %v7887_v52  ;;  %v7787_v2 = vpack.c.bf16 %v7283_v34, %v7279_v25  ;;  %v7407_v9 = vcvt.s32.f32 %v6895_v19  ;;  %v7411_v62 = vcvt.s32.f32 %v6899_v42  ;;  %v6759_v46 = vunpack.c.0.s8 %v6631_v7 }
 0x73a   :  { %v7819_v43 = vpack.c.bf16 %v7347_v61, %v7343_v48  ;;  %v7471_v60 = vcvt.s32.f32 %v6959_v55  ;;  %v7475_v12 = vcvt.s32.f32 %v6963_v38  ;;  %v6763_v5 = vunpack.c.1.s8 %v6631_v7 }
 0x73b   :  { %8251 = vmatpush.bf16.msrb.mxu0 %v7787_v2  ;;  %v7851_v37 = vpack.c.bf16 %v7411_v62, %v7407_v9  ;;  %v7271_v26 = vcvt.s32.f32 %v6759_v46  ;;  %v6823_v14 = vunpack.c.0.s8 %v6647_v21  ;;  %v6827_v36 = vunpack.c.1.s8 %v6647_v21  ;;  %v6703_v9 = vld [vmem:[#allocation4 + $0x250] sm:$0xff] }
 0x73c   :  { %8264 = vmatpush.bf16.msrb.mxu1 %v7819_v43  ;;  %v7883_v27 = vpack.c.bf16 %v7475_v12, %v7471_v60  ;;  %v7275_v18 = vcvt.s32.f32 %v6763_v5  ;;  %v6887_v3 = vunpack.c.0.s8 %v6663_v39  ;;  %v6891_v57 = vunpack.c.1.s8 %v6663_v39  ;;  %v10312_v12 = vpop.f32.mrf.mxu0  ;;  %v10314_v5 = vpop.f32.mrf.mxu1 }
 0x73d   :  { %8277 = vmatpush.bf16.msrb.mxu2 %v7851_v37  ;;  %v7335_v41 = vcvt.s32.f32 %v6823_v14  ;;  %v7339_v33 = vcvt.s32.f32 %v6827_v36  ;;  %v6951_v63 = vunpack.c.0.s8 %v6679_v44  ;;  %v6955_v6 = vunpack.c.1.s8 %v6679_v44 }
 0x73e   :  { %8290 = vmatpush.bf16.msrb.mxu3 %v7883_v27  ;;  %v7783_v13 = vpack.c.bf16 %v7275_v18, %v7271_v26  ;;  %v7399_v7 = vcvt.s32.f32 %v6887_v3  ;;  %v7403_v10 = vcvt.s32.f32 %v6891_v57  ;;  %v7071_v16 = vunpack.c.2.s8 %v6707_v28 }
 0x73f   :  { %v7815_v45 = vpack.c.bf16 %v7339_v33, %v7335_v41  ;;  %v7463_v47 = vcvt.s32.f32 %v6951_v63  ;;  %v7467_v22 = vcvt.s32.f32 %v6955_v6  ;;  %v7075_v20 = vunpack.c.3.s8 %v6707_v28  ;;  %v6735_v41 = vld [vmem:[#allocation4 + $0x350] sm:$0xff] }
 0x740   :  { %8252 = vmatpush.bf16.msrb.mxu0 %v7783_v13  ;;  %v7847_v21 = vpack.c.bf16 %v7403_v10, %v7399_v7  ;;  %v7583_v50 = vcvt.s32.f32 %v7071_v16  ;;  %v7135_v58 = vunpack.c.2.s8 %v6723_v17  ;;  %v7139_v59 = vunpack.c.3.s8 %v6723_v17  ;;  %v6751_v13 = vld [vmem:[#allocation4 + $0x3d0] sm:$0xff] }
 0x741   :  { %8265 = vmatpush.bf16.msrb.mxu1 %v7815_v45  ;;  %v7879_v51 = vpack.c.bf16 %v7467_v22, %v7463_v47  ;;  %v7587_v39 = vcvt.s32.f32 %v7075_v20  ;;  %v7199_v40 = vunpack.c.2.s8 %v6739_v4  ;;  %v7203_v56 = vunpack.c.3.s8 %v6739_v4 }
 0x742   :  { %8278 = vmatpush.bf16.msrb.mxu2 %v7847_v21  ;;  %v7647_v23 = vcvt.s32.f32 %v7135_v58  ;;  %v7651_v53 = vcvt.s32.f32 %v7139_v59  ;;  %v7263_v44 = vunpack.c.2.s8 %v6755_v31  ;;  %v7267_v8 = vunpack.c.3.s8 %v6755_v31 }
 0x743   :  { %8291 = vmatpush.bf16.msrb.mxu3 %v7879_v51  ;;  %v7939_v25 = vpack.c.bf16 %v7587_v39, %v7583_v50  ;;  %v7711_v24 = vcvt.s32.f32 %v7199_v40  ;;  %v7715_v11 = vcvt.s32.f32 %v7203_v56  ;;  %v7063_v52 = vunpack.c.0.s8 %v6707_v28  ;;  %8253 = vmatmul.bf16.vlgmr.msrb.gmra.mxu0 %v10276_v15 }
 0x744   :  { %v7971_v34 = vpack.c.bf16 %v7651_v53, %v7647_v23  ;;  %v7775_v19 = vcvt.s32.f32 %v7263_v44  ;;  %v7779_v42 = vcvt.s32.f32 %v7267_v8  ;;  %v7067_v48 = vunpack.c.1.s8 %v6707_v28  ;;  %8266 = vmatmul.bf16.vlgmr.msrb.gmra.mxu1 %v10278_v35  ;;  %v6719_v28 = vld [vmem:[#allocation4 + $0x2d0] sm:$0xff]  ;;  %v8048_v8 = vpop.f32.mrf.mxu0 }
 0x745   :  { %8297 = vmatpush.bf16.msra.mxu0 %v7939_v25  ;;  %v8003_v61 = vpack.c.bf16 %v7715_v11, %v7711_v24  ;;  %v7575_v55 = vcvt.s32.f32 %v7063_v52  ;;  %v7127_v38 = vunpack.c.0.s8 %v6723_v17  ;;  %v7131_v2 = vunpack.c.1.s8 %v6723_v17  ;;  %8279 = vmatmul.bf16.vlgmr.msrb.gmra.mxu2 %v10280_v29  ;;  %v8061_v25 = vpop.f32.mrf.mxu1 }
 0x746   :  { %8310 = vmatpush.bf16.msra.mxu1 %v7971_v34  ;;  %v8035_v62 = vpack.c.bf16 %v7779_v42, %v7775_v19  ;;  %v7579_v46 = vcvt.s32.f32 %v7067_v48  ;;  %v7191_v43 = vunpack.c.0.s8 %v6739_v4  ;;  %v7195_v60 = vunpack.c.1.s8 %v6739_v4  ;;  %8292 = vmatmul.bf16.vlgmr.msrb.gmra.mxu3 %v10282_v30  ;;  %v6699_v19 = vld [vmem:[#allocation4 + $0x230] sm:$0xff] }
 0x747   :  { %8323 = vmatpush.bf16.msra.mxu2 %v8003_v61  ;;  %v7639_v37 = vcvt.s32.f32 %v7127_v38  ;;  %v7643_v26 = vcvt.s32.f32 %v7131_v2  ;;  %v7255_v14 = vunpack.c.0.s8 %v6755_v31  ;;  %v7259_v36 = vunpack.c.1.s8 %v6755_v31  ;;  %v10316_v38 = vpop.f32.mrf.mxu2  ;;  %v10318_v2 = vpop.f32.mrf.mxu3  ;;  %v6695_v25 = vld [vmem:[#allocation4 + $0x210] sm:$0xff] }
 0x748   :  { %8336 = vmatpush.bf16.msra.mxu3 %v8035_v62  ;;  %v7935_v27 = vpack.c.bf16 %v7579_v46, %v7575_v55  ;;  %v7703_v18 = vcvt.s32.f32 %v7191_v43  ;;  %v7707_v3 = vcvt.s32.f32 %v7195_v60  ;;  %v7055_v57 = vunpack.c.2.s8 %v6703_v9  ;;  %v6715_v60 = vld [vmem:[#allocation4 + $0x2b0] sm:$0xff] }
 0x749   :  { %v7967_v33 = vpack.c.bf16 %v7643_v26, %v7639_v37  ;;  %v7767_v63 = vcvt.s32.f32 %v7255_v14  ;;  %v7771_v6 = vcvt.s32.f32 %v7259_v36  ;;  %v7059_v17 = vunpack.c.3.s8 %v6703_v9 }
 0x74a   :  { %8298 = vmatpush.bf16.msra.mxu0 %v7935_v27  ;;  %v7999_v7 = vpack.c.bf16 %v7707_v3, %v7703_v18  ;;  %v7567_v10 = vcvt.s32.f32 %v7055_v57  ;;  %v7119_v16 = vunpack.c.2.s8 %v6719_v28  ;;  %v7123_v4 = vunpack.c.3.s8 %v6719_v28 }
 0x74b   :  { %8311 = vmatpush.bf16.msra.mxu1 %v7967_v33  ;;  %v8031_v45 = vpack.c.bf16 %v7771_v6, %v7767_v63  ;;  %v7571_v47 = vcvt.s32.f32 %v7059_v17  ;;  %v7183_v22 = vunpack.c.2.s8 %v6735_v41  ;;  %v7187_v20 = vunpack.c.3.s8 %v6735_v41 }
 0x74c   :  { %8324 = vmatpush.bf16.msra.mxu2 %v7999_v7  ;;  %v7631_v31 = vcvt.s32.f32 %v7119_v16  ;;  %v7635_v21 = vcvt.s32.f32 %v7123_v4  ;;  %v7247_v50 = vunpack.c.2.s8 %v6751_v13  ;;  %v7251_v58 = vunpack.c.3.s8 %v6751_v13 }
 0x74d   :  { %8337 = vmatpush.bf16.msra.mxu3 %v8031_v45  ;;  %v7931_v59 = vpack.c.bf16 %v7571_v47, %v7567_v10  ;;  %v7695_v51 = vcvt.s32.f32 %v7183_v22  ;;  %v7699_v39 = vcvt.s32.f32 %v7187_v20  ;;  %v7047_v40 = vunpack.c.0.s8 %v6703_v9 }
 0x74e   :  { %v7963_v56 = vpack.c.bf16 %v7635_v21, %v7631_v31  ;;  %v7759_v23 = vcvt.s32.f32 %v7247_v50  ;;  %v7763_v53 = vcvt.s32.f32 %v7251_v58  ;;  %v7051_v44 = vunpack.c.1.s8 %v6703_v9 }
 0x74f   :  { %8299 = vmatpush.bf16.msra.mxu0 %v7931_v59  ;;  %v7995_v24 = vpack.c.bf16 %v7699_v39, %v7695_v51  ;;  %v7559_v11 = vcvt.s32.f32 %v7047_v40  ;;  %v7111_v52 = vunpack.c.0.s8 %v6719_v28  ;;  %v7115_v34 = vunpack.c.1.s8 %v6719_v28  ;;  %v6731_v28 = vld [vmem:[#allocation4 + $0x330] sm:$0xff]  ;;  %v8074_v40 = vpop.f32.mrf.mxu2 }
 0x750   :  { %8312 = vmatpush.bf16.msra.mxu1 %v7963_v56  ;;  %v8027_v42 = vpack.c.bf16 %v7763_v53, %v7759_v23  ;;  %v7563_v48 = vcvt.s32.f32 %v7051_v44  ;;  %v7175_v61 = vunpack.c.0.s8 %v6735_v41  ;;  %v7179_v55 = vunpack.c.1.s8 %v6735_v41  ;;  %v6747_v41 = vld [vmem:[#allocation4 + $0x3b0] sm:$0xff]  ;;  %v8087_v56 = vpop.f32.mrf.mxu3 }
 0x751   :  { %8325 = vmatpush.bf16.msra.mxu2 %v7995_v24  ;;  %v7623_v62 = vcvt.s32.f32 %v7111_v52  ;;  %v7627_v9 = vcvt.s32.f32 %v7115_v34  ;;  %v7239_v46 = vunpack.c.0.s8 %v6751_v13  ;;  %v7243_v43 = vunpack.c.1.s8 %v6751_v13  ;;  %v10326_v56 = vld [vmem:[#allocation4 + $0x78] sm:$0xff] }
 0x752   :  { %8338 = vmatpush.bf16.msra.mxu3 %v8027_v42  ;;  %v7927_v37 = vpack.c.bf16 %v7563_v48, %v7559_v11  ;;  %v7687_v26 = vcvt.s32.f32 %v7175_v61  ;;  %v7691_v14 = vcvt.s32.f32 %v7179_v55  ;;  %v7039_v36 = vunpack.c.2.s8 %v6699_v19 }
 0x753   :  { %v7959_v27 = vpack.c.bf16 %v7627_v9, %v7623_v62  ;;  %v7751_v18 = vcvt.s32.f32 %v7239_v46  ;;  %v7755_v3 = vcvt.s32.f32 %v7243_v43  ;;  %v7043_v57 = vunpack.c.3.s8 %v6699_v19  ;;  %v6711_v62 = vld [vmem:[#allocation4 + $0x290] sm:$0xff] }
 0x754   :  { %8300 = vmatpush.bf16.msra.mxu0 %v7927_v37  ;;  %v7991_v33 = vpack.c.bf16 %v7691_v14, %v7687_v26  ;;  %v7551_v63 = vcvt.s32.f32 %v7039_v36  ;;  %v7103_v6 = vunpack.c.2.s8 %v6715_v60  ;;  %v7107_v17 = vunpack.c.3.s8 %v6715_v60  ;;  %v6727_v37 = vld [vmem:[#allocation4 + $0x310] sm:$0xff] }
 0x755   :  { %8313 = vmatpush.bf16.msra.mxu1 %v7959_v27  ;;  %v8023_v7 = vpack.c.bf16 %v7755_v3, %v7751_v18  ;;  %v7555_v13 = vcvt.s32.f32 %v7043_v57  ;;  %v7167_v10 = vunpack.c.2.s8 %v6731_v28  ;;  %v7171_v16 = vunpack.c.3.s8 %v6731_v28  ;;  %v6743_v27 = vld [vmem:[#allocation4 + $0x390] sm:$0xff] }
 0x756   :  { %8326 = vmatpush.bf16.msra.mxu2 %v7991_v33  ;;  %v7615_v4 = vcvt.s32.f32 %v7103_v6  ;;  %v7619_v45 = vcvt.s32.f32 %v7107_v17  ;;  %v7231_v47 = vunpack.c.2.s8 %v6747_v41  ;;  %v7235_v22 = vunpack.c.3.s8 %v6747_v41 }
 0x757   :  { %8339 = vmatpush.bf16.msra.mxu3 %v8023_v7  ;;  %v7923_v20 = vpack.c.bf16 %v7555_v13, %v7551_v63  ;;  %v7679_v31 = vcvt.s32.f32 %v7167_v10  ;;  %v7683_v21 = vcvt.s32.f32 %v7171_v16  ;;  %v7031_v50 = vunpack.c.0.s8 %v6699_v19  ;;  %v10320_v16 = vpop.f32.mrf.mxu0 }
 0x758   :  { %v7955_v58 = vpack.c.bf16 %v7619_v45, %v7615_v4  ;;  %v7743_v59 = vcvt.s32.f32 %v7231_v47  ;;  %v7747_v51 = vcvt.s32.f32 %v7235_v22  ;;  %v7035_v39 = vunpack.c.1.s8 %v6699_v19  ;;  %v10322_v4 = vpop.f32.mrf.mxu1 }
 0x759   :  { %8301 = vmatpush.bf16.msra.mxu0 %v7923_v20  ;;  %v7987_v23 = vpack.c.bf16 %v7683_v21, %v7679_v31  ;;  %v7543_v53 = vcvt.s32.f32 %v7031_v50  ;;  %v7095_v44 = vunpack.c.0.s8 %v6715_v60  ;;  %v7099_v8 = vunpack.c.1.s8 %v6715_v60 }
 0x75a   :  { %8314 = vmatpush.bf16.msra.mxu1 %v7955_v58  ;;  %v8019_v24 = vpack.c.bf16 %v7747_v51, %v7743_v59  ;;  %v7547_v11 = vcvt.s32.f32 %v7035_v39  ;;  %v7159_v52 = vunpack.c.0.s8 %v6731_v28  ;;  %v7163_v34 = vunpack.c.1.s8 %v6731_v28 }
 0x75b   :  { %8327 = vmatpush.bf16.msra.mxu2 %v7987_v23  ;;  %v7607_v42 = vcvt.s32.f32 %v7095_v44  ;;  %v7611_v48 = vcvt.s32.f32 %v7099_v8  ;;  %v7223_v61 = vunpack.c.0.s8 %v6747_v41  ;;  %v7227_v55 = vunpack.c.1.s8 %v6747_v41 }
 0x75c   :  { %8340 = vmatpush.bf16.msra.mxu3 %v8019_v24  ;;  %v7919_v19 = vpack.c.bf16 %v7547_v11, %v7543_v53  ;;  %v7671_v9 = vcvt.s32.f32 %v7159_v52  ;;  %v7675_v46 = vcvt.s32.f32 %v7163_v34  ;;  %v7023_v43 = vunpack.c.2.s8 %v6695_v25  ;;  %v6660_v52 = vld [vmem:[#allocation4 + $0xf8] sm:$0xff]  ;;  %v10328_v34 = vpop.f32.mrf.mxu2 }
 0x75d   :  { %v7951_v26 = vpack.c.bf16 %v7611_v48, %v7607_v42  ;;  %v7735_v60 = vcvt.s32.f32 %v7223_v61  ;;  %v7739_v14 = vcvt.s32.f32 %v7227_v55  ;;  %v7027_v36 = vunpack.c.3.s8 %v6695_v25  ;;  %v10330_v42 = vpop.f32.mrf.mxu3 }
 0x75e   :  { %8302 = vmatpush.bf16.msra.mxu0 %v7919_v19  ;;  %v7983_v18 = vpack.c.bf16 %v7675_v46, %v7671_v9  ;;  %v7535_v28 = vcvt.s32.f32 %v7023_v43  ;;  %v7087_v3 = vunpack.c.2.s8 %v6711_v62  ;;  %v7091_v57 = vunpack.c.3.s8 %v6711_v62 }
 0x75f   :  { %8315 = vmatpush.bf16.msra.mxu1 %v7951_v26  ;;  %v8015_v33 = vpack.c.bf16 %v7739_v14, %v7735_v60  ;;  %v7539_v41 = vcvt.s32.f32 %v7027_v36  ;;  %v7151_v63 = vunpack.c.2.s8 %v6727_v37  ;;  %v7155_v6 = vunpack.c.3.s8 %v6727_v37 }
 0x760   :  { %8328 = vmatpush.bf16.msra.mxu2 %v7983_v18  ;;  %v7599_v17 = vcvt.s32.f32 %v7087_v3  ;;  %v7603_v7 = vcvt.s32.f32 %v7091_v57  ;;  %v7215_v13 = vunpack.c.2.s8 %v6743_v27  ;;  %v7219_v10 = vunpack.c.3.s8 %v6743_v27  ;;  %v8100_v18 = vpop.f32.mrf.mxu0 }
 0x761   :  { %8341 = vmatpush.bf16.msra.mxu3 %v8015_v33  ;;  %v7915_v45 = vpack.c.bf16 %v7539_v41, %v7535_v28  ;;  %v7663_v47 = vcvt.s32.f32 %v7151_v63  ;;  %v7667_v22 = vcvt.s32.f32 %v7155_v6  ;;  %v8060_v20 = vadd.f32 %v10314_v5, %v10312_v12  ;;  %v8113_v28 = vpop.f32.mrf.mxu1 }
 0x762   :  { %v7947_v31 = vpack.c.bf16 %v7603_v7, %v7599_v17  ;;  %v7727_v21 = vcvt.s32.f32 %v7215_v13  ;;  %v7731_v50 = vcvt.s32.f32 %v7219_v10  ;;  %v7015_v58 = vunpack.c.0.s8 %v6695_v25 }
 0x763   :  { %8303 = vmatpush.bf16.msra.mxu0 %v7915_v45  ;;  %v7979_v59 = vpack.c.bf16 %v7667_v22, %v7663_v47  ;;  %v7019_v51 = vunpack.c.1.s8 %v6695_v25  ;;  %v7079_v39 = vunpack.c.0.s8 %v6711_v62  ;;  %v7083_v40 = vunpack.c.1.s8 %v6711_v62  ;;  %v6676_v62 = vld [vmem:[#allocation4 + $0x178] sm:$0xff] }
 0x764   :  { %8316 = vmatpush.bf16.msra.mxu1 %v7947_v31  ;;  %v8011_v23 = vpack.c.bf16 %v7731_v50, %v7727_v21  ;;  %v7527_v53 = vcvt.s32.f32 %v7015_v58  ;;  %v7143_v44 = vunpack.c.0.s8 %v6727_v37  ;;  %v7147_v8 = vunpack.c.1.s8 %v6727_v37  ;;  %v10334_v37 = vld [vmem:[#allocation4 + $0x1f8] sm:$0xff] }
 0x765   :  { %8329 = vmatpush.bf16.msra.mxu2 %v7979_v59  ;;  %v7531_v24 = vcvt.s32.f32 %v7019_v51  ;;  %v7591_v11 = vcvt.s32.f32 %v7079_v39  ;;  %v7595_v12 = vcvt.s32.f32 %v7083_v40  ;;  %v7207_v5 = vunpack.c.0.s8 %v6743_v27  ;;  %v10343_v39 = vld [vmem:[#allocation4 + $0x58] sm:$0xff]  ;;  %v8126_v40 = vpop.f32.mrf.mxu2 }
 0x766   :  { %8342 = vmatpush.bf16.msra.mxu3 %v8011_v23  ;;  %v7655_v25 = vcvt.s32.f32 %v7143_v44  ;;  %v7659_v48 = vcvt.s32.f32 %v7147_v8  ;;  %v7211_v61 = vunpack.c.1.s8 %v6743_v27  ;;  %v6816_v55 = vunpack.c.2.s8 %v10326_v56  ;;  %v8139_v23 = vpop.f32.mrf.mxu3 }
 0x767   :  { %v7911_v19 = vpack.c.bf16 %v7531_v24, %v7527_v53  ;;  %v7943_v9 = vpack.c.bf16 %v7595_v12, %v7591_v11  ;;  %v7719_v46 = vcvt.s32.f32 %v7207_v5  ;;  %v6820_v43 = vunpack.c.3.s8 %v10326_v56 }
 0x768   :  { %v7975_v26 = vpack.c.bf16 %v7659_v48, %v7655_v25  ;;  %v7723_v60 = vcvt.s32.f32 %v7211_v61  ;;  %v7328_v14 = vcvt.s32.f32 %v6816_v55  ;;  %v6880_v36 = vunpack.c.2.s8 %v6660_v52 }
 0x769   :  { %8304 = vmatpush.bf16.msra.mxu0 %v7911_v19  ;;  %8317 = vmatpush.bf16.msra.mxu1 %v7943_v9  ;;  %v7332_v3 = vcvt.s32.f32 %v6820_v43  ;;  %v6884_v27 = vunpack.c.3.s8 %v6660_v52  ;;  %v6944_v57 = vunpack.c.2.s8 %v6676_v62  ;;  %v6948_v33 = vunpack.c.3.s8 %v6676_v62  ;;  %v6672_v9 = vld [vmem:[#allocation4 + $0x158] sm:$0xff] }
 0x76a   :  { %8330 = vmatpush.bf16.msra.mxu2 %v7975_v26  ;;  %v8007_v41 = vpack.c.bf16 %v7723_v60, %v7719_v46  ;;  %v7392_v63 = vcvt.s32.f32 %v6880_v36  ;;  %v7008_v6 = vunpack.c.2.s8 %v10334_v37  ;;  %v7012_v17 = vunpack.c.3.s8 %v10334_v37  ;;  %v6688_v46 = vld [vmem:[#allocation4 + $0x1d8] sm:$0xff] }
 0x76b   :  { %v7812_v7 = vpack.c.bf16 %v7332_v3, %v7328_v14  ;;  %v7396_v13 = vcvt.s32.f32 %v6884_v27  ;;  %v7456_v10 = vcvt.s32.f32 %v6944_v57  ;;  %v7460_v45 = vcvt.s32.f32 %v6948_v33 }
 0x76c   :  { %8343 = vmatpush.bf16.msra.mxu3 %v8007_v41  ;;  %v7520_v47 = vcvt.s32.f32 %v7008_v6  ;;  %v7524_v22 = vcvt.s32.f32 %v7012_v17  ;;  %v8073_v31 = vadd.f32 %v10316_v38, %v8060_v20  ;;  %8305 = vmatmul.bf16.vlgmr.msra.gmra.mxu0 %v10284_v54  ;;  %v6808_v21 = vunpack.c.0.s8 %v10326_v56 }
 0x76d   :  { %8349 = vmatpush.bf16.msrb.mxu0 %v7812_v7  ;;  %v7844_v50 = vpack.c.bf16 %v7396_v13, %v7392_v63  ;;  %v7876_v58 = vpack.c.bf16 %v7460_v45, %v7456_v10  ;;  %8331 = vmatmul.bf16.vlgmr.msra.gmra.mxu2 %v10288_v32  ;;  %v6812_v59 = vunpack.c.1.s8 %v10326_v56  ;;  %v6872_v51 = vunpack.c.0.s8 %v6660_v52 }
 0x76e   :  { %v7908_v53 = vpack.c.bf16 %v7524_v22, %v7520_v47  ;;  %v10346_v44 = vadd.f32 %v10318_v2, %v8073_v31  ;;  %v7320_v38 = vcvt.s32.f32 %v6808_v21  ;;  %v6876_v20 = vunpack.c.1.s8 %v6660_v52  ;;  %8318 = vmatmul.bf16.vlgmr.msra.gmra.mxu1 %v10286_v1  ;;  %v6656_v2 = vld [vmem:[#allocation4 + $0xd8] sm:$0xff] }
 0x76f   :  { %8362 = vmatpush.bf16.msrb.mxu1 %v7844_v50  ;;  %8375 = vmatpush.bf16.msrb.mxu2 %v7876_v58  ;;  %v7324_v8 = vcvt.s32.f32 %v6812_v59  ;;  %v7384_v24 = vcvt.s32.f32 %v6872_v51  ;;  %v6936_v11 = vunpack.c.0.s8 %v6676_v62  ;;  %v6940_v12 = vunpack.c.1.s8 %v6676_v62  ;;  %v6636_v51 = vld [vmem:[#allocation4 + $0x38] sm:$0xff] }
 0x770   :  { %8388 = vmatpush.bf16.msrb.mxu3 %v7908_v53  ;;  %v7388_v56 = vcvt.s32.f32 %v6876_v20  ;;  %v7000_v5 = vunpack.c.0.s8 %v10334_v37  ;;  %v7004_v25 = vunpack.c.1.s8 %v10334_v37  ;;  %v6800_v48 = vunpack.c.2.s8 %v10343_v39 }
 0x771   :  { %8344 = vmatmul.bf16.vlgmr.msra.gmra.mxu3 %v10290_v0  ;;  %v7808_v52 = vpack.c.bf16 %v7324_v8, %v7320_v38  ;;  %v7448_v61 = vcvt.s32.f32 %v6936_v11  ;;  %v7452_v55 = vcvt.s32.f32 %v6940_v12  ;;  %v6804_v19 = vunpack.c.3.s8 %v10343_v39  ;;  %v6652_v12 = vld [vmem:[#allocation4 + $0xb8] sm:$0xff] }
 0x772   :  { %v7840_v43 = vpack.c.bf16 %v7388_v56, %v7384_v24  ;;  %v7512_v62 = vcvt.s32.f32 %v7000_v5  ;;  %v7516_v26 = vcvt.s32.f32 %v7004_v25  ;;  %v7312_v60 = vcvt.s32.f32 %v6800_v48  ;;  %v6668_v48 = vld [vmem:[#allocation4 + $0x138] sm:$0xff] }
 0x773   :  { %8350 = vmatpush.bf16.msrb.mxu0 %v7808_v52  ;;  %v7872_v14 = vpack.c.bf16 %v7452_v55, %v7448_v61  ;;  %v7316_v36 = vcvt.s32.f32 %v6804_v19  ;;  %v6864_v37 = vunpack.c.2.s8 %v6656_v2  ;;  %v6868_v18 = vunpack.c.3.s8 %v6656_v2  ;;  %v6684_v19 = vld [vmem:[#allocation4 + $0x1b8] sm:$0xff] }
 0x774   :  { %8363 = vmatpush.bf16.msrb.mxu1 %v7840_v43  ;;  %v7904_v28 = vpack.c.bf16 %v7516_v26, %v7512_v62  ;;  %v6928_v3 = vunpack.c.2.s8 %v6672_v9  ;;  %v6932_v27 = vunpack.c.3.s8 %v6672_v9  ;;  %v6992_v57 = vunpack.c.2.s8 %v6688_v46 }
 0x775   :  { %8376 = vmatpush.bf16.msrb.mxu2 %v7872_v14  ;;  %v7804_v33 = vpack.c.bf16 %v7316_v36, %v7312_v60  ;;  %v7376_v41 = vcvt.s32.f32 %v6864_v37  ;;  %v7380_v63 = vcvt.s32.f32 %v6868_v18  ;;  %v6996_v6 = vunpack.c.3.s8 %v6688_v46 }
 0x776   :  { %8389 = vmatpush.bf16.msrb.mxu3 %v7904_v28  ;;  %v7440_v17 = vcvt.s32.f32 %v6928_v3  ;;  %v7444_v7 = vcvt.s32.f32 %v6932_v27  ;;  %v7504_v13 = vcvt.s32.f32 %v6992_v57  ;;  %v6792_v10 = vunpack.c.0.s8 %v10343_v39 }
 0x777   :  { %8351 = vmatpush.bf16.msrb.mxu0 %v7804_v33  ;;  %v7836_v45 = vpack.c.bf16 %v7380_v63, %v7376_v41  ;;  %v7508_v47 = vcvt.s32.f32 %v6996_v6  ;;  %v6796_v22 = vunpack.c.1.s8 %v10343_v39  ;;  %v6856_v31 = vunpack.c.0.s8 %v6656_v2 }
 0x778   :  { %v7868_v21 = vpack.c.bf16 %v7444_v7, %v7440_v17  ;;  %v7304_v50 = vcvt.s32.f32 %v6792_v10  ;;  %v6860_v58 = vunpack.c.1.s8 %v6656_v2  ;;  %v6920_v59 = vunpack.c.0.s8 %v6672_v9 }
 0x779   :  { %8364 = vmatpush.bf16.msrb.mxu1 %v7836_v45  ;;  %v7900_v40 = vpack.c.bf16 %v7508_v47, %v7504_v13  ;;  %v7308_v23 = vcvt.s32.f32 %v6796_v22  ;;  %v7368_v53 = vcvt.s32.f32 %v6856_v31  ;;  %v6924_v38 = vunpack.c.1.s8 %v6672_v9 }
 0x77a   :  { %8377 = vmatpush.bf16.msrb.mxu2 %v7868_v21  ;;  %v7372_v20 = vcvt.s32.f32 %v6860_v58  ;;  %v7432_v8 = vcvt.s32.f32 %v6920_v59  ;;  %v6984_v24 = vunpack.c.0.s8 %v6688_v46  ;;  %v6988_v11 = vunpack.c.1.s8 %v6688_v46  ;;  %v6632_v21 = vld [vmem:[#allocation4 + $0x18] sm:$0xff] }
 0x77b   :  { %8390 = vmatpush.bf16.msrb.mxu3 %v7900_v40  ;;  %v7800_v56 = vpack.c.bf16 %v7308_v23, %v7304_v50  ;;  %v7436_v39 = vcvt.s32.f32 %v6924_v38  ;;  %v8099_v5 = vadd.f32 %v10320_v16, %v10346_v44  ;;  %v6784_v25 = vunpack.c.2.s8 %v6636_v51 }
 0x77c   :  { %v7832_v2 = vpack.c.bf16 %v7372_v20, %v7368_v53  ;;  %v7496_v52 = vcvt.s32.f32 %v6984_v24  ;;  %v7500_v61 = vcvt.s32.f32 %v6988_v11  ;;  %v6788_v55 = vunpack.c.3.s8 %v6636_v51  ;;  %v6664_v24 = vld [vmem:[#allocation4 + $0x118] sm:$0xff] }
 0x77d   :  { %8352 = vmatpush.bf16.msrb.mxu0 %v7800_v56  ;;  %v7864_v9 = vpack.c.bf16 %v7436_v39, %v7432_v8  ;;  %v8112_v43 = vadd.f32 %v10322_v4, %v8099_v5  ;;  %v7296_v62 = vcvt.s32.f32 %v6784_v25  ;;  %v6848_v46 = vunpack.c.2.s8 %v6652_v12  ;;  %v6680_v39 = vld [vmem:[#allocation4 + $0x198] sm:$0xff] }
 0x77e   :  { %8365 = vmatpush.bf16.msrb.mxu1 %v7832_v2  ;;  %v7896_v26 = vpack.c.bf16 %v7500_v61, %v7496_v52  ;;  %v7300_v60 = vcvt.s32.f32 %v6788_v55  ;;  %v6852_v14 = vunpack.c.3.s8 %v6652_v12  ;;  %v6912_v36 = vunpack.c.2.s8 %v6668_v48 }
 0x77f   :  { %8378 = vmatpush.bf16.msrb.mxu2 %v7864_v9  ;;  %v7360_v16 = vcvt.s32.f32 %v6848_v46  ;;  %v6916_v44 = vunpack.c.3.s8 %v6668_v48  ;;  %v6976_v37 = vunpack.c.2.s8 %v6684_v19  ;;  %v6980_v18 = vunpack.c.3.s8 %v6684_v19 }
 0x780   :  { %8391 = vmatpush.bf16.msrb.mxu3 %v7896_v26  ;;  %v7796_v28 = vpack.c.bf16 %v7300_v60, %v7296_v62  ;;  %v7364_v3 = vcvt.s32.f32 %v6852_v14  ;;  %v7424_v27 = vcvt.s32.f32 %v6912_v36  ;;  %v8125_v57 = vadd.f32 %v10328_v34, %v8112_v43 }
 0x781   :  { %v7428_v33 = vcvt.s32.f32 %v6916_v44  ;;  %v7488_v4 = vcvt.s32.f32 %v6976_v37  ;;  %v7492_v41 = vcvt.s32.f32 %v6980_v18  ;;  %v6776_v63 = vunpack.c.0.s8 %v6636_v51 }
 0x782   :  { %8353 = vmatpush.bf16.msrb.mxu0 %v7796_v28  ;;  %v7828_v6 = vpack.c.bf16 %v7364_v3, %v7360_v16  ;;  %v10361_v17 = vadd.f32 %v10330_v42, %v8125_v57  ;;  %v6780_v7 = vunpack.c.1.s8 %v6636_v51  ;;  %v6840_v47 = vunpack.c.0.s8 %v6652_v12  ;;  %v6648_v42 = vld [vmem:[#allocation4 + $0x98] sm:$0xff] }
 0x783   :  { %v7860_v13 = vpack.c.bf16 %v7428_v33, %v7424_v27  ;;  %v7892_v10 = vpack.c.bf16 %v7492_v41, %v7488_v4  ;;  %v7288_v45 = vcvt.s32.f32 %v6776_v63  ;;  %v6844_v31 = vunpack.c.1.s8 %v6652_v12  ;;  %v6708_v4 = vld [vmem:[#allocation4 + $0x278] sm:$0xff] }
 0x784   :  { %8366 = vmatpush.bf16.msrb.mxu1 %v7828_v6  ;;  %v7292_v22 = vcvt.s32.f32 %v6780_v7  ;;  %v7352_v34 = vcvt.s32.f32 %v6840_v47  ;;  %v6904_v50 = vunpack.c.0.s8 %v6668_v48  ;;  %v6908_v58 = vunpack.c.1.s8 %v6668_v48  ;;  %v6724_v47 = vld [vmem:[#allocation4 + $0x2f8] sm:$0xff] }
 0x785   :  { %8379 = vmatpush.bf16.msrb.mxu2 %v7860_v13  ;;  %8392 = vmatpush.bf16.msrb.mxu3 %v7892_v10  ;;  %v6968_v59 = vunpack.c.0.s8 %v6684_v19  ;;  %v7356_v23 = vcvt.s32.f32 %v6844_v31  ;;  %v6972_v53 = vunpack.c.1.s8 %v6684_v19  ;;  %v6768_v8 = vunpack.c.2.s8 %v6632_v21 }
 0x786   :  { %v7792_v40 = vpack.c.bf16 %v7292_v22, %v7288_v45  ;;  %v7416_v38 = vcvt.s32.f32 %v6904_v50  ;;  %v7420_v51 = vcvt.s32.f32 %v6908_v58  ;;  %v6772_v12 = vunpack.c.3.s8 %v6632_v21 }
 0x787   :  { %v7480_v20 = vcvt.s32.f32 %v6968_v59  ;;  %v7824_v11 = vpack.c.bf16 %v7356_v23, %v7352_v34  ;;  %v7484_v56 = vcvt.s32.f32 %v6972_v53  ;;  %v7280_v25 = vcvt.s32.f32 %v6768_v8  ;;  %v6740_v34 = vld [vmem:[#allocation4 + $0x378] sm:$0xff] }
 0x788   :  { %8354 = vmatpush.bf16.msrb.mxu0 %v7792_v40  ;;  %v7856_v5 = vpack.c.bf16 %v7420_v51, %v7416_v38  ;;  %v6832_v2 = vunpack.c.2.s8 %v6648_v42  ;;  %v6836_v52 = vunpack.c.3.s8 %v6648_v42  ;;  %v7284_v61 = vcvt.s32.f32 %v6772_v12  ;;  %v6756_v38 = vld [vmem:[#allocation4 + $0x3f8] sm:$0xff] }
 0x789   :  { %8367 = vmatpush.bf16.msrb.mxu1 %v7824_v11  ;;  %v7888_v48 = vpack.c.bf16 %v7484_v56, %v7480_v20  ;;  %v6896_v55 = vunpack.c.2.s8 %v6664_v24  ;;  %v6900_v43 = vunpack.c.3.s8 %v6664_v24  ;;  %v6960_v62 = vunpack.c.2.s8 %v6680_v39 }
 0x78a   :  { %8380 = vmatpush.bf16.msrb.mxu2 %v7856_v5  ;;  %v7344_v19 = vcvt.s32.f32 %v6832_v2  ;;  %v7348_v9 = vcvt.s32.f32 %v6836_v52  ;;  %v7788_v46 = vpack.c.bf16 %v7284_v61, %v7280_v25  ;;  %v6964_v60 = vunpack.c.3.s8 %v6680_v39 }
 0x78b   :  { %8393 = vmatpush.bf16.msrb.mxu3 %v7888_v48  ;;  %v7408_v26 = vcvt.s32.f32 %v6896_v55  ;;  %v7412_v36 = vcvt.s32.f32 %v6900_v43  ;;  %v7472_v16 = vcvt.s32.f32 %v6960_v62  ;;  %v6760_v44 = vunpack.c.0.s8 %v6632_v21 }
 0x78c   :  { %v7820_v14 = vpack.c.bf16 %v7348_v9, %v7344_v19  ;;  %8355 = vmatpush.bf16.msrb.mxu0 %v7788_v46  ;;  %v7476_v37 = vcvt.s32.f32 %v6964_v60  ;;  %v6764_v18 = vunpack.c.1.s8 %v6632_v21  ;;  %v6824_v28 = vunpack.c.0.s8 %v6648_v42 }
 0x78d   :  { %v7852_v3 = vpack.c.bf16 %v7412_v36, %v7408_v26  ;;  %v7272_v27 = vcvt.s32.f32 %v6760_v44  ;;  %v6828_v57 = vunpack.c.1.s8 %v6648_v42  ;;  %v6888_v33 = vunpack.c.0.s8 %v6664_v24 }
 0x78e   :  { %8368 = vmatpush.bf16.msrb.mxu1 %v7820_v14  ;;  %v7884_v41 = vpack.c.bf16 %v7476_v37, %v7472_v16  ;;  %v7276_v63 = vcvt.s32.f32 %v6764_v18  ;;  %v7336_v6 = vcvt.s32.f32 %v6824_v28  ;;  %v6892_v13 = vunpack.c.1.s8 %v6664_v24  ;;  %v6704_v16 = vld [vmem:[#allocation4 + $0x258] sm:$0xff] }
 0x78f   :  { %8381 = vmatpush.bf16.msrb.mxu2 %v7852_v3  ;;  %v7340_v7 = vcvt.s32.f32 %v6828_v57  ;;  %v7400_v10 = vcvt.s32.f32 %v6888_v33  ;;  %v6952_v45 = vunpack.c.0.s8 %v6680_v39  ;;  %v6956_v31 = vunpack.c.1.s8 %v6680_v39  ;;  %v6720_v18 = vld [vmem:[#allocation4 + $0x2d8] sm:$0xff] }
 0x790   :  { %8394 = vmatpush.bf16.msrb.mxu3 %v7884_v41  ;;  %v7784_v22 = vpack.c.bf16 %v7276_v63, %v7272_v27  ;;  %v7072_v21 = vunpack.c.2.s8 %v6708_v4  ;;  %v7404_v58 = vcvt.s32.f32 %v6892_v13  ;;  %v7076_v40 = vunpack.c.3.s8 %v6708_v4  ;;  %v6736_v41 = vld [vmem:[#allocation4 + $0x358] sm:$0xff] }
 0x791   :  { %v7816_v50 = vpack.c.bf16 %v7340_v7, %v7336_v6  ;;  %v7464_v59 = vcvt.s32.f32 %v6952_v45  ;;  %v7468_v23 = vcvt.s32.f32 %v6956_v31  ;;  %v7136_v42 = vunpack.c.2.s8 %v6724_v47  ;;  %v10369_v45 = vpop.f32.mrf.mxu1 }
 0x792   :  { %8356 = vmatpush.bf16.msrb.mxu0 %v7784_v22  ;;  %v7584_v53 = vcvt.s32.f32 %v7072_v21  ;;  %v7848_v51 = vpack.c.bf16 %v7404_v58, %v7400_v10  ;;  %v7588_v20 = vcvt.s32.f32 %v7076_v40  ;;  %v7140_v8 = vunpack.c.3.s8 %v6724_v47  ;;  %v10367_v10 = vpop.f32.mrf.mxu0 }
 0x793   :  { %8369 = vmatpush.bf16.msrb.mxu1 %v7816_v50  ;;  %v7200_v24 = vunpack.c.2.s8 %v6740_v34  ;;  %v7880_v11 = vpack.c.bf16 %v7468_v23, %v7464_v59  ;;  %v7648_v56 = vcvt.s32.f32 %v7136_v42  ;;  %v7204_v12 = vunpack.c.3.s8 %v6740_v34 }
 0x794   :  { %8382 = vmatpush.bf16.msrb.mxu2 %v7848_v51  ;;  %v7940_v39 = vpack.c.bf16 %v7588_v20, %v7584_v53  ;;  %v7652_v5 = vcvt.s32.f32 %v7140_v8  ;;  %v7264_v2 = vunpack.c.2.s8 %v6756_v38  ;;  %v7268_v48 = vunpack.c.3.s8 %v6756_v38 }
 0x795   :  { %v7712_v25 = vcvt.s32.f32 %v7200_v24  ;;  %8357 = vmatmul.bf16.vlgmr.msrb.gmra.mxu0 %v10276_v15  ;;  %8395 = vmatpush.bf16.msrb.mxu3 %v7880_v11  ;;  %v7716_v52 = vcvt.s32.f32 %v7204_v12  ;;  %v7064_v61 = vunpack.c.0.s8 %v6708_v4  ;;  %v7068_v9 = vunpack.c.1.s8 %v6708_v4  ;;  %v10371_v11 = vpop.f32.mrf.mxu2 }
 0x796   :  { %8370 = vmatmul.bf16.vlgmr.msrb.gmra.mxu1 %v10278_v35  ;;  %8401 = vmatpush.bf16.msra.mxu0 %v7940_v39  ;;  %v7972_v55 = vpack.c.bf16 %v7652_v5, %v7648_v56  ;;  %v7776_v19 = vcvt.s32.f32 %v7264_v2  ;;  %v7128_v43 = vunpack.c.0.s8 %v6724_v47  ;;  %v7780_v46 = vcvt.s32.f32 %v7268_v48 }
 0x797   :  { %v8004_v62 = vpack.c.bf16 %v7716_v52, %v7712_v25  ;;  %v7576_v26 = vcvt.s32.f32 %v7064_v61  ;;  %8383 = vmatmul.bf16.vlgmr.msrb.gmra.mxu2 %v10280_v29  ;;  %v7580_v60 = vcvt.s32.f32 %v7068_v9  ;;  %v7132_v14 = vunpack.c.1.s8 %v6724_v47  ;;  %v6700_v9 = vld [vmem:[#allocation4 + $0x238] sm:$0xff] }
 0x798   :  { %8414 = vmatpush.bf16.msra.mxu1 %v7972_v55  ;;  %v7640_v15 = vcvt.s32.f32 %v7128_v43  ;;  %v7192_v36 = vunpack.c.0.s8 %v6740_v34  ;;  %8396 = vmatmul.bf16.vlgmr.msrb.gmra.mxu3 %v10282_v30  ;;  %v8036_v35 = vpack.c.bf16 %v7780_v46, %v7776_v19  ;;  %v7196_v44 = vunpack.c.1.s8 %v6740_v34  ;;  %v6752_v30 = vld [vmem:[#allocation4 + $0x3d8] sm:$0xff] }
 0x799   :  { %8427 = vmatpush.bf16.msra.mxu2 %v8004_v62  ;;  %v7256_v37 = vunpack.c.0.s8 %v6756_v38  ;;  %v7936_v28 = vpack.c.bf16 %v7580_v60, %v7576_v26  ;;  %v7644_v3 = vcvt.s32.f32 %v7132_v14  ;;  %v7260_v57 = vunpack.c.1.s8 %v6756_v38  ;;  %v6716_v43 = vld [vmem:[#allocation4 + $0x2b8] sm:$0xff]  ;;  %v10373_v62 = vpop.f32.mrf.mxu3  ;;  %v8165_v14 = vpop.f32.mrf.mxu1 }
 0x79a   :  { %v7704_v27 = vcvt.s32.f32 %v7192_v36  ;;  %8440 = vmatpush.bf16.msra.mxu3 %v8036_v35  ;;  %v7708_v33 = vcvt.s32.f32 %v7196_v44  ;;  %v7056_v4 = vunpack.c.2.s8 %v6704_v16  ;;  %v7060_v7 = vunpack.c.3.s8 %v6704_v16  ;;  %v8152_v46 = vpop.f32.mrf.mxu0  ;;  %v6732_v44 = vld [vmem:[#allocation4 + $0x338] sm:$0xff] }
 0x79b   :  { %v7768_v29 = vcvt.s32.f32 %v7256_v37  ;;  %8402 = vmatpush.bf16.msra.mxu0 %v7936_v28  ;;  %v7968_v63 = vpack.c.bf16 %v7644_v3, %v7640_v15  ;;  %v7772_v6 = vcvt.s32.f32 %v7260_v57  ;;  %v7120_v13 = vunpack.c.2.s8 %v6720_v18  ;;  %v6728_v14 = vld [vmem:[#allocation4 + $0x318] sm:$0xff] }
 0x79c   :  { %v8000_v47 = vpack.c.bf16 %v7708_v33, %v7704_v27  ;;  %v7568_v22 = vcvt.s32.f32 %v7056_v4  ;;  %v7124_v31 = vunpack.c.3.s8 %v6720_v18  ;;  %v7572_v34 = vcvt.s32.f32 %v7060_v7  ;;  %v6748_v27 = vld [vmem:[#allocation4 + $0x3b8] sm:$0xff] }
 0x79d   :  { %8415 = vmatpush.bf16.msra.mxu1 %v7968_v63  ;;  %v8032_v21 = vpack.c.bf16 %v7772_v6, %v7768_v29  ;;  %v7632_v50 = vcvt.s32.f32 %v7120_v13  ;;  %v7184_v58 = vunpack.c.2.s8 %v6736_v41  ;;  %v7188_v40 = vunpack.c.3.s8 %v6736_v41  ;;  %v8178_v13 = vpop.f32.mrf.mxu2 }
 0x79e   :  { %8428 = vmatpush.bf16.msra.mxu2 %v8000_v47  ;;  %v7636_v59 = vcvt.s32.f32 %v7124_v31  ;;  %v7248_v23 = vunpack.c.2.s8 %v6752_v30  ;;  %v7932_v53 = vpack.c.bf16 %v7572_v34, %v7568_v22  ;;  %v7252_v38 = vunpack.c.3.s8 %v6752_v30 }
 0x79f   :  { %8441 = vmatpush.bf16.msra.mxu3 %v8032_v21  ;;  %v7696_v42 = vcvt.s32.f32 %v7184_v58  ;;  %v7048_v51 = vunpack.c.0.s8 %v6704_v16  ;;  %v7700_v8 = vcvt.s32.f32 %v7188_v40  ;;  %v7052_v12 = vunpack.c.1.s8 %v6704_v16 }
 0x7a0   :  { %v7964_v20 = vpack.c.bf16 %v7636_v59, %v7632_v50  ;;  %v7760_v24 = vcvt.s32.f32 %v7248_v23  ;;  %8403 = vmatpush.bf16.msra.mxu0 %v7932_v53  ;;  %v7764_v56 = vcvt.s32.f32 %v7252_v38  ;;  %v7112_v5 = vunpack.c.0.s8 %v6720_v18 }
 0x7a1   :  { %v7560_v39 = vcvt.s32.f32 %v7048_v51  ;;  %v7996_v25 = vpack.c.bf16 %v7700_v8, %v7696_v42  ;;  %v7116_v2 = vunpack.c.1.s8 %v6720_v18  ;;  %v7176_v52 = vunpack.c.0.s8 %v6736_v41  ;;  %v8191_v23 = vpop.f32.mrf.mxu3  ;;  %v10377_v8 = vpop.f32.mrf.mxu1 }
 0x7a2   :  { %8416 = vmatpush.bf16.msra.mxu1 %v7964_v20  ;;  %v8028_v48 = vpack.c.bf16 %v7764_v56, %v7760_v24  ;;  %v7564_v61 = vcvt.s32.f32 %v7052_v12  ;;  %v7624_v55 = vcvt.s32.f32 %v7112_v5  ;;  %v7180_v19 = vunpack.c.1.s8 %v6736_v41  ;;  %v10375_v53 = vpop.f32.mrf.mxu0 }
 0x7a3   :  { %8429 = vmatpush.bf16.msra.mxu2 %v7996_v25  ;;  %v7628_v26 = vcvt.s32.f32 %v7116_v2  ;;  %v7688_v60 = vcvt.s32.f32 %v7176_v52  ;;  %v7240_v16 = vunpack.c.0.s8 %v6752_v30  ;;  %v7244_v35 = vunpack.c.1.s8 %v6752_v30  ;;  %v6696_v52 = vld [vmem:[#allocation4 + $0x218] sm:$0xff] }
 0x7a4   :  { %8442 = vmatpush.bf16.msra.mxu3 %v8028_v48  ;;  %v7928_v15 = vpack.c.bf16 %v7564_v61, %v7560_v39  ;;  %v7692_v36 = vcvt.s32.f32 %v7180_v19  ;;  %v7040_v18 = vunpack.c.2.s8 %v6700_v9  ;;  %v7044_v28 = vunpack.c.3.s8 %v6700_v9  ;;  %v6712_v19 = vld [vmem:[#allocation4 + $0x298] sm:$0xff] }
 0x7a5   :  { %v7960_v37 = vpack.c.bf16 %v7628_v26, %v7624_v55  ;;  %v7104_v3 = vunpack.c.2.s8 %v6716_v43  ;;  %v7752_v33 = vcvt.s32.f32 %v7240_v16  ;;  %v7756_v29 = vcvt.s32.f32 %v7244_v35  ;;  %v6744_v35 = vld [vmem:[#allocation4 + $0x398] sm:$0xff] }
 0x7a6   :  { %8404 = vmatpush.bf16.msra.mxu0 %v7928_v15  ;;  %v7992_v57 = vpack.c.bf16 %v7692_v36, %v7688_v60  ;;  %v7108_v4 = vunpack.c.3.s8 %v6716_v43  ;;  %v7552_v41 = vcvt.s32.f32 %v7040_v18  ;;  %v7556_v63 = vcvt.s32.f32 %v7044_v28  ;;  %v10379_v15 = vpop.f32.mrf.mxu2 }
 0x7a7   :  { %8417 = vmatpush.bf16.msra.mxu1 %v7960_v37  ;;  %v7616_v6 = vcvt.s32.f32 %v7104_v3  ;;  %v7168_v7 = vunpack.c.2.s8 %v6732_v44  ;;  %v8024_v47 = vpack.c.bf16 %v7756_v29, %v7752_v33  ;;  %v7172_v22 = vunpack.c.3.s8 %v6732_v44 }
 0x7a8   :  { %8430 = vmatpush.bf16.msra.mxu2 %v7992_v57  ;;  %v7620_v30 = vcvt.s32.f32 %v7108_v4  ;;  %v7232_v31 = vunpack.c.2.s8 %v6748_v27  ;;  %v7924_v21 = vpack.c.bf16 %v7556_v63, %v7552_v41  ;;  %v7236_v50 = vunpack.c.3.s8 %v6748_v27 }
 0x7a9   :  { %v7680_v34 = vcvt.s32.f32 %v7168_v7  ;;  %v7032_v58 = vunpack.c.0.s8 %v6700_v9  ;;  %8443 = vmatpush.bf16.msra.mxu3 %v8024_v47  ;;  %v7684_v40 = vcvt.s32.f32 %v7172_v22  ;;  %v7036_v51 = vunpack.c.1.s8 %v6700_v9  ;;  %v8241_v4 = vpop.f32.mrf.mxu3  ;;  %v8217_v13 = vpop.f32.mrf.mxu1 }
 0x7aa   :  { %v7956_v59 = vpack.c.bf16 %v7620_v30, %v7616_v6  ;;  %8405 = vmatpush.bf16.msra.mxu0 %v7924_v21  ;;  %v7744_v42 = vcvt.s32.f32 %v7232_v31  ;;  %v7748_v38 = vcvt.s32.f32 %v7236_v50  ;;  %v7096_v56 = vunpack.c.0.s8 %v6716_v43  ;;  %v8204_v41 = vpop.f32.mrf.mxu0 }
 0x7ab   :  { %v7544_v20 = vcvt.s32.f32 %v7032_v58  ;;  %v7988_v24 = vpack.c.bf16 %v7684_v40, %v7680_v34  ;;  %v7100_v12 = vunpack.c.1.s8 %v6716_v43  ;;  %v7548_v5 = vcvt.s32.f32 %v7036_v51 }
 0x7ac   :  { %8418 = vmatpush.bf16.msra.mxu1 %v7956_v59  ;;  %v8020_v39 = vpack.c.bf16 %v7748_v38, %v7744_v42  ;;  %v7160_v25 = vunpack.c.0.s8 %v6732_v44  ;;  %v7164_v2 = vunpack.c.1.s8 %v6732_v44  ;;  %v7608_v48 = vcvt.s32.f32 %v7096_v56 }
 0x7ad   :  { %8431 = vmatpush.bf16.msra.mxu2 %v7988_v24  ;;  %v7612_v61 = vcvt.s32.f32 %v7100_v12  ;;  %v7224_v55 = vunpack.c.0.s8 %v6748_v27  ;;  %v7920_v46 = vpack.c.bf16 %v7548_v5, %v7544_v20  ;;  %v7228_v60 = vunpack.c.1.s8 %v6748_v27 }
 0x7ae   :  { %8444 = vmatpush.bf16.msra.mxu3 %v8020_v39  ;;  %v7672_v9 = vcvt.s32.f32 %v7160_v25  ;;  %v7676_v26 = vcvt.s32.f32 %v7164_v2  ;;  %v7024_v16 = vunpack.c.2.s8 %v6696_v52  ;;  %v7028_v18 = vunpack.c.3.s8 %v6696_v52  ;;  %v8230_v56 = vpop.f32.mrf.mxu2 }
 0x7af   :  { %v7952_v36 = vpack.c.bf16 %v7612_v61, %v7608_v48  ;;  %v7736_v43 = vcvt.s32.f32 %v7224_v55  ;;  %8406 = vmatpush.bf16.msra.mxu0 %v7920_v46  ;;  %v7740_v37 = vcvt.s32.f32 %v7228_v60  ;;  %v7088_v28 = vunpack.c.2.s8 %v6712_v19 }
 0x7b0   :  { %v7984_v44 = vpack.c.bf16 %v7676_v26, %v7672_v9  ;;  %v7536_v3 = vcvt.s32.f32 %v7024_v16  ;;  %v7092_v57 = vunpack.c.3.s8 %v6712_v19  ;;  %v7152_v33 = vunpack.c.2.s8 %v6728_v14 }
 0x7b1   :  { %8419 = vmatpush.bf16.msra.mxu1 %v7952_v36  ;;  %v7156_v29 = vunpack.c.3.s8 %v6728_v14  ;;  %v8016_v27 = vpack.c.bf16 %v7740_v37, %v7736_v43  ;;  %v7540_v63 = vcvt.s32.f32 %v7028_v18  ;;  %v7600_v6 = vcvt.s32.f32 %v7088_v28  ;;  %v8243_v9 = vpop.f32.mrf.mxu3 }
 0x7b2   :  { %8432 = vmatpush.bf16.msra.mxu2 %v7984_v44  ;;  %v7216_v7 = vunpack.c.2.s8 %v6744_v35  ;;  %v7604_v47 = vcvt.s32.f32 %v7092_v57  ;;  %v7664_v30 = vcvt.s32.f32 %v7152_v33  ;;  %v7220_v31 = vunpack.c.3.s8 %v6744_v35 }
 0x7b3   :  { %v7668_v22 = vcvt.s32.f32 %v7156_v29  ;;  %8445 = vmatpush.bf16.msra.mxu3 %v8016_v27  ;;  %v7916_v21 = vpack.c.bf16 %v7540_v63, %v7536_v3  ;;  %v8164_v50 = vadd.f32 %v10369_v45, %v10367_v10  ;;  %v7016_v58 = vunpack.c.0.s8 %v6696_v52 }
 0x7b4   :  { %v7728_v34 = vcvt.s32.f32 %v7216_v7  ;;  %v7948_v59 = vpack.c.bf16 %v7604_v47, %v7600_v6  ;;  %v7732_v23 = vcvt.s32.f32 %v7220_v31  ;;  %v7020_v42 = vunpack.c.1.s8 %v6696_v52 }
 0x7b5   :  { %v7980_v40 = vpack.c.bf16 %v7668_v22, %v7664_v30  ;;  %8407 = vmatpush.bf16.msra.mxu0 %v7916_v21  ;;  %v7528_v38 = vcvt.s32.f32 %v7016_v58  ;;  %v7080_v51 = vunpack.c.0.s8 %v6712_v19  ;;  %v7084_v20 = vunpack.c.1.s8 %v6712_v19 }
 0x7b6   :  { %v7144_v24 = vunpack.c.0.s8 %v6728_v14  ;;  %8420 = vmatpush.bf16.msra.mxu1 %v7948_v59  ;;  %v8012_v12 = vpack.c.bf16 %v7732_v23, %v7728_v34  ;;  %v7532_v39 = vcvt.s32.f32 %v7020_v42  ;;  %v7148_v5 = vunpack.c.1.s8 %v6728_v14 }
 0x7b7   :  { %8433 = vmatpush.bf16.msra.mxu2 %v7980_v40  ;;  %v7208_v25 = vunpack.c.0.s8 %v6744_v35  ;;  %v7592_v2 = vcvt.s32.f32 %v7080_v51  ;;  %v7596_v48 = vcvt.s32.f32 %v7084_v20  ;;  %v7212_v45 = vunpack.c.1.s8 %v6744_v35 }
 0x7b8   :  { %v7656_v10 = vcvt.s32.f32 %v7144_v24  ;;  %8446 = vmatpush.bf16.msra.mxu3 %v8012_v12  ;;  %v7912_v61 = vpack.c.bf16 %v7532_v39, %v7528_v38  ;;  %v7660_v55 = vcvt.s32.f32 %v7148_v5  ;;  %v8177_v46 = vadd.f32 %v10371_v11, %v8164_v50 }
 0x7b9   :  { %v7720_v52 = vcvt.s32.f32 %v7208_v25  ;;  %v7944_v19 = vpack.c.bf16 %v7596_v48, %v7592_v2  ;;  %v7724_v26 = vcvt.s32.f32 %v7212_v45  ;;  %v8456_v40 = vrot.slane %v10361_v17, 4 }
 0x7ba   :  { %8408 = vmatpush.bf16.msra.mxu0 %v7912_v61  ;;  %v7976_v60 = vpack.c.bf16 %v7660_v55, %v7656_v10  ;;  %v8190_v36 = vadd.f32 %v10373_v62, %v8177_v46 }
 0x7bb   :  { %8421 = vmatpush.bf16.msra.mxu1 %v7944_v19  ;;  %v8008_v14 = vpack.c.bf16 %v7724_v26, %v7720_v52  ;;  %v8457_v38 = vadd.f32 %v8456_v40, %v10361_v17 }
 0x7bc   :  { %8434 = vmatpush.bf16.msra.mxu2 %v7976_v60  ;;  %v8203_v43 = vadd.f32 %v10375_v53, %v8190_v36 }
 0x7bd   :  { %8447 = vmatpush.bf16.msra.mxu3 %v8008_v14  ;;  %8409 = vmatmul.bf16.vlgmr.msra.gmra.mxu0 %v10284_v54  ;;  %v8458_v12 = vrot.slane %v8457_v38, 2 }
 0x7be   :  { %8422 = vmatmul.bf16.vlgmr.msra.gmra.mxu1 %v10286_v1  ;;  %v8216_v16 = vadd.f32 %v10377_v8, %v8203_v43 }
 0x7bf   :  { %8435 = vmatmul.bf16.vlgmr.msra.gmra.mxu2 %v10288_v32  ;;  %v8459_v25 = vadd.f32 %v8458_v12, %v8457_v38 }
 0x7c0   :  { %8448 = vmatmul.bf16.vlgmr.msra.gmra.mxu3 %v10290_v0  ;;  %v8229_v11 = vadd.f32 %v10379_v15, %v8216_v16  ;;  %v8254_v62 = vpop.f32.mrf.mxu0 }
 0x7c1   :  { %v8267_v44 = vpop.f32.mrf.mxu1  ;;  %v8460_v10 = vrot.slane %v8459_v25, 1 }
 0x7c2   :  { %v10392_v35 = vadd.f32 %v8241_v4, %v8229_v11  ;;  %v8268_v37 = vadd.f32 %v8267_v44, %v8254_v62 }
 0x7c3   :  { %v8461_v55 = vadd.f32 %v8460_v10, %v8459_v25 }
 0x7c4   :  { %v8462_v22 = vrot.slane %v10392_v35, 4 }
 0x7c5   :  { %v10411_v9 = vmul.f32 %v8461_v55, %v9331_v49 }
 0x7c6   :  { %v8463_v58 = vadd.f32 %v8462_v22, %v10392_v35 }
 0x7c7   :  { %v8484_v36 = vsub.f32 %v10361_v17, %v10411_v9 }
 0x7c8   :  { %v8280_v18 = vpop.f32.mrf.mxu2  ;;  %v8256_v54 = vpop.f32.mrf.mxu0  ;;  %v8464_v42 = vrot.slane %v8463_v58, 2 }
 0x7c9   :  { %v8293_v53 = vpop.f32.mrf.mxu3  ;;  %v8281_v28 = vadd.f32 %v8280_v18, %v8268_v37  ;;  %v8269_v57 = vpop.f32.mrf.mxu1  ;;  %v8488_v11 = vmul.f32 %v8484_v36, %v8484_v36 }
 0x7ca   :  { %v8465_v24 = vadd.f32 %v8464_v42, %v8463_v58 }
 0x7cb   :  { %v8294_v3 = vadd.f32 %v8293_v53, %v8281_v28  ;;  %v8492_v28 = vrot.slane %v8488_v11, 4 }
 0x7cc   :  { %v8466_v5 = vrot.slane %v8465_v24, 1 }
 0x7ce   :  { %v8467_v48 = vadd.f32 %v8466_v5, %v8465_v24 }
 0x7d0   :  { %v8282_v1 = vpop.f32.mrf.mxu2  ;;  %v10403_v61 = vmul.f32 %v8467_v48, %v9331_v49 }
 0x7d1   :  { %v8295_v33 = vpop.f32.mrf.mxu3  ;;  %v8493_v1 = vadd.f32 %v8492_v28, %v8488_v11 }
 0x7d2   :  { %v8485_v46 = vsub.f32 %v10392_v35, %v10403_v61 }
 0x7d4   :  { %v8489_v26 = vmul.f32 %v8485_v46, %v8485_v46 }
 0x7d6   :  { %v8498_v43 = vrot.slane %v8489_v26, 4 }
 0x7d8   :  { %v8499_v37 = vadd.f32 %v8498_v43, %v8489_v26 }
 0x7da   :  { %v8500_v57 = vrot.slane %v8499_v37, 2 }
 0x7e9   :  { %v8306_v8 = vpop.f32.mrf.mxu0 }
 0x7ea   :  { %v8307_v32 = vadd.f32 %v8306_v8, %v8294_v3 }
 0x7eb   :  { %v8319_v29 = vpop.f32.mrf.mxu1 }
 0x7ec   :  { %v8320_v41 = vadd.f32 %v8319_v29, %v8307_v32 }
 0x7f0   :  { %v8332_v0 = vpop.f32.mrf.mxu2 }
 0x7f1   :  { %v8333_v27 = vadd.f32 %v8332_v0, %v8320_v41  ;;  %v8308_v4 = vpop.f32.mrf.mxu0  ;;  %v8501_v41 = vadd.f32 %v8500_v57, %v8499_v37 }
 0x7f2   :  { %v8494_v4 = vrot.slane %v8493_v1, 2 }
 0x7f3   :  { %v8321_v6 = vpop.f32.mrf.mxu1 }
 0x7f4   :  { %v8345_v15 = vpop.f32.mrf.mxu3 }
 0x7f5   :  { %v10394_v63 = vadd.f32 %v8345_v15, %v8333_v27 }
 0x7f7   :  { %v8468_v31 = vrot.slane %v10394_v63, 4 }
 0x7f8   :  { %v8334_v7 = vpop.f32.mrf.mxu2 }
 0x7f9   :  { %v8469_v23 = vadd.f32 %v8468_v31, %v10394_v63 }
 0x7fb   :  { %v8470_v51 = vrot.slane %v8469_v23, 2 }
 0x7fc   :  { %v8347_v13 = vpop.f32.mrf.mxu3 }
 0x7fd   :  { %v8471_v39 = vadd.f32 %v8470_v51, %v8469_v23  ;;  %v8502_v13 = vrot.slane %v8501_v41, 1 }
 0x7ff   :  { %v8472_v2 = vrot.slane %v8471_v39, 1 }
 0x801   :  { %v8473_v45 = vadd.f32 %v8472_v2, %v8471_v39 }
 0x803   :  { %v10406_v52 = vmul.f32 %v8473_v45, %v9331_v49 }
 0x805   :  { %v8486_v19 = vsub.f32 %v10394_v63, %v10406_v52 }
 0x807   :  { %v8490_v14 = vmul.f32 %v8486_v19, %v8486_v19 }
 0x809   :  { %v8504_v62 = vrot.slane %v8490_v14, 4 }
 0x80b   :  { %v8505_v3 = vadd.f32 %v8504_v62, %v8490_v14 }
 0x80d   :  { %v8506_v33 = vrot.slane %v8505_v3, 2 }
 0x80f   :  { %v8507_v6 = vadd.f32 %v8506_v33, %v8505_v3 }
 0x811   :  { %v8508_v22 = vrot.slane %v8507_v6, 1 }
 0x812   :  { %v8358_v47 = vpop.f32.mrf.mxu0 }
 0x813   :  { %v8371_v30 = vpop.f32.mrf.mxu1  ;;  %v8509_v42 = vadd.f32 %v8508_v22, %v8507_v6 }
 0x814   :  { %v8372_v60 = vadd.f32 %v8371_v30, %v8358_v47  ;;  %v8495_v30 = vadd.f32 %v8494_v4, %v8493_v1 }
 0x815   :  { %v8518_v12 = vmul.f32 %v8509_v42, %v9331_v49 }
 0x816   :  { %v8496_v40 = vrot.slane %v8495_v30, 1 }
 0x81a   :  { %v8360_v21 = vpop.f32.mrf.mxu0  ;;  %v8384_v34 = vpop.f32.mrf.mxu2 }
 0x81b   :  { %v8373_v50 = vpop.f32.mrf.mxu1  ;;  %v8397_v59 = vpop.f32.mrf.mxu3  ;;  %v8385_v16 = vadd.f32 %v8384_v34, %v8372_v60  ;;  %v10421_v21 = vld [vmem:[#allocation12 + $0x40] sm:$0xf] }
 0x81c   :  { %v8503_v50 = vadd.f32 %v8502_v13, %v8501_v41  ;;  %v8521_v23 = vmul.f32 %v10421_v21, %v10421_v21 }
 0x81d   :  { %v8398_v18 = vadd.f32 %v8397_v59, %v8385_v16 }
 0x81e   :  { %v8517_v51 = vmul.f32 %v8503_v50, %v9331_v49  ;;  %v8525_v39 = vperm.slane %v8521_v23, 2  ;;  %v8523_v10 = vperm.slane %v8521_v23, 0 }
 0x820   :  { %v8533_v45 = vmul.f32 %v8525_v39, %v8518_v12 }
 0x822   :  { %v8386_v20 = vpop.f32.mrf.mxu2  ;;  %v8537_v60 = vadd.f32 1e-05, %v8533_v45 }
 0x823   :  { %v8399_v56 = vpop.f32.mrf.mxu3  ;;  %v8524_v20 = vperm.slane %v8521_v23, 1 }
 0x824   :  { %v8497_v56 = vadd.f32 %v8496_v40, %v8495_v30  ;;  %vm8565_vm15 = vweird.f32 %v8537_v60 }
 0x825   :  { %v8532_v25 = vmul.f32 %v8524_v20, %v8517_v51 }
 0x826   :  { %v8516_v48 = vmul.f32 %v8497_v56, %v9331_v49 }
 0x827   :  { %v8536_v46 = vadd.f32 1e-05, %v8532_v25 }
 0x828   :  { %v8531_v26 = vmul.f32 %v8523_v10, %v8516_v48 }
 0x829   :  { %9029 = vrsqrt.f32 %v8536_v46  ;;  %vm8555_vm13 = vweird.f32 %v8536_v46 }
 0x82a   :  { %v8535_v43 = vadd.f32 1e-05, %v8531_v26  ;;  %9031 = vrsqrt.f32 %v8537_v60 }
 0x82c   :  { %9033 = vrsqrt.f32 %v8535_v43  ;;  %vm8545_vm7 = vweird.f32 %v8535_v43 }
 0x82f   :  { %v9030_v62 = vpop.eup %9029 }
 0x830   :  { %v9032_v37 = vpop.eup %9031  ;;  %v8550_v28 = vmul.f32 %v9030_v62, %v8536_v46  ;;  %vm8556_vm11 = vweird.f32 %v9030_v62 }
 0x831   :  { %v8560_v57 = vmul.f32 %v9032_v37, %v8537_v60  ;;  %vm8566_vm1 = vweird.f32 %v9032_v37  ;;  %vm8557_vm10 = vmor %vm8555_vm13, %vm8556_vm11 }
 0x832   :  { %v8551_v33 = vmul.f32 %v9030_v62, %v8550_v28  ;;  %vm8567_vm9 = vmor %vm8565_vm15, %vm8566_vm1 }
 0x834   :  { %v8552_v41 = vmul.f32 0.5, %v8551_v33 }
 0x83a   :  { %v8410_v44 = vpop.f32.mrf.mxu0 }
 0x83b   :  { %v8423_v53 = vpop.f32.mrf.mxu1  ;;  %v8411_v54 = vadd.f32 %v8410_v44, %v8398_v18 }
 0x83d   :  { %v8424_v8 = vadd.f32 %v8423_v53, %v8411_v54  ;;  %v8526_v53 = vperm.slane %v8521_v23, 3  ;;  %v9034_v54 = vpop.eup %9033 }
 0x83e   :  { %vm8546_vm2 = vweird.f32 %v9034_v54 }
 0x83f   :  { %vm8547_vm4 = vmor %vm8545_vm7, %vm8546_vm2 }
 0x842   :  { %v8436_v29 = vpop.f32.mrf.mxu2  ;;  %v8412_v32 = vpop.f32.mrf.mxu0 }
 0x843   :  { %v8437_v0 = vadd.f32 %v8436_v29, %v8424_v8  ;;  %v8449_v27 = vpop.f32.mrf.mxu3  ;;  %v8425_v15 = vpop.f32.mrf.mxu1  ;;  %v8540_v8 = vmul.f32 %v9034_v54, %v8535_v43  ;;  %v8561_v32 = vmul.f32 %v9032_v37, %v8560_v57 }
 0x844   :  { %v8553_v15 = vsub.f32 1.5, %v8552_v41 }
 0x845   :  { %v10417_v7 = vadd.f32 %v8449_v27, %v8437_v0  ;;  %v8541_v0 = vmul.f32 %v9034_v54, %v8540_v8  ;;  %v8562_v27 = vmul.f32 0.5, %v8561_v32 }
 0x846   :  { %v8554_v30 = vmul.f32 %v9030_v62, %v8553_v15 }
 0x847   :  { %v8474_v47 = vrot.slane %v10417_v7, 4  ;;  %v8542_v6 = vmul.f32 0.5, %v8541_v0  ;;  %v8563_v13 = vsub.f32 1.5, %v8562_v27 }
 0x848   :  { %v8558_v50 = vsel %vm8557_vm10, %v9030_v62, %v8554_v30 }
 0x849   :  { %v8475_v31 = vadd.f32 %v8474_v47, %v10417_v7 }
 0x84a   :  { %v8438_v34 = vpop.f32.mrf.mxu2 }
 0x84b   :  { %v8476_v58 = vrot.slane %v8475_v31, 2  ;;  %v8451_v59 = vpop.f32.mrf.mxu3 }
 0x84c   :  { %v8453_v59 = vld [vmem:[#allocation12 + $0x28] sm:$0xf] }
 0x84d   :  { %v8477_v38 = vadd.f32 %v8476_v58, %v8475_v31  ;;  %v8564_v31 = vmul.f32 %v9032_v37, %v8563_v13  ;;  %v8520_v20 = vmul.f32 %v10421_v21, %v8453_v59 }
 0x84f   :  { %v8478_v24 = vrot.slane %v8477_v38, 1  ;;  %v8568_v23 = vsel %vm8567_vm9, %v9032_v37, %v8564_v31 }
 0x851   :  { %v8479_v5 = vadd.f32 %v8478_v24, %v8477_v38  ;;  %v8583_v38 = vrot.slane %v8558_v50, 7  ;;  %v8584_v24 = vrot.slane %v8568_v23, 6 }
 0x853   :  { %v10428_v2 = vmul.f32 %v8479_v5, %v9331_v49 }
 0x855   :  { %v8487_v55 = vsub.f32 %v10417_v7, %v10428_v2 }
 0x857   :  { %v8491_v19 = vmul.f32 %v8487_v55, %v8487_v55 }
 0x859   :  { %v8510_v36 = vrot.slane %v8491_v19, 4 }
 0x85b   :  { %v8511_v14 = vadd.f32 %v8510_v36, %v8491_v19 }
 0x85d   :  { %v8512_v16 = vrot.slane %v8511_v14, 2 }
 0x85f   :  { %v8513_v11 = vadd.f32 %v8512_v16, %v8511_v14  ;;  %v8454_v16 = vld [vmem:[#allocation12 + $0x2c] sm:$0xf] }
 0x861   :  { %v8514_v44 = vrot.slane %v8513_v11, 1 }
 0x863   :  { %v8515_v18 = vadd.f32 %v8514_v44, %v8513_v11 }
 0x865   :  { %v8519_v3 = vmul.f32 %v8515_v18, %v9331_v49  ;;  %v8543_v49 = vsub.f32 1.5, %v8542_v6 }
 0x867   :  { %v8534_v1 = vmul.f32 %v8526_v53, %v8519_v3  ;;  %v8544_v40 = vmul.f32 %v9034_v54, %v8543_v49 }
 0x869   :  { %v8538_v29 = vadd.f32 1e-05, %v8534_v1  ;;  %v8548_v12 = vsel %vm8547_vm4, %v9034_v54, %v8544_v40 }
 0x86a   :  { %v8586_v39 = vsel %vm348_vm12, %v8548_v12, %v8583_v38 }
 0x86b   :  { %9035 = vrsqrt.f32 %v8538_v29  ;;  %vm8575_vm3 = vweird.f32 %v8538_v29 }
 0x871   :  { %v9036_v4 = vpop.eup %9035 }
 0x872   :  { %v8570_v47 = vmul.f32 %v9036_v4, %v8538_v29  ;;  %vm8576_vm6 = vweird.f32 %v9036_v4 }
 0x873   :  { %vm8577_vm5 = vmor %vm8575_vm3, %vm8576_vm6 }
 0x874   :  { %v8571_v22 = vmul.f32 %v9036_v4, %v8570_v47 }
 0x876   :  { %v8572_v34 = vmul.f32 0.5, %v8571_v22 }
 0x878   :  { %v8573_v58 = vsub.f32 1.5, %v8572_v34 }
 0x87a   :  { %v8574_v42 = vmul.f32 %v9036_v4, %v8573_v58 }
 0x87c   :  { %v8578_v51 = vsel %vm8577_vm5, %v9036_v4, %v8574_v42 }
 0x87d   :  { %v8585_v56 = vrot.slane %v8578_v51, 5 }
 0x87f   :  { %v8587_v5 = vsel %vm350_vm14, %v8584_v24, %v8585_v56 }
 0x880   :  { %v8588_v25 = vsel %vm352_vm0, %v8586_v39, %v8587_v5 }
 0x881   :  { %v8590_v48 = vmul.f32 %v8588_v25, %v8520_v20 }
 0x883   :  { %v8592_v10 = vperm.slane %v8590_v48, 0  ;;  %v8593_v45 = vperm.slane %v8590_v48, 1  ;;  %v8594_v55 = vperm.slane %v8590_v48, 2  ;;  %v8595_v46 = vperm.slane %v8590_v48, 3 }
 0x885   :  { %v8601_v19 = vmul.f32 %v8593_v45, %v10403_v61  ;;  %v8602_v26 = vmul.f32 %v8594_v55, %v10406_v52  ;;  %v8603_v21 = vmul.f32 %v8595_v46, %v10428_v2  ;;  %v8600_v60 = vmul.f32 %v8592_v10, %v10411_v9 }
 0x886   :  { %v8616_v18 = vmul.f32 %v8592_v10, %v10361_v17  ;;  %v8617_v61 = vmul.f32 %v8593_v45, %v10392_v35  ;;  %v8618_v52 = vmul.f32 %v8594_v55, %v10394_v63  ;;  %v8619_v2 = vmul.f32 %v8595_v46, %v10417_v7 }
 0x887   :  { %v8608_v36 = vrot.slane %v8601_v19, 7  ;;  %v8609_v14 = vrot.slane %v8602_v26, 6  ;;  %v8610_v43 = vrot.slane %v8603_v21, 5 }
 0x889   :  { %v8611_v11 = vsel %vm348_vm12, %v8600_v60, %v8608_v36  ;;  %v8612_v62 = vsel %vm350_vm14, %v8609_v14, %v8610_v43 }
 0x88a   :  { %v8613_v44 = vsel %vm352_vm0, %v8611_v11, %v8612_v62 }
 0x88b   :  { %v8615_v37 = vsub.f32 %v8454_v16, %v8613_v44 }
 0x88d   :  { %v8621_v9 = vperm.slane %v8615_v37, 0  ;;  %v8622_v53 = vperm.slane %v8615_v37, 1  ;;  %v8623_v28 = vperm.slane %v8615_v37, 2  ;;  %v8624_v3 = vperm.slane %v8615_v37, 3 }
 0x88f   :  { %v8629_v54 = vadd.f32 %v8621_v9, %v8616_v18  ;;  %v8630_v57 = vadd.f32 %v8622_v53, %v8617_v61  ;;  %v8631_v1 = vadd.f32 %v8623_v28, %v8618_v52  ;;  %v8632_v33 = vadd.f32 %v8624_v3, %v8619_v2 }
 0x891   :  { %v8633_v8 = vmax.f32 %v8629_v54, 0.0  ;;  %v8634_v29 = vmax.f32 %v8630_v57, 0.0  ;;  %v8635_v32 = vmax.f32 %v8631_v1, 0.0  ;;  %v8636_v41 = vmax.f32 %v8632_v33, 0.0 }
 0x893   :  { %v10449_v0 = vpack.c.bf16 %v8633_v8, %v8633_v8  ;;  %v10451_v17 = vpack.c.bf16 %v8634_v29, %v8634_v29  ;;  %v10453_v35 = vpack.c.bf16 %v8635_v32, %v8635_v32  ;;  %v10455_v63 = vpack.c.bf16 %v8636_v41, %v8636_v41 }
 0x894   :  { %9241 = dma.done.wait [#allocation6 + $0x3], 2048 }
 0x895   :  { %9242 = vsyncadd [#allocation6 + $0x3], 4294965248  ;;  %v8647_v7 = vld [vmem:[#allocation5 + $0x18] sm:$0xff]  ;;  %v8646_v10 = vld [vmem:[#allocation5 + $0x10] sm:$0xff]  ;;  %s9255_s5 = smov [#allocation13]   ;;  %s8890_s12 = sshll.u32 %s10471_s7, 4  ;;  %s8891_s12 = int_to_ptr.hbm [resolvable:$true] %s8890_s12 }
 0x896   :  { %v8651_v27 = vld [vmem:[#allocation5 + $0x38] sm:$0xff]  ;;  %v8674_v4 = vunpack.c.2.s8 %v8647_v7  ;;  %v8675_v6 = vunpack.c.3.s8 %v8647_v7  ;;  %v8672_v56 = vunpack.c.0.s8 %v8647_v7  ;;  %v8673_v12 = vunpack.c.1.s8 %v8647_v7  ;;  %v8650_v14 = vld [vmem:[#allocation5 + $0x30] sm:$0xff]  ;;  %s8888_s6 = sshll.u32 %s9255_s5, 4  ;;  %s8889_s6 = int_to_ptr.vmem [resolvable:$true] %s8888_s6 }
 0x897   :  { %v8655_v15 = vld [vmem:[#allocation5 + $0x58] sm:$0xff]  ;;  %v8690_v13 = vunpack.c.2.s8 %v8651_v27  ;;  %v8691_v47 = vunpack.c.3.s8 %v8651_v27  ;;  %v8688_v25 = vunpack.c.0.s8 %v8651_v27  ;;  %v8689_v48 = vunpack.c.1.s8 %v8651_v27  ;;  %v8654_v44 = vld [vmem:[#allocation5 + $0x50] sm:$0xff] }
 0x898   :  { %v8659_v30 = vld [vmem:[#allocation5 + $0x78] sm:$0xff]  ;;  %v8706_v22 = vunpack.c.2.s8 %v8655_v15  ;;  %v8707_v49 = vunpack.c.3.s8 %v8655_v15  ;;  %v8738_v50 = vcvt.s32.f32 %v8674_v4  ;;  %v8739_v58 = vcvt.s32.f32 %v8675_v6  ;;  %v8658_v2 = vld [vmem:[#allocation5 + $0x70] sm:$0xff] }
 0x899   :  { %v8722_v31 = vunpack.c.2.s8 %v8659_v30  ;;  %v8723_v34 = vunpack.c.3.s8 %v8659_v30  ;;  %v8754_v59 = vcvt.s32.f32 %v8690_v13  ;;  %v8755_v40 = vcvt.s32.f32 %v8691_v47 }
 0x89a   :  { %v8770_v23 = vcvt.s32.f32 %v8706_v22  ;;  %v8771_v42 = vcvt.s32.f32 %v8707_v49  ;;  %v8795_v20 = vpack.c.bf16 %v8739_v58, %v8738_v50  ;;  %v8736_v45 = vcvt.s32.f32 %v8672_v56  ;;  %v8645_v50 = vld [vmem:[#allocation5 + $0x8] sm:$0xff] }
 0x89b   :  { %v8786_v38 = vcvt.s32.f32 %v8722_v31  ;;  %v8787_v51 = vcvt.s32.f32 %v8723_v34  ;;  %v8803_v24 = vpack.c.bf16 %v8755_v40, %v8754_v59  ;;  %v8737_v55 = vcvt.s32.f32 %v8673_v12 }
 0x89c   :  { %v8811_v39 = vpack.c.bf16 %v8771_v42, %v8770_v23  ;;  %8820 = vmatpush.bf16.msrb.mxu0 %v8795_v20  ;;  %v8704_v46 = vunpack.c.0.s8 %v8655_v15  ;;  %v8705_v19 = vunpack.c.1.s8 %v8655_v15  ;;  %v8752_v26 = vcvt.s32.f32 %v8688_v25  ;;  %v8653_v25 = vld [vmem:[#allocation5 + $0x48] sm:$0xff] }
 0x89d   :  { %v8819_v5 = vpack.c.bf16 %v8787_v51, %v8786_v38  ;;  %8833 = vmatpush.bf16.msrb.mxu1 %v8803_v24  ;;  %v8753_v21 = vcvt.s32.f32 %v8689_v48  ;;  %v8720_v60 = vunpack.c.0.s8 %v8659_v30  ;;  %v8721_v36 = vunpack.c.1.s8 %v8659_v30  ;;  %v8649_v24 = vld [vmem:[#allocation5 + $0x28] sm:$0xff] }
 0x89e   :  { %8846 = vmatpush.bf16.msrb.mxu2 %v8811_v39  ;;  %v8794_v43 = vpack.c.bf16 %v8737_v55, %v8736_v45  ;;  %v8768_v16 = vcvt.s32.f32 %v8704_v46  ;;  %v8769_v11 = vcvt.s32.f32 %v8705_v19  ;;  %v8670_v62 = vunpack.c.2.s8 %v8646_v10  ;;  %v8657_v46 = vld [vmem:[#allocation5 + $0x68] sm:$0xff] }
 0x89f   :  { %8859 = vmatpush.bf16.msrb.mxu3 %v8819_v5  ;;  %v8802_v37 = vpack.c.bf16 %v8753_v21, %v8752_v26  ;;  %v8784_v18 = vcvt.s32.f32 %v8720_v60  ;;  %v8785_v61 = vcvt.s32.f32 %v8721_v36  ;;  %v8671_v52 = vunpack.c.3.s8 %v8646_v10 }
 0x8a0   :  { %8821 = vmatpush.bf16.msrb.mxu0 %v8794_v43  ;;  %v8810_v9 = vpack.c.bf16 %v8769_v11, %v8768_v16  ;;  %v8734_v53 = vcvt.s32.f32 %v8670_v62  ;;  %v8686_v28 = vunpack.c.2.s8 %v8650_v14  ;;  %v8687_v3 = vunpack.c.3.s8 %v8650_v14 }
 0x8a1   :  { %8834 = vmatpush.bf16.msrb.mxu1 %v8802_v37  ;;  %v8818_v54 = vpack.c.bf16 %v8785_v61, %v8784_v18  ;;  %v8735_v57 = vcvt.s32.f32 %v8671_v52  ;;  %v8702_v1 = vunpack.c.2.s8 %v8654_v44  ;;  %v8703_v33 = vunpack.c.3.s8 %v8654_v44 }
 0x8a2   :  { %8847 = vmatpush.bf16.msrb.mxu2 %v8810_v9  ;;  %v8750_v8 = vcvt.s32.f32 %v8686_v28  ;;  %v8751_v29 = vcvt.s32.f32 %v8687_v3  ;;  %v8718_v32 = vunpack.c.2.s8 %v8658_v2  ;;  %v8719_v41 = vunpack.c.3.s8 %v8658_v2 }
 0x8a3   :  { %8860 = vmatpush.bf16.msrb.mxu3 %v8818_v54  ;;  %v8793_v7 = vpack.c.bf16 %v8735_v57, %v8734_v53  ;;  %v8766_v27 = vcvt.s32.f32 %v8702_v1  ;;  %v8767_v15 = vcvt.s32.f32 %v8703_v33  ;;  %v8668_v4 = vunpack.c.0.s8 %v8646_v10 }
 0x8a4   :  { %v8801_v6 = vpack.c.bf16 %v8751_v29, %v8750_v8  ;;  %v8782_v13 = vcvt.s32.f32 %v8718_v32  ;;  %v8783_v47 = vcvt.s32.f32 %v8719_v41  ;;  %v8669_v30 = vunpack.c.1.s8 %v8646_v10  ;;  %v8644_v8 = vld [vmem:[#allocation5] sm:$0xff] }
 0x8a5   :  { %8822 = vmatpush.bf16.msrb.mxu0 %v8793_v7  ;;  %v8809_v22 = vpack.c.bf16 %v8767_v15, %v8766_v27  ;;  %v8732_v49 = vcvt.s32.f32 %v8668_v4  ;;  %v8684_v31 = vunpack.c.0.s8 %v8650_v14  ;;  %v8685_v34 = vunpack.c.1.s8 %v8650_v14 }
 0x8a6   :  { %8835 = vmatpush.bf16.msrb.mxu1 %v8801_v6  ;;  %v8817_v58 = vpack.c.bf16 %v8783_v47, %v8782_v13  ;;  %v8733_v59 = vcvt.s32.f32 %v8669_v30  ;;  %v8700_v40 = vunpack.c.0.s8 %v8654_v44  ;;  %v8701_v23 = vunpack.c.1.s8 %v8654_v44  ;;  %v8648_v13 = vld [vmem:[#allocation5 + $0x20] sm:$0xff] }
 0x8a7   :  { %8848 = vmatpush.bf16.msrb.mxu2 %v8809_v22  ;;  %v8748_v42 = vcvt.s32.f32 %v8684_v31  ;;  %v8749_v38 = vcvt.s32.f32 %v8685_v34  ;;  %v8716_v51 = vunpack.c.0.s8 %v8658_v2  ;;  %v8717_v20 = vunpack.c.1.s8 %v8658_v2  ;;  %v8652_v31 = vld [vmem:[#allocation5 + $0x40] sm:$0xff] }
 0x8a8   :  { %8861 = vmatpush.bf16.msrb.mxu3 %v8817_v58  ;;  %v8792_v56 = vpack.c.bf16 %v8733_v59, %v8732_v49  ;;  %v8764_v12 = vcvt.s32.f32 %v8700_v40  ;;  %v8765_v39 = vcvt.s32.f32 %v8701_v23  ;;  %v8666_v5 = vunpack.c.2.s8 %v8645_v50  ;;  %v8656_v40 = vld [vmem:[#allocation5 + $0x60] sm:$0xff] }
 0x8a9   :  { %v8800_v48 = vpack.c.bf16 %v8749_v38, %v8748_v42  ;;  %v8780_v10 = vcvt.s32.f32 %v8716_v51  ;;  %v8781_v45 = vcvt.s32.f32 %v8717_v20  ;;  %v8667_v55 = vunpack.c.3.s8 %v8645_v50 }
 0x8aa   :  { %8823 = vmatpush.bf16.msrb.mxu0 %v8792_v56  ;;  %v8808_v19 = vpack.c.bf16 %v8765_v39, %v8764_v12  ;;  %v8730_v26 = vcvt.s32.f32 %v8666_v5  ;;  %v8682_v21 = vunpack.c.2.s8 %v8649_v24  ;;  %v8683_v60 = vunpack.c.3.s8 %v8649_v24 }
 0x8ab   :  { %8836 = vmatpush.bf16.msrb.mxu1 %v8800_v48  ;;  %v8816_v36 = vpack.c.bf16 %v8781_v45, %v8780_v10  ;;  %v8731_v14 = vcvt.s32.f32 %v8667_v55  ;;  %v8698_v43 = vunpack.c.2.s8 %v8653_v25  ;;  %v8699_v16 = vunpack.c.3.s8 %v8653_v25 }
 0x8ac   :  { %8849 = vmatpush.bf16.msrb.mxu2 %v8808_v19  ;;  %v8746_v11 = vcvt.s32.f32 %v8682_v21  ;;  %v8747_v62 = vcvt.s32.f32 %v8683_v60  ;;  %v8714_v44 = vunpack.c.2.s8 %v8657_v46  ;;  %v8715_v37 = vunpack.c.3.s8 %v8657_v46 }
 0x8ad   :  { %8862 = vmatpush.bf16.msrb.mxu3 %v8816_v36  ;;  %v8791_v18 = vpack.c.bf16 %v8731_v14, %v8730_v26  ;;  %v8762_v61 = vcvt.s32.f32 %v8698_v43  ;;  %v8763_v52 = vcvt.s32.f32 %v8699_v16  ;;  %v8664_v2 = vunpack.c.0.s8 %v8645_v50 }
 0x8ae   :  { %v8799_v9 = vpack.c.bf16 %v8747_v62, %v8746_v11  ;;  %v8778_v53 = vcvt.s32.f32 %v8714_v44  ;;  %v8779_v28 = vcvt.s32.f32 %v8715_v37  ;;  %v8665_v3 = vunpack.c.1.s8 %v8645_v50 }
 0x8af   :  { %8824 = vmatpush.bf16.msrb.mxu0 %v8791_v18  ;;  %v8807_v54 = vpack.c.bf16 %v8763_v52, %v8762_v61  ;;  %v8728_v57 = vcvt.s32.f32 %v8664_v2  ;;  %v8680_v1 = vunpack.c.0.s8 %v8649_v24  ;;  %v8681_v33 = vunpack.c.1.s8 %v8649_v24 }
 0x8b0   :  { %8837 = vmatpush.bf16.msrb.mxu1 %v8799_v9  ;;  %v8815_v29 = vpack.c.bf16 %v8779_v28, %v8778_v53  ;;  %v8729_v32 = vcvt.s32.f32 %v8665_v3  ;;  %v8696_v41 = vunpack.c.0.s8 %v8653_v25  ;;  %v8697_v7 = vunpack.c.1.s8 %v8653_v25 }
 0x8b1   :  { %8850 = vmatpush.bf16.msrb.mxu2 %v8807_v54  ;;  %v8744_v27 = vcvt.s32.f32 %v8680_v1  ;;  %v8745_v15 = vcvt.s32.f32 %v8681_v33  ;;  %v8712_v4 = vunpack.c.0.s8 %v8657_v46  ;;  %v8713_v6 = vunpack.c.1.s8 %v8657_v46 }
 0x8b2   :  { %8863 = vmatpush.bf16.msrb.mxu3 %v8815_v29  ;;  %v8790_v47 = vpack.c.bf16 %v8729_v32, %v8728_v57  ;;  %v8760_v30 = vcvt.s32.f32 %v8696_v41  ;;  %v8761_v22 = vcvt.s32.f32 %v8697_v7  ;;  %v8662_v49 = vunpack.c.2.s8 %v8644_v8 }
 0x8b3   :  { %v8798_v34 = vpack.c.bf16 %v8745_v15, %v8744_v27  ;;  %v8776_v50 = vcvt.s32.f32 %v8712_v4  ;;  %v8777_v58 = vcvt.s32.f32 %v8713_v6  ;;  %v8663_v59 = vunpack.c.3.s8 %v8644_v8  ;;  %v9037_v4 = vld [vmem:[#allocation12 + $0x44] ss:$0 sm:$0xff] }
 0x8b4   :  { %8825 = vmatpush.bf16.msrb.mxu0 %v8790_v47  ;;  %v8806_v23 = vpack.c.bf16 %v8761_v22, %v8760_v30  ;;  %v8726_v42 = vcvt.s32.f32 %v8662_v49  ;;  %v8678_v38 = vunpack.c.2.s8 %v8648_v13  ;;  %v8679_v51 = vunpack.c.3.s8 %v8648_v13  ;;  %v9038_v47 = vld [vmem:[#allocation12 + $0x45] ss:$0 sm:$0xff] }
 0x8b5   :  { %8838 = vmatpush.bf16.msrb.mxu1 %v8798_v34  ;;  %v8814_v20 = vpack.c.bf16 %v8777_v58, %v8776_v50  ;;  %v8727_v24 = vcvt.s32.f32 %v8663_v59  ;;  %v8694_v56 = vunpack.c.2.s8 %v8652_v31  ;;  %v8695_v12 = vunpack.c.3.s8 %v8652_v31 }
 0x8b6   :  { %8851 = vmatpush.bf16.msrb.mxu2 %v8806_v23  ;;  %v8742_v39 = vcvt.s32.f32 %v8678_v38  ;;  %v8743_v5 = vcvt.s32.f32 %v8679_v51  ;;  %v8710_v25 = vunpack.c.2.s8 %v8656_v40  ;;  %v8711_v48 = vunpack.c.3.s8 %v8656_v40 }
 0x8b7   :  { %8864 = vmatpush.bf16.msrb.mxu3 %v8814_v20  ;;  %v8789_v10 = vpack.c.bf16 %v8727_v24, %v8726_v42  ;;  %v8758_v45 = vcvt.s32.f32 %v8694_v56  ;;  %v8759_v55 = vcvt.s32.f32 %v8695_v12  ;;  %v8660_v46 = vunpack.c.0.s8 %v8644_v8 }
 0x8b8   :  { %v8797_v19 = vpack.c.bf16 %v8743_v5, %v8742_v39  ;;  %v8774_v26 = vcvt.s32.f32 %v8710_v25  ;;  %v8775_v21 = vcvt.s32.f32 %v8711_v48  ;;  %v8661_v60 = vunpack.c.1.s8 %v8644_v8 }
 0x8b9   :  { %8826 = vmatpush.bf16.msrb.mxu0 %v8789_v10  ;;  %v8805_v36 = vpack.c.bf16 %v8759_v55, %v8758_v45  ;;  %v8724_v14 = vcvt.s32.f32 %v8660_v46  ;;  %v8676_v43 = vunpack.c.0.s8 %v8648_v13  ;;  %v8677_v16 = vunpack.c.1.s8 %v8648_v13 }
 0x8ba   :  { %8839 = vmatpush.bf16.msrb.mxu1 %v8797_v19  ;;  %v8813_v11 = vpack.c.bf16 %v8775_v21, %v8774_v26  ;;  %v8725_v62 = vcvt.s32.f32 %v8661_v60  ;;  %v8692_v44 = vunpack.c.0.s8 %v8652_v31  ;;  %v8693_v37 = vunpack.c.1.s8 %v8652_v31 }
 0x8bb   :  { %8852 = vmatpush.bf16.msrb.mxu2 %v8805_v36  ;;  %v8740_v18 = vcvt.s32.f32 %v8676_v43  ;;  %v8741_v61 = vcvt.s32.f32 %v8677_v16  ;;  %v8708_v52 = vunpack.c.0.s8 %v8656_v40  ;;  %v8709_v2 = vunpack.c.1.s8 %v8656_v40 }
 0x8bc   :  { %8865 = vmatpush.bf16.msrb.mxu3 %v8813_v11  ;;  %v8788_v9 = vpack.c.bf16 %v8725_v62, %v8724_v14  ;;  %v8756_v53 = vcvt.s32.f32 %v8692_v44  ;;  %v8757_v28 = vcvt.s32.f32 %v8693_v37 }
 0x8bd   :  { %v8796_v3 = vpack.c.bf16 %v8741_v61, %v8740_v18  ;;  %v8772_v54 = vcvt.s32.f32 %v8708_v52  ;;  %v8773_v57 = vcvt.s32.f32 %v8709_v2 }
 0x8be   :  { %8827 = vmatpush.bf16.msrb.mxu0 %v8788_v9  ;;  %v8804_v1 = vpack.c.bf16 %v8757_v28, %v8756_v53 }
 0x8bf   :  { %8840 = vmatpush.bf16.msrb.mxu1 %v8796_v3  ;;  %v8812_v33 = vpack.c.bf16 %v8773_v57, %v8772_v54 }
 0x8c0   :  { %8853 = vmatpush.bf16.msrb.mxu2 %v8804_v1 }
 0x8c1   :  { %8866 = vmatpush.bf16.msrb.mxu3 %v8812_v33  ;;  %8828 = vmatmul.bf16.vlgmr.msrb.gmra.mxu0 %v10449_v0 }
 0x8c2   :  { %8841 = vmatmul.bf16.vlgmr.msrb.gmra.mxu1 %v10451_v17 }
 0x8c3   :  { %8854 = vmatmul.bf16.vlgmr.msrb.gmra.mxu2 %v10453_v35 }
 0x8c4   :  { %8867 = vmatmul.bf16.vlgmr.msrb.gmra.mxu3 %v10455_v63 }
 0x93e   :  { %v8829_v8 = vpop.f32.mrf.mxu0 }
 0x93f   :  { %v8842_v29 = vpop.f32.mrf.mxu1 }
 0x940   :  { %v8843_v32 = vadd.f32 %v8842_v29, %v8829_v8 }
 0x946   :  { %v8855_v41 = vpop.f32.mrf.mxu2  ;;  %v8831_v7 = vpop.f32.mrf.mxu0 }
 0x947   :  { %v8856_v27 = vadd.f32 %v8855_v41, %v8843_v32  ;;  %v8868_v15 = vpop.f32.mrf.mxu3  ;;  %v8844_v6 = vpop.f32.mrf.mxu1 }
 0x949   :  { %v8869_v13 = vadd.f32 %v8868_v15, %v8856_v27 }
 0x94b   :  { %v8877_v0 = vmul.f32 %v9037_v4, %v8869_v13 }
 0x94d   :  { %v8881_v17 = vadd.f32 %v9038_v47, %v8877_v0 }
 0x94e   :  { %v8857_v35 = vpop.f32.mrf.mxu2 }
 0x94f   :  { %8882 = vst [vmem:[#allocation13] sm:$0xff] %v8881_v17  ;;  %v8870_v63 = vpop.f32.mrf.mxu3 }
 0x950   :  { %8893 = dma.vmem_to_hbm [thread:$0]  %s8889_s6, 128, %s8891_s12, [#allocation9]  }
 0x951   :  { %9243 = dma.done.wait [#allocation9], 128  }
 0x952   :  { %9244 = vsyncadd [#allocation9], 4294967168 }
 0x953   :  { %8898 = vsyncpa [#allocation8], 1 }
 0x954   :  { %8899 = vsyncpa [#allocation11], 1 }
 0x955   :  { %8900 = vsyncpa [#allocation9], 1 }
 0x956   :  { %8901 = vsyncmov [#allocation6] }
 0x959   :  { %s8902_s13 = vpop.sfrf %8901 }
 0x95a   :  { %p8964_p0 = scmp.ne.s32.totalorder %s8902_s13, 0 }
 0x95c   :  { %8906 = shalt.err (%p8964_p0)  }
 0x95d   :  { %8908 = vsyncmov [#allocation6 + $0x1] }
 0x960   :  { %s8909_s14 = vpop.sfrf %8908 }
 0x961   :  { %p8965_p1 = scmp.ne.s32.totalorder %s8909_s14, 0 }
 0x963   :  { %8913 = shalt.err (%p8965_p1)  }
 0x964   :  { %8915 = vsyncmov [#allocation6 + $0x2] }
 0x967   :  { %s8916_s7 = vpop.sfrf %8915 }
 0x968   :  { %p8966_p2 = scmp.ne.s32.totalorder %s8916_s7, 0 }
 0x96a   :  { %8920 = shalt.err (%p8966_p2)  }
 0x96b   :  { %8922 = vsyncmov [#allocation6 + $0x3] }
 0x96e   :  { %s8923_s15 = vpop.sfrf %8922 }
 0x96f   :  { %p8967_p3 = scmp.ne.s32.totalorder %s8923_s15, 0 }
 0x971   :  { %8927 = shalt.err (%p8967_p3)  }

</bundles_post_ra>
